<compile_context>
chip_gen: v7x
topology: tpu7x:2x2x1
jax: 0.10.0
libtpu: 0.0.40
codegen_flags: <defaults>
</compile_context>

<pallas_src>
import functools
import math

import jax
import jax.numpy as jnp
from jax.experimental import pallas as pl
from jax.experimental.pallas import tpu as pltpu


# ----------------------------------------------------------------------------
# Pallas kernels
# ----------------------------------------------------------------------------

def _matmul_bias_relu_kernel(x_ref, w_ref, b_ref, o_ref, *, relu):
    # x: (M, K) bf16, w: (K, N) bf16, b: (1, N) f32  -> o: (M, N)
    y = jnp.dot(x_ref[...], w_ref[...], preferred_element_type=jnp.float32)
    y = y + b_ref[...]
    if relu:
        y = jnp.maximum(y, 0.0)
    o_ref[...] = y.astype(o_ref.dtype)


def pallas_matmul_bias_relu(x, w, b, *, relu, out_dtype, block_m=None):
    """y = x @ w + b (optionally ReLU). bf16 operands, f32 accumulation."""
    M, K = x.shape
    N = w.shape[1]
    b2 = b.reshape(1, N).astype(jnp.float32)
    kernel = functools.partial(_matmul_bias_relu_kernel, relu=relu)

    if block_m is not None and M > block_m and M % block_m == 0:
        # Grid over M so the GEMM can shard across both TensorCores on v7x.
        return pl.pallas_call(
            kernel,
            out_shape=jax.ShapeDtypeStruct((M, N), out_dtype),
            grid=(M // block_m,),
            in_specs=[
                pl.BlockSpec((block_m, K), lambda i: (i, 0)),
                pl.BlockSpec((K, N), lambda i: (0, 0)),
                pl.BlockSpec((1, N), lambda i: (0, 0)),
            ],
            out_specs=pl.BlockSpec((block_m, N), lambda i: (i, 0)),
            compiler_params=pltpu.CompilerParams(
                dimension_semantics=("parallel",)),
        )(x, w, b2)

    # Single block resident in VMEM (M is small).
    return pl.pallas_call(
        kernel,
        out_shape=jax.ShapeDtypeStruct((M, N), out_dtype),
        in_specs=[
            pl.BlockSpec((M, K), lambda: (0, 0)),
            pl.BlockSpec((K, N), lambda: (0, 0)),
            pl.BlockSpec((1, N), lambda: (0, 0)),
        ],
        out_specs=pl.BlockSpec((M, N), lambda: (0, 0)),
    )(x, w, b2)


def _head_kernel(flat_ref, w1_ref, b1_ref, wv_ref, bv_ref, wa_ref, ba_ref,
                 o_ref, *, num_actions, hidden):
    # Fused: fc_value|fc_advantage GEMM + ReLU, value/advantage streams,
    # dueling combine, softmax over atoms, clamp.
    h = jnp.dot(flat_ref[...], w1_ref[...], preferred_element_type=jnp.float32)
    h = jnp.maximum(h + b1_ref[...], 0.0).astype(jnp.bfloat16)   # (B, 2*hidden)
    hv = h[:, :hidden]        # value features      (B, hidden)
    ha = h[:, hidden:]        # advantage features  (B, hidden)

    v = jnp.dot(hv, wv_ref[...], preferred_element_type=jnp.float32) + bv_ref[...]

    a = []
    for i in range(num_actions):
        a_i = jnp.dot(ha, wa_ref[i], preferred_element_type=jnp.float32) + ba_ref[i]
        a.append(a_i)                                             # (B, Z)

    a_sum = a[0]
    for i in range(1, num_actions):
        a_sum = a_sum + a[i]
    a_mean = a_sum * (1.0 / num_actions)

    for i in range(num_actions):
        q = v + a[i] - a_mean
        q = q - jnp.max(q, axis=-1, keepdims=True)
        e = jnp.exp(q)
        p = e / jnp.sum(e, axis=-1, keepdims=True)
        o_ref[:, i, :] = jnp.maximum(p, 0.001)


def pallas_fused_head(flat, kp, num_actions, num_atoms):
    B, K = flat.shape
    H2 = kp["w1"].shape[1]          # 1024 = 512 (value) + 512 (advantage)
    hidden = H2 // 2
    kernel = functools.partial(_head_kernel, num_actions=num_actions,
                               hidden=hidden)
    return pl.pallas_call(
        kernel,
        out_shape=jax.ShapeDtypeStruct((B, num_actions, num_atoms), jnp.float32),
        in_specs=[
            pl.BlockSpec((B, K), lambda: (0, 0)),
            pl.BlockSpec((K, H2), lambda: (0, 0)),
            pl.BlockSpec((1, H2), lambda: (0, 0)),
            pl.BlockSpec((hidden, num_atoms), lambda: (0, 0)),
            pl.BlockSpec((1, num_atoms), lambda: (0, 0)),
            pl.BlockSpec((num_actions, hidden, num_atoms), lambda: (0, 0, 0)),
            pl.BlockSpec((num_actions, 1, num_atoms), lambda: (0, 0, 0)),
        ],
        out_specs=pl.BlockSpec((B, num_actions, num_atoms), lambda: (0, 0, 0)),
        compiler_params=pltpu.CompilerParams(
            vmem_limit_bytes=32 * 1024 * 1024),
    )(flat, kp["w1"], kp["b1"], kp["wv"], kp["bv"], kp["wa"], kp["ba"])


# ----------------------------------------------------------------------------
# Conv layer = fused patch extraction (XLA) + Pallas GEMM
# ----------------------------------------------------------------------------

def pallas_conv_relu(h, w_mat, b, *, kernel_size, stride, dimension_numbers,
                     block_m=None):
    """Conv + bias + ReLU as patches-GEMM. Output is NHWC (B, OH, OW, OC)."""
    patches = jax.lax.conv_general_dilated_patches(
        h, (kernel_size, kernel_size), (stride, stride), "VALID",
        dimension_numbers=dimension_numbers)          # (B, OH, OW, C*KH*KW)
    B, oh, ow, K = patches.shape
    y = pallas_matmul_bias_relu(patches.reshape(B * oh * ow, K), w_mat, b,
                                relu=True, out_dtype=jnp.bfloat16,
                                block_m=block_m)
    return y.reshape(B, oh, ow, -1)


# ----------------------------------------------------------------------------
# Parameter construction (deterministic, synthetic — torch layout)
# ----------------------------------------------------------------------------

def _scale_noise(key, n):
    e = jax.random.normal(key, (n,), jnp.float32)
    return jnp.sign(e) * jnp.sqrt(jnp.abs(e))


def make_noisy_linear(key, in_f, out_f, sigma_init=0.017):
    """Effective (training-mode) weight/bias: mu + sigma * eps."""
    k1, k2, k3, k4 = jax.random.split(key, 4)
    bound = 1.0 / math.sqrt(in_f)
    w_mu = jax.random.uniform(k1, (out_f, in_f), jnp.float32, -bound, bound)
    b_mu = jax.random.uniform(k2, (out_f,), jnp.float32, -bound, bound)
    w_sigma = jnp.full((out_f, in_f), sigma_init / math.sqrt(in_f), jnp.float32)
    b_sigma = jnp.full((out_f,), sigma_init / math.sqrt(out_f), jnp.float32)
    eps_in = _scale_noise(k3, in_f)
    eps_out = _scale_noise(k4, out_f)
    w = w_mu + w_sigma * jnp.outer(eps_out, eps_in)
    b = b_mu + b_sigma * eps_out
    return w, b


def make_conv(key, out_c, in_c, k):
    k1, k2 = jax.random.split(key)
    fan_in = in_c * k * k
    bound = 1.0 / math.sqrt(fan_in)
    w = jax.random.uniform(k1, (out_c, in_c, k, k), jnp.float32, -bound, bound)
    b = jax.random.uniform(k2, (out_c,), jnp.float32, -bound, bound)
    return w, b


def make_params(key, input_channels, num_actions, num_atoms):
    keys = jax.random.split(key, 7)
    linear_input_size = 7 * 7 * 64  # from hard-coded 84x84 input in the module
    p = {}
    p["c1_w"], p["c1_b"] = make_conv(keys[0], 32, input_channels, 8)
    p["c2_w"], p["c2_b"] = make_conv(keys[1], 64, 32, 4)
    p["c3_w"], p["c3_b"] = make_conv(keys[2], 64, 64, 3)
    p["fcv_w"], p["fcv_b"] = make_noisy_linear(keys[3], linear_input_size, 512)
    p["fca_w"], p["fca_b"] = make_noisy_linear(keys[4], linear_input_size, 512)
    p["vs_w"], p["vs_b"] = make_noisy_linear(keys[5], 512, num_atoms)
    p["as_w"], p["as_b"] = make_noisy_linear(keys[6], 512, num_actions * num_atoms)
    return p


def prepare_params(p, num_actions, num_atoms):
    """One-time layout/dtype prep for the Pallas forward (no per-forward work).

    * conv weights -> (C*KH*KW, OC) bf16 matrices (patch order is channel-major,
      matching torch's weight.reshape(OC, -1)).
    * fc_value/fc_advantage: K axis permuted from NCHW flatten (c,h,w) to NHWC
      flatten (h,w,c), concatenated into one (3136, 1024) bf16 weight.
    * value_stream -> (512, Z); advantage_stream -> (A, 512, Z) so each action's
      stream is a clean MXU pass inside the fused head kernel.
    * biases stay f32.
    """
    kp = {}
    for name in ("c1", "c2", "c3"):
        w = p[name + "_w"]
        kp[name + "_w"] = w.reshape(w.shape[0], -1).T.astype(jnp.bfloat16)
        kp[name + "_b"] = p[name + "_b"].astype(jnp.float32)

    def to_nhwc_k(w):  # (512, 3136) torch (c,h,w) cols -> NHWC (h,w,c) cols
        return w.reshape(w.shape[0], 64, 7, 7).transpose(0, 2, 3, 1).reshape(
            w.shape[0], -1)

    w1 = jnp.concatenate([to_nhwc_k(p["fcv_w"]), to_nhwc_k(p["fca_w"])], axis=0)
    kp["w1"] = w1.T.astype(jnp.bfloat16)                       # (3136, 1024)
    kp["b1"] = jnp.concatenate([p["fcv_b"], p["fca_b"]]).reshape(1, -1).astype(
        jnp.float32)                                           # (1, 1024)

    kp["wv"] = p["vs_w"].T.astype(jnp.bfloat16)                # (512, Z)
    kp["bv"] = p["vs_b"].reshape(1, -1).astype(jnp.float32)    # (1, Z)
    kp["wa"] = p["as_w"].reshape(num_actions, num_atoms, -1).transpose(
        0, 2, 1).astype(jnp.bfloat16)                          # (A, 512, Z)
    kp["ba"] = p["as_b"].reshape(num_actions, 1, num_atoms).astype(jnp.float32)
    return kp


# ----------------------------------------------------------------------------
# Forward passes
# ----------------------------------------------------------------------------

def rainbow_forward_pallas(x, kp, num_actions, num_atoms):
    xb = x.astype(jnp.bfloat16)
    # conv1 takes NCHW input directly; everything downstream stays NHWC.
    h = pallas_conv_relu(xb, kp["c1_w"], kp["c1_b"], kernel_size=8, stride=4,
                         dimension_numbers=("NCHW", "OIHW", "NHWC"),
                         block_m=160)                 # (B, 20, 20, 32)
    h = pallas_conv_relu(h, kp["c2_w"], kp["c2_b"], kernel_size=4, stride=2,
                         dimension_numbers=("NHWC", "OIHW", "NHWC"))
    h = pallas_conv_relu(h, kp["c3_w"], kp["c3_b"], kernel_size=3, stride=1,
                         dimension_numbers=("NHWC", "OIHW", "NHWC"))
    B = x.shape[0]
    flat = h.reshape(B, -1)   # NHWC flatten; head weights were permuted to match
    return pallas_fused_head(flat, kp, num_actions, num_atoms)


def rainbow_forward_reference(x, params, num_actions, num_atoms):
    """Pure-JAX reference in torch layout (for correctness check only)."""
    def conv(h, w, b, s):
        y = jax.lax.conv_general_dilated(
            h, w, (s, s), "VALID",
            dimension_numbers=("NCHW", "OIHW", "NCHW"),
            precision=jax.lax.Precision.HIGHEST)
        return jnp.maximum(y + b[None, :, None, None], 0.0)

    h = conv(x, params["c1_w"], params["c1_b"], 4)
    h = conv(h, params["c2_w"], params["c2_b"], 2)
    h = conv(h, params["c3_w"], params["c3_b"], 1)
    B = x.shape[0]
    flat = h.reshape(B, -1)
    mm = functools.partial(jnp.matmul, precision=jax.lax.Precision.HIGHEST)
    v = jnp.maximum(mm(flat, params["fcv_w"].T) + params["fcv_b"], 0.0)
    a = jnp.maximum(mm(flat, params["fca_w"].T) + params["fca_b"], 0.0)
    v = mm(v, params["vs_w"].T) + params["vs_b"]
    a = mm(a, params["as_w"].T) + params["as_b"]
    a = a.reshape(B, num_actions, num_atoms)
    q = v[:, None, :] + a - jnp.mean(a, axis=1, keepdims=True)
    p = jax.nn.softmax(q, axis=2)
    return jnp.clip(p, 0.001, None)


# ----------------------------------------------------------------------------
# Main
# ----------------------------------------------------------------------------

if __name__ == "__main__":
    INPUT_CHANNELS = 4
    NUM_ACTIONS = 6
    NUM_ATOMS = 51
    BATCH = 2
    SPATIAL = 84  # the module hard-codes 84x84 via linear_input_size

    key = jax.random.PRNGKey(0)
    k_params, k_x = jax.random.split(key)
    params = make_params(k_params, INPUT_CHANNELS, NUM_ACTIONS, NUM_ATOMS)
    kparams = prepare_params(params, NUM_ACTIONS, NUM_ATOMS)  # one-time layout prep
    x = jax.random.normal(k_x, (BATCH, INPUT_CHANNELS, SPATIAL, SPATIAL), jnp.float32)

    fwd = jax.jit(functools.partial(
        rainbow_forward_pallas, num_actions=NUM_ACTIONS, num_atoms=NUM_ATOMS))
    out = fwd(x, kparams)
    out = jax.block_until_ready(out)

    assert out.shape == (BATCH, NUM_ACTIONS, NUM_ATOMS), out.shape
    assert bool(jnp.all(jnp.isfinite(out)))
    assert bool(jnp.all(out >= 0.001))

    ref = rainbow_forward_reference(x, params, NUM_ACTIONS, NUM_ATOMS)
    ref = jax.block_until_ready(ref)
    # bf16 weights/activations vs f32 HIGHEST reference; outputs are softmax
    # probabilities (~0.02 each), so 1e-2 absolute is a generous bound.
    max_err = float(jnp.max(jnp.abs(out - ref)))
    if max_err > 1e-2:
        raise AssertionError(f"Pallas output mismatch vs reference: {max_err}")

    print("KERNEL_OK")
</pallas_src>

<mosaic_0001>
module attributes {stable_mosaic.version = 11 : i64} {
  func.func @_matmul_bias_relu_kernel(%arg0: i32, %arg1: memref<160x256xbf16, #tpu.memory_space<vmem>>, %arg2: memref<256x32xbf16, #tpu.memory_space<vmem>>, %arg3: memref<1x32xf32, #tpu.memory_space<vmem>>, %arg4: memref<160x32xbf16, #tpu.memory_space<vmem>>) attributes {dimension_semantics = [#tpu.dimension_semantics<parallel>], iteration_bounds = array<i64: 5>, scalar_prefetch = 0 : i64, scratch_operands = 0 : i64, tpu.core_type = #tpu.core_type<tc>, window_params = [{transform_indices = @transform_0, window_bounds = array<i64: 160, 256>}, {pipeline_mode = #tpu.pipeline_mode<synchronous>, transform_indices = @transform_1, window_bounds = array<i64: 256, 32>}, {pipeline_mode = #tpu.pipeline_mode<synchronous>, transform_indices = @transform_2, window_bounds = array<i64: 1, 32>}, {transform_indices = @transform_3, window_bounds = array<i64: 160, 32>}]} {
    %c0 = arith.constant 0 : index
    %c0_0 = arith.constant 0 : index
    %0 = vector.load %arg1[%c0, %c0_0] : memref<160x256xbf16, #tpu.memory_space<vmem>>, vector<160x256xbf16>
    %c0_1 = arith.constant 0 : index
    %c0_2 = arith.constant 0 : index
    %1 = vector.load %arg2[%c0_1, %c0_2] : memref<256x32xbf16, #tpu.memory_space<vmem>>, vector<256x32xbf16>
    %cst = arith.constant dense<0.000000e+00> : vector<160x32xf32>
    %2 = tpu.matmul %0, %1, %cst {dimension_numbers = #tpu.dot_dimension_numbers<[1], [0], [0], [1], [0, 0, 1, 1], [], []>} : vector<160x256xbf16>, vector<256x32xbf16>, vector<160x32xf32> -> vector<160x32xf32>
    %c0_3 = arith.constant 0 : index
    %c0_4 = arith.constant 0 : index
    %3 = vector.load %arg3[%c0_3, %c0_4] : memref<1x32xf32, #tpu.memory_space<vmem>>, vector<1x32xf32>
    %4 = vector.broadcast %3 : vector<1x32xf32> to vector<160x32xf32>
    %5 = arith.addf %2, %4 : vector<160x32xf32>
    %cst_5 = arith.constant 0.000000e+00 : f32
    %6 = vector.broadcast %cst_5 : f32 to vector<160x32xf32>
    %7 = arith.maximumf %5, %6 : vector<160x32xf32>
    %8 = arith.truncf %7 : vector<160x32xf32> to vector<160x32xbf16>
    %c0_6 = arith.constant 0 : index
    %c0_7 = arith.constant 0 : index
    %9 = vector.load %arg4[%c0_6, %c0_7] : memref<160x32xbf16, #tpu.memory_space<vmem>>, vector<160x32xbf16>
    tpu.vector_store %arg4[%c0_6, %c0_7], %8 {strides = array<i32>} : memref<160x32xbf16, #tpu.memory_space<vmem>>, vector<160x32xbf16>,
    return
  }
  func.func @transform_0(%arg0: i32) -> (i32, i32) {
    %c0_i32 = arith.constant 0 : i32
    %c0_i32_0 = arith.constant 0 : i32
    return %arg0, %c0_i32 : i32, i32
  }
  func.func @transform_1(%arg0: i32) -> (i32, i32) {
    %c0_i32 = arith.constant 0 : i32
    %c0_i32_0 = arith.constant 0 : i32
    %c0_i32_1 = arith.constant 0 : i32
    return %c0_i32, %c0_i32_0 : i32, i32
  }
  func.func @transform_2(%arg0: i32) -> (i32, i32) {
    %c0_i32 = arith.constant 0 : i32
    %c0_i32_0 = arith.constant 0 : i32
    %c0_i32_1 = arith.constant 0 : i32
    return %c0_i32, %c0_i32_0 : i32, i32
  }
  func.func @transform_3(%arg0: i32) -> (i32, i32) {
    %c0_i32 = arith.constant 0 : i32
    %c0_i32_0 = arith.constant 0 : i32
    return %arg0, %c0_i32 : i32, i32
  }
}

module attributes {stable_mosaic.version = 11 : i64} {
  func.func @_matmul_bias_relu_kernel(%arg0: memref<162x512xbf16, #tpu.memory_space<vmem>>, %arg1: memref<512x64xbf16, #tpu.memory_space<vmem>>, %arg2: memref<1x64xf32, #tpu.memory_space<vmem>>, %arg3: memref<162x64xbf16, #tpu.memory_space<vmem>>) attributes {dimension_semantics = [], scalar_prefetch = 0 : i64, scratch_operands = 0 : i64, tpu.core_type = #tpu.core_type<tc>} {
    %c0 = arith.constant 0 : index
    %c0_0 = arith.constant 0 : index
    %0 = vector.load %arg0[%c0, %c0_0] : memref<162x512xbf16, #tpu.memory_space<vmem>>, vector<162x512xbf16>
    %c0_1 = arith.constant 0 : index
    %c0_2 = arith.constant 0 : index
    %1 = vector.load %arg1[%c0_1, %c0_2] : memref<512x64xbf16, #tpu.memory_space<vmem>>, vector<512x64xbf16>
    %cst = arith.constant dense<0.000000e+00> : vector<162x64xf32>
    %2 = tpu.matmul %0, %1, %cst {dimension_numbers = #tpu.dot_dimension_numbers<[1], [0], [0], [1], [0, 0, 1, 1], [], []>} : vector<162x512xbf16>, vector<512x64xbf16>, vector<162x64xf32> -> vector<162x64xf32>
    %c0_3 = arith.constant 0 : index
    %c0_4 = arith.constant 0 : index
    %3 = vector.load %arg2[%c0_3, %c0_4] : memref<1x64xf32, #tpu.memory_space<vmem>>, vector<1x64xf32>
    %4 = vector.broadcast %3 : vector<1x64xf32> to vector<162x64xf32>
    %5 = arith.addf %2, %4 : vector<162x64xf32>
    %cst_5 = arith.constant 0.000000e+00 : f32
    %6 = vector.broadcast %cst_5 : f32 to vector<162x64xf32>
    %7 = arith.maximumf %5, %6 : vector<162x64xf32>
    %8 = arith.truncf %7 : vector<162x64xf32> to vector<162x64xbf16>
    %c0_6 = arith.constant 0 : index
    %c0_7 = arith.constant 0 : index
    %9 = vector.load %arg3[%c0_6, %c0_7] : memref<162x64xbf16, #tpu.memory_space<vmem>>, vector<162x64xbf16>
    tpu.vector_store %arg3[%c0_6, %c0_7], %8 {strides = array<i32>} : memref<162x64xbf16, #tpu.memory_space<vmem>>, vector<162x64xbf16>,
    return
  }
}

module attributes {stable_mosaic.version = 11 : i64} {
  func.func @_matmul_bias_relu_kernel(%arg0: memref<98x576xbf16, #tpu.memory_space<vmem>>, %arg1: memref<576x64xbf16, #tpu.memory_space<vmem>>, %arg2: memref<1x64xf32, #tpu.memory_space<vmem>>, %arg3: memref<98x64xbf16, #tpu.memory_space<vmem>>) attributes {dimension_semantics = [], scalar_prefetch = 0 : i64, scratch_operands = 0 : i64, tpu.core_type = #tpu.core_type<tc>} {
    %c0 = arith.constant 0 : index
    %c0_0 = arith.constant 0 : index
    %0 = vector.load %arg0[%c0, %c0_0] : memref<98x576xbf16, #tpu.memory_space<vmem>>, vector<98x576xbf16>
    %c0_1 = arith.constant 0 : index
    %c0_2 = arith.constant 0 : index
    %1 = vector.load %arg1[%c0_1, %c0_2] : memref<576x64xbf16, #tpu.memory_space<vmem>>, vector<576x64xbf16>
    %cst = arith.constant dense<0.000000e+00> : vector<98x64xf32>
    %2 = tpu.matmul %0, %1, %cst {dimension_numbers = #tpu.dot_dimension_numbers<[1], [0], [0], [1], [0, 0, 1, 1], [], []>} : vector<98x576xbf16>, vector<576x64xbf16>, vector<98x64xf32> -> vector<98x64xf32>
    %c0_3 = arith.constant 0 : index
    %c0_4 = arith.constant 0 : index
    %3 = vector.load %arg2[%c0_3, %c0_4] : memref<1x64xf32, #tpu.memory_space<vmem>>, vector<1x64xf32>
    %4 = vector.broadcast %3 : vector<1x64xf32> to vector<98x64xf32>
    %5 = arith.addf %2, %4 : vector<98x64xf32>
    %cst_5 = arith.constant 0.000000e+00 : f32
    %6 = vector.broadcast %cst_5 : f32 to vector<98x64xf32>
    %7 = arith.maximumf %5, %6 : vector<98x64xf32>
    %8 = arith.truncf %7 : vector<98x64xf32> to vector<98x64xbf16>
    %c0_6 = arith.constant 0 : index
    %c0_7 = arith.constant 0 : index
    %9 = vector.load %arg3[%c0_6, %c0_7] : memref<98x64xbf16, #tpu.memory_space<vmem>>, vector<98x64xbf16>
    tpu.vector_store %arg3[%c0_6, %c0_7], %8 {strides = array<i32>} : memref<98x64xbf16, #tpu.memory_space<vmem>>, vector<98x64xbf16>,
    return
  }
}

module attributes {stable_mosaic.version = 11 : i64} {
  func.func @_head_kernel(%arg0: memref<2x3136xbf16, #tpu.memory_space<vmem>>, %arg1: memref<3136x1024xbf16, #tpu.memory_space<vmem>>, %arg2: memref<1x1024xf32, #tpu.memory_space<vmem>>, %arg3: memref<512x51xbf16, #tpu.memory_space<vmem>>, %arg4: memref<1x51xf32, #tpu.memory_space<vmem>>, %arg5: memref<6x512x51xbf16, #tpu.memory_space<vmem>>, %arg6: memref<6x1x51xf32, #tpu.memory_space<vmem>>, %arg7: memref<2x6x51xf32, #tpu.memory_space<vmem>>) attributes {dimension_semantics = [], scalar_prefetch = 0 : i64, scratch_operands = 0 : i64, tpu.core_type = #tpu.core_type<tc>} {
    %c0 = arith.constant 0 : index
    %c0_0 = arith.constant 0 : index
    %0 = vector.load %arg0[%c0, %c0_0] : memref<2x3136xbf16, #tpu.memory_space<vmem>>, vector<2x3136xbf16>
    %c0_1 = arith.constant 0 : index
    %c0_2 = arith.constant 0 : index
    %1 = vector.load %arg1[%c0_1, %c0_2] : memref<3136x1024xbf16, #tpu.memory_space<vmem>>, vector<3136x1024xbf16>
    %cst = arith.constant dense<0.000000e+00> : vector<2x1024xf32>
    %2 = tpu.matmul %0, %1, %cst {dimension_numbers = #tpu.dot_dimension_numbers<[1], [0], [0], [1], [0, 0, 1, 1], [], []>} : vector<2x3136xbf16>, vector<3136x1024xbf16>, vector<2x1024xf32> -> vector<2x1024xf32>
    %c0_3 = arith.constant 0 : index
    %c0_4 = arith.constant 0 : index
    %3 = vector.load %arg2[%c0_3, %c0_4] : memref<1x1024xf32, #tpu.memory_space<vmem>>, vector<1x1024xf32>
    %4 = vector.broadcast %3 : vector<1x1024xf32> to vector<2x1024xf32>
    %5 = arith.addf %2, %4 : vector<2x1024xf32>
    %cst_5 = arith.constant 0.000000e+00 : f32
    %6 = vector.broadcast %cst_5 : f32 to vector<2x1024xf32>
    %7 = arith.maximumf %5, %6 : vector<2x1024xf32>
    %8 = arith.truncf %7 : vector<2x1024xf32> to vector<2x1024xbf16>
    %9 = vector.extract_strided_slice %8 {offsets = [0, 0], sizes = [2, 512], strides = [1, 1]} : vector<2x1024xbf16> to vector<2x512xbf16>
    %10 = vector.extract_strided_slice %8 {offsets = [0, 512], sizes = [2, 512], strides = [1, 1]} : vector<2x1024xbf16> to vector<2x512xbf16>
    %c0_6 = arith.constant 0 : index
    %c0_7 = arith.constant 0 : index
    %11 = vector.load %arg3[%c0_6, %c0_7] : memref<512x51xbf16, #tpu.memory_space<vmem>>, vector<512x51xbf16>
    %cst_8 = arith.constant dense<0.000000e+00> : vector<2x51xf32>
    %12 = tpu.matmul %9, %11, %cst_8 {dimension_numbers = #tpu.dot_dimension_numbers<[1], [0], [0], [1], [0, 0, 1, 1], [], []>} : vector<2x512xbf16>, vector<512x51xbf16>, vector<2x51xf32> -> vector<2x51xf32>
    %c0_9 = arith.constant 0 : index
    %c0_10 = arith.constant 0 : index
    %13 = vector.load %arg4[%c0_9, %c0_10] : memref<1x51xf32, #tpu.memory_space<vmem>>, vector<1x51xf32>
    %14 = vector.broadcast %13 : vector<1x51xf32> to vector<2x51xf32>
    %15 = arith.addf %12, %14 : vector<2x51xf32>
    %c0_11 = arith.constant 0 : index
    %c0_12 = arith.constant 0 : index
    %c0_13 = arith.constant 0 : index
    %16 = vector.load %arg5[%c0_11, %c0_12, %c0_13] : memref<6x512x51xbf16, #tpu.memory_space<vmem>>, vector<1x512x51xbf16>
    %17 = vector.shape_cast %16 : vector<1x512x51xbf16> to vector<512x51xbf16>
    %cst_14 = arith.constant dense<0.000000e+00> : vector<2x51xf32>
    %18 = tpu.matmul %10, %17, %cst_14 {dimension_numbers = #tpu.dot_dimension_numbers<[1], [0], [0], [1], [0, 0, 1, 1], [], []>} : vector<2x512xbf16>, vector<512x51xbf16>, vector<2x51xf32> -> vector<2x51xf32>
    %c0_15 = arith.constant 0 : index
    %c0_16 = arith.constant 0 : index
    %c0_17 = arith.constant 0 : index
    %19 = vector.load %arg6[%c0_15, %c0_16, %c0_17] : memref<6x1x51xf32, #tpu.memory_space<vmem>>, vector<1x1x51xf32>
    %20 = vector.shape_cast %19 : vector<1x1x51xf32> to vector<1x51xf32>
    %21 = vector.broadcast %20 : vector<1x51xf32> to vector<2x51xf32>
    %22 = arith.addf %18, %21 : vector<2x51xf32>
    %c1 = arith.constant 1 : index
    %c0_18 = arith.constant 0 : index
    %c0_19 = arith.constant 0 : index
    %23 = vector.load %arg5[%c1, %c0_18, %c0_19] : memref<6x512x51xbf16, #tpu.memory_space<vmem>>, vector<1x512x51xbf16>
    %24 = vector.shape_cast %23 : vector<1x512x51xbf16> to vector<512x51xbf16>
    %cst_20 = arith.constant dense<0.000000e+00> : vector<2x51xf32>
    %25 = tpu.matmul %10, %24, %cst_20 {dimension_numbers = #tpu.dot_dimension_numbers<[1], [0], [0], [1], [0, 0, 1, 1], [], []>} : vector<2x512xbf16>, vector<512x51xbf16>, vector<2x51xf32> -> vector<2x51xf32>
    %c1_21 = arith.constant 1 : index
    %c0_22 = arith.constant 0 : index
    %c0_23 = arith.constant 0 : index
    %26 = vector.load %arg6[%c1_21, %c0_22, %c0_23] : memref<6x1x51xf32, #tpu.memory_space<vmem>>, vector<1x1x51xf32>
    %27 = vector.shape_cast %26 : vector<1x1x51xf32> to vector<1x51xf32>
    %28 = vector.broadcast %27 : vector<1x51xf32> to vector<2x51xf32>
    %29 = arith.addf %25, %28 : vector<2x51xf32>
    %c2 = arith.constant 2 : index
    %c0_24 = arith.constant 0 : index
    %c0_25 = arith.constant 0 : index
    %30 = vector.load %arg5[%c2, %c0_24, %c0_25] : memref<6x512x51xbf16, #tpu.memory_space<vmem>>, vector<1x512x51xbf16>
    %31 = vector.shape_cast %30 : vector<1x512x51xbf16> to vector<512x51xbf16>
    %cst_26 = arith.constant dense<0.000000e+00> : vector<2x51xf32>
    %32 = tpu.matmul %10, %31, %cst_26 {dimension_numbers = #tpu.dot_dimension_numbers<[1], [0], [0], [1], [0, 0, 1, 1], [], []>} : vector<2x512xbf16>, vector<512x51xbf16>, vector<2x51xf32> -> vector<2x51xf32>
    %c2_27 = arith.constant 2 : index
    %c0_28 = arith.constant 0 : index
    %c0_29 = arith.constant 0 : index
    %33 = vector.load %arg6[%c2_27, %c0_28, %c0_29] : memref<6x1x51xf32, #tpu.memory_space<vmem>>, vector<1x1x51xf32>
    %34 = vector.shape_cast %33 : vector<1x1x51xf32> to vector<1x51xf32>
    %35 = vector.broadcast %34 : vector<1x51xf32> to vector<2x51xf32>
    %36 = arith.addf %32, %35 : vector<2x51xf32>
    %c3 = arith.constant 3 : index
    %c0_30 = arith.constant 0 : index
    %c0_31 = arith.constant 0 : index
    %37 = vector.load %arg5[%c3, %c0_30, %c0_31] : memref<6x512x51xbf16, #tpu.memory_space<vmem>>, vector<1x512x51xbf16>
    %38 = vector.shape_cast %37 : vector<1x512x51xbf16> to vector<512x51xbf16>
    %cst_32 = arith.constant dense<0.000000e+00> : vector<2x51xf32>
    %39 = tpu.matmul %10, %38, %cst_32 {dimension_numbers = #tpu.dot_dimension_numbers<[1], [0], [0], [1], [0, 0, 1, 1], [], []>} : vector<2x512xbf16>, vector<512x51xbf16>, vector<2x51xf32> -> vector<2x51xf32>
    %c3_33 = arith.constant 3 : index
    %c0_34 = arith.constant 0 : index
    %c0_35 = arith.constant 0 : index
    %40 = vector.load %arg6[%c3_33, %c0_34, %c0_35] : memref<6x1x51xf32, #tpu.memory_space<vmem>>, vector<1x1x51xf32>
    %41 = vector.shape_cast %40 : vector<1x1x51xf32> to vector<1x51xf32>
    %42 = vector.broadcast %41 : vector<1x51xf32> to vector<2x51xf32>
    %43 = arith.addf %39, %42 : vector<2x51xf32>
    %c4 = arith.constant 4 : index
    %c0_36 = arith.constant 0 : index
    %c0_37 = arith.constant 0 : index
    %44 = vector.load %arg5[%c4, %c0_36, %c0_37] : memref<6x512x51xbf16, #tpu.memory_space<vmem>>, vector<1x512x51xbf16>
    %45 = vector.shape_cast %44 : vector<1x512x51xbf16> to vector<512x51xbf16>
    %cst_38 = arith.constant dense<0.000000e+00> : vector<2x51xf32>
    %46 = tpu.matmul %10, %45, %cst_38 {dimension_numbers = #tpu.dot_dimension_numbers<[1], [0], [0], [1], [0, 0, 1, 1], [], []>} : vector<2x512xbf16>, vector<512x51xbf16>, vector<2x51xf32> -> vector<2x51xf32>
    %c4_39 = arith.constant 4 : index
    %c0_40 = arith.constant 0 : index
    %c0_41 = arith.constant 0 : index
    %47 = vector.load %arg6[%c4_39, %c0_40, %c0_41] : memref<6x1x51xf32, #tpu.memory_space<vmem>>, vector<1x1x51xf32>
    %48 = vector.shape_cast %47 : vector<1x1x51xf32> to vector<1x51xf32>
    %49 = vector.broadcast %48 : vector<1x51xf32> to vector<2x51xf32>
    %50 = arith.addf %46, %49 : vector<2x51xf32>
    %c5 = arith.constant 5 : index
    %c0_42 = arith.constant 0 : index
    %c0_43 = arith.constant 0 : index
    %51 = vector.load %arg5[%c5, %c0_42, %c0_43] : memref<6x512x51xbf16, #tpu.memory_space<vmem>>, vector<1x512x51xbf16>
    %52 = vector.shape_cast %51 : vector<1x512x51xbf16> to vector<512x51xbf16>
    %cst_44 = arith.constant dense<0.000000e+00> : vector<2x51xf32>
    %53 = tpu.matmul %10, %52, %cst_44 {dimension_numbers = #tpu.dot_dimension_numbers<[1], [0], [0], [1], [0, 0, 1, 1], [], []>} : vector<2x512xbf16>, vector<512x51xbf16>, vector<2x51xf32> -> vector<2x51xf32>
    %c5_45 = arith.constant 5 : index
    %c0_46 = arith.constant 0 : index
    %c0_47 = arith.constant 0 : index
    %54 = vector.load %arg6[%c5_45, %c0_46, %c0_47] : memref<6x1x51xf32, #tpu.memory_space<vmem>>, vector<1x1x51xf32>
    %55 = vector.shape_cast %54 : vector<1x1x51xf32> to vector<1x51xf32>
    %56 = vector.broadcast %55 : vector<1x51xf32> to vector<2x51xf32>
    %57 = arith.addf %53, %56 : vector<2x51xf32>
    %58 = arith.addf %22, %29 : vector<2x51xf32>
    %59 = arith.addf %58, %36 : vector<2x51xf32>
    %60 = arith.addf %59, %43 : vector<2x51xf32>
    %61 = arith.addf %60, %50 : vector<2x51xf32>
    %62 = arith.addf %61, %57 : vector<2x51xf32>
    %cst_48 = arith.constant 0.166666672 : f32
    %63 = vector.broadcast %cst_48 : f32 to vector<2x51xf32>
    %64 = arith.mulf %62, %63 : vector<2x51xf32>
    %65 = arith.addf %15, %22 : vector<2x51xf32>
    %66 = arith.subf %65, %64 : vector<2x51xf32>
    %cst_49 = arith.constant dense<0xFF800000> : vector<2xf32>
    %67 = vector.multi_reduction <maximumf>, %66, %cst_49 [1] : vector<2x51xf32> to vector<2xf32>
    %68 = vector.shape_cast %67 : vector<2xf32> to vector<2x1xf32>
    %69 = vector.broadcast %68 : vector<2x1xf32> to vector<2x51xf32>
    %70 = arith.subf %66, %69 : vector<2x51xf32>
    %71 = math.exp %70 : vector<2x51xf32>
    %cst_50 = arith.constant dense<0.000000e+00> : vector<2xf32>
    %72 = vector.multi_reduction <add>, %71, %cst_50 [1] : vector<2x51xf32> to vector<2xf32>
    %73 = vector.shape_cast %72 : vector<2xf32> to vector<2x1xf32>
    %74 = vector.broadcast %73 : vector<2x1xf32> to vector<2x51xf32>
    %75 = arith.divf %71, %74 : vector<2x51xf32>
    %cst_51 = arith.constant 1.000000e-03 : f32
    %76 = vector.broadcast %cst_51 : f32 to vector<2x51xf32>
    %77 = arith.maximumf %75, %76 : vector<2x51xf32>
    %c0_52 = arith.constant 0 : index
    %c0_53 = arith.constant 0 : index
    %c0_54 = arith.constant 0 : index
    %78 = vector.load %arg7[%c0_52, %c0_53, %c0_54] : memref<2x6x51xf32, #tpu.memory_space<vmem>>, vector<2x1x51xf32>
    %79 = vector.shape_cast %78 : vector<2x1x51xf32> to vector<2x51xf32>
    %80 = vector.shape_cast %77 : vector<2x51xf32> to vector<2x1x51xf32>
    tpu.vector_store %arg7[%c0_52, %c0_53, %c0_54], %80 {strides = array<i32>} : memref<2x6x51xf32, #tpu.memory_space<vmem>>, vector<2x1x51xf32>,
    %81 = arith.addf %15, %29 : vector<2x51xf32>
    %82 = arith.subf %81, %64 : vector<2x51xf32>
    %cst_55 = arith.constant dense<0xFF800000> : vector<2xf32>
    %83 = vector.multi_reduction <maximumf>, %82, %cst_55 [1] : vector<2x51xf32> to vector<2xf32>
    %84 = vector.shape_cast %83 : vector<2xf32> to vector<2x1xf32>
    %85 = vector.broadcast %84 : vector<2x1xf32> to vector<2x51xf32>
    %86 = arith.subf %82, %85 : vector<2x51xf32>
    %87 = math.exp %86 : vector<2x51xf32>
    %cst_56 = arith.constant dense<0.000000e+00> : vector<2xf32>
    %88 = vector.multi_reduction <add>, %87, %cst_56 [1] : vector<2x51xf32> to vector<2xf32>
    %89 = vector.shape_cast %88 : vector<2xf32> to vector<2x1xf32>
    %90 = vector.broadcast %89 : vector<2x1xf32> to vector<2x51xf32>
    %91 = arith.divf %87, %90 : vector<2x51xf32>
    %cst_57 = arith.constant 1.000000e-03 : f32
    %92 = vector.broadcast %cst_57 : f32 to vector<2x51xf32>
    %93 = arith.maximumf %91, %92 : vector<2x51xf32>
    %c0_58 = arith.constant 0 : index
    %c1_59 = arith.constant 1 : index
    %c0_60 = arith.constant 0 : index
    %94 = vector.load %arg7[%c0_58, %c1_59, %c0_60] : memref<2x6x51xf32, #tpu.memory_space<vmem>>, vector<2x1x51xf32>
    %95 = vector.shape_cast %94 : vector<2x1x51xf32> to vector<2x51xf32>
    %96 = vector.shape_cast %93 : vector<2x51xf32> to vector<2x1x51xf32>
    tpu.vector_store %arg7[%c0_58, %c1_59, %c0_60], %96 {strides = array<i32>} : memref<2x6x51xf32, #tpu.memory_space<vmem>>, vector<2x1x51xf32>,
    %97 = arith.addf %15, %36 : vector<2x51xf32>
    %98 = arith.subf %97, %64 : vector<2x51xf32>
    %cst_61 = arith.constant dense<0xFF800000> : vector<2xf32>
    %99 = vector.multi_reduction <maximumf>, %98, %cst_61 [1] : vector<2x51xf32> to vector<2xf32>
    %100 = vector.shape_cast %99 : vector<2xf32> to vector<2x1xf32>
    %101 = vector.broadcast %100 : vector<2x1xf32> to vector<2x51xf32>
    %102 = arith.subf %98, %101 : vector<2x51xf32>
    %103 = math.exp %102 : vector<2x51xf32>
    %cst_62 = arith.constant dense<0.000000e+00> : vector<2xf32>
    %104 = vector.multi_reduction <add>, %103, %cst_62 [1] : vector<2x51xf32> to vector<2xf32>
    %105 = vector.shape_cast %104 : vector<2xf32> to vector<2x1xf32>
    %106 = vector.broadcast %105 : vector<2x1xf32> to vector<2x51xf32>
    %107 = arith.divf %103, %106 : vector<2x51xf32>
    %cst_63 = arith.constant 1.000000e-03 : f32
    %108 = vector.broadcast %cst_63 : f32 to vector<2x51xf32>
    %109 = arith.maximumf %107, %108 : vector<2x51xf32>
    %c0_64 = arith.constant 0 : index
    %c2_65 = arith.constant 2 : index
    %c0_66 = arith.constant 0 : index
    %110 = vector.load %arg7[%c0_64, %c2_65, %c0_66] : memref<2x6x51xf32, #tpu.memory_space<vmem>>, vector<2x1x51xf32>
    %111 = vector.shape_cast %110 : vector<2x1x51xf32> to vector<2x51xf32>
    %112 = vector.shape_cast %109 : vector<2x51xf32> to vector<2x1x51xf32>
    tpu.vector_store %arg7[%c0_64, %c2_65, %c0_66], %112 {strides = array<i32>} : memref<2x6x51xf32, #tpu.memory_space<vmem>>, vector<2x1x51xf32>,
    %113 = arith.addf %15, %43 : vector<2x51xf32>
    %114 = arith.subf %113, %64 : vector<2x51xf32>
    %cst_67 = arith.constant dense<0xFF800000> : vector<2xf32>
    %115 = vector.multi_reduction <maximumf>, %114, %cst_67 [1] : vector<2x51xf32> to vector<2xf32>
    %116 = vector.shape_cast %115 : vector<2xf32> to vector<2x1xf32>
    %117 = vector.broadcast %116 : vector<2x1xf32> to vector<2x51xf32>
    %118 = arith.subf %114, %117 : vector<2x51xf32>
    %119 = math.exp %118 : vector<2x51xf32>
    %cst_68 = arith.constant dense<0.000000e+00> : vector<2xf32>
    %120 = vector.multi_reduction <add>, %119, %cst_68 [1] : vector<2x51xf32> to vector<2xf32>
    %121 = vector.shape_cast %120 : vector<2xf32> to vector<2x1xf32>
    %122 = vector.broadcast %121 : vector<2x1xf32> to vector<2x51xf32>
    %123 = arith.divf %119, %122 : vector<2x51xf32>
    %cst_69 = arith.constant 1.000000e-03 : f32
    %124 = vector.broadcast %cst_69 : f32 to vector<2x51xf32>
    %125 = arith.maximumf %123, %124 : vector<2x51xf32>
    %c0_70 = arith.constant 0 : index
    %c3_71 = arith.constant 3 : index
    %c0_72 = arith.constant 0 : index
    %126 = vector.load %arg7[%c0_70, %c3_71, %c0_72] : memref<2x6x51xf32, #tpu.memory_space<vmem>>, vector<2x1x51xf32>
    %127 = vector.shape_cast %126 : vector<2x1x51xf32> to vector<2x51xf32>
    %128 = vector.shape_cast %125 : vector<2x51xf32> to vector<2x1x51xf32>
    tpu.vector_store %arg7[%c0_70, %c3_71, %c0_72], %128 {strides = array<i32>} : memref<2x6x51xf32, #tpu.memory_space<vmem>>, vector<2x1x51xf32>,
    %129 = arith.addf %15, %50 : vector<2x51xf32>
    %130 = arith.subf %129, %64 : vector<2x51xf32>
    %cst_73 = arith.constant dense<0xFF800000> : vector<2xf32>
    %131 = vector.multi_reduction <maximumf>, %130, %cst_73 [1] : vector<2x51xf32> to vector<2xf32>
    %132 = vector.shape_cast %131 : vector<2xf32> to vector<2x1xf32>
    %133 = vector.broadcast %132 : vector<2x1xf32> to vector<2x51xf32>
    %134 = arith.subf %130, %133 : vector<2x51xf32>
    %135 = math.exp %134 : vector<2x51xf32>
    %cst_74 = arith.constant dense<0.000000e+00> : vector<2xf32>
    %136 = vector.multi_reduction <add>, %135, %cst_74 [1] : vector<2x51xf32> to vector<2xf32>
    %137 = vector.shape_cast %136 : vector<2xf32> to vector<2x1xf32>
    %138 = vector.broadcast %137 : vector<2x1xf32> to vector<2x51xf32>
    %139 = arith.divf %135, %138 : vector<2x51xf32>
    %cst_75 = arith.constant 1.000000e-03 : f32
    %140 = vector.broadcast %cst_75 : f32 to vector<2x51xf32>
    %141 = arith.maximumf %139, %140 : vector<2x51xf32>
    %c0_76 = arith.constant 0 : index
    %c4_77 = arith.constant 4 : index
    %c0_78 = arith.constant 0 : index
    %142 = vector.load %arg7[%c0_76, %c4_77, %c0_78] : memref<2x6x51xf32, #tpu.memory_space<vmem>>, vector<2x1x51xf32>
    %143 = vector.shape_cast %142 : vector<2x1x51xf32> to vector<2x51xf32>
    %144 = vector.shape_cast %141 : vector<2x51xf32> to vector<2x1x51xf32>
    tpu.vector_store %arg7[%c0_76, %c4_77, %c0_78], %144 {strides = array<i32>} : memref<2x6x51xf32, #tpu.memory_space<vmem>>, vector<2x1x51xf32>,
    %145 = arith.addf %15, %57 : vector<2x51xf32>
    %146 = arith.subf %145, %64 : vector<2x51xf32>
    %cst_79 = arith.constant dense<0xFF800000> : vector<2xf32>
    %147 = vector.multi_reduction <maximumf>, %146, %cst_79 [1] : vector<2x51xf32> to vector<2xf32>
    %148 = vector.shape_cast %147 : vector<2xf32> to vector<2x1xf32>
    %149 = vector.broadcast %148 : vector<2x1xf32> to vector<2x51xf32>
    %150 = arith.subf %146, %149 : vector<2x51xf32>
    %151 = math.exp %150 : vector<2x51xf32>
    %cst_80 = arith.constant dense<0.000000e+00> : vector<2xf32>
    %152 = vector.multi_reduction <add>, %151, %cst_80 [1] : vector<2x51xf32> to vector<2xf32>
    %153 = vector.shape_cast %152 : vector<2xf32> to vector<2x1xf32>
    %154 = vector.broadcast %153 : vector<2x1xf32> to vector<2x51xf32>
    %155 = arith.divf %151, %154 : vector<2x51xf32>
    %cst_81 = arith.constant 1.000000e-03 : f32
    %156 = vector.broadcast %cst_81 : f32 to vector<2x51xf32>
    %157 = arith.maximumf %155, %156 : vector<2x51xf32>
    %c0_82 = arith.constant 0 : index
    %c5_83 = arith.constant 5 : index
    %c0_84 = arith.constant 0 : index
    %158 = vector.load %arg7[%c0_82, %c5_83, %c0_84] : memref<2x6x51xf32, #tpu.memory_space<vmem>>, vector<2x1x51xf32>
    %159 = vector.shape_cast %158 : vector<2x1x51xf32> to vector<2x51xf32>
    %160 = vector.shape_cast %157 : vector<2x51xf32> to vector<2x1x51xf32>
    tpu.vector_store %arg7[%c0_82, %c5_83, %c0_84], %160 {strides = array<i32>} : memref<2x6x51xf32, #tpu.memory_space<vmem>>, vector<2x1x51xf32>,
    return
  }
}

</mosaic_0001>

<bundles_post_ra>
// kernel: rainbow_forward_pallas.4
= control target key start
LH: loop header
LB: loop body
LE: loop exit
PB: predicated region body
PF: predicated region fallthrough
CT: control target
= control target key end

     0   :  { %s985_s12 = smov 0   ;;  %s1143_s0 = inlined_call_operand.vmem [shape: bf16[800,256], index: 0, kind: input, shape index: {}]   ;;  %s1144_s1 = inlined_call_operand.vmem [shape: bf16[256,32], index: 1, kind: input, shape index: {}]   ;;  %s1145_s2 = inlined_call_operand.vmem [shape: f32[1,32], index: 2, kind: input, shape index: {}]   ;;  %s1146_s3 = inlined_call_operand.vmem [shape: bf16[800,32], index: 3, kind: output, shape index: {}]  }
   0x1 LB: > { %s723_s13 = sadd.s32 4294967295, %s963_s12   ;;  %p727_p0 = scmp.ge.s32.totalorder %s963_s12, 1  ;;  %s963_s12 = sphi %s985_s12, %s13_s12  }
   0x2   : > { %p139_p1 = scmp.lt.s32.totalorder %s963_s12, 6 }
   0x4   : > { %p140_p2 = pnand %p727_p0, %p139_p1 }
   0x5   : > { %v911_v0 = vld [vmem:[%s1144_s1 + $0x40] sm:$0xff] (!%p140_p2)   ;;  %s164_s16 = smul.u32 (!%p140_p2), 20, %s723_s13  ;;  %v913_v2 = vld [vmem:[%s1144_s1 + $0x48] sm:$0xff] (!%p140_p2)   ;;  %v915_v4 = vld [vmem:[%s1144_s1 + $0x50] sm:$0xff] (!%p140_p2)   ;;  %vm646_vm0 = vcmask (!%p140_p2), 257024  }
   0x6   : > { %143 = sbr.rel (%p140_p2) target bundleno = 294 (0x126), region = 32  ;;  %v912_v1 = vld [vmem:[%s1144_s1] sm:$0xff] (!%p140_p2)   ;;  %811 = vmatprep.subr.bf16.mxu0 (!%p140_p2), %v911_v0  ;;  %887 = vmatprep.subr.bf16.mxu1 (!%p140_p2), %v911_v0  ;;  %v914_v3 = vld [vmem:[%s1144_s1 + $0x8] sm:$0xff] (!%p140_p2)   ;;  %v916_v5 = vld [vmem:[%s1144_s1 + $0x10] sm:$0xff] (!%p140_p2)  }
   0x7   : > { %812 = vmatpush3.bf16.msra.mxu0 (!%p140_p2), %v912_v1  ;;  %895 = vmatpush3.bf16.msra.mxu1 (!%p140_p2), %v912_v1  ;;  %p165_p3 = scmp.lt.s32.totalorder (!%p140_p2), %s164_s16, 99  ;;  %v917_v6 = vld [vmem:[%s1144_s1 + $0x58] sm:$0xff] (!%p140_p2)   ;;  %v919_v8 = vld [vmem:[%s1144_s1 + $0x60] sm:$0xff] (!%p140_p2)   ;;  %v921_v10 = vld [vmem:[%s1144_s1 + $0x68] sm:$0xff] (!%p140_p2)  }
   0x8   : > { %813 = vmatprep.subr.bf16.mxu0 (!%p140_p2), %v913_v2  ;;  %888 = vmatprep.subr.bf16.mxu1 (!%p140_p2), %v913_v2  ;;  %v918_v7 = vld [vmem:[%s1144_s1 + $0x18] sm:$0xff] (!%p140_p2)   ;;  %v920_v9 = vld [vmem:[%s1144_s1 + $0x20] sm:$0xff] (!%p140_p2)   ;;  %v922_v13 = vld [vmem:[%s1144_s1 + $0x28] sm:$0xff] (!%p140_p2)  }
   0x9   : > { %v923_v14 = vld [vmem:[%s1144_s1 + $0x70] sm:$0xff] (!%p140_p2)   ;;  %v925_v16 = vld [vmem:[%s1144_s1 + $0x78] sm:$0xff] (!%p140_p2)   ;;  %v1072_v38 = vld [vmem:[%s1145_s2] ss:$0 sm:$0xff] (!%p140_p2) }
   0xa   : > { %v924_v15 = vld [vmem:[%s1144_s1 + $0x30] sm:$0xff] (!%p140_p2)   ;;  %v926_v17 = vld [vmem:[%s1144_s1 + $0x38] sm:$0xff] (!%p140_p2)  }
   0xb   : > { %814 = vmatpush3.bf16.msra.mxu0 (!%p140_p2), %v914_v3  ;;  %896 = vmatpush3.bf16.msra.mxu1 (!%p140_p2), %v914_v3 }
   0xc   : > { %815 = vmatprep.subr.bf16.mxu0 (!%p140_p2), %v915_v4  ;;  %889 = vmatprep.subr.bf16.mxu1 (!%p140_p2), %v915_v4 }
   0xd   : > { %s1148_s16 = smov (!%p165_p3, %s164_s16), 99 }
   0xe   : > { %s790_s4 = sshll.u32 %s1148_s16, 3  ;;  %s730_s28 = sshll.u32 %s1148_s16, 2 }
   0xf   : > { %816 = vmatpush3.bf16.msra.mxu0 %v916_v5  ;;  %897 = vmatpush3.bf16.msra.mxu1 %v916_v5  ;;  %s1026_s9 = scalar_lea.vmem %s1143_s0, %s790_s4  ;;  %s1082_s4 = scalar_lea.vmem %s1146_s3, %s730_s28 }
  0x10   : > { %817 = vmatprep.subr.bf16.mxu0 %v917_v6  ;;  %890 = vmatprep.subr.bf16.mxu1 %v917_v6  ;;  %v929_v11 = vld [vmem:[%s1026_s9 + $0x4] ss:$8 sps:$4 sm:$0xff]   ;;  %v932_v12 = vld [vmem:[%s1026_s9 + $0x54] ss:$8 sps:$4 sm:$0xff]   ;;  %v927_v18 = vld [vmem:[%s1026_s9] ss:$8 sps:$4 sm:$0xff]  }
  0x11   : > { %465 = vmatprep.mubr.bf16.mxu0 %v929_v11  ;;  %505 = vmatprep.mubr.bf16.mxu1 %v932_v12  ;;  %v930_v19 = vld [vmem:[%s1026_s9 + $0x50] ss:$8 sps:$4 sm:$0xff]   ;;  %v933_v20 = vld [vmem:[%s1026_s9 + $0x14] ss:$8 sps:$4 sm:$0xff]   ;;  %v935_v21 = vld [vmem:[%s1026_s9 + $0x64] ss:$8 sps:$4 sm:$0xff]  }
  0x12   : > { %v937_v22 = vld [vmem:[%s1026_s9 + $0x10] ss:$8 sps:$4 sm:$0xff]   ;;  %v938_v23 = vld [vmem:[%s1026_s9 + $0x60] ss:$8 sps:$4 sm:$0xff]   ;;  %v939_v24 = vld [vmem:[%s1026_s9 + $0x24] ss:$8 sps:$4 sm:$0xff]  }
  0x13   : > { %818 = vmatpush3.bf16.msra.mxu0 %v918_v7  ;;  %898 = vmatpush3.bf16.msra.mxu1 %v918_v7  ;;  %v941_v25 = vld [vmem:[%s1026_s9 + $0x74] ss:$8 sps:$4 sm:$0xff]   ;;  %v943_v26 = vld [vmem:[%s1026_s9 + $0x20] ss:$8 sps:$4 sm:$0xff]   ;;  %v944_v27 = vld [vmem:[%s1026_s9 + $0x70] ss:$8 sps:$4 sm:$0xff]  }
  0x14   : > { %819 = vmatprep.subr.bf16.mxu0 %v919_v8  ;;  %891 = vmatprep.subr.bf16.mxu1 %v919_v8  ;;  %v945_v28 = vld [vmem:[%s1026_s9 + $0x34] ss:$8 sps:$4 sm:$0xff]   ;;  %v947_v29 = vld [vmem:[%s1026_s9 + $0x84] ss:$8 sps:$4 sm:$0xff]   ;;  %v949_v30 = vld [vmem:[%s1026_s9 + $0x30] ss:$8 sps:$4 sm:$0xff]  }
  0x15   : > { %v950_v31 = vld [vmem:[%s1026_s9 + $0x80] ss:$8 sps:$4 sm:$0xff]   ;;  %v951_v32 = vld [vmem:[%s1026_s9 + $0x44] ss:$8 sps:$4 sm:$0xff]   ;;  %v953_v33 = vld [vmem:[%s1026_s9 + $0x94] ss:$8 sps:$4 sm:$0xff]  }
  0x16   : > { %v955_v34 = vld [vmem:[%s1026_s9 + $0x40] ss:$8 sps:$4 sm:$0xff]   ;;  %v956_v35 = vld [vmem:[%s1026_s9 + $0x90] ss:$8 sps:$4 sm:$0xff]  }
  0x17   : > { %820 = vmatpush3.bf16.msra.mxu0 %v920_v9  ;;  %899 = vmatpush3.bf16.msra.mxu1 %v920_v9 }
  0x18   : > { %821 = vmatprep.subr.bf16.mxu0 %v921_v10  ;;  %892 = vmatprep.subr.bf16.mxu1 %v921_v10 }
  0x1b   : > { %822 = vmatpush3.bf16.msra.mxu0 %v922_v13  ;;  %900 = vmatpush3.bf16.msra.mxu1 %v922_v13 }
  0x1c   : > { %823 = vmatprep.subr.bf16.mxu0 %v923_v14  ;;  %893 = vmatprep.subr.bf16.mxu1 %v923_v14 }
  0x1f   : > { %824 = vmatpush3.bf16.msra.mxu0 %v924_v15  ;;  %901 = vmatpush3.bf16.msra.mxu1 %v924_v15 }
  0x20   : > { %825 = vmatprep.subr.bf16.mxu0 %v925_v16  ;;  %894 = vmatprep.subr.bf16.mxu1 %v925_v16 }
  0x23   : > { %826 = vmatpush3.bf16.msra.mxu0 %v926_v17  ;;  %902 = vmatpush3.bf16.msra.mxu1 %v926_v17 }
  0x26   : > { %466 = vmatmul.mubr.bf16.vlgmr.msra.gmra.mrb[0].mxu0 %v927_v18  ;;  %506 = vmatmul.mubr.bf16.vlgmr.msra.gmra.mrb[0].mxu1 %v930_v19 }
  0x27   : > { %473 = vmatprep.mubr.bf16.mxu0 %v933_v20  ;;  %513 = vmatprep.mubr.bf16.mxu1 %v935_v21 }
  0x2e   : > { %474 = vmatmul.mubr.bf16.gmra.mrb[4].mxu0 %v937_v22  ;;  %514 = vmatmul.mubr.bf16.gmra.mrb[4].mxu1 %v938_v23 }
  0x2f   : > { %481 = vmatprep.mubr.bf16.mxu0 %v939_v24  ;;  %521 = vmatprep.mubr.bf16.mxu1 %v941_v25 }
  0x36   : > { %482 = vmatmul.mubr.bf16.gmra.mrb[8].mxu0 %v943_v26  ;;  %522 = vmatmul.mubr.bf16.gmra.mrb[8].mxu1 %v944_v27 }
  0x37   : > { %489 = vmatprep.mubr.bf16.mxu0 %v945_v28  ;;  %529 = vmatprep.mubr.bf16.mxu1 %v947_v29 }
  0x3e   : > { %490 = vmatmul.mubr.bf16.gmra.mrb[12].mxu0 %v949_v30  ;;  %530 = vmatmul.mubr.bf16.gmra.mrb[12].mxu1 %v950_v31 }
  0x3f   : > { %497 = vmatprep.mubr.bf16.mxu0 %v951_v32  ;;  %537 = vmatprep.mubr.bf16.mxu1 %v953_v33 }
  0x46   : > { %498 = vmatmul.mubr.bf16.gmra.mrb[16].mxu0 %v955_v34  ;;  %538 = vmatmul.mubr.bf16.gmra.mrb[16].mxu1 %v956_v35 }
  0xf9   : > { %v827_v36 = vpop.f32.mrb[0].mxu0  ;;  %v857_v37 = vpop.f32.mrb[0].mxu1 }
  0xfa   : > { %v828_v39 = vpop.f32.mrb[1].mxu0  ;;  %v858_v40 = vpop.f32.mrb[1].mxu1 }
  0xfb   : > { %v829_v41 = vadd.f32 %v828_v39, %v827_v36  ;;  %v859_v42 = vadd.f32 %v858_v40, %v857_v37  ;;  %v830_v43 = vpop.f32.mrb[2].mxu0  ;;  %v860_v44 = vpop.f32.mrb[2].mxu1 }
  0xfc   : > { %v831_v45 = vpop.f32.mrb[3].mxu0  ;;  %v861_v46 = vpop.f32.mrb[3].mxu1 }
  0xfd   : > { %v468_v47 = vadd.f32 %v829_v41, %v1072_v38  ;;  %v508_v48 = vadd.f32 %v859_v42, %v1072_v38  ;;  %v832_v49 = vadd.f32 %v831_v45, %v830_v43  ;;  %v862_v50 = vadd.f32 %v861_v46, %v860_v44 }
  0xff   : > { %v546_v51 = vmax.f32 %v468_v47, 0.0  ;;  %v556_v52 = vmax.f32 %v508_v48, 0.0  ;;  %v471_v53 = vadd.f32 %v832_v49, %v1072_v38  ;;  %v511_v54 = vadd.f32 %v862_v50, %v1072_v38 }
 0x101   : > { %v791_v55 = vpack.c.bf16 %v546_v51, %v546_v51  ;;  %v801_v56 = vpack.c.bf16 %v556_v52, %v556_v52  ;;  %v547_v57 = vmax.f32 %v471_v53, 0.0  ;;  %v557_v58 = vmax.f32 %v511_v54, 0.0  ;;  %v833_v59 = vpop.f32.mrb[4].mxu0  ;;  %v863_v60 = vpop.f32.mrb[4].mxu1 }
 0x102   : > { %v834_v61 = vpop.f32.mrb[5].mxu0  ;;  %v864_v62 = vpop.f32.mrb[5].mxu1 }
 0x103   : > { %647 = vst.msk [vmem:[%s1082_s4] sm:$0xf] %vm646_vm0, %v791_v55  ;;  %657 = vst.msk [vmem:[%s1082_s4 + $0x28] sm:$0xf] %vm646_vm0, %v801_v56  ;;  %v792_v63 = vpack.c.bf16 %v547_v57, %v547_v57  ;;  %v802_v0 = vpack.c.bf16 %v557_v58, %v557_v58  ;;  %v835_v1 = vadd.f32 %v834_v61, %v833_v59  ;;  %v836_v3 = vpop.f32.mrb[6].mxu0  ;;  %v866_v4 = vpop.f32.mrb[6].mxu1 }
 0x104   : > { %v865_v2 = vadd.f32 %v864_v62, %v863_v60  ;;  %v837_v5 = vpop.f32.mrb[7].mxu0  ;;  %v867_v6 = vpop.f32.mrb[7].mxu1 }
 0x105   : > { %648 = vst.msk [vmem:[%s1082_s4 + $0x4] sm:$0xf] %vm646_vm0, %v792_v63  ;;  %658 = vst.msk [vmem:[%s1082_s4 + $0x2c] sm:$0xf] %vm646_vm0, %v802_v0  ;;  %v476_v7 = vadd.f32 %v835_v1, %v1072_v38  ;;  %v838_v9 = vadd.f32 %v837_v5, %v836_v3  ;;  %v868_v10 = vadd.f32 %v867_v6, %v866_v4 }
 0x106   : > { %v516_v8 = vadd.f32 %v865_v2, %v1072_v38 }
 0x107   : > { %v548_v11 = vmax.f32 %v476_v7, 0.0  ;;  %v479_v13 = vadd.f32 %v838_v9, %v1072_v38  ;;  %v519_v14 = vadd.f32 %v868_v10, %v1072_v38 }
 0x108   : > { %v558_v12 = vmax.f32 %v516_v8, 0.0 }
 0x109   : > { %v793_v15 = vpack.c.bf16 %v548_v11, %v548_v11  ;;  %v549_v17 = vmax.f32 %v479_v13, 0.0  ;;  %v559_v18 = vmax.f32 %v519_v14, 0.0  ;;  %v839_v19 = vpop.f32.mrb[8].mxu0  ;;  %v869_v20 = vpop.f32.mrb[8].mxu1 }
 0x10a   : > { %v803_v16 = vpack.c.bf16 %v558_v12, %v558_v12  ;;  %v840_v21 = vpop.f32.mrb[9].mxu0  ;;  %v870_v22 = vpop.f32.mrb[9].mxu1 }
 0x10b   : > { %649 = vst.msk [vmem:[%s1082_s4 + $0x8] sm:$0xf] %vm646_vm0, %v793_v15  ;;  %v794_v23 = vpack.c.bf16 %v549_v17, %v549_v17  ;;  %v804_v24 = vpack.c.bf16 %v559_v18, %v559_v18  ;;  %v841_v25 = vadd.f32 %v840_v21, %v839_v19  ;;  %v871_v26 = vadd.f32 %v870_v22, %v869_v20  ;;  %v842_v27 = vpop.f32.mrb[10].mxu0  ;;  %v872_v28 = vpop.f32.mrb[10].mxu1 }
 0x10c   : > { %659 = vst.msk [vmem:[%s1082_s4 + $0x30] sm:$0xf] %vm646_vm0, %v803_v16  ;;  %v843_v29 = vpop.f32.mrb[11].mxu0  ;;  %v873_v30 = vpop.f32.mrb[11].mxu1 }
 0x10d   : > { %650 = vst.msk [vmem:[%s1082_s4 + $0xc] sm:$0xf] %vm646_vm0, %v794_v23  ;;  %660 = vst.msk [vmem:[%s1082_s4 + $0x34] sm:$0xf] %vm646_vm0, %v804_v24  ;;  %v484_v31 = vadd.f32 %v841_v25, %v1072_v38  ;;  %v524_v32 = vadd.f32 %v871_v26, %v1072_v38  ;;  %v844_v33 = vadd.f32 %v843_v29, %v842_v27 }
 0x10e   : > { %v874_v34 = vadd.f32 %v873_v30, %v872_v28 }
 0x10f   : > { %v550_v35 = vmax.f32 %v484_v31, 0.0  ;;  %v560_v36 = vmax.f32 %v524_v32, 0.0  ;;  %v487_v37 = vadd.f32 %v844_v33, %v1072_v38 }
 0x110   : > { %v527_v39 = vadd.f32 %v874_v34, %v1072_v38 }
 0x111   : > { %v795_v40 = vpack.c.bf16 %v550_v35, %v550_v35  ;;  %v805_v41 = vpack.c.bf16 %v560_v36, %v560_v36  ;;  %v551_v42 = vmax.f32 %v487_v37, 0.0  ;;  %v845_v44 = vpop.f32.mrb[12].mxu0  ;;  %v875_v45 = vpop.f32.mrb[12].mxu1 }
 0x112   : > { %v561_v43 = vmax.f32 %v527_v39, 0.0  ;;  %v846_v46 = vpop.f32.mrb[13].mxu0  ;;  %v876_v47 = vpop.f32.mrb[13].mxu1 }
 0x113   : > { %651 = vst.msk [vmem:[%s1082_s4 + $0x10] sm:$0xf] %vm646_vm0, %v795_v40  ;;  %661 = vst.msk [vmem:[%s1082_s4 + $0x38] sm:$0xf] %vm646_vm0, %v805_v41  ;;  %v796_v48 = vpack.c.bf16 %v551_v42, %v551_v42  ;;  %v847_v50 = vadd.f32 %v846_v46, %v845_v44  ;;  %v877_v51 = vadd.f32 %v876_v47, %v875_v45  ;;  %v848_v52 = vpop.f32.mrb[14].mxu0  ;;  %v878_v53 = vpop.f32.mrb[14].mxu1 }
 0x114   : > { %v806_v49 = vpack.c.bf16 %v561_v43, %v561_v43  ;;  %v849_v54 = vpop.f32.mrb[15].mxu0  ;;  %v879_v55 = vpop.f32.mrb[15].mxu1 }
 0x115   : > { %652 = vst.msk [vmem:[%s1082_s4 + $0x14] sm:$0xf] %vm646_vm0, %v796_v48  ;;  %v492_v56 = vadd.f32 %v847_v50, %v1072_v38  ;;  %v532_v57 = vadd.f32 %v877_v51, %v1072_v38  ;;  %v850_v58 = vadd.f32 %v849_v54, %v848_v52  ;;  %v880_v59 = vadd.f32 %v879_v55, %v878_v53 }
 0x116   : > { %662 = vst.msk [vmem:[%s1082_s4 + $0x3c] sm:$0xf] %vm646_vm0, %v806_v49 }
 0x117   : > { %v552_v60 = vmax.f32 %v492_v56, 0.0  ;;  %v562_v61 = vmax.f32 %v532_v57, 0.0  ;;  %v495_v62 = vadd.f32 %v850_v58, %v1072_v38  ;;  %v535_v63 = vadd.f32 %v880_v59, %v1072_v38 }
 0x119   : > { %v797_v0 = vpack.c.bf16 %v552_v60, %v552_v60  ;;  %v807_v1 = vpack.c.bf16 %v562_v61, %v562_v61  ;;  %v553_v2 = vmax.f32 %v495_v62, 0.0  ;;  %v563_v3 = vmax.f32 %v535_v63, 0.0  ;;  %v851_v4 = vpop.f32.mrb[16].mxu0  ;;  %v881_v5 = vpop.f32.mrb[16].mxu1 }
 0x11a   : > { %v852_v6 = vpop.f32.mrb[17].mxu0  ;;  %v882_v7 = vpop.f32.mrb[17].mxu1 }
 0x11b   : > { %653 = vst.msk [vmem:[%s1082_s4 + $0x18] sm:$0xf] %vm646_vm0, %v797_v0  ;;  %663 = vst.msk [vmem:[%s1082_s4 + $0x40] sm:$0xf] %vm646_vm0, %v807_v1  ;;  %v798_v8 = vpack.c.bf16 %v553_v2, %v553_v2  ;;  %v808_v9 = vpack.c.bf16 %v563_v3, %v563_v3  ;;  %v853_v10 = vadd.f32 %v852_v6, %v851_v4  ;;  %v854_v12 = vpop.f32.mrb[18].mxu0  ;;  %v884_v13 = vpop.f32.mrb[18].mxu1 }
 0x11c   : > { %v883_v11 = vadd.f32 %v882_v7, %v881_v5  ;;  %v855_v14 = vpop.f32.mrb[19].mxu0  ;;  %v885_v15 = vpop.f32.mrb[19].mxu1 }
 0x11d   : > { %654 = vst.msk [vmem:[%s1082_s4 + $0x1c] sm:$0xf] %vm646_vm0, %v798_v8  ;;  %664 = vst.msk [vmem:[%s1082_s4 + $0x44] sm:$0xf] %vm646_vm0, %v808_v9  ;;  %v500_v16 = vadd.f32 %v853_v10, %v1072_v38  ;;  %v856_v18 = vadd.f32 %v855_v14, %v854_v12  ;;  %v886_v19 = vadd.f32 %v885_v15, %v884_v13 }
 0x11e   : > { %v540_v17 = vadd.f32 %v883_v11, %v1072_v38 }
 0x11f   : > { %v554_v20 = vmax.f32 %v500_v16, 0.0  ;;  %v503_v22 = vadd.f32 %v856_v18, %v1072_v38  ;;  %v543_v23 = vadd.f32 %v886_v19, %v1072_v38 }
 0x120   : > { %v564_v21 = vmax.f32 %v540_v17, 0.0 }
 0x121   : > { %v799_v24 = vpack.c.bf16 %v554_v20, %v554_v20  ;;  %v555_v26 = vmax.f32 %v503_v22, 0.0  ;;  %v565_v27 = vmax.f32 %v543_v23, 0.0 }
 0x122   : > { %v809_v25 = vpack.c.bf16 %v564_v21, %v564_v21 }
 0x123   : > { %655 = vst.msk [vmem:[%s1082_s4 + $0x20] sm:$0xf] %vm646_vm0, %v799_v24  ;;  %v800_v28 = vpack.c.bf16 %v555_v26, %v555_v26  ;;  %v810_v29 = vpack.c.bf16 %v565_v27, %v565_v27 }
 0x124   : > { %665 = vst.msk [vmem:[%s1082_s4 + $0x48] sm:$0xf] %vm646_vm0, %v809_v25 }
 0x125   : > { %656 = vst.msk [vmem:[%s1082_s4 + $0x24] sm:$0xf] %vm646_vm0, %v800_v28  ;;  %666 = vst.msk [vmem:[%s1082_s4 + $0x4c] sm:$0xf] %vm646_vm0, %v810_v29 }
 0x126 PF: > { %s13_s12 = sadd.s32 1, %s963_s12  }
 0x127   : > { %p10_p4 = scmp.ge.s32.totalorder %s13_s12, 7  }
 0x129   :  { %12 = sbr.rel (!%p10_p4) target bundleno = 1 (0x1), region = 62 }

// kernel: rainbow_forward_pallas.5
= control target key start
LH: loop header
LB: loop body
LE: loop exit
PB: predicated region body
PF: predicated region fallthrough
CT: control target
= control target key end

     0   :  { %vm880_vm0 = vcmask 519168   ;;  %vm901_vm1 = vcmask 516096   ;;  %s1637_s1 = inlined_call_operand.vmem [shape: bf16[512,64], index: 1, kind: input, shape index: {}]   ;;  %s1638_s0 = inlined_call_operand.vmem [shape: bf16[162,512], index: 0, kind: input, shape index: {}]   ;;  %s1639_s2 = inlined_call_operand.vmem [shape: f32[1,64], index: 2, kind: input, shape index: {}]   ;;  %s1640_s3 = inlined_call_operand.vmem [shape: bf16[162,64], index: 3, kind: output, shape index: {}]  }
   0x1   :  { %v1190_v0 = vld [vmem:[%s1637_s1 + $0x40] sm:$0xff]   ;;  %v1194_v4 = vld [vmem:[%s1637_s1 + $0x48] sm:$0xff]   ;;  %v1198_v8 = vld [vmem:[%s1637_s1 + $0x50] sm:$0xff]  }
   0x2   :  { %v1191_v1 = vld [vmem:[%s1637_s1 + $0xc0] sm:$0xff]   ;;  %1026 = vmatprep.subr.bf16.mxu0 %v1190_v0  ;;  %v1195_v5 = vld [vmem:[%s1637_s1 + $0xc8] sm:$0xff]   ;;  %v1199_v9 = vld [vmem:[%s1637_s1 + $0xd0] sm:$0xff]  }
   0x3   :  { %v1192_v2 = vld [vmem:[%s1637_s1] sm:$0xff]   ;;  %1108 = vmatprep.subr.bf16.mxu1 %v1191_v1  ;;  %v1196_v6 = vld [vmem:[%s1637_s1 + $0x8] sm:$0xff]   ;;  %v1200_v10 = vld [vmem:[%s1637_s1 + $0x10] sm:$0xff]  }
   0x4   :  { %v1193_v3 = vld [vmem:[%s1637_s1 + $0x80] sm:$0xff]   ;;  %1027 = vmatpush3.bf16.msra.mxu0 %v1192_v2  ;;  %v1197_v7 = vld [vmem:[%s1637_s1 + $0x88] sm:$0xff]   ;;  %v1201_v11 = vld [vmem:[%s1637_s1 + $0x90] sm:$0xff]  }
   0x5   :  { %1109 = vmatpush3.bf16.msra.mxu1 %v1193_v3  ;;  %1028 = vmatprep.subr.bf16.mxu0 %v1194_v4  ;;  %v1202_v12 = vld [vmem:[%s1637_s1 + $0x58] sm:$0xff]   ;;  %v1206_v16 = vld [vmem:[%s1637_s1 + $0x60] sm:$0xff]   ;;  %v1210_v20 = vld [vmem:[%s1637_s1 + $0x68] sm:$0xff]  }
   0x6   :  { %1110 = vmatprep.subr.bf16.mxu1 %v1195_v5  ;;  %v1203_v13 = vld [vmem:[%s1637_s1 + $0xd8] sm:$0xff]   ;;  %v1207_v17 = vld [vmem:[%s1637_s1 + $0xe0] sm:$0xff]   ;;  %v1211_v21 = vld [vmem:[%s1637_s1 + $0xe8] sm:$0xff]  }
   0x7   :  { %v1204_v14 = vld [vmem:[%s1637_s1 + $0x18] sm:$0xff]   ;;  %v1208_v18 = vld [vmem:[%s1637_s1 + $0x20] sm:$0xff]   ;;  %v1212_v22 = vld [vmem:[%s1637_s1 + $0x28] sm:$0xff]  }
   0x8   :  { %1029 = vmatpush3.bf16.msra.mxu0 %v1196_v6  ;;  %v1205_v15 = vld [vmem:[%s1637_s1 + $0x98] sm:$0xff]   ;;  %v1209_v19 = vld [vmem:[%s1637_s1 + $0xa0] sm:$0xff]   ;;  %v1213_v23 = vld [vmem:[%s1637_s1 + $0xa8] sm:$0xff]  }
   0x9   :  { %1111 = vmatpush3.bf16.msra.mxu1 %v1197_v7  ;;  %1030 = vmatprep.subr.bf16.mxu0 %v1198_v8  ;;  %v1214_v24 = vld [vmem:[%s1637_s1 + $0x70] sm:$0xff]   ;;  %v1218_v28 = vld [vmem:[%s1637_s1 + $0x78] sm:$0xff]   ;;  %v55_v6 = vld [vmem:[%s1638_s0 + $0x140] sm:$0x11] }
   0xa   :  { %1112 = vmatprep.subr.bf16.mxu1 %v1199_v9  ;;  %v1215_v25 = vld [vmem:[%s1637_s1 + $0xf0] sm:$0xff]   ;;  %v1219_v29 = vld [vmem:[%s1637_s1 + $0xf8] sm:$0xff]   ;;  %v56_v7 = vld [vmem:[%s1638_s0 + $0x148] sm:$0x11] }
   0xb   :  { %v1216_v26 = vld [vmem:[%s1637_s1 + $0x30] sm:$0xff]   ;;  %v1220_v30 = vld [vmem:[%s1637_s1 + $0x38] sm:$0xff]  }
   0xc   :  { %1031 = vmatpush3.bf16.msra.mxu0 %v1200_v10  ;;  %v1217_v27 = vld [vmem:[%s1637_s1 + $0xb0] sm:$0xff]   ;;  %v1221_v31 = vld [vmem:[%s1637_s1 + $0xb8] sm:$0xff]   ;;  %v949_v10 = vcombine.high %v55_v6, %v55_v6 }
   0xd   :  { %1113 = vmatpush3.bf16.msra.mxu1 %v1201_v11  ;;  %1032 = vmatprep.subr.bf16.mxu0 %v1202_v12  ;;  %v1222_v32 = vld [vmem:[%s1638_s0] ss:$16 sps:$4 sm:$0xff]   ;;  %v1224_v33 = vld [vmem:[%s1638_s0 + $0x4] ss:$16 sps:$4 sm:$0xff]   ;;  %v1225_v34 = vld [vmem:[%s1638_s0 + $0x8] ss:$16 sps:$4 sm:$0xff]   ;;  %v951_v11 = vcombine.high %v56_v7, %v56_v7  ;;  %v948_v12 = vcombine.low %v55_v6, %v55_v6 }
   0xe   :  { %1114 = vmatprep.subr.bf16.mxu1 %v1203_v13  ;;  %v1227_v35 = vld [vmem:[%s1638_s0 + $0xc] ss:$16 sps:$4 sm:$0xff]   ;;  %566 = vmatprep.mubr.bf16.mxu0 %v1224_v33  ;;  %v1228_v36 = vld [vmem:[%s1638_s0 + $0x24] ss:$16 sps:$4 sm:$0xff]   ;;  %v1232_v38 = vld [vmem:[%s1638_s0 + $0x20] ss:$16 sps:$4 sm:$0xff]   ;;  %v950_v13 = vcombine.low %v56_v7, %v56_v7 }
   0xf   :  { %686 = vmatprep.mubr.bf16.mxu1 %v1227_v35  ;;  %v1230_v37 = vld [vmem:[%s1638_s0 + $0x2c] ss:$16 sps:$4 sm:$0xff]   ;;  %v1233_v39 = vld [vmem:[%s1638_s0 + $0x28] ss:$16 sps:$4 sm:$0xff]   ;;  %v1234_v40 = vld [vmem:[%s1638_s0 + $0x44] ss:$16 sps:$4 sm:$0xff]  }
  0x10   :  { %1033 = vmatpush3.bf16.msra.mxu0 %v1204_v14  ;;  %v1236_v41 = vld [vmem:[%s1638_s0 + $0x4c] ss:$16 sps:$4 sm:$0xff]   ;;  %v1238_v42 = vld [vmem:[%s1638_s0 + $0x40] ss:$16 sps:$4 sm:$0xff]   ;;  %v1239_v43 = vld [vmem:[%s1638_s0 + $0x48] ss:$16 sps:$4 sm:$0xff]  }
  0x11   :  { %1115 = vmatpush3.bf16.msra.mxu1 %v1205_v15  ;;  %1034 = vmatprep.subr.bf16.mxu0 %v1206_v16  ;;  %v1240_v44 = vld [vmem:[%s1638_s0 + $0x64] ss:$16 sps:$4 sm:$0xff]   ;;  %v1242_v45 = vld [vmem:[%s1638_s0 + $0x6c] ss:$16 sps:$4 sm:$0xff]   ;;  %v1244_v46 = vld [vmem:[%s1638_s0 + $0x60] ss:$16 sps:$4 sm:$0xff]  }
  0x12   :  { %1116 = vmatprep.subr.bf16.mxu1 %v1207_v17  ;;  %v1245_v47 = vld [vmem:[%s1638_s0 + $0x68] ss:$16 sps:$4 sm:$0xff]   ;;  %v1246_v48 = vld [vmem:[%s1638_s0 + $0x84] ss:$16 sps:$4 sm:$0xff]   ;;  %v1248_v49 = vld [vmem:[%s1638_s0 + $0x8c] ss:$16 sps:$4 sm:$0xff]  }
  0x13   :  { %v1250_v50 = vld [vmem:[%s1638_s0 + $0x80] ss:$16 sps:$4 sm:$0xff]   ;;  %v1251_v51 = vld [vmem:[%s1638_s0 + $0x88] ss:$16 sps:$4 sm:$0xff]   ;;  %v1252_v52 = vld [vmem:[%s1638_s0 + $0xa4] ss:$16 sps:$4 sm:$0xff]  }
  0x14   :  { %1035 = vmatpush3.bf16.msra.mxu0 %v1208_v18  ;;  %v1254_v53 = vld [vmem:[%s1638_s0 + $0xac] ss:$16 sps:$4 sm:$0xff]   ;;  %v1256_v54 = vld [vmem:[%s1638_s0 + $0xa0] ss:$16 sps:$4 sm:$0xff]   ;;  %v1257_v55 = vld [vmem:[%s1638_s0 + $0xa8] ss:$16 sps:$4 sm:$0xff]  }
  0x15   :  { %1117 = vmatpush3.bf16.msra.mxu1 %v1209_v19  ;;  %1036 = vmatprep.subr.bf16.mxu0 %v1210_v20  ;;  %v1258_v56 = vld [vmem:[%s1638_s0 + $0xc4] ss:$16 sps:$4 sm:$0xff]   ;;  %v1260_v57 = vld [vmem:[%s1638_s0 + $0xcc] ss:$16 sps:$4 sm:$0xff]   ;;  %v1262_v58 = vld [vmem:[%s1638_s0 + $0xc0] ss:$16 sps:$4 sm:$0xff]  }
  0x16   :  { %1118 = vmatprep.subr.bf16.mxu1 %v1211_v21  ;;  %v1263_v59 = vld [vmem:[%s1638_s0 + $0xc8] ss:$16 sps:$4 sm:$0xff]   ;;  %v1264_v60 = vld [vmem:[%s1638_s0 + $0xe4] ss:$16 sps:$4 sm:$0xff]   ;;  %v1266_v61 = vld [vmem:[%s1638_s0 + $0xec] ss:$16 sps:$4 sm:$0xff]  }
  0x17   :  { %v1268_v62 = vld [vmem:[%s1638_s0 + $0xe0] ss:$16 sps:$4 sm:$0xff]   ;;  %v1269_v63 = vld [vmem:[%s1638_s0 + $0xe8] ss:$16 sps:$4 sm:$0xff]   ;;  %v1270_v0 = vld [vmem:[%s1638_s0 + $0x104] ss:$16 sps:$4 sm:$0xff]  }
  0x18   :  { %1037 = vmatpush3.bf16.msra.mxu0 %v1212_v22  ;;  %v1272_v1 = vld [vmem:[%s1638_s0 + $0x10c] ss:$16 sps:$4 sm:$0xff]   ;;  %v1274_v2 = vld [vmem:[%s1638_s0 + $0x100] ss:$16 sps:$4 sm:$0xff]   ;;  %v1275_v3 = vld [vmem:[%s1638_s0 + $0x108] ss:$16 sps:$4 sm:$0xff]  }
  0x19   :  { %1119 = vmatpush3.bf16.msra.mxu1 %v1213_v23  ;;  %1038 = vmatprep.subr.bf16.mxu0 %v1214_v24  ;;  %v1276_v4 = vld [vmem:[%s1638_s0 + $0x124] ss:$16 sps:$4 sm:$0xff]   ;;  %v1278_v5 = vld [vmem:[%s1638_s0 + $0x12c] ss:$16 sps:$4 sm:$0xff]   ;;  %v1280_v8 = vld [vmem:[%s1638_s0 + $0x120] ss:$16 sps:$4 sm:$0xff]  }
  0x1a   :  { %1120 = vmatprep.subr.bf16.mxu1 %v1215_v25  ;;  %v1281_v9 = vld [vmem:[%s1638_s0 + $0x128] ss:$16 sps:$4 sm:$0xff]   ;;  %v1531_v16 = vld [vmem:[%s1639_s2] ss:$0 sm:$0xff] }
  0x1c   :  { %1039 = vmatpush3.bf16.msra.mxu0 %v1216_v26 }
  0x1d   :  { %1121 = vmatpush3.bf16.msra.mxu1 %v1217_v27  ;;  %1040 = vmatprep.subr.bf16.mxu0 %v1218_v28 }
  0x1e   :  { %1122 = vmatprep.subr.bf16.mxu1 %v1219_v29 }
  0x20   :  { %1041 = vmatpush3.bf16.msra.mxu0 %v1220_v30 }
  0x21   :  { %1123 = vmatpush3.bf16.msra.mxu1 %v1221_v31 }
  0x23   :  { %567 = vmatmul.mubr.bf16.vlgmr.msra.gmra.mrb[0].mxu0 %v1222_v32 }
  0x24   :  { %687 = vmatmul.mubr.bf16.vlgmr.msra.gmra.mrb[0].mxu1 %v1225_v34  ;;  %574 = vmatprep.mubr.bf16.mxu0 %v1228_v36 }
  0x25   :  { %694 = vmatprep.mubr.bf16.mxu1 %v1230_v37 }
  0x2b   :  { %575 = vmatmul.mubr.bf16.gmra.mrb[4].mxu0 %v1232_v38 }
  0x2c   :  { %695 = vmatmul.mubr.bf16.gmra.mrb[4].mxu1 %v1233_v39  ;;  %582 = vmatprep.mubr.bf16.mxu0 %v1234_v40 }
  0x2d   :  { %702 = vmatprep.mubr.bf16.mxu1 %v1236_v41 }
  0x33   :  { %583 = vmatmul.mubr.bf16.gmra.mrb[8].mxu0 %v1238_v42 }
  0x34   :  { %703 = vmatmul.mubr.bf16.gmra.mrb[8].mxu1 %v1239_v43  ;;  %590 = vmatprep.mubr.bf16.mxu0 %v1240_v44 }
  0x35   :  { %710 = vmatprep.mubr.bf16.mxu1 %v1242_v45 }
  0x3b   :  { %591 = vmatmul.mubr.bf16.gmra.mrb[12].mxu0 %v1244_v46 }
  0x3c   :  { %711 = vmatmul.mubr.bf16.gmra.mrb[12].mxu1 %v1245_v47  ;;  %598 = vmatprep.mubr.bf16.mxu0 %v1246_v48 }
  0x3d   :  { %718 = vmatprep.mubr.bf16.mxu1 %v1248_v49 }
  0x43   :  { %599 = vmatmul.mubr.bf16.gmra.mrb[16].mxu0 %v1250_v50 }
  0x44   :  { %719 = vmatmul.mubr.bf16.gmra.mrb[16].mxu1 %v1251_v51  ;;  %606 = vmatprep.mubr.bf16.mxu0 %v1252_v52 }
  0x45   :  { %726 = vmatprep.mubr.bf16.mxu1 %v1254_v53 }
  0x4b   :  { %607 = vmatmul.mubr.bf16.gmra.mrb[20].mxu0 %v1256_v54 }
  0x4c   :  { %727 = vmatmul.mubr.bf16.gmra.mrb[20].mxu1 %v1257_v55  ;;  %614 = vmatprep.mubr.bf16.mxu0 %v1258_v56 }
  0x4d   :  { %734 = vmatprep.mubr.bf16.mxu1 %v1260_v57 }
  0x53   :  { %615 = vmatmul.mubr.bf16.gmra.mrb[24].mxu0 %v1262_v58 }
  0x54   :  { %735 = vmatmul.mubr.bf16.gmra.mrb[24].mxu1 %v1263_v59  ;;  %622 = vmatprep.mubr.bf16.mxu0 %v1264_v60 }
  0x55   :  { %742 = vmatprep.mubr.bf16.mxu1 %v1266_v61 }
  0x5b   :  { %623 = vmatmul.mubr.bf16.gmra.mrb[28].mxu0 %v1268_v62 }
  0x5c   :  { %743 = vmatmul.mubr.bf16.gmra.mrb[28].mxu1 %v1269_v63  ;;  %630 = vmatprep.mubr.bf16.mxu0 %v1270_v0 }
  0x5d   :  { %750 = vmatprep.mubr.bf16.mxu1 %v1272_v1 }
  0x63   :  { %631 = vmatmul.mubr.bf16.gmra.mrb[32].mxu0 %v1274_v2 }
  0x64   :  { %751 = vmatmul.mubr.bf16.gmra.mrb[32].mxu1 %v1275_v3  ;;  %638 = vmatprep.mubr.bf16.mxu0 %v1276_v4 }
  0x65   :  { %758 = vmatprep.mubr.bf16.mxu1 %v1278_v5 }
  0x6b   :  { %639 = vmatmul.mubr.bf16.gmra.mrb[36].mxu0 %v1280_v8 }
  0x6c   :  { %759 = vmatmul.mubr.bf16.gmra.mrb[36].mxu1 %v1281_v9  ;;  %646 = vmatprep.mubr.bf16.mxu0 %v949_v10 }
  0x6d   :  { %766 = vmatprep.mubr.bf16.mxu1 %v951_v11 }
  0x73   :  { %647 = vmatmul.mubr.bf16.gmra.mrb[40].mxu0 %v948_v12 }
  0x74   :  { %767 = vmatmul.mubr.bf16.gmra.mrb[40].mxu1 %v950_v13 }
  0xf6   :  { %v1042_v14 = vpop.f32.mrb[0].mxu0 }
  0xf7   :  { %v1124_v15 = vpop.f32.mrb[0].mxu1  ;;  %v1043_v17 = vpop.f32.mrb[1].mxu0 }
  0xf8   :  { %v1044_v18 = vadd.f32 %v1043_v17, %v1042_v14  ;;  %v1125_v19 = vpop.f32.mrb[1].mxu1  ;;  %v1045_v20 = vpop.f32.mrb[2].mxu0 }
  0xf9   :  { %v1126_v21 = vadd.f32 %v1125_v19, %v1124_v15  ;;  %v1127_v22 = vpop.f32.mrb[2].mxu1  ;;  %v1046_v23 = vpop.f32.mrb[3].mxu0 }
  0xfa   :  { %v569_v24 = vadd.f32 %v1044_v18, %v1531_v16  ;;  %v1047_v25 = vadd.f32 %v1046_v23, %v1045_v20  ;;  %v1128_v26 = vpop.f32.mrb[3].mxu1 }
  0xfb   :  { %v1129_v27 = vadd.f32 %v1128_v26, %v1127_v22 }
  0xfc   :  { %v689_v28 = vadd.f32 %v1126_v21, %v569_v24  ;;  %v572_v29 = vadd.f32 %v1047_v25, %v1531_v16 }
  0xfe   :  { %v774_v30 = vmax.f32 %v689_v28, 0.0  ;;  %v692_v31 = vadd.f32 %v1129_v27, %v572_v29  ;;  %v1048_v32 = vpop.f32.mrb[4].mxu0 }
  0xff   :  { %v1130_v33 = vpop.f32.mrb[4].mxu1  ;;  %v1049_v34 = vpop.f32.mrb[5].mxu0 }
 0x100   :  { %v1005_v35 = vpack.c.bf16 %v774_v30, %v774_v30  ;;  %v775_v36 = vmax.f32 %v692_v31, 0.0  ;;  %v1050_v37 = vadd.f32 %v1049_v34, %v1048_v32  ;;  %v1131_v38 = vpop.f32.mrb[5].mxu1  ;;  %v1051_v39 = vpop.f32.mrb[6].mxu0 }
 0x101   :  { %v1132_v40 = vadd.f32 %v1131_v38, %v1130_v33  ;;  %v1133_v41 = vpop.f32.mrb[6].mxu1  ;;  %v1052_v42 = vpop.f32.mrb[7].mxu0 }
 0x102   :  { %881 = vst.msk [vmem:[%s1640_s3] sm:$0xf] %vm880_vm0, %v1005_v35  ;;  %v1006_v43 = vpack.c.bf16 %v775_v36, %v775_v36  ;;  %v577_v44 = vadd.f32 %v1050_v37, %v1531_v16  ;;  %v1053_v45 = vadd.f32 %v1052_v42, %v1051_v39  ;;  %v1134_v46 = vpop.f32.mrb[7].mxu1 }
 0x103   :  { %v1135_v47 = vadd.f32 %v1134_v46, %v1133_v41 }
 0x104   :  { %882 = vst.msk [vmem:[%s1640_s3 + $0x4] sm:$0xf] %vm880_vm0, %v1006_v43  ;;  %v697_v48 = vadd.f32 %v1132_v40, %v577_v44  ;;  %v580_v49 = vadd.f32 %v1053_v45, %v1531_v16 }
 0x106   :  { %v776_v50 = vmax.f32 %v697_v48, 0.0  ;;  %v700_v51 = vadd.f32 %v1135_v47, %v580_v49  ;;  %v1054_v52 = vpop.f32.mrb[8].mxu0 }
 0x107   :  { %v1136_v53 = vpop.f32.mrb[8].mxu1  ;;  %v1055_v54 = vpop.f32.mrb[9].mxu0 }
 0x108   :  { %v1007_v55 = vpack.c.bf16 %v776_v50, %v776_v50  ;;  %v777_v56 = vmax.f32 %v700_v51, 0.0  ;;  %v1056_v57 = vadd.f32 %v1055_v54, %v1054_v52  ;;  %v1137_v58 = vpop.f32.mrb[9].mxu1  ;;  %v1057_v59 = vpop.f32.mrb[10].mxu0 }
 0x109   :  { %v1138_v60 = vadd.f32 %v1137_v58, %v1136_v53  ;;  %v1139_v61 = vpop.f32.mrb[10].mxu1  ;;  %v1058_v62 = vpop.f32.mrb[11].mxu0 }
 0x10a   :  { %883 = vst.msk [vmem:[%s1640_s3 + $0x8] sm:$0xf] %vm880_vm0, %v1007_v55  ;;  %v1008_v63 = vpack.c.bf16 %v777_v56, %v777_v56  ;;  %v585_v0 = vadd.f32 %v1056_v57, %v1531_v16  ;;  %v1059_v1 = vadd.f32 %v1058_v62, %v1057_v59  ;;  %v1140_v2 = vpop.f32.mrb[11].mxu1 }
 0x10b   :  { %v1141_v3 = vadd.f32 %v1140_v2, %v1139_v61 }
 0x10c   :  { %884 = vst.msk [vmem:[%s1640_s3 + $0xc] sm:$0xf] %vm880_vm0, %v1008_v63  ;;  %v705_v4 = vadd.f32 %v1138_v60, %v585_v0  ;;  %v588_v5 = vadd.f32 %v1059_v1, %v1531_v16 }
 0x10e   :  { %v778_v6 = vmax.f32 %v705_v4, 0.0  ;;  %v708_v7 = vadd.f32 %v1141_v3, %v588_v5  ;;  %v1060_v8 = vpop.f32.mrb[12].mxu0 }
 0x10f   :  { %v1142_v9 = vpop.f32.mrb[12].mxu1  ;;  %v1061_v10 = vpop.f32.mrb[13].mxu0 }
 0x110   :  { %v1009_v11 = vpack.c.bf16 %v778_v6, %v778_v6  ;;  %v779_v12 = vmax.f32 %v708_v7, 0.0  ;;  %v1062_v13 = vadd.f32 %v1061_v10, %v1060_v8  ;;  %v1143_v14 = vpop.f32.mrb[13].mxu1  ;;  %v1063_v15 = vpop.f32.mrb[14].mxu0 }
 0x111   :  { %v1144_v17 = vadd.f32 %v1143_v14, %v1142_v9  ;;  %v1145_v18 = vpop.f32.mrb[14].mxu1  ;;  %v1064_v19 = vpop.f32.mrb[15].mxu0 }
 0x112   :  { %885 = vst.msk [vmem:[%s1640_s3 + $0x10] sm:$0xf] %vm880_vm0, %v1009_v11  ;;  %v1010_v20 = vpack.c.bf16 %v779_v12, %v779_v12  ;;  %v593_v21 = vadd.f32 %v1062_v13, %v1531_v16  ;;  %v1065_v22 = vadd.f32 %v1064_v19, %v1063_v15  ;;  %v1146_v23 = vpop.f32.mrb[15].mxu1 }
 0x113   :  { %v1147_v24 = vadd.f32 %v1146_v23, %v1145_v18 }
 0x114   :  { %886 = vst.msk [vmem:[%s1640_s3 + $0x14] sm:$0xf] %vm880_vm0, %v1010_v20  ;;  %v713_v25 = vadd.f32 %v1144_v17, %v593_v21  ;;  %v596_v26 = vadd.f32 %v1065_v22, %v1531_v16 }
 0x116   :  { %v780_v27 = vmax.f32 %v713_v25, 0.0  ;;  %v716_v28 = vadd.f32 %v1147_v24, %v596_v26  ;;  %v1066_v29 = vpop.f32.mrb[16].mxu0 }
 0x117   :  { %v1148_v30 = vpop.f32.mrb[16].mxu1  ;;  %v1067_v31 = vpop.f32.mrb[17].mxu0 }
 0x118   :  { %v1011_v32 = vpack.c.bf16 %v780_v27, %v780_v27  ;;  %v781_v33 = vmax.f32 %v716_v28, 0.0  ;;  %v1068_v34 = vadd.f32 %v1067_v31, %v1066_v29  ;;  %v1149_v35 = vpop.f32.mrb[17].mxu1  ;;  %v1069_v36 = vpop.f32.mrb[18].mxu0 }
 0x119   :  { %v1150_v37 = vadd.f32 %v1149_v35, %v1148_v30  ;;  %v1151_v38 = vpop.f32.mrb[18].mxu1  ;;  %v1070_v39 = vpop.f32.mrb[19].mxu0 }
 0x11a   :  { %887 = vst.msk [vmem:[%s1640_s3 + $0x18] sm:$0xf] %vm880_vm0, %v1011_v32  ;;  %v1012_v40 = vpack.c.bf16 %v781_v33, %v781_v33  ;;  %v601_v41 = vadd.f32 %v1068_v34, %v1531_v16  ;;  %v1071_v42 = vadd.f32 %v1070_v39, %v1069_v36  ;;  %v1152_v43 = vpop.f32.mrb[19].mxu1 }
 0x11b   :  { %v1153_v44 = vadd.f32 %v1152_v43, %v1151_v38 }
 0x11c   :  { %888 = vst.msk [vmem:[%s1640_s3 + $0x1c] sm:$0xf] %vm880_vm0, %v1012_v40  ;;  %v721_v45 = vadd.f32 %v1150_v37, %v601_v41  ;;  %v604_v46 = vadd.f32 %v1071_v42, %v1531_v16 }
 0x11e   :  { %v782_v47 = vmax.f32 %v721_v45, 0.0  ;;  %v724_v48 = vadd.f32 %v1153_v44, %v604_v46  ;;  %v1072_v49 = vpop.f32.mrb[20].mxu0 }
 0x11f   :  { %v1154_v50 = vpop.f32.mrb[20].mxu1  ;;  %v1073_v51 = vpop.f32.mrb[21].mxu0 }
 0x120   :  { %v1013_v52 = vpack.c.bf16 %v782_v47, %v782_v47  ;;  %v783_v53 = vmax.f32 %v724_v48, 0.0  ;;  %v1074_v54 = vadd.f32 %v1073_v51, %v1072_v49  ;;  %v1155_v55 = vpop.f32.mrb[21].mxu1  ;;  %v1075_v56 = vpop.f32.mrb[22].mxu0 }
 0x121   :  { %v1156_v57 = vadd.f32 %v1155_v55, %v1154_v50  ;;  %v1157_v58 = vpop.f32.mrb[22].mxu1  ;;  %v1076_v59 = vpop.f32.mrb[23].mxu0 }
 0x122   :  { %889 = vst.msk [vmem:[%s1640_s3 + $0x20] sm:$0xf] %vm880_vm0, %v1013_v52  ;;  %v1014_v60 = vpack.c.bf16 %v783_v53, %v783_v53  ;;  %v609_v61 = vadd.f32 %v1074_v54, %v1531_v16  ;;  %v1077_v62 = vadd.f32 %v1076_v59, %v1075_v56  ;;  %v1158_v63 = vpop.f32.mrb[23].mxu1 }
 0x123   :  { %v1159_v0 = vadd.f32 %v1158_v63, %v1157_v58 }
 0x124   :  { %890 = vst.msk [vmem:[%s1640_s3 + $0x24] sm:$0xf] %vm880_vm0, %v1014_v60  ;;  %v729_v1 = vadd.f32 %v1156_v57, %v609_v61  ;;  %v612_v2 = vadd.f32 %v1077_v62, %v1531_v16 }
 0x126   :  { %v784_v3 = vmax.f32 %v729_v1, 0.0  ;;  %v732_v4 = vadd.f32 %v1159_v0, %v612_v2  ;;  %v1078_v5 = vpop.f32.mrb[24].mxu0 }
 0x127   :  { %v1160_v6 = vpop.f32.mrb[24].mxu1  ;;  %v1079_v7 = vpop.f32.mrb[25].mxu0 }
 0x128   :  { %v1015_v8 = vpack.c.bf16 %v784_v3, %v784_v3  ;;  %v785_v9 = vmax.f32 %v732_v4, 0.0  ;;  %v1080_v10 = vadd.f32 %v1079_v7, %v1078_v5  ;;  %v1161_v11 = vpop.f32.mrb[25].mxu1  ;;  %v1081_v12 = vpop.f32.mrb[26].mxu0 }
 0x129   :  { %v1162_v13 = vadd.f32 %v1161_v11, %v1160_v6  ;;  %v1163_v14 = vpop.f32.mrb[26].mxu1  ;;  %v1082_v15 = vpop.f32.mrb[27].mxu0 }
 0x12a   :  { %891 = vst.msk [vmem:[%s1640_s3 + $0x28] sm:$0xf] %vm880_vm0, %v1015_v8  ;;  %v1016_v17 = vpack.c.bf16 %v785_v9, %v785_v9  ;;  %v617_v18 = vadd.f32 %v1080_v10, %v1531_v16  ;;  %v1083_v19 = vadd.f32 %v1082_v15, %v1081_v12  ;;  %v1164_v20 = vpop.f32.mrb[27].mxu1 }
 0x12b   :  { %v1165_v21 = vadd.f32 %v1164_v20, %v1163_v14 }
 0x12c   :  { %892 = vst.msk [vmem:[%s1640_s3 + $0x2c] sm:$0xf] %vm880_vm0, %v1016_v17  ;;  %v737_v22 = vadd.f32 %v1162_v13, %v617_v18  ;;  %v620_v23 = vadd.f32 %v1083_v19, %v1531_v16 }
 0x12e   :  { %v786_v24 = vmax.f32 %v737_v22, 0.0  ;;  %v740_v25 = vadd.f32 %v1165_v21, %v620_v23  ;;  %v1084_v26 = vpop.f32.mrb[28].mxu0 }
 0x12f   :  { %v1166_v27 = vpop.f32.mrb[28].mxu1  ;;  %v1085_v28 = vpop.f32.mrb[29].mxu0 }
 0x130   :  { %v1017_v29 = vpack.c.bf16 %v786_v24, %v786_v24  ;;  %v787_v30 = vmax.f32 %v740_v25, 0.0  ;;  %v1086_v31 = vadd.f32 %v1085_v28, %v1084_v26  ;;  %v1167_v32 = vpop.f32.mrb[29].mxu1  ;;  %v1087_v33 = vpop.f32.mrb[30].mxu0 }
 0x131   :  { %v1168_v34 = vadd.f32 %v1167_v32, %v1166_v27  ;;  %v1169_v35 = vpop.f32.mrb[30].mxu1  ;;  %v1088_v36 = vpop.f32.mrb[31].mxu0 }
 0x132   :  { %893 = vst.msk [vmem:[%s1640_s3 + $0x30] sm:$0xf] %vm880_vm0, %v1017_v29  ;;  %v1018_v37 = vpack.c.bf16 %v787_v30, %v787_v30  ;;  %v625_v38 = vadd.f32 %v1086_v31, %v1531_v16  ;;  %v1089_v39 = vadd.f32 %v1088_v36, %v1087_v33  ;;  %v1170_v40 = vpop.f32.mrb[31].mxu1 }
 0x133   :  { %v1171_v41 = vadd.f32 %v1170_v40, %v1169_v35 }
 0x134   :  { %894 = vst.msk [vmem:[%s1640_s3 + $0x34] sm:$0xf] %vm880_vm0, %v1018_v37  ;;  %v745_v42 = vadd.f32 %v1168_v34, %v625_v38  ;;  %v628_v43 = vadd.f32 %v1089_v39, %v1531_v16 }
 0x136   :  { %v788_v44 = vmax.f32 %v745_v42, 0.0  ;;  %v748_v45 = vadd.f32 %v1171_v41, %v628_v43  ;;  %v1090_v46 = vpop.f32.mrb[32].mxu0 }
 0x137   :  { %v1172_v47 = vpop.f32.mrb[32].mxu1  ;;  %v1091_v48 = vpop.f32.mrb[33].mxu0 }
 0x138   :  { %v1019_v49 = vpack.c.bf16 %v788_v44, %v788_v44  ;;  %v789_v50 = vmax.f32 %v748_v45, 0.0  ;;  %v1092_v51 = vadd.f32 %v1091_v48, %v1090_v46  ;;  %v1173_v52 = vpop.f32.mrb[33].mxu1  ;;  %v1093_v53 = vpop.f32.mrb[34].mxu0 }
 0x139   :  { %v1174_v54 = vadd.f32 %v1173_v52, %v1172_v47  ;;  %v1175_v55 = vpop.f32.mrb[34].mxu1  ;;  %v1094_v56 = vpop.f32.mrb[35].mxu0 }
 0x13a   :  { %895 = vst.msk [vmem:[%s1640_s3 + $0x38] sm:$0xf] %vm880_vm0, %v1019_v49  ;;  %v1020_v57 = vpack.c.bf16 %v789_v50, %v789_v50  ;;  %v633_v58 = vadd.f32 %v1092_v51, %v1531_v16  ;;  %v1095_v59 = vadd.f32 %v1094_v56, %v1093_v53  ;;  %v1176_v60 = vpop.f32.mrb[35].mxu1 }
 0x13b   :  { %v1177_v61 = vadd.f32 %v1176_v60, %v1175_v55 }
 0x13c   :  { %896 = vst.msk [vmem:[%s1640_s3 + $0x3c] sm:$0xf] %vm880_vm0, %v1020_v57  ;;  %v753_v62 = vadd.f32 %v1174_v54, %v633_v58  ;;  %v636_v63 = vadd.f32 %v1095_v59, %v1531_v16 }
 0x13e   :  { %v790_v0 = vmax.f32 %v753_v62, 0.0  ;;  %v756_v1 = vadd.f32 %v1177_v61, %v636_v63  ;;  %v1096_v2 = vpop.f32.mrb[36].mxu0 }
 0x13f   :  { %v1178_v3 = vpop.f32.mrb[36].mxu1  ;;  %v1097_v4 = vpop.f32.mrb[37].mxu0 }
 0x140   :  { %v1021_v5 = vpack.c.bf16 %v790_v0, %v790_v0  ;;  %v791_v6 = vmax.f32 %v756_v1, 0.0  ;;  %v1098_v7 = vadd.f32 %v1097_v4, %v1096_v2  ;;  %v1179_v8 = vpop.f32.mrb[37].mxu1  ;;  %v1099_v9 = vpop.f32.mrb[38].mxu0 }
 0x141   :  { %v1180_v10 = vadd.f32 %v1179_v8, %v1178_v3  ;;  %v1181_v11 = vpop.f32.mrb[38].mxu1  ;;  %v1100_v12 = vpop.f32.mrb[39].mxu0 }
 0x142   :  { %897 = vst.msk [vmem:[%s1640_s3 + $0x40] sm:$0xf] %vm880_vm0, %v1021_v5  ;;  %v1022_v13 = vpack.c.bf16 %v791_v6, %v791_v6  ;;  %v641_v14 = vadd.f32 %v1098_v7, %v1531_v16  ;;  %v1101_v15 = vadd.f32 %v1100_v12, %v1099_v9  ;;  %v1182_v17 = vpop.f32.mrb[39].mxu1 }
 0x143   :  { %v1183_v18 = vadd.f32 %v1182_v17, %v1181_v11 }
 0x144   :  { %898 = vst.msk [vmem:[%s1640_s3 + $0x44] sm:$0xf] %vm880_vm0, %v1022_v13  ;;  %v761_v19 = vadd.f32 %v1180_v10, %v641_v14  ;;  %v644_v20 = vadd.f32 %v1101_v15, %v1531_v16 }
 0x146   :  { %v792_v21 = vmax.f32 %v761_v19, 0.0  ;;  %v764_v22 = vadd.f32 %v1183_v18, %v644_v20  ;;  %v1102_v23 = vpop.f32.mrb[40].mxu0 }
 0x147   :  { %v1184_v24 = vpop.f32.mrb[40].mxu1  ;;  %v1103_v25 = vpop.f32.mrb[41].mxu0 }
 0x148   :  { %v1023_v26 = vpack.c.bf16 %v792_v21, %v792_v21  ;;  %v793_v27 = vmax.f32 %v764_v22, 0.0  ;;  %v1104_v28 = vadd.f32 %v1103_v25, %v1102_v23  ;;  %v1185_v29 = vpop.f32.mrb[41].mxu1  ;;  %v1105_v30 = vpop.f32.mrb[42].mxu0 }
 0x149   :  { %v1186_v31 = vadd.f32 %v1185_v29, %v1184_v24  ;;  %v1187_v32 = vpop.f32.mrb[42].mxu1  ;;  %v1106_v33 = vpop.f32.mrb[43].mxu0 }
 0x14a   :  { %899 = vst.msk [vmem:[%s1640_s3 + $0x48] sm:$0xf] %vm880_vm0, %v1023_v26  ;;  %v1024_v34 = vpack.c.bf16 %v793_v27, %v793_v27  ;;  %v649_v35 = vadd.f32 %v1104_v28, %v1531_v16  ;;  %v1188_v36 = vpop.f32.mrb[43].mxu1 }
 0x14c   :  { %900 = vst.msk [vmem:[%s1640_s3 + $0x4c] sm:$0xf] %vm880_vm0, %v1024_v34  ;;  %v769_v37 = vadd.f32 %v1186_v31, %v649_v35 }
 0x14e   :  { %v794_v38 = vmax.f32 %v769_v37, 0.0 }
 0x150   :  { %v1025_v39 = vpack.c.bf16 %v794_v38, %v794_v38 }
 0x152   :  { %902 = vst.msk [vmem:[%s1640_s3 + $0x50] sm:$0x1] %vm901_vm1, %v1025_v39 }

// kernel: rainbow_forward_pallas.6
= control target key start
LH: loop header
LB: loop body
LE: loop exit
PB: predicated region body
PF: predicated region fallthrough
CT: control target
= control target key end

     0   :  { %v1248_v34 = vmov 0.0   ;;  %vm1249_vm0 = vmmov 0   ;;  %vm516_vm1 = vcmask 523264   ;;  %vm868_vm2 = vcmask 519168   ;;  %s1599_s1 = inlined_call_operand.vmem [shape: bf16[576,64], index: 1, kind: input, shape index: {}]   ;;  %s1600_s0 = inlined_call_operand.vmem [shape: bf16[98,576], index: 0, kind: input, shape index: {}]   ;;  %s1601_s2 = inlined_call_operand.vmem [shape: f32[1,64], index: 2, kind: input, shape index: {}]   ;;  %s1602_s3 = inlined_call_operand.vmem [shape: bf16[98,64], index: 3, kind: output, shape index: {}]  }
   0x1   :  { %v1165_v0 = vld [vmem:[%s1599_s1 + $0x40] sm:$0xff]   ;;  %v1169_v4 = vld [vmem:[%s1599_s1 + $0x48] sm:$0xff]   ;;  %v1173_v8 = vld [vmem:[%s1599_s1 + $0x50] sm:$0xff]   ;;  %vm881_vm3 = vcmask 516096  }
   0x2   :  { %v1166_v1 = vld [vmem:[%s1599_s1 + $0xc0] sm:$0xff]   ;;  %992 = vmatprep.subr.bf16.mxu0 %v1165_v0  ;;  %v1170_v5 = vld [vmem:[%s1599_s1 + $0xc8] sm:$0xff]   ;;  %v1174_v9 = vld [vmem:[%s1599_s1 + $0xd0] sm:$0xff]  }
   0x3   :  { %v1167_v2 = vld [vmem:[%s1599_s1] sm:$0xff]   ;;  %1050 = vmatprep.subr.bf16.mxu1 %v1166_v1  ;;  %v1171_v6 = vld [vmem:[%s1599_s1 + $0x8] sm:$0xff]   ;;  %v1175_v10 = vld [vmem:[%s1599_s1 + $0x10] sm:$0xff]  }
   0x4   :  { %v1168_v3 = vld [vmem:[%s1599_s1 + $0x80] sm:$0xff]   ;;  %993 = vmatpush3.bf16.msra.mxu0 %v1167_v2  ;;  %v1172_v7 = vld [vmem:[%s1599_s1 + $0x88] sm:$0xff]   ;;  %v1176_v11 = vld [vmem:[%s1599_s1 + $0x90] sm:$0xff]  }
   0x5   :  { %1051 = vmatpush3.bf16.msra.mxu1 %v1168_v3  ;;  %994 = vmatprep.subr.bf16.mxu0 %v1169_v4  ;;  %v1177_v12 = vld [vmem:[%s1599_s1 + $0x58] sm:$0xff]   ;;  %v1181_v16 = vld [vmem:[%s1599_s1 + $0x60] sm:$0xff]   ;;  %v1185_v20 = vld [vmem:[%s1599_s1 + $0x68] sm:$0xff]  }
   0x6   :  { %1052 = vmatprep.subr.bf16.mxu1 %v1170_v5  ;;  %v1178_v13 = vld [vmem:[%s1599_s1 + $0xd8] sm:$0xff]   ;;  %v1182_v17 = vld [vmem:[%s1599_s1 + $0xe0] sm:$0xff]   ;;  %v1186_v21 = vld [vmem:[%s1599_s1 + $0xe8] sm:$0xff]  }
   0x7   :  { %v1179_v14 = vld [vmem:[%s1599_s1 + $0x18] sm:$0xff]   ;;  %v1183_v18 = vld [vmem:[%s1599_s1 + $0x20] sm:$0xff]   ;;  %v1187_v22 = vld [vmem:[%s1599_s1 + $0x28] sm:$0xff]  }
   0x8   :  { %995 = vmatpush3.bf16.msra.mxu0 %v1171_v6  ;;  %v1180_v15 = vld [vmem:[%s1599_s1 + $0x98] sm:$0xff]   ;;  %v1184_v19 = vld [vmem:[%s1599_s1 + $0xa0] sm:$0xff]   ;;  %v1188_v23 = vld [vmem:[%s1599_s1 + $0xa8] sm:$0xff]  }
   0x9   :  { %1053 = vmatpush3.bf16.msra.mxu1 %v1172_v7  ;;  %996 = vmatprep.subr.bf16.mxu0 %v1173_v8  ;;  %v1189_v24 = vld [vmem:[%s1599_s1 + $0x70] sm:$0xff]   ;;  %v1193_v28 = vld [vmem:[%s1599_s1 + $0x78] sm:$0xff]   ;;  %v1202_v36 = vld [vmem:[%s1600_s0 + $0xc] ss:$20 sps:$4 sm:$0xff]  }
   0xa   :  { %1054 = vmatprep.subr.bf16.mxu1 %v1174_v9  ;;  %v1190_v25 = vld [vmem:[%s1599_s1 + $0xf0] sm:$0xff]   ;;  %v1194_v29 = vld [vmem:[%s1599_s1 + $0xf8] sm:$0xff]   ;;  %v1203_v37 = vld [vmem:[%s1599_s1 + $0x100] sm:$0xff]   ;;  %658 = vmatprep.mubr.bf16.mxu1 %v1202_v36 }
   0xb   :  { %v1191_v26 = vld [vmem:[%s1599_s1 + $0x30] sm:$0xff]   ;;  %v1195_v30 = vld [vmem:[%s1599_s1 + $0x38] sm:$0xff]   ;;  %v1204_v38 = vld [vmem:[%s1600_s0 + $0x2c] ss:$20 sps:$4 sm:$0xff]  }
   0xc   :  { %997 = vmatpush3.bf16.msra.mxu0 %v1175_v10  ;;  %v1192_v27 = vld [vmem:[%s1599_s1 + $0xb0] sm:$0xff]   ;;  %v1196_v31 = vld [vmem:[%s1599_s1 + $0xb8] sm:$0xff]   ;;  %v1214_v43 = vld [vmem:[%s1599_s1 + $0x108] sm:$0xff]  }
   0xd   :  { %1055 = vmatpush3.bf16.msra.mxu1 %v1176_v11  ;;  %998 = vmatprep.subr.bf16.mxu0 %v1177_v12  ;;  %v1197_v32 = vld [vmem:[%s1600_s0] ss:$20 sps:$4 sm:$0xff]   ;;  %v1199_v33 = vld [vmem:[%s1600_s0 + $0x4] ss:$20 sps:$4 sm:$0xff]   ;;  %v1200_v35 = vld [vmem:[%s1600_s0 + $0x8] ss:$20 sps:$4 sm:$0xff]  }
   0xe   :  { %1056 = vmatprep.subr.bf16.mxu1 %v1178_v13  ;;  %570 = vmatprep.mubr.bf16.mxu0 %v1199_v33  ;;  %v1206_v39 = vld [vmem:[%s1600_s0 + $0x34] ss:$20 sps:$4 sm:$0xff]   ;;  %v1209_v41 = vld [vmem:[%s1600_s0 + $0x30] ss:$20 sps:$4 sm:$0xff]   ;;  %v1216_v47 = vld [vmem:[%s1600_s0 + $0x58] ss:$20 sps:$4 sm:$0xff]  }
   0xf   :  { %v1208_v40 = vld [vmem:[%s1600_s0 + $0x28] ss:$20 sps:$4 sm:$0xff]   ;;  %v1223_v45 = vld [vmem:[%s1599_s1 + $0x110] sm:$0xff]   ;;  %v1219_v49 = vld [vmem:[%s1600_s0 + $0x84] ss:$20 sps:$4 sm:$0xff]  }
  0x10   :  { %999 = vmatpush3.bf16.msra.mxu0 %v1179_v14  ;;  %v1210_v42 = vld [vmem:[%s1600_s0 + $0x54] ss:$20 sps:$4 sm:$0xff]   ;;  %v1212_v44 = vld [vmem:[%s1600_s0 + $0x5c] ss:$20 sps:$4 sm:$0xff]   ;;  %v1221_v51 = vld [vmem:[%s1600_s0 + $0x78] ss:$20 sps:$4 sm:$0xff]  }
  0x11   :  { %1057 = vmatpush3.bf16.msra.mxu1 %v1180_v15  ;;  %1000 = vmatprep.subr.bf16.mxu0 %v1181_v16  ;;  %v1215_v46 = vld [vmem:[%s1600_s0 + $0x50] ss:$20 sps:$4 sm:$0xff]   ;;  %v1236_v50 = vld [vmem:[%s1599_s1 + $0x118] sm:$0xff]   ;;  %v1222_v52 = vld [vmem:[%s1600_s0 + $0x80] ss:$20 sps:$4 sm:$0xff]  }
  0x12   :  { %1058 = vmatprep.subr.bf16.mxu1 %v1182_v17  ;;  %v1217_v48 = vld [vmem:[%s1600_s0 + $0x7c] ss:$20 sps:$4 sm:$0xff]   ;;  %v1224_v53 = vld [vmem:[%s1600_s0 + $0xa4] ss:$20 sps:$4 sm:$0xff]   ;;  %v1226_v54 = vld [vmem:[%s1600_s0 + $0xac] ss:$20 sps:$4 sm:$0xff]  }
  0x13   :  { %v1228_v55 = vld [vmem:[%s1600_s0 + $0xa0] ss:$20 sps:$4 sm:$0xff]   ;;  %v1229_v56 = vld [vmem:[%s1600_s0 + $0xa8] ss:$20 sps:$4 sm:$0xff]   ;;  %v1235_v62 = vld [vmem:[%s1600_s0 + $0xd0] ss:$20 sps:$4 sm:$0xff]  }
  0x14   :  { %1001 = vmatpush3.bf16.msra.mxu0 %v1183_v18  ;;  %v1230_v57 = vld [vmem:[%s1600_s0 + $0xcc] ss:$20 sps:$4 sm:$0xff]   ;;  %v1232_v58 = vld [vmem:[%s1600_s0 + $0xd4] ss:$20 sps:$4 sm:$0xff]   ;;  %v52_v60 = vld [vmem:[%s1600_s0 + $0xf8] sm:$0x11] }
  0x15   :  { %1059 = vmatpush3.bf16.msra.mxu1 %v1184_v19  ;;  %1002 = vmatprep.subr.bf16.mxu0 %v1185_v20  ;;  %v51_v59 = vld [vmem:[%s1600_s0 + $0xf0] sm:$0x11]  ;;  %v1234_v61 = vld [vmem:[%s1600_s0 + $0xc8] ss:$20 sps:$4 sm:$0xff]   ;;  %v921_v0 = vcombine.high %v52_v60, %v52_v60  ;;  %v920_v2 = vcombine.low %v52_v60, %v52_v60  ;;  %v1243_v5 = vld [vmem:[%s1600_s0 + $0x38] ss:$20 sps:$4 sm:$0xff]  }
  0x16   :  { %1060 = vmatprep.subr.bf16.mxu1 %v1186_v21  ;;  %v919_v63 = vcombine.high %v51_v59, %v51_v59  ;;  %v918_v1 = vcombine.low %v51_v59, %v51_v59  ;;  %v1241_v3 = vld [vmem:[%s1600_s0 + $0x10] ss:$20 sps:$4 sm:$0xff]   ;;  %v1244_v6 = vld [vmem:[%s1600_s0 + $0xd8] ss:$20 sps:$4 sm:$0xff]   ;;  %v1245_v7 = vld [vmem:[%s1600_s0 + $0x60] ss:$20 sps:$4 sm:$0xff]  }
  0x17   :  { %v1242_v4 = vld [vmem:[%s1600_s0 + $0xb0] ss:$20 sps:$4 sm:$0xff]   ;;  %v1246_v8 = vld [vmem:[%s1600_s0 + $0x100] ss:$0 sps:$4 sm:$0x11]  }
  0x18   :  { %1003 = vmatpush3.bf16.msra.mxu0 %v1187_v22  ;;  %v1247_v9 = vld [vmem:[%s1600_s0 + $0x88] ss:$20 sps:$4 sm:$0xff]   ;;  %v1509_v11 = vld [vmem:[%s1601_s2] ss:$0 sm:$0xff] }
  0x19   :  { %1061 = vmatpush3.bf16.msra.mxu1 %v1188_v23  ;;  %1004 = vmatprep.subr.bf16.mxu0 %v1189_v24 }
  0x1a   :  { %1062 = vmatprep.subr.bf16.mxu1 %v1190_v25 }
  0x1c   :  { %1005 = vmatpush3.bf16.msra.mxu0 %v1191_v26 }
  0x1d   :  { %1063 = vmatpush3.bf16.msra.mxu1 %v1192_v27  ;;  %1006 = vmatprep.subr.bf16.mxu0 %v1193_v28 }
  0x1e   :  { %1064 = vmatprep.subr.bf16.mxu1 %v1194_v29 }
  0x20   :  { %1007 = vmatpush3.bf16.msra.mxu0 %v1195_v30 }
  0x21   :  { %1065 = vmatpush3.bf16.msra.mxu1 %v1196_v31  ;;  %1119 = vmatprep.subr.bf16.mxu0 %v1248_v34 }
  0x22   :  { %1155 = vmatprep.subr.bf16.mxu1 %v1248_v34 }
  0x23   :  { %571 = vmatmul.mubr.bf16.vlgmr.msra.gmra.mrb[0].mxu0 %v1197_v32 }
  0x24   :  { %659 = vmatmul.mubr.bf16.vlgmr.msra.gmra.mrb[0].mxu1 %v1200_v35  ;;  %1120 = vmatpush3.bf16.msra.mxu0 %v1203_v37 }
  0x25   :  { %578 = vmatprep.mubr.bf16.mxu0 %v1204_v38  ;;  %1159 = vmatpush3.bf16.msra.mxu1 %v1203_v37 }
  0x26   :  { %666 = vmatprep.mubr.bf16.mxu1 %v1206_v39  ;;  %1121 = vmatprep.subr.bf16.mxu0 %v1248_v34 }
  0x27   :  { %1156 = vmatprep.subr.bf16.mxu1 %v1248_v34 }
  0x28   :  { %1122 = vmatpush3.bf16.msra.mxu0 %v1214_v43 }
  0x29   :  { %1160 = vmatpush3.bf16.msra.mxu1 %v1214_v43  ;;  %1123 = vmatprep.subr.bf16.mxu0 %v1248_v34 }
  0x2a   :  { %1157 = vmatprep.subr.bf16.mxu1 %v1248_v34 }
  0x2b   :  { %579 = vmatmul.mubr.bf16.gmra.mrb[4].mxu0 %v1208_v40 }
  0x2c   :  { %667 = vmatmul.mubr.bf16.gmra.mrb[4].mxu1 %v1209_v41  ;;  %586 = vmatprep.mubr.bf16.mxu0 %v1210_v42 }
  0x2d   :  { %674 = vmatprep.mubr.bf16.mxu1 %v1212_v44  ;;  %1124 = vmatpush3.bf16.msra.mxu0 %v1223_v45 }
  0x2e   :  { %1161 = vmatpush3.bf16.msra.mxu1 %v1223_v45  ;;  %1125 = vmatprep.subr.bf16.mxu0 %v1248_v34 }
  0x2f   :  { %1158 = vmatprep.subr.bf16.mxu1 %v1248_v34 }
  0x31   :  { %1126 = vmatpush3.bf16.msra.mxu0 %v1236_v50 }
  0x32   :  { %1162 = vmatpush3.bf16.msra.mxu1 %v1236_v50 }
  0x33   :  { %587 = vmatmul.mubr.bf16.gmra.mrb[8].mxu0 %v1215_v46 }
  0x34   :  { %675 = vmatmul.mubr.bf16.gmra.mrb[8].mxu1 %v1216_v47  ;;  %594 = vmatprep.mubr.bf16.mxu0 %v1217_v48 }
  0x35   :  { %682 = vmatprep.mubr.bf16.mxu1 %v1219_v49 }
  0x3b   :  { %595 = vmatmul.mubr.bf16.gmra.mrb[12].mxu0 %v1221_v51 }
  0x3c   :  { %683 = vmatmul.mubr.bf16.gmra.mrb[12].mxu1 %v1222_v52  ;;  %602 = vmatprep.mubr.bf16.mxu0 %v1224_v53 }
  0x3d   :  { %690 = vmatprep.mubr.bf16.mxu1 %v1226_v54 }
  0x43   :  { %603 = vmatmul.mubr.bf16.gmra.mrb[16].mxu0 %v1228_v55 }
  0x44   :  { %691 = vmatmul.mubr.bf16.gmra.mrb[16].mxu1 %v1229_v56  ;;  %610 = vmatprep.mubr.bf16.mxu0 %v1230_v57 }
  0x45   :  { %698 = vmatprep.mubr.bf16.mxu1 %v1232_v58 }
  0x4b   :  { %611 = vmatmul.mubr.bf16.gmra.mrb[20].mxu0 %v1234_v61 }
  0x4c   :  { %699 = vmatmul.mubr.bf16.gmra.mrb[20].mxu1 %v1235_v62  ;;  %618 = vmatprep.mubr.bf16.mxu0 %v919_v63 }
  0x4d   :  { %706 = vmatprep.mubr.bf16.mxu1 %v921_v0 }
  0x53   :  { %619 = vmatmul.mubr.bf16.gmra.mrb[24].mxu0 %v918_v1 }
  0x54   :  { %707 = vmatmul.mubr.bf16.gmra.mrb[24].mxu1 %v920_v2  ;;  %1127 = vmatprep.mubr.msk.bf16.mxu0 %vm1249_vm0, %v1248_v34 }
  0x55   :  { %1143 = vmatprep.mubr.msk.bf16.mxu1 %vm1249_vm0, %v1248_v34 }
  0x5b   :  { %1128 = vmatmul.mubr.msk.bf16.vlgmr.msra.gmra.mrb[28].mxu0 %vm516_vm1, %v1241_v3 }
  0x5c   :  { %1144 = vmatmul.mubr.msk.bf16.vlgmr.msra.gmra.mrb[28].mxu1 %vm516_vm1, %v1242_v4  ;;  %1131 = vmatprep.mubr.msk.bf16.mxu0 %vm1249_vm0, %v1248_v34 }
  0x5d   :  { %1147 = vmatprep.mubr.msk.bf16.mxu1 %vm1249_vm0, %v1248_v34 }
  0x63   :  { %1132 = vmatmul.mubr.msk.bf16.gmra.mrb[32].mxu0 %vm516_vm1, %v1243_v5 }
  0x64   :  { %1148 = vmatmul.mubr.msk.bf16.gmra.mrb[32].mxu1 %vm516_vm1, %v1244_v6  ;;  %1135 = vmatprep.mubr.msk.bf16.mxu0 %vm1249_vm0, %v1248_v34 }
  0x65   :  { %1151 = vmatprep.mubr.msk.bf16.mxu1 %vm1249_vm0, %v1248_v34 }
  0x6b   :  { %1136 = vmatmul.mubr.msk.bf16.gmra.mrb[36].mxu0 %vm516_vm1, %v1245_v7 }
  0x6c   :  { %1152 = vmatmul.mubr.msk.bf16.gmra.mrb[36].mxu1 %vm516_vm1, %v1246_v8  ;;  %1139 = vmatprep.mubr.msk.bf16.mxu0 %vm1249_vm0, %v1248_v34 }
  0x73   :  { %1140 = vmatmul.mubr.msk.bf16.gmra.mrb[40].mxu0 %vm516_vm1, %v1247_v9 }
  0xf6   :  { %v1008_v10 = vpop.f32.mrb[0].mxu0 }
  0xf7   :  { %v1009_v12 = vpop.f32.mrb[1].mxu0  ;;  %v1066_v13 = vpop.f32.mrb[0].mxu1 }
  0xf8   :  { %v1010_v14 = vadd.f32 %v1009_v12, %v1008_v10  ;;  %v1011_v15 = vpop.f32.mrb[2].mxu0  ;;  %v1067_v16 = vpop.f32.mrb[1].mxu1 }
  0xf9   :  { %v1012_v17 = vpop.f32.mrb[3].mxu0  ;;  %v1068_v18 = vadd.f32 %v1067_v16, %v1066_v13  ;;  %v1069_v19 = vpop.f32.mrb[2].mxu1 }
  0xfa   :  { %v573_v20 = vadd.f32 %v1010_v14, %v1509_v11  ;;  %v1013_v21 = vadd.f32 %v1012_v17, %v1011_v15  ;;  %v1070_v22 = vpop.f32.mrb[3].mxu1 }
  0xfb   :  { %v1071_v23 = vadd.f32 %v1070_v22, %v1069_v19 }
  0xfc   :  { %v576_v24 = vadd.f32 %v1013_v21, %v1509_v11  ;;  %v1513_v25 = vadd.f32 %v1068_v18, %v573_v20 }
  0xfe   :  { %v1014_v26 = vpop.f32.mrb[4].mxu0  ;;  %v1515_v27 = vadd.f32 %v1071_v23, %v576_v24 }
  0xff   :  { %v1015_v28 = vpop.f32.mrb[5].mxu0  ;;  %v1072_v29 = vpop.f32.mrb[4].mxu1 }
 0x100   :  { %v1016_v30 = vadd.f32 %v1015_v28, %v1014_v26  ;;  %v1017_v31 = vpop.f32.mrb[6].mxu0  ;;  %v1073_v32 = vpop.f32.mrb[5].mxu1 }
 0x101   :  { %v1018_v33 = vpop.f32.mrb[7].mxu0  ;;  %v1074_v34 = vadd.f32 %v1073_v32, %v1072_v29  ;;  %v1075_v35 = vpop.f32.mrb[6].mxu1 }
 0x102   :  { %v581_v36 = vadd.f32 %v1016_v30, %v1509_v11  ;;  %v1019_v37 = vadd.f32 %v1018_v33, %v1017_v31  ;;  %v1076_v38 = vpop.f32.mrb[7].mxu1 }
 0x103   :  { %v1077_v39 = vadd.f32 %v1076_v38, %v1075_v35 }
 0x104   :  { %v584_v40 = vadd.f32 %v1019_v37, %v1509_v11  ;;  %v1519_v41 = vadd.f32 %v1074_v34, %v581_v36 }
 0x106   :  { %v1020_v42 = vpop.f32.mrb[8].mxu0  ;;  %v1521_v43 = vadd.f32 %v1077_v39, %v584_v40 }
 0x107   :  { %v1021_v44 = vpop.f32.mrb[9].mxu0  ;;  %v1078_v45 = vpop.f32.mrb[8].mxu1 }
 0x108   :  { %v1022_v46 = vadd.f32 %v1021_v44, %v1020_v42  ;;  %v1023_v47 = vpop.f32.mrb[10].mxu0  ;;  %v1079_v48 = vpop.f32.mrb[9].mxu1 }
 0x109   :  { %v1024_v49 = vpop.f32.mrb[11].mxu0  ;;  %v1080_v50 = vadd.f32 %v1079_v48, %v1078_v45  ;;  %v1081_v51 = vpop.f32.mrb[10].mxu1 }
 0x10a   :  { %v589_v52 = vadd.f32 %v1022_v46, %v1509_v11  ;;  %v1025_v53 = vadd.f32 %v1024_v49, %v1023_v47  ;;  %v1082_v54 = vpop.f32.mrb[11].mxu1 }
 0x10b   :  { %v1083_v55 = vadd.f32 %v1082_v54, %v1081_v51 }
 0x10c   :  { %v592_v56 = vadd.f32 %v1025_v53, %v1509_v11  ;;  %v1525_v57 = vadd.f32 %v1080_v50, %v589_v52 }
 0x10e   :  { %v1026_v58 = vpop.f32.mrb[12].mxu0  ;;  %v1527_v59 = vadd.f32 %v1083_v55, %v592_v56 }
 0x10f   :  { %v1027_v60 = vpop.f32.mrb[13].mxu0  ;;  %v1084_v61 = vpop.f32.mrb[12].mxu1 }
 0x110   :  { %v1028_v62 = vadd.f32 %v1027_v60, %v1026_v58  ;;  %v1029_v63 = vpop.f32.mrb[14].mxu0  ;;  %v1085_v0 = vpop.f32.mrb[13].mxu1 }
 0x111   :  { %v1030_v1 = vpop.f32.mrb[15].mxu0  ;;  %v1086_v2 = vadd.f32 %v1085_v0, %v1084_v61  ;;  %v1087_v3 = vpop.f32.mrb[14].mxu1 }
 0x112   :  { %v597_v4 = vadd.f32 %v1028_v62, %v1509_v11  ;;  %v1031_v5 = vadd.f32 %v1030_v1, %v1029_v63  ;;  %v1088_v6 = vpop.f32.mrb[15].mxu1 }
 0x113   :  { %v1089_v7 = vadd.f32 %v1088_v6, %v1087_v3 }
 0x114   :  { %v600_v8 = vadd.f32 %v1031_v5, %v1509_v11  ;;  %v1531_v9 = vadd.f32 %v1086_v2, %v597_v4 }
 0x116   :  { %v1032_v10 = vpop.f32.mrb[16].mxu0  ;;  %v1533_v12 = vadd.f32 %v1089_v7, %v600_v8 }
 0x117   :  { %v1033_v13 = vpop.f32.mrb[17].mxu0  ;;  %v1090_v14 = vpop.f32.mrb[16].mxu1 }
 0x118   :  { %v1034_v15 = vadd.f32 %v1033_v13, %v1032_v10  ;;  %v1035_v16 = vpop.f32.mrb[18].mxu0  ;;  %v1091_v17 = vpop.f32.mrb[17].mxu1 }
 0x119   :  { %v1036_v18 = vpop.f32.mrb[19].mxu0  ;;  %v1092_v19 = vadd.f32 %v1091_v17, %v1090_v14  ;;  %v1093_v20 = vpop.f32.mrb[18].mxu1 }
 0x11a   :  { %v605_v21 = vadd.f32 %v1034_v15, %v1509_v11  ;;  %v1037_v22 = vadd.f32 %v1036_v18, %v1035_v16  ;;  %v1094_v23 = vpop.f32.mrb[19].mxu1 }
 0x11b   :  { %v1095_v24 = vadd.f32 %v1094_v23, %v1093_v20 }
 0x11c   :  { %v608_v26 = vadd.f32 %v1037_v22, %v1509_v11  ;;  %v693_v28 = vadd.f32 %v1092_v19, %v605_v21 }
 0x11e   :  { %v1038_v29 = vpop.f32.mrb[20].mxu0  ;;  %v696_v30 = vadd.f32 %v1095_v24, %v608_v26 }
 0x11f   :  { %v1039_v31 = vpop.f32.mrb[21].mxu0  ;;  %v1096_v32 = vpop.f32.mrb[20].mxu1 }
 0x120   :  { %v1040_v33 = vadd.f32 %v1039_v31, %v1038_v29  ;;  %v1041_v34 = vpop.f32.mrb[22].mxu0  ;;  %v1097_v35 = vpop.f32.mrb[21].mxu1 }
 0x121   :  { %v1042_v36 = vpop.f32.mrb[23].mxu0  ;;  %v1098_v37 = vadd.f32 %v1097_v35, %v1096_v32  ;;  %v1099_v38 = vpop.f32.mrb[22].mxu1 }
 0x122   :  { %v613_v39 = vadd.f32 %v1040_v33, %v1509_v11  ;;  %v1043_v40 = vadd.f32 %v1042_v36, %v1041_v34  ;;  %v1100_v42 = vpop.f32.mrb[23].mxu1 }
 0x123   :  { %v1101_v44 = vadd.f32 %v1100_v42, %v1099_v38 }
 0x124   :  { %v616_v45 = vadd.f32 %v1043_v40, %v1509_v11  ;;  %v701_v46 = vadd.f32 %v1098_v37, %v613_v39 }
 0x126   :  { %v1044_v47 = vpop.f32.mrb[24].mxu0  ;;  %v704_v48 = vadd.f32 %v1101_v44, %v616_v45 }
 0x127   :  { %v1045_v49 = vpop.f32.mrb[25].mxu0  ;;  %v1102_v50 = vpop.f32.mrb[24].mxu1 }
 0x128   :  { %v1046_v51 = vadd.f32 %v1045_v49, %v1044_v47  ;;  %v1047_v52 = vpop.f32.mrb[26].mxu0  ;;  %v1103_v53 = vpop.f32.mrb[25].mxu1 }
 0x129   :  { %v1048_v54 = vpop.f32.mrb[27].mxu0  ;;  %v1104_v55 = vadd.f32 %v1103_v53, %v1102_v50  ;;  %v1105_v56 = vpop.f32.mrb[26].mxu1 }
 0x12a   :  { %v621_v58 = vadd.f32 %v1046_v51, %v1509_v11  ;;  %v1106_v60 = vpop.f32.mrb[27].mxu1 }
 0x12c   :  { %v709_v61 = vadd.f32 %v1104_v55, %v621_v58 }
 0x12e   :  { %v748_v62 = vpop.f32.mrb[28].mxu0 }
 0x12f   :  { %v749_v63 = vadd.f32 %v748_v62, %v1513_v25  ;;  %v780_v0 = vpop.f32.mrb[28].mxu1  ;;  %v1129_v1 = vpop.f32.mrb[29].mxu0 }
 0x130   :  { %v781_v2 = vadd.f32 %v780_v0, %v693_v28  ;;  %v1145_v3 = vpop.f32.mrb[29].mxu1  ;;  %v751_v4 = vpop.f32.mrb[30].mxu0 }
 0x131   :  { %v802_v5 = vmax.f32 %v749_v63, 0.0  ;;  %v752_v6 = vadd.f32 %v751_v4, %v1515_v27  ;;  %v783_v7 = vpop.f32.mrb[30].mxu1  ;;  %v1130_v8 = vpop.f32.mrb[31].mxu0 }
 0x132   :  { %v810_v10 = vmax.f32 %v781_v2, 0.0  ;;  %v784_v13 = vadd.f32 %v783_v7, %v696_v30  ;;  %v1146_v14 = vpop.f32.mrb[31].mxu1 }
 0x133   :  { %v979_v11 = vpack.c.bf16 %v802_v5, %v802_v5  ;;  %v803_v15 = vmax.f32 %v752_v6, 0.0 }
 0x134   :  { %v987_v16 = vpack.c.bf16 %v810_v10, %v810_v10  ;;  %v811_v17 = vmax.f32 %v784_v13, 0.0 }
 0x135   :  { %869 = vst.msk [vmem:[%s1602_s3] sm:$0xf] %vm868_vm2, %v979_v11  ;;  %v980_v25 = vpack.c.bf16 %v803_v15, %v803_v15 }
 0x136   :  { %877 = vst.msk [vmem:[%s1602_s3 + $0x20] sm:$0xf] %vm868_vm2, %v987_v16  ;;  %v988_v27 = vpack.c.bf16 %v811_v17, %v811_v17  ;;  %v756_v18 = vpop.f32.mrb[32].mxu0 }
 0x137   :  { %870 = vst.msk [vmem:[%s1602_s3 + $0x4] sm:$0xf] %vm868_vm2, %v980_v25  ;;  %v757_v19 = vadd.f32 %v756_v18, %v1519_v41  ;;  %v788_v20 = vpop.f32.mrb[32].mxu1  ;;  %v1133_v21 = vpop.f32.mrb[33].mxu0 }
 0x138   :  { %878 = vst.msk [vmem:[%s1602_s3 + $0x24] sm:$0xf] %vm868_vm2, %v988_v27  ;;  %v789_v22 = vadd.f32 %v788_v20, %v701_v46  ;;  %v1149_v23 = vpop.f32.mrb[33].mxu1  ;;  %v759_v24 = vpop.f32.mrb[34].mxu0 }
 0x139   :  { %v804_v26 = vmax.f32 %v757_v19, 0.0  ;;  %v760_v28 = vadd.f32 %v759_v24, %v1521_v43  ;;  %v791_v29 = vpop.f32.mrb[34].mxu1  ;;  %v1134_v30 = vpop.f32.mrb[35].mxu0 }
 0x13a   :  { %v812_v31 = vmax.f32 %v789_v22, 0.0  ;;  %v792_v32 = vadd.f32 %v791_v29, %v704_v48  ;;  %v1150_v33 = vpop.f32.mrb[35].mxu1 }
 0x13b   :  { %v981_v34 = vpack.c.bf16 %v804_v26, %v804_v26  ;;  %v805_v41 = vmax.f32 %v760_v28, 0.0 }
 0x13c   :  { %v989_v35 = vpack.c.bf16 %v812_v31, %v812_v31  ;;  %v813_v36 = vmax.f32 %v792_v32, 0.0 }
 0x13d   :  { %871 = vst.msk [vmem:[%s1602_s3 + $0x8] sm:$0xf] %vm868_vm2, %v981_v34  ;;  %v982_v37 = vpack.c.bf16 %v805_v41, %v805_v41 }
 0x13e   :  { %879 = vst.msk [vmem:[%s1602_s3 + $0x28] sm:$0xf] %vm868_vm2, %v989_v35  ;;  %v990_v43 = vpack.c.bf16 %v813_v36, %v813_v36  ;;  %v764_v38 = vpop.f32.mrb[36].mxu0 }
 0x13f   :  { %872 = vst.msk [vmem:[%s1602_s3 + $0xc] sm:$0xf] %vm868_vm2, %v982_v37  ;;  %v765_v39 = vadd.f32 %v764_v38, %v1525_v57  ;;  %v796_v40 = vpop.f32.mrb[36].mxu1  ;;  %v1137_v42 = vpop.f32.mrb[37].mxu0 }
 0x140   :  { %880 = vst.msk [vmem:[%s1602_s3 + $0x2c] sm:$0xf] %vm868_vm2, %v990_v43  ;;  %v797_v44 = vadd.f32 %v796_v40, %v709_v61  ;;  %v767_v45 = vpop.f32.mrb[38].mxu0  ;;  %v1153_v46 = vpop.f32.mrb[37].mxu1 }
 0x141   :  { %v806_v47 = vmax.f32 %v765_v39, 0.0  ;;  %v768_v48 = vadd.f32 %v767_v45, %v1527_v59  ;;  %v1138_v49 = vpop.f32.mrb[39].mxu0  ;;  %v799_v50 = vpop.f32.mrb[38].mxu1 }
 0x142   :  { %v814_v51 = vmax.f32 %v797_v44, 0.0  ;;  %v1154_v52 = vpop.f32.mrb[39].mxu1 }
 0x143   :  { %v983_v53 = vpack.c.bf16 %v806_v47, %v806_v47  ;;  %v807_v57 = vmax.f32 %v768_v48, 0.0 }
 0x144   :  { %v991_v54 = vpack.c.bf16 %v814_v51, %v814_v51 }
 0x145   :  { %873 = vst.msk [vmem:[%s1602_s3 + $0x10] sm:$0xf] %vm868_vm2, %v983_v53  ;;  %v984_v55 = vpack.c.bf16 %v807_v57, %v807_v57 }
 0x146   :  { %882 = vst.msk [vmem:[%s1602_s3 + $0x30] sm:$0x1] %vm881_vm3, %v991_v54  ;;  %v772_v56 = vpop.f32.mrb[40].mxu0 }
 0x147   :  { %874 = vst.msk [vmem:[%s1602_s3 + $0x14] sm:$0xf] %vm868_vm2, %v984_v55  ;;  %v773_v59 = vadd.f32 %v772_v56, %v1531_v9  ;;  %v1141_v58 = vpop.f32.mrb[41].mxu0 }
 0x148   :  { %v775_v60 = vpop.f32.mrb[42].mxu0 }
 0x149   :  { %v808_v61 = vmax.f32 %v773_v59, 0.0  ;;  %v776_v62 = vadd.f32 %v775_v60, %v1533_v12  ;;  %v1142_v63 = vpop.f32.mrb[43].mxu0 }
 0x14b   :  { %v985_v0 = vpack.c.bf16 %v808_v61, %v808_v61  ;;  %v809_v1 = vmax.f32 %v776_v62, 0.0 }
 0x14d   :  { %875 = vst.msk [vmem:[%s1602_s3 + $0x18] sm:$0xf] %vm868_vm2, %v985_v0  ;;  %v986_v2 = vpack.c.bf16 %v809_v1, %v809_v1 }
 0x14f   :  { %876 = vst.msk [vmem:[%s1602_s3 + $0x1c] sm:$0xf] %vm868_vm2, %v986_v2 }

// kernel: rainbow_forward_pallas.7
= control target key start
LH: loop header
LB: loop body
LE: loop exit
PB: predicated region body
PF: predicated region fallthrough
CT: control target
= control target key end

     0   :  { %v1601_v32 = vlaneseq  ;;  %v17382_v33 = vmov 1966171168   ;;  %vm9670_vm0 = vcmask 523264   ;;  %vm14241_vm1 = vcmask 410624   ;;  %s23258_s1 = inlined_call_operand.vmem [shape: bf16[3136,1024], index: 1, kind: input, shape index: {}]   ;;  %s23259_s0 = inlined_call_operand.vmem [shape: bf16[2,3136], index: 0, kind: input, shape index: {}]   ;;  %s23260_s3 = inlined_call_operand.vmem [shape: bf16[512,51], index: 3, kind: input, shape index: {}]   ;;  %s23261_s5 = inlined_call_operand.vmem [shape: bf16[6,512,51], index: 5, kind: input, shape index: {}]   ;;  %s23262_s2 = inlined_call_operand.vmem [shape: f32[1,1024], index: 2, kind: input, shape index: {}]   ;;  %s23263_s4 = inlined_call_operand.vmem [shape: f32[1,51], index: 4, kind: input, shape index: {}]   ;;  %s23264_s6 = inlined_call_operand.vmem [shape: f32[6,1,51], index: 6, kind: input, shape index: {}]   ;;  %s23265_s7 = inlined_call_operand.vmem [shape: f32[2,6,51], index: 7, kind: output, shape index: {}]  }
   0x1   :  { %v31_v0 = vld [vmem:[%s23258_s1] sm:$0xff]  ;;  %v32_v2 = vld [vmem:[%s23258_s1 + $0x8] sm:$0xff]  ;;  %v1647_v34 = vunpack.c.l.s4 %v17382_v33  ;;  %vm14279_vm2 = vcmask 409600  }
   0x2   :  { %v35_v1 = vld [vmem:[%s23258_s1 + $0x20] sm:$0xff]  ;;  %v36_v4 = vld [vmem:[%s23258_s1 + $0x28] sm:$0xff]  ;;  %v17490_v43 = vshrl.u32 %v1601_v32, 7 }
   0x3   :  { %v14493_v3 = vcombine.high %v31_v0, %v35_v1  ;;  %v14492_v5 = vcombine.low %v31_v0, %v35_v1  ;;  %v39_v6 = vld [vmem:[%s23258_s1 + $0x40] sm:$0xff]  ;;  %v14495_v8 = vcombine.high %v32_v2, %v36_v4  ;;  %v14494_v9 = vcombine.low %v32_v2, %v36_v4  ;;  %v40_v11 = vld [vmem:[%s23258_s1 + $0x48] sm:$0xff] }
   0x4   :  { %v43_v7 = vld [vmem:[%s23258_s1 + $0x60] sm:$0xff]  ;;  %v44_v12 = vld [vmem:[%s23258_s1 + $0x68] sm:$0xff]  ;;  %v1648_v44 = vunpack.c.0.s8 %v1647_v34 }
   0x5   :  { %v14501_v10 = vcombine.high %v39_v6, %v43_v7  ;;  %v47_v13 = vld [vmem:[%s23258_s1 + $0x80] sm:$0xff]  ;;  %9674 = vmatprep.subr.bf16.mxu0 %v14493_v3  ;;  %v14503_v14 = vcombine.high %v40_v11, %v44_v12  ;;  %v48_v16 = vld [vmem:[%s23258_s1 + $0x88] sm:$0xff]  ;;  %10207 = vmatprep.subr.bf16.mxu1 %v14495_v8  ;;  %v14500_v18 = vcombine.low %v39_v6, %v43_v7 }
   0x6   :  { %v51_v15 = vld [vmem:[%s23258_s1 + $0xa0] sm:$0xff]  ;;  %v52_v17 = vld [vmem:[%s23258_s1 + $0xa8] sm:$0xff]  ;;  %9675 = vmatpush1.bf16.msra.mxu0 %v14492_v5  ;;  %10208 = vmatpush1.bf16.msra.mxu1 %v14494_v9  ;;  %v14502_v19 = vcombine.low %v40_v11, %v44_v12  ;;  %v17505_v53 = vsub.s32 %v1648_v44, %v17490_v43 }
   0x7   :  { %9676 = vmatprep.subr.bf16.mxu0 %v14501_v10  ;;  %v14509_v20 = vcombine.high %v47_v13, %v51_v15  ;;  %10209 = vmatprep.subr.bf16.mxu1 %v14503_v14  ;;  %v14511_v21 = vcombine.high %v48_v16, %v52_v17  ;;  %v55_v22 = vld [vmem:[%s23258_s1 + $0xc0] sm:$0xff]  ;;  %v56_v24 = vld [vmem:[%s23258_s1 + $0xc8] sm:$0xff]  ;;  %v14508_v26 = vcombine.low %v47_v13, %v51_v15 }
   0x8   :  { %v59_v23 = vld [vmem:[%s23258_s1 + $0xe0] sm:$0xff]  ;;  %v60_v25 = vld [vmem:[%s23258_s1 + $0xe8] sm:$0xff]  ;;  %v14510_v27 = vcombine.low %v48_v16, %v52_v17 }
   0x9   :  { %v14517_v28 = vcombine.high %v55_v22, %v59_v23  ;;  %v14519_v29 = vcombine.high %v56_v24, %v60_v25  ;;  %v63_v30 = vld [vmem:[%s23258_s1 + $0x100] sm:$0xff]  ;;  %v64_v35 = vld [vmem:[%s23258_s1 + $0x108] sm:$0xff]  ;;  %v14516_v37 = vcombine.low %v55_v22, %v59_v23  ;;  %v14518_v38 = vcombine.low %v56_v24, %v60_v25 }
   0xa   :  { %9677 = vmatpush1.bf16.msra.mxu0 %v14500_v18  ;;  %10210 = vmatpush1.bf16.msra.mxu1 %v14502_v19  ;;  %v67_v31 = vld [vmem:[%s23258_s1 + $0x120] sm:$0xff]  ;;  %v68_v36 = vld [vmem:[%s23258_s1 + $0x128] sm:$0xff] }
   0xb   :  { %9678 = vmatprep.subr.bf16.mxu0 %v14509_v20  ;;  %10211 = vmatprep.subr.bf16.mxu1 %v14511_v21  ;;  %v14525_v39 = vcombine.high %v63_v30, %v67_v31  ;;  %v14527_v40 = vcombine.high %v64_v35, %v68_v36  ;;  %v71_v41 = vld [vmem:[%s23258_s1 + $0x140] sm:$0xff]  ;;  %v72_v45 = vld [vmem:[%s23258_s1 + $0x148] sm:$0xff]  ;;  %v14524_v47 = vcombine.low %v63_v30, %v67_v31 }
   0xc   :  { %v75_v42 = vld [vmem:[%s23258_s1 + $0x160] sm:$0xff]  ;;  %v76_v46 = vld [vmem:[%s23258_s1 + $0x168] sm:$0xff]  ;;  %v14526_v48 = vcombine.low %v64_v35, %v68_v36 }
   0xd   :  { %v14533_v49 = vcombine.high %v71_v41, %v75_v42  ;;  %v14535_v50 = vcombine.high %v72_v45, %v76_v46  ;;  %v79_v51 = vld [vmem:[%s23258_s1 + $0x180] sm:$0xff]  ;;  %v80_v54 = vld [vmem:[%s23258_s1 + $0x188] sm:$0xff]  ;;  %v14532_v56 = vcombine.low %v71_v41, %v75_v42  ;;  %v14534_v57 = vcombine.low %v72_v45, %v76_v46 }
   0xe   :  { %9679 = vmatpush1.bf16.msra.mxu0 %v14508_v26  ;;  %10212 = vmatpush1.bf16.msra.mxu1 %v14510_v27  ;;  %v83_v52 = vld [vmem:[%s23258_s1 + $0x1a0] sm:$0xff]  ;;  %v84_v55 = vld [vmem:[%s23258_s1 + $0x1a8] sm:$0xff] }
   0xf   :  { %9680 = vmatprep.subr.bf16.mxu0 %v14517_v28  ;;  %10213 = vmatprep.subr.bf16.mxu1 %v14519_v29  ;;  %v14541_v58 = vcombine.high %v79_v51, %v83_v52  ;;  %v17516_v59 = vld [vmem:[%s23259_s0] sm:$0xff]  ;;  %v14543_v60 = vcombine.high %v80_v54, %v84_v55  ;;  %v88_v0 = vld [vmem:[%s23258_s1 + $0x1c8] sm:$0xff]  ;;  %v14540_v2 = vcombine.low %v79_v51, %v83_v52 }
  0x10   :  { %v87_v61 = vld [vmem:[%s23258_s1 + $0x1c0] sm:$0xff]  ;;  %v17526_v63 = vrot.slane %v17516_v59, %v17505_v53  ;;  %v92_v1 = vld [vmem:[%s23258_s1 + $0x1e8] sm:$0xff]  ;;  %v14542_v4 = vcombine.low %v80_v54, %v84_v55 }
  0x11   :  { %v91_v62 = vld [vmem:[%s23258_s1 + $0x1e0] sm:$0xff]  ;;  %v14551_v6 = vcombine.high %v88_v0, %v92_v1  ;;  %v96_v10 = vld [vmem:[%s23258_s1 + $0x208] sm:$0xff]  ;;  %v14550_v13 = vcombine.low %v88_v0, %v92_v1 }
  0x12   :  { %9681 = vmatpush1.bf16.msra.mxu0 %v14516_v37  ;;  %10214 = vmatpush1.bf16.msra.mxu1 %v14518_v38  ;;  %v1660_v3 = vcombine.high %v17526_v63, %v17526_v63  ;;  %v14549_v5 = vcombine.high %v87_v61, %v91_v62  ;;  %v95_v7 = vld [vmem:[%s23258_s1 + $0x200] sm:$0xff]  ;;  %v100_v11 = vld [vmem:[%s23258_s1 + $0x228] sm:$0xff]  ;;  %v14548_v12 = vcombine.low %v87_v61, %v91_v62 }
  0x13   :  { %9682 = vmatprep.subr.bf16.mxu0 %v14525_v39  ;;  %10215 = vmatprep.subr.bf16.mxu1 %v14527_v40  ;;  %v99_v8 = vld [vmem:[%s23258_s1 + $0x220] sm:$0xff]  ;;  %v14559_v15 = vcombine.high %v96_v10, %v100_v11  ;;  %v104_v18 = vld [vmem:[%s23258_s1 + $0x248] sm:$0xff]  ;;  %v14558_v21 = vcombine.low %v96_v10, %v100_v11 }
  0x14   :  { %v17543_v9 = vrot.slane %v1660_v3, %v17505_v53  ;;  %v14557_v14 = vcombine.high %v95_v7, %v99_v8  ;;  %v103_v16 = vld [vmem:[%s23258_s1 + $0x240] sm:$0xff]  ;;  %v108_v19 = vld [vmem:[%s23258_s1 + $0x268] sm:$0xff]  ;;  %v14556_v20 = vcombine.low %v95_v7, %v99_v8 }
  0x15   :  { %v107_v17 = vld [vmem:[%s23258_s1 + $0x260] sm:$0xff]  ;;  %v14567_v23 = vcombine.high %v104_v18, %v108_v19  ;;  %v112_v26 = vld [vmem:[%s23258_s1 + $0x288] sm:$0xff]  ;;  %v14566_v29 = vcombine.low %v104_v18, %v108_v19 }
  0x16   :  { %9683 = vmatpush1.bf16.msra.mxu0 %v14524_v47  ;;  %10216 = vmatpush1.bf16.msra.mxu1 %v14526_v48  ;;  %v14565_v22 = vcombine.high %v103_v16, %v107_v17  ;;  %v111_v24 = vld [vmem:[%s23258_s1 + $0x280] sm:$0xff]  ;;  %v116_v27 = vld [vmem:[%s23258_s1 + $0x2a8] sm:$0xff]  ;;  %v14564_v28 = vcombine.low %v103_v16, %v107_v17 }
  0x17   :  { %9684 = vmatprep.subr.bf16.mxu0 %v14533_v49  ;;  %10217 = vmatprep.subr.bf16.mxu1 %v14535_v50  ;;  %v115_v25 = vld [vmem:[%s23258_s1 + $0x2a0] sm:$0xff]  ;;  %v14575_v31 = vcombine.high %v112_v26, %v116_v27  ;;  %v120_v34 = vld [vmem:[%s23258_s1 + $0x2c8] sm:$0xff]  ;;  %v14574_v37 = vcombine.low %v112_v26, %v116_v27 }
  0x18   :  { %9706 = vmatprep.mubr.bf16.mxu0 %v17543_v9  ;;  %10239 = vmatprep.mubr.bf16.mxu1 %v17543_v9  ;;  %v14573_v30 = vcombine.high %v111_v24, %v115_v25  ;;  %v119_v32 = vld [vmem:[%s23258_s1 + $0x2c0] sm:$0xff]  ;;  %v124_v35 = vld [vmem:[%s23258_s1 + $0x2e8] sm:$0xff]  ;;  %v14572_v36 = vcombine.low %v111_v24, %v115_v25 }
  0x19   :  { %v123_v33 = vld [vmem:[%s23258_s1 + $0x2e0] sm:$0xff]  ;;  %v14583_v39 = vcombine.high %v120_v34, %v124_v35  ;;  %v128_v42 = vld [vmem:[%s23258_s1 + $0x308] sm:$0xff]  ;;  %v14582_v46 = vcombine.low %v120_v34, %v124_v35 }
  0x1a   :  { %9685 = vmatpush1.bf16.msra.mxu0 %v14532_v56  ;;  %10218 = vmatpush1.bf16.msra.mxu1 %v14534_v57  ;;  %v14581_v38 = vcombine.high %v119_v32, %v123_v33  ;;  %v127_v40 = vld [vmem:[%s23258_s1 + $0x300] sm:$0xff]  ;;  %v132_v44 = vld [vmem:[%s23258_s1 + $0x328] sm:$0xff]  ;;  %v14580_v45 = vcombine.low %v119_v32, %v123_v33 }
  0x1b   :  { %9686 = vmatprep.subr.bf16.mxu0 %v14541_v58  ;;  %10219 = vmatprep.subr.bf16.mxu1 %v14543_v60  ;;  %v131_v41 = vld [vmem:[%s23258_s1 + $0x320] sm:$0xff]  ;;  %v14591_v48 = vcombine.high %v128_v42, %v132_v44  ;;  %v136_v51 = vld [vmem:[%s23258_s1 + $0x348] sm:$0xff]  ;;  %v14590_v55 = vcombine.low %v128_v42, %v132_v44 }
  0x1c   :  { %v14589_v47 = vcombine.high %v127_v40, %v131_v41  ;;  %v135_v49 = vld [vmem:[%s23258_s1 + $0x340] sm:$0xff]  ;;  %v140_v52 = vld [vmem:[%s23258_s1 + $0x368] sm:$0xff]  ;;  %v14588_v54 = vcombine.low %v127_v40, %v131_v41 }
  0x1d   :  { %v139_v50 = vld [vmem:[%s23258_s1 + $0x360] sm:$0xff]  ;;  %v14599_v57 = vcombine.high %v136_v51, %v140_v52  ;;  %v144_v61 = vld [vmem:[%s23258_s1 + $0x388] sm:$0xff]  ;;  %v14598_v1 = vcombine.low %v136_v51, %v140_v52 }
  0x1e   :  { %9687 = vmatpush1.bf16.msra.mxu0 %v14540_v2  ;;  %10220 = vmatpush1.bf16.msra.mxu1 %v14542_v4  ;;  %v14597_v56 = vcombine.high %v135_v49, %v139_v50  ;;  %v143_v58 = vld [vmem:[%s23258_s1 + $0x380] sm:$0xff]  ;;  %v148_v62 = vld [vmem:[%s23258_s1 + $0x3a8] sm:$0xff]  ;;  %v14596_v0 = vcombine.low %v135_v49, %v139_v50 }
  0x1f   :  { %9688 = vmatprep.subr.bf16.mxu0 %v14549_v5  ;;  %10221 = vmatprep.subr.bf16.mxu1 %v14551_v6  ;;  %v147_v60 = vld [vmem:[%s23258_s1 + $0x3a0] sm:$0xff]  ;;  %v14607_v3 = vcombine.high %v144_v61, %v148_v62  ;;  %v152_v6 = vld [vmem:[%s23258_s1 + $0x3c8] sm:$0xff]  ;;  %v14606_v10 = vcombine.low %v144_v61, %v148_v62 }
  0x20   :  { %v14605_v2 = vcombine.high %v143_v58, %v147_v60  ;;  %v151_v4 = vld [vmem:[%s23258_s1 + $0x3c0] sm:$0xff]  ;;  %v156_v7 = vld [vmem:[%s23258_s1 + $0x3e8] sm:$0xff]  ;;  %v14604_v8 = vcombine.low %v143_v58, %v147_v60 }
  0x21   :  { %v155_v5 = vld [vmem:[%s23258_s1 + $0x3e0] sm:$0xff]  ;;  %v164_v16 = vld [vmem:[%s23258_s1 + $0x428] sm:$0xff]  ;;  %v14614_v18 = vcombine.low %v152_v6, %v156_v7 }
  0x22   :  { %9689 = vmatpush1.bf16.msra.mxu0 %v14548_v12  ;;  %10222 = vmatpush1.bf16.msra.mxu1 %v14550_v13  ;;  %v14613_v11 = vcombine.high %v151_v4, %v155_v5  ;;  %v14615_v12 = vcombine.high %v152_v6, %v156_v7  ;;  %v159_v13 = vld [vmem:[%s23258_s1 + $0x400] sm:$0xff]  ;;  %v14612_v17 = vcombine.low %v151_v4, %v155_v5  ;;  %v168_v24 = vld [vmem:[%s23258_s1 + $0x448] sm:$0xff] }
  0x23   :  { %9690 = vmatprep.subr.bf16.mxu0 %v14557_v14  ;;  %10223 = vmatprep.subr.bf16.mxu1 %v14559_v15  ;;  %v163_v14 = vld [vmem:[%s23258_s1 + $0x420] sm:$0xff]  ;;  %v160_v15 = vld [vmem:[%s23258_s1 + $0x408] sm:$0xff] }
  0x24   :  { %v14621_v19 = vcombine.high %v159_v13, %v163_v14  ;;  %v172_v25 = vld [vmem:[%s23258_s1 + $0x468] sm:$0xff]  ;;  %v14620_v26 = vcombine.low %v159_v13, %v163_v14  ;;  %v14622_v27 = vcombine.low %v160_v15, %v164_v16 }
  0x25   :  { %v176_v32 = vld [vmem:[%s23258_s1 + $0x488] sm:$0xff]  ;;  %v14630_v35 = vcombine.low %v168_v24, %v172_v25 }
  0x26   :  { %9691 = vmatpush1.bf16.msra.mxu0 %v14556_v20  ;;  %10224 = vmatpush1.bf16.msra.mxu1 %v14558_v21  ;;  %v14623_v20 = vcombine.high %v160_v15, %v164_v16  ;;  %v167_v21 = vld [vmem:[%s23258_s1 + $0x440] sm:$0xff]  ;;  %v180_v33 = vld [vmem:[%s23258_s1 + $0x4a8] sm:$0xff] }
  0x27   :  { %9692 = vmatprep.subr.bf16.mxu0 %v14565_v22  ;;  %10225 = vmatprep.subr.bf16.mxu1 %v14567_v23  ;;  %v171_v22 = vld [vmem:[%s23258_s1 + $0x460] sm:$0xff]  ;;  %v17657_v23 = vrot.slane %v17526_v63, %v17505_v53  ;;  %v184_v40 = vld [vmem:[%s23258_s1 + $0x4c8] sm:$0xff]  ;;  %v14638_v44 = vcombine.low %v176_v32, %v180_v33 }
  0x28   :  { %v175_v63 = vld [vmem:[%s23258_s1 + $0x480] sm:$0xff]  ;;  %v14628_v34 = vcombine.low %v167_v21, %v171_v22  ;;  %v188_v41 = vld [vmem:[%s23258_s1 + $0x4e8] sm:$0xff] }
  0x29   :  { %v192_v49 = vld [vmem:[%s23258_s1 + $0x508] sm:$0xff]  ;;  %v14646_v52 = vcombine.low %v184_v40, %v188_v41 }
  0x2a   :  { %9693 = vmatpush1.bf16.msra.mxu0 %v14564_v28  ;;  %10226 = vmatpush1.bf16.msra.mxu1 %v14566_v29  ;;  %v14629_v28 = vcombine.high %v167_v21, %v171_v22  ;;  %v14631_v29 = vcombine.high %v168_v24, %v172_v25  ;;  %v196_v50 = vld [vmem:[%s23258_s1 + $0x528] sm:$0xff] }
  0x2b   :  { %9694 = vmatprep.subr.bf16.mxu0 %v14573_v30  ;;  %10227 = vmatprep.subr.bf16.mxu1 %v14575_v31  ;;  %v179_v30 = vld [vmem:[%s23258_s1 + $0x4a0] sm:$0xff]  ;;  %v17673_v31 = vcombine.high %v17543_v9, %v17543_v9  ;;  %v200_v58 = vld [vmem:[%s23258_s1 + $0x548] sm:$0xff]  ;;  %v14654_v62 = vcombine.low %v192_v49, %v196_v50 }
  0x2c   :  { %v14636_v42 = vcombine.low %v175_v63, %v179_v30  ;;  %v204_v60 = vld [vmem:[%s23258_s1 + $0x568] sm:$0xff] }
  0x2d   :  { %v208_v4 = vld [vmem:[%s23258_s1 + $0x588] sm:$0xff]  ;;  %v14662_v7 = vcombine.low %v200_v58, %v204_v60 }
  0x2e   :  { %9695 = vmatpush1.bf16.msra.mxu0 %v14572_v36  ;;  %10228 = vmatpush1.bf16.msra.mxu1 %v14574_v37  ;;  %v14637_v36 = vcombine.high %v175_v63, %v179_v30  ;;  %v14639_v37 = vcombine.high %v176_v32, %v180_v33  ;;  %v212_v5 = vld [vmem:[%s23258_s1 + $0x5a8] sm:$0xff] }
  0x2f   :  { %9696 = vmatprep.subr.bf16.mxu0 %v14581_v38  ;;  %10229 = vmatprep.subr.bf16.mxu1 %v14583_v39  ;;  %v183_v38 = vld [vmem:[%s23258_s1 + $0x4c0] sm:$0xff]  ;;  %v216_v13 = vld [vmem:[%s23258_s1 + $0x5c8] sm:$0xff]  ;;  %v14670_v16 = vcombine.low %v208_v4, %v212_v5 }
  0x30   :  { %v187_v39 = vld [vmem:[%s23258_s1 + $0x4e0] sm:$0xff]  ;;  %v220_v14 = vld [vmem:[%s23258_s1 + $0x5e8] sm:$0xff] }
  0x31   :  { %v14644_v51 = vcombine.low %v183_v38, %v187_v39  ;;  %v224_v21 = vld [vmem:[%s23258_s1 + $0x608] sm:$0xff]  ;;  %v14678_v25 = vcombine.low %v216_v13, %v220_v14 }
  0x32   :  { %9697 = vmatpush1.bf16.msra.mxu0 %v14580_v45  ;;  %10230 = vmatpush1.bf16.msra.mxu1 %v14582_v46  ;;  %v14645_v45 = vcombine.high %v183_v38, %v187_v39  ;;  %v14647_v46 = vcombine.high %v184_v40, %v188_v41  ;;  %v228_v22 = vld [vmem:[%s23258_s1 + $0x628] sm:$0xff] }
  0x33   :  { %9698 = vmatprep.subr.bf16.mxu0 %v14589_v47  ;;  %10231 = vmatprep.subr.bf16.mxu1 %v14591_v48  ;;  %v191_v47 = vld [vmem:[%s23258_s1 + $0x500] sm:$0xff]  ;;  %v232_v63 = vld [vmem:[%s23258_s1 + $0x648] sm:$0xff]  ;;  %v14686_v33 = vcombine.low %v224_v21, %v228_v22 }
  0x34   :  { %v195_v48 = vld [vmem:[%s23258_s1 + $0x520] sm:$0xff]  ;;  %v236_v30 = vld [vmem:[%s23258_s1 + $0x668] sm:$0xff] }
  0x35   :  { %v14652_v61 = vcombine.low %v191_v47, %v195_v48  ;;  %v240_v38 = vld [vmem:[%s23258_s1 + $0x688] sm:$0xff]  ;;  %v14694_v41 = vcombine.low %v232_v63, %v236_v30 }
  0x36   :  { %9699 = vmatpush1.bf16.msra.mxu0 %v14588_v54  ;;  %10232 = vmatpush1.bf16.msra.mxu1 %v14590_v55  ;;  %v14653_v54 = vcombine.high %v191_v47, %v195_v48  ;;  %v14655_v55 = vcombine.high %v192_v49, %v196_v50  ;;  %v244_v39 = vld [vmem:[%s23258_s1 + $0x6a8] sm:$0xff] }
  0x37   :  { %9700 = vmatprep.subr.bf16.mxu0 %v14597_v56  ;;  %10233 = vmatprep.subr.bf16.mxu1 %v14599_v57  ;;  %v199_v56 = vld [vmem:[%s23258_s1 + $0x540] sm:$0xff]  ;;  %v248_v47 = vld [vmem:[%s23258_s1 + $0x6c8] sm:$0xff]  ;;  %v14702_v50 = vcombine.low %v240_v38, %v244_v39 }
  0x38   :  { %v203_v57 = vld [vmem:[%s23258_s1 + $0x560] sm:$0xff]  ;;  %v252_v48 = vld [vmem:[%s23258_s1 + $0x6e8] sm:$0xff] }
  0x39   :  { %v14660_v6 = vcombine.low %v199_v56, %v203_v57 }
  0x3a   :  { %9701 = vmatpush1.bf16.msra.mxu0 %v14596_v0  ;;  %10234 = vmatpush1.bf16.msra.mxu1 %v14598_v1  ;;  %v14661_v0 = vcombine.high %v199_v56, %v203_v57  ;;  %v14663_v1 = vcombine.high %v200_v58, %v204_v60  ;;  %v256_v56 = vld [vmem:[%s23258_s1 + $0x708] sm:$0xff]  ;;  %v14710_v60 = vcombine.low %v248_v47, %v252_v48 }
  0x3b   :  { %9702 = vmatprep.subr.bf16.mxu0 %v14605_v2  ;;  %10235 = vmatprep.subr.bf16.mxu1 %v14607_v3  ;;  %v207_v2 = vld [vmem:[%s23258_s1 + $0x580] sm:$0xff]  ;;  %v260_v57 = vld [vmem:[%s23258_s1 + $0x728] sm:$0xff] }
  0x3c   :  { %v211_v3 = vld [vmem:[%s23258_s1 + $0x5a0] sm:$0xff] }
  0x3d   :  { %v14668_v15 = vcombine.low %v207_v2, %v211_v3 }
  0x3e   :  { %9703 = vmatpush1.bf16.msra.mxu0 %v14604_v8  ;;  %10236 = vmatpush1.bf16.msra.mxu1 %v14606_v10  ;;  %v14669_v8 = vcombine.high %v207_v2, %v211_v3  ;;  %v14671_v10 = vcombine.high %v208_v4, %v212_v5  ;;  %v264_v2 = vld [vmem:[%s23258_s1 + $0x748] sm:$0xff]  ;;  %v14718_v5 = vcombine.low %v256_v56, %v260_v57 }
  0x3f   :  { %9704 = vmatprep.subr.bf16.mxu0 %v14613_v11  ;;  %10237 = vmatprep.subr.bf16.mxu1 %v14615_v12  ;;  %v215_v11 = vld [vmem:[%s23258_s1 + $0x5c0] sm:$0xff]  ;;  %v268_v3 = vld [vmem:[%s23258_s1 + $0x768] sm:$0xff] }
  0x40   :  { %v219_v12 = vld [vmem:[%s23258_s1 + $0x5e0] sm:$0xff] }
  0x41   :  { %v14676_v24 = vcombine.low %v215_v11, %v219_v12 }
  0x42   :  { %9705 = vmatpush1.bf16.msra.mxu0 %v14612_v17  ;;  %10238 = vmatpush1.bf16.msra.mxu1 %v14614_v18  ;;  %v14677_v17 = vcombine.high %v215_v11, %v219_v12  ;;  %v14679_v18 = vcombine.high %v216_v13, %v220_v14  ;;  %v272_v11 = vld [vmem:[%s23258_s1 + $0x788] sm:$0xff]  ;;  %v14726_v14 = vcombine.low %v264_v2, %v268_v3 }
  0x43   :  { %9715 = vmatprep.subr.bf16.mxu0 %v14621_v19  ;;  %10248 = vmatprep.subr.bf16.mxu1 %v14623_v20  ;;  %v223_v19 = vld [vmem:[%s23258_s1 + $0x600] sm:$0xff]  ;;  %v276_v12 = vld [vmem:[%s23258_s1 + $0x7a8] sm:$0xff] }
  0x44   :  { %v227_v20 = vld [vmem:[%s23258_s1 + $0x620] sm:$0xff] }
  0x45   :  { %9707 = vmatmul.mubr.bf16.vlgmr.msra.gmra.mrb[0].mxu0 %v17657_v23  ;;  %10240 = vmatmul.mubr.bf16.vlgmr.msra.gmra.mrb[0].mxu1 %v17657_v23  ;;  %v14684_v32 = vcombine.low %v223_v19, %v227_v20 }
  0x46   :  { %9716 = vmatpush1.bf16.msra.mxu0 %v14620_v26  ;;  %10249 = vmatpush1.bf16.msra.mxu1 %v14622_v27  ;;  %v14685_v26 = vcombine.high %v223_v19, %v227_v20  ;;  %v14687_v27 = vcombine.high %v224_v21, %v228_v22  ;;  %v1645_v19 = vcombine.high %v17516_v59, %v17516_v59  ;;  %v280_v20 = vld [vmem:[%s23258_s1 + $0x7c8] sm:$0xff]  ;;  %v287_v59 = vld [vmem:[%s23258_s1 + $0x800] sm:$0xff] }
  0x47   :  { %9717 = vmatprep.subr.bf16.mxu0 %v14629_v28  ;;  %10250 = vmatprep.subr.bf16.mxu1 %v14631_v29  ;;  %v231_v28 = vld [vmem:[%s23258_s1 + $0x640] sm:$0xff]  ;;  %v284_v21 = vld [vmem:[%s23258_s1 + $0x7e8] sm:$0xff] }
  0x48   :  { %9747 = vmatprep.mubr.bf16.mxu0 %v17673_v31  ;;  %10280 = vmatprep.mubr.bf16.mxu1 %v17673_v31  ;;  %v235_v29 = vld [vmem:[%s23258_s1 + $0x660] sm:$0xff] }
  0x49   :  { %v14692_v40 = vcombine.low %v231_v28, %v235_v29 }
  0x4a   :  { %9718 = vmatpush1.bf16.msra.mxu0 %v14628_v34  ;;  %10251 = vmatpush1.bf16.msra.mxu1 %v14630_v35  ;;  %v14693_v34 = vcombine.high %v231_v28, %v235_v29  ;;  %v14695_v35 = vcombine.high %v232_v63, %v236_v30  ;;  %v17850_v28 = vrot.slane %v1645_v19, %v17505_v53  ;;  %v288_v29 = vld [vmem:[%s23258_s1 + $0x808] sm:$0xff]  ;;  %v335_v19 = vld [vmem:[%s23258_s1 + $0x980] sm:$0xff] }
  0x4b   :  { %9719 = vmatprep.subr.bf16.mxu0 %v14637_v36  ;;  %10252 = vmatprep.subr.bf16.mxu1 %v14639_v37  ;;  %v239_v36 = vld [vmem:[%s23258_s1 + $0x680] sm:$0xff]  ;;  %v292_v63 = vld [vmem:[%s23258_s1 + $0x828] sm:$0xff] }
  0x4c   :  { %v243_v37 = vld [vmem:[%s23258_s1 + $0x6a0] sm:$0xff] }
  0x4d   :  { %v14700_v49 = vcombine.low %v239_v36, %v243_v37 }
  0x4e   :  { %9720 = vmatpush1.bf16.msra.mxu0 %v14636_v42  ;;  %10253 = vmatpush1.bf16.msra.mxu1 %v14638_v44  ;;  %v14701_v42 = vcombine.high %v239_v36, %v243_v37  ;;  %v14703_v44 = vcombine.high %v240_v38, %v244_v39  ;;  %v299_v36 = vld [vmem:[%s23258_s1 + $0x860] sm:$0xff]  ;;  %v1661_v37 = vcombine.high %v17850_v28, %v17850_v28  ;;  %v296_v39 = vld [vmem:[%s23258_s1 + $0x848] sm:$0xff] }
  0x4f   :  { %9721 = vmatprep.subr.bf16.mxu0 %v14645_v45  ;;  %10254 = vmatprep.subr.bf16.mxu1 %v14647_v46  ;;  %v247_v45 = vld [vmem:[%s23258_s1 + $0x6c0] sm:$0xff]  ;;  %v17868_v38 = vcombine.high %v17657_v23, %v17657_v23 }
  0x50   :  { %v251_v46 = vld [vmem:[%s23258_s1 + $0x6e0] sm:$0xff] }
  0x51   :  { %v14708_v58 = vcombine.low %v247_v45, %v251_v46 }
  0x52   :  { %9722 = vmatpush1.bf16.msra.mxu0 %v14644_v51  ;;  %10255 = vmatpush1.bf16.msra.mxu1 %v14646_v52  ;;  %v14709_v51 = vcombine.high %v247_v45, %v251_v46  ;;  %v14711_v52 = vcombine.high %v248_v47, %v252_v48  ;;  %v303_v46 = vld [vmem:[%s23258_s1 + $0x880] sm:$0xff]  ;;  %v17883_v48 = vrot.slane %v1661_v37, %v17505_v53 }
  0x53   :  { %9723 = vmatprep.subr.bf16.mxu0 %v14653_v54  ;;  %10256 = vmatprep.subr.bf16.mxu1 %v14655_v55  ;;  %v255_v54 = vld [vmem:[%s23258_s1 + $0x700] sm:$0xff] }
  0x54   :  { %v259_v55 = vld [vmem:[%s23258_s1 + $0x720] sm:$0xff] }
  0x55   :  { %v14716_v4 = vcombine.low %v255_v54, %v259_v55  ;;  %v307_v47 = vld [vmem:[%s23258_s1 + $0x8a0] sm:$0xff] }
  0x56   :  { %9724 = vmatpush1.bf16.msra.mxu0 %v14652_v61  ;;  %10257 = vmatpush1.bf16.msra.mxu1 %v14654_v62  ;;  %v14717_v61 = vcombine.high %v255_v54, %v259_v55  ;;  %v14719_v62 = vcombine.high %v256_v56, %v260_v57  ;;  %v14765_v54 = vcombine.high %v303_v46, %v307_v47  ;;  %v311_v56 = vld [vmem:[%s23258_s1 + $0x8c0] sm:$0xff] }
  0x57   :  { %9725 = vmatprep.subr.bf16.mxu0 %v14661_v0  ;;  %10258 = vmatprep.subr.bf16.mxu1 %v14663_v1  ;;  %v263_v0 = vld [vmem:[%s23258_s1 + $0x740] sm:$0xff] }
  0x58   :  { %v267_v1 = vld [vmem:[%s23258_s1 + $0x760] sm:$0xff] }
  0x59   :  { %v14724_v13 = vcombine.low %v263_v0, %v267_v1  ;;  %v315_v57 = vld [vmem:[%s23258_s1 + $0x8e0] sm:$0xff] }
  0x5a   :  { %9726 = vmatpush1.bf16.msra.mxu0 %v14660_v6  ;;  %10259 = vmatpush1.bf16.msra.mxu1 %v14662_v7  ;;  %v14725_v6 = vcombine.high %v263_v0, %v267_v1  ;;  %v14727_v7 = vcombine.high %v264_v2, %v268_v3  ;;  %v14773_v0 = vcombine.high %v311_v56, %v315_v57  ;;  %v319_v2 = vld [vmem:[%s23258_s1 + $0x900] sm:$0xff] }
  0x5b   :  { %9727 = vmatprep.subr.bf16.mxu0 %v14669_v8  ;;  %10260 = vmatprep.subr.bf16.mxu1 %v14671_v10  ;;  %v271_v8 = vld [vmem:[%s23258_s1 + $0x780] sm:$0xff] }
  0x5c   :  { %v275_v10 = vld [vmem:[%s23258_s1 + $0x7a0] sm:$0xff] }
  0x5d   :  { %v14732_v22 = vcombine.low %v271_v8, %v275_v10  ;;  %v323_v3 = vld [vmem:[%s23258_s1 + $0x920] sm:$0xff] }
  0x5e   :  { %9728 = vmatpush1.bf16.msra.mxu0 %v14668_v15  ;;  %10261 = vmatpush1.bf16.msra.mxu1 %v14670_v16  ;;  %v14733_v15 = vcombine.high %v271_v8, %v275_v10  ;;  %v14735_v16 = vcombine.high %v272_v11, %v276_v12  ;;  %v14781_v8 = vcombine.high %v319_v2, %v323_v3  ;;  %v355_v37 = vld [vmem:[%s23258_s1 + $0xa20] sm:$0xff] }
  0x5f   :  { %9729 = vmatprep.subr.bf16.mxu0 %v14677_v17  ;;  %10262 = vmatprep.subr.bf16.mxu1 %v14679_v18  ;;  %v279_v17 = vld [vmem:[%s23258_s1 + $0x7c0] sm:$0xff] }
  0x60   :  { %v283_v18 = vld [vmem:[%s23258_s1 + $0x7e0] sm:$0xff] }
  0x61   :  { %v14740_v30 = vcombine.low %v279_v17, %v283_v18 }
  0x62   :  { %9730 = vmatpush1.bf16.msra.mxu0 %v14676_v24  ;;  %10263 = vmatpush1.bf16.msra.mxu1 %v14678_v25  ;;  %v14734_v24 = vcombine.low %v272_v11, %v276_v12  ;;  %v14741_v25 = vcombine.high %v279_v17, %v283_v18  ;;  %v327_v11 = vld [vmem:[%s23258_s1 + $0x940] sm:$0xff] }
  0x63   :  { %9731 = vmatprep.subr.bf16.mxu0 %v14685_v26  ;;  %10264 = vmatprep.subr.bf16.mxu1 %v14687_v27  ;;  %v14743_v26 = vcombine.high %v280_v20, %v284_v21  ;;  %v291_v27 = vld [vmem:[%s23258_s1 + $0x820] sm:$0xff] }
  0x64   :  { %v331_v12 = vld [vmem:[%s23258_s1 + $0x960] sm:$0xff] }
  0x65   :  { %v14789_v17 = vcombine.high %v327_v11, %v331_v12 }
  0x66   :  { %9732 = vmatpush1.bf16.msra.mxu0 %v14684_v32  ;;  %10265 = vmatpush1.bf16.msra.mxu1 %v14686_v33  ;;  %v14742_v32 = vcombine.low %v280_v20, %v284_v21  ;;  %v14749_v33 = vcombine.high %v287_v59, %v291_v27  ;;  %v339_v20 = vld [vmem:[%s23258_s1 + $0x9a0] sm:$0xff]  ;;  %v336_v21 = vld [vmem:[%s23258_s1 + $0x988] sm:$0xff] }
  0x67   :  { %9733 = vmatprep.subr.bf16.mxu0 %v14693_v34  ;;  %10266 = vmatprep.subr.bf16.mxu1 %v14695_v35  ;;  %v14751_v34 = vcombine.high %v288_v29, %v292_v63  ;;  %v295_v35 = vld [vmem:[%s23258_s1 + $0x840] sm:$0xff] }
  0x6a   :  { %9734 = vmatpush1.bf16.msra.mxu0 %v14692_v40  ;;  %10267 = vmatpush1.bf16.msra.mxu1 %v14694_v41  ;;  %v300_v40 = vld [vmem:[%s23258_s1 + $0x868] sm:$0xff]  ;;  %v14748_v41 = vcombine.low %v287_v59, %v291_v27  ;;  %v343_v27 = vld [vmem:[%s23258_s1 + $0x9c0] sm:$0xff] }
  0x6b   :  { %9735 = vmatprep.subr.bf16.mxu0 %v14701_v42  ;;  %10268 = vmatprep.subr.bf16.mxu1 %v14703_v44  ;;  %v14750_v42 = vcombine.low %v288_v29, %v292_v63  ;;  %v14757_v44 = vcombine.high %v295_v35, %v299_v36  ;;  %v14759_v45 = vcombine.high %v296_v39, %v300_v40  ;;  %v347_v29 = vld [vmem:[%s23258_s1 + $0x9e0] sm:$0xff]  ;;  %v344_v63 = vld [vmem:[%s23258_s1 + $0x9c8] sm:$0xff] }
  0x6e   :  { %9736 = vmatpush1.bf16.msra.mxu0 %v14700_v49  ;;  %10269 = vmatpush1.bf16.msra.mxu1 %v14702_v50  ;;  %v304_v49 = vld [vmem:[%s23258_s1 + $0x888] sm:$0xff] }
  0x6f   :  { %9737 = vmatprep.subr.bf16.mxu0 %v14709_v51  ;;  %10270 = vmatprep.subr.bf16.mxu1 %v14711_v52  ;;  %v308_v50 = vld [vmem:[%s23258_s1 + $0x8a8] sm:$0xff]  ;;  %v14756_v51 = vcombine.low %v295_v35, %v299_v36  ;;  %v14758_v52 = vcombine.low %v296_v39, %v300_v40  ;;  %v351_v36 = vld [vmem:[%s23258_s1 + $0xa00] sm:$0xff] }
  0x70   :  { %v14767_v55 = vcombine.high %v304_v49, %v308_v50  ;;  %v352_v39 = vld [vmem:[%s23258_s1 + $0xa08] sm:$0xff] }
  0x71   :  { %v356_v40 = vld [vmem:[%s23258_s1 + $0xa28] sm:$0xff] }
  0x72   :  { %9738 = vmatpush1.bf16.msra.mxu0 %v14708_v58  ;;  %10271 = vmatpush1.bf16.msra.mxu1 %v14710_v60  ;;  %v312_v58 = vld [vmem:[%s23258_s1 + $0x8c8] sm:$0xff] }
  0x73   :  { %9739 = vmatprep.subr.bf16.mxu0 %v14717_v61  ;;  %10272 = vmatprep.subr.bf16.mxu1 %v14719_v62  ;;  %v316_v60 = vld [vmem:[%s23258_s1 + $0x8e8] sm:$0xff]  ;;  %v14764_v61 = vcombine.low %v303_v46, %v307_v47  ;;  %v14766_v62 = vcombine.low %v304_v49, %v308_v50  ;;  %v359_v46 = vld [vmem:[%s23258_s1 + $0xa40] sm:$0xff] }
  0x74   :  { %v14775_v1 = vcombine.high %v312_v58, %v316_v60  ;;  %v363_v47 = vld [vmem:[%s23258_s1 + $0xa60] sm:$0xff]  ;;  %v360_v49 = vld [vmem:[%s23258_s1 + $0xa48] sm:$0xff] }
  0x75   :  { %v364_v50 = vld [vmem:[%s23258_s1 + $0xa68] sm:$0xff] }
  0x76   :  { %9740 = vmatpush1.bf16.msra.mxu0 %v14716_v4  ;;  %10273 = vmatpush1.bf16.msra.mxu1 %v14718_v5  ;;  %v320_v4 = vld [vmem:[%s23258_s1 + $0x908] sm:$0xff] }
  0x77   :  { %9741 = vmatprep.subr.bf16.mxu0 %v14725_v6  ;;  %10274 = vmatprep.subr.bf16.mxu1 %v14727_v7  ;;  %v324_v5 = vld [vmem:[%s23258_s1 + $0x928] sm:$0xff]  ;;  %v14772_v6 = vcombine.low %v311_v56, %v315_v57  ;;  %v14774_v7 = vcombine.low %v312_v58, %v316_v60  ;;  %v367_v56 = vld [vmem:[%s23258_s1 + $0xa80] sm:$0xff] }
  0x78   :  { %v14783_v10 = vcombine.high %v320_v4, %v324_v5  ;;  %v371_v57 = vld [vmem:[%s23258_s1 + $0xaa0] sm:$0xff]  ;;  %v368_v58 = vld [vmem:[%s23258_s1 + $0xa88] sm:$0xff] }
  0x79   :  { %v372_v60 = vld [vmem:[%s23258_s1 + $0xaa8] sm:$0xff] }
  0x7a   :  { %9742 = vmatpush1.bf16.msra.mxu0 %v14724_v13  ;;  %10275 = vmatpush1.bf16.msra.mxu1 %v14726_v14  ;;  %v328_v13 = vld [vmem:[%s23258_s1 + $0x948] sm:$0xff] }
  0x7b   :  { %9743 = vmatprep.subr.bf16.mxu0 %v14733_v15  ;;  %10276 = vmatprep.subr.bf16.mxu1 %v14735_v16  ;;  %v332_v14 = vld [vmem:[%s23258_s1 + $0x968] sm:$0xff]  ;;  %v14780_v15 = vcombine.low %v319_v2, %v323_v3  ;;  %v14782_v16 = vcombine.low %v320_v4, %v324_v5  ;;  %v375_v2 = vld [vmem:[%s23258_s1 + $0xac0] sm:$0xff] }
  0x7c   :  { %v14791_v18 = vcombine.high %v328_v13, %v332_v14  ;;  %v379_v3 = vld [vmem:[%s23258_s1 + $0xae0] sm:$0xff]  ;;  %v376_v4 = vld [vmem:[%s23258_s1 + $0xac8] sm:$0xff] }
  0x7d   :  { %v380_v5 = vld [vmem:[%s23258_s1 + $0xae8] sm:$0xff] }
  0x7e   :  { %9744 = vmatpush1.bf16.msra.mxu0 %v14732_v22  ;;  %10277 = vmatpush1.bf16.msra.mxu1 %v14734_v24  ;;  %v340_v22 = vld [vmem:[%s23258_s1 + $0x9a8] sm:$0xff]  ;;  %v14788_v24 = vcombine.low %v327_v11, %v331_v12  ;;  %v383_v11 = vld [vmem:[%s23258_s1 + $0xb00] sm:$0xff] }
  0x7f   :  { %9745 = vmatprep.subr.bf16.mxu0 %v14741_v25  ;;  %10278 = vmatprep.subr.bf16.mxu1 %v14743_v26  ;;  %v14790_v25 = vcombine.low %v328_v13, %v332_v14  ;;  %v14797_v26 = vcombine.high %v335_v19, %v339_v20  ;;  %v14799_v59 = vcombine.high %v336_v21, %v340_v22  ;;  %v387_v12 = vld [vmem:[%s23258_s1 + $0xb20] sm:$0xff]  ;;  %v384_v13 = vld [vmem:[%s23258_s1 + $0xb08] sm:$0xff] }
  0x80   :  { %v388_v14 = vld [vmem:[%s23258_s1 + $0xb28] sm:$0xff] }
  0x82   :  { %9746 = vmatpush1.bf16.msra.mxu0 %v14740_v30  ;;  %10279 = vmatpush1.bf16.msra.mxu1 %v14742_v32  ;;  %v348_v30 = vld [vmem:[%s23258_s1 + $0x9e8] sm:$0xff]  ;;  %v14796_v32 = vcombine.low %v335_v19, %v339_v20  ;;  %v391_v19 = vld [vmem:[%s23258_s1 + $0xb40] sm:$0xff] }
  0x83   :  { %9756 = vmatprep.subr.bf16.mxu0 %v14749_v33  ;;  %10289 = vmatprep.subr.bf16.mxu1 %v14751_v34  ;;  %v14798_v33 = vcombine.low %v336_v21, %v340_v22  ;;  %v14805_v34 = vcombine.high %v343_v27, %v347_v29  ;;  %v14807_v35 = vcombine.high %v344_v63, %v348_v30  ;;  %v395_v20 = vld [vmem:[%s23258_s1 + $0xb60] sm:$0xff]  ;;  %v392_v21 = vld [vmem:[%s23258_s1 + $0xb48] sm:$0xff] }
  0x84   :  { %v396_v22 = vld [vmem:[%s23258_s1 + $0xb68] sm:$0xff] }
  0x85   :  { %9748 = vmatmul.mubr.bf16.vlgmr.msra.gmra.mrb[0].mxu0 %v17868_v38  ;;  %10281 = vmatmul.mubr.bf16.vlgmr.msra.gmra.mrb[0].mxu1 %v17868_v38 }
  0x86   :  { %9757 = vmatpush1.bf16.msra.mxu0 %v14748_v41  ;;  %10290 = vmatpush1.bf16.msra.mxu1 %v14750_v42  ;;  %v14804_v41 = vcombine.low %v343_v27, %v347_v29  ;;  %v14806_v42 = vcombine.low %v344_v63, %v348_v30  ;;  %v399_v27 = vld [vmem:[%s23258_s1 + $0xb80] sm:$0xff]  ;;  %v400_v63 = vld [vmem:[%s23258_s1 + $0xb88] sm:$0xff] }
  0x87   :  { %9758 = vmatprep.subr.bf16.mxu0 %v14757_v44  ;;  %10291 = vmatprep.subr.bf16.mxu1 %v14759_v45  ;;  %v14813_v44 = vcombine.high %v351_v36, %v355_v37  ;;  %v14815_v45 = vcombine.high %v352_v39, %v356_v40  ;;  %v403_v29 = vld [vmem:[%s23258_s1 + $0xba0] sm:$0xff]  ;;  %v404_v30 = vld [vmem:[%s23258_s1 + $0xba8] sm:$0xff] }
  0x88   :  { %9788 = vmatprep.mubr.bf16.mxu0 %v17883_v48  ;;  %10321 = vmatprep.mubr.bf16.mxu1 %v17883_v48 }
  0x8a   :  { %9759 = vmatpush1.bf16.msra.mxu0 %v14756_v51  ;;  %10292 = vmatpush1.bf16.msra.mxu1 %v14758_v52  ;;  %v14812_v51 = vcombine.low %v351_v36, %v355_v37  ;;  %v14814_v52 = vcombine.low %v352_v39, %v356_v40  ;;  %v407_v36 = vld [vmem:[%s23258_s1 + $0xbc0] sm:$0xff]  ;;  %v408_v39 = vld [vmem:[%s23258_s1 + $0xbc8] sm:$0xff] }
  0x8b   :  { %9760 = vmatprep.subr.bf16.mxu0 %v14765_v54  ;;  %10293 = vmatprep.subr.bf16.mxu1 %v14767_v55  ;;  %v14821_v54 = vcombine.high %v359_v46, %v363_v47  ;;  %v14823_v55 = vcombine.high %v360_v49, %v364_v50  ;;  %v411_v37 = vld [vmem:[%s23258_s1 + $0xbe0] sm:$0xff]  ;;  %v412_v40 = vld [vmem:[%s23258_s1 + $0xbe8] sm:$0xff] }
  0x8e   :  { %9761 = vmatpush1.bf16.msra.mxu0 %v14764_v61  ;;  %10294 = vmatpush1.bf16.msra.mxu1 %v14766_v62  ;;  %v14820_v61 = vcombine.low %v359_v46, %v363_v47  ;;  %v14822_v62 = vcombine.low %v360_v49, %v364_v50  ;;  %v415_v46 = vld [vmem:[%s23258_s1 + $0xc00] sm:$0xff]  ;;  %v416_v49 = vld [vmem:[%s23258_s1 + $0xc08] sm:$0xff] }
  0x8f   :  { %9762 = vmatprep.subr.bf16.mxu0 %v14773_v0  ;;  %10295 = vmatprep.subr.bf16.mxu1 %v14775_v1  ;;  %v14829_v0 = vcombine.high %v367_v56, %v371_v57  ;;  %v14831_v1 = vcombine.high %v368_v58, %v372_v60  ;;  %v419_v47 = vld [vmem:[%s23258_s1 + $0xc20] sm:$0xff]  ;;  %v420_v50 = vld [vmem:[%s23258_s1 + $0xc28] sm:$0xff] }
  0x92   :  { %9763 = vmatpush1.bf16.msra.mxu0 %v14772_v6  ;;  %10296 = vmatpush1.bf16.msra.mxu1 %v14774_v7  ;;  %v14828_v6 = vcombine.low %v367_v56, %v371_v57  ;;  %v14830_v7 = vcombine.low %v368_v58, %v372_v60  ;;  %v423_v56 = vld [vmem:[%s23258_s1 + $0xc40] sm:$0xff]  ;;  %v18071_v58 = vrot.slane %v17850_v28, %v17505_v53  ;;  %v424_v60 = vld [vmem:[%s23258_s1 + $0xc48] sm:$0xff] }
  0x93   :  { %9764 = vmatprep.subr.bf16.mxu0 %v14781_v8  ;;  %10297 = vmatprep.subr.bf16.mxu1 %v14783_v10  ;;  %v14837_v8 = vcombine.high %v375_v2, %v379_v3  ;;  %v14839_v10 = vcombine.high %v376_v4, %v380_v5  ;;  %v427_v57 = vld [vmem:[%s23258_s1 + $0xc60] sm:$0xff] }
  0x94   :  { %v431_v28 = vld [vmem:[%s23258_s1 + $0xc80] sm:$0xff] }
  0x96   :  { %9765 = vmatpush1.bf16.msra.mxu0 %v14780_v15  ;;  %10298 = vmatpush1.bf16.msra.mxu1 %v14782_v16  ;;  %v14836_v15 = vcombine.low %v375_v2, %v379_v3  ;;  %v14838_v16 = vcombine.low %v376_v4, %v380_v5  ;;  %v435_v3 = vld [vmem:[%s23258_s1 + $0xca0] sm:$0xff]  ;;  %v18087_v4 = vcombine.high %v17883_v48, %v17883_v48  ;;  %v432_v5 = vld [vmem:[%s23258_s1 + $0xc88] sm:$0xff] }
  0x97   :  { %9766 = vmatprep.subr.bf16.mxu0 %v14789_v17  ;;  %10299 = vmatprep.subr.bf16.mxu1 %v14791_v18  ;;  %v14845_v17 = vcombine.high %v383_v11, %v387_v12  ;;  %v14847_v18 = vcombine.high %v384_v13, %v388_v14 }
  0x9a   :  { %9767 = vmatpush1.bf16.msra.mxu0 %v14788_v24  ;;  %10300 = vmatpush1.bf16.msra.mxu1 %v14790_v25  ;;  %v14844_v24 = vcombine.low %v383_v11, %v387_v12  ;;  %v14846_v25 = vcombine.low %v384_v13, %v388_v14  ;;  %v439_v12 = vld [vmem:[%s23258_s1 + $0xcc0] sm:$0xff]  ;;  %v440_v14 = vld [vmem:[%s23258_s1 + $0xcc8] sm:$0xff] }
  0x9b   :  { %9768 = vmatprep.subr.bf16.mxu0 %v14797_v26  ;;  %10301 = vmatprep.subr.bf16.mxu1 %v14799_v59  ;;  %v14853_v26 = vcombine.high %v391_v19, %v395_v20  ;;  %v14855_v59 = vcombine.high %v392_v21, %v396_v22  ;;  %v443_v13 = vld [vmem:[%s23258_s1 + $0xce0] sm:$0xff] }
  0x9e   :  { %9769 = vmatpush1.bf16.msra.mxu0 %v14796_v32  ;;  %10302 = vmatpush1.bf16.msra.mxu1 %v14798_v33  ;;  %v14852_v32 = vcombine.low %v391_v19, %v395_v20  ;;  %v14854_v33 = vcombine.low %v392_v21, %v396_v22  ;;  %v447_v20 = vld [vmem:[%s23258_s1 + $0xd00] sm:$0xff]  ;;  %v448_v22 = vld [vmem:[%s23258_s1 + $0xd08] sm:$0xff] }
  0x9f   :  { %9770 = vmatprep.subr.bf16.mxu0 %v14805_v34  ;;  %10303 = vmatprep.subr.bf16.mxu1 %v14807_v35  ;;  %v14861_v34 = vcombine.high %v399_v27, %v403_v29  ;;  %v14863_v35 = vcombine.high %v400_v63, %v404_v30  ;;  %v451_v21 = vld [vmem:[%s23258_s1 + $0xd20] sm:$0xff] }
  0xa2   :  { %9771 = vmatpush1.bf16.msra.mxu0 %v14804_v41  ;;  %10304 = vmatpush1.bf16.msra.mxu1 %v14806_v42  ;;  %v14860_v41 = vcombine.low %v399_v27, %v403_v29  ;;  %v14862_v42 = vcombine.low %v400_v63, %v404_v30  ;;  %v455_v29 = vld [vmem:[%s23258_s1 + $0xd40] sm:$0xff]  ;;  %v456_v30 = vld [vmem:[%s23258_s1 + $0xd48] sm:$0xff] }
  0xa3   :  { %9772 = vmatprep.subr.bf16.mxu0 %v14813_v44  ;;  %10305 = vmatprep.subr.bf16.mxu1 %v14815_v45  ;;  %v14869_v44 = vcombine.high %v407_v36, %v411_v37  ;;  %v14871_v45 = vcombine.high %v408_v39, %v412_v40  ;;  %v459_v63 = vld [vmem:[%s23258_s1 + $0xd60] sm:$0xff] }
  0xa6   :  { %9773 = vmatpush1.bf16.msra.mxu0 %v14812_v51  ;;  %10306 = vmatpush1.bf16.msra.mxu1 %v14814_v52  ;;  %v14868_v51 = vcombine.low %v407_v36, %v411_v37  ;;  %v14870_v52 = vcombine.low %v408_v39, %v412_v40  ;;  %v463_v37 = vld [vmem:[%s23258_s1 + $0xd80] sm:$0xff]  ;;  %v464_v40 = vld [vmem:[%s23258_s1 + $0xd88] sm:$0xff] }
  0xa7   :  { %9774 = vmatprep.subr.bf16.mxu0 %v14821_v54  ;;  %10307 = vmatprep.subr.bf16.mxu1 %v14823_v55  ;;  %v14877_v54 = vcombine.high %v415_v46, %v419_v47  ;;  %v14879_v55 = vcombine.high %v416_v49, %v420_v50  ;;  %v467_v39 = vld [vmem:[%s23258_s1 + $0xda0] sm:$0xff] }
  0xaa   :  { %9775 = vmatpush1.bf16.msra.mxu0 %v14820_v61  ;;  %10308 = vmatpush1.bf16.msra.mxu1 %v14822_v62  ;;  %v428_v61 = vld [vmem:[%s23258_s1 + $0xc68] sm:$0xff]  ;;  %v14876_v62 = vcombine.low %v415_v46, %v419_v47  ;;  %v471_v47 = vld [vmem:[%s23258_s1 + $0xdc0] sm:$0xff] }
  0xab   :  { %9776 = vmatprep.subr.bf16.mxu0 %v14829_v0  ;;  %10309 = vmatprep.subr.bf16.mxu1 %v14831_v1  ;;  %v14878_v0 = vcombine.low %v416_v49, %v420_v50  ;;  %v14885_v1 = vcombine.high %v423_v56, %v427_v57  ;;  %v14887_v2 = vcombine.high %v424_v60, %v428_v61  ;;  %v475_v49 = vld [vmem:[%s23258_s1 + $0xde0] sm:$0xff]  ;;  %v472_v50 = vld [vmem:[%s23258_s1 + $0xdc8] sm:$0xff] }
  0xae   :  { %9777 = vmatpush1.bf16.msra.mxu0 %v14828_v6  ;;  %10310 = vmatpush1.bf16.msra.mxu1 %v14830_v7  ;;  %v436_v6 = vld [vmem:[%s23258_s1 + $0xca8] sm:$0xff]  ;;  %v14884_v7 = vcombine.low %v423_v56, %v427_v57  ;;  %v479_v57 = vld [vmem:[%s23258_s1 + $0xe00] sm:$0xff] }
  0xaf   :  { %9778 = vmatprep.subr.bf16.mxu0 %v14837_v8  ;;  %10311 = vmatprep.subr.bf16.mxu1 %v14839_v10  ;;  %v14886_v8 = vcombine.low %v424_v60, %v428_v61  ;;  %v14893_v10 = vcombine.high %v431_v28, %v435_v3  ;;  %v14895_v11 = vcombine.high %v432_v5, %v436_v6  ;;  %v483_v60 = vld [vmem:[%s23258_s1 + $0xe20] sm:$0xff]  ;;  %v480_v61 = vld [vmem:[%s23258_s1 + $0xe08] sm:$0xff] }
  0xb2   :  { %9779 = vmatpush1.bf16.msra.mxu0 %v14836_v15  ;;  %10312 = vmatpush1.bf16.msra.mxu1 %v14838_v16  ;;  %v444_v15 = vld [vmem:[%s23258_s1 + $0xce8] sm:$0xff]  ;;  %v14892_v16 = vcombine.low %v431_v28, %v435_v3  ;;  %v487_v3 = vld [vmem:[%s23258_s1 + $0xe40] sm:$0xff] }
  0xb3   :  { %9780 = vmatprep.subr.bf16.mxu0 %v14845_v17  ;;  %10313 = vmatprep.subr.bf16.mxu1 %v14847_v18  ;;  %v14894_v17 = vcombine.low %v432_v5, %v436_v6  ;;  %v14901_v18 = vcombine.high %v439_v12, %v443_v13  ;;  %v14903_v19 = vcombine.high %v440_v14, %v444_v15  ;;  %v491_v5 = vld [vmem:[%s23258_s1 + $0xe60] sm:$0xff]  ;;  %v488_v6 = vld [vmem:[%s23258_s1 + $0xe48] sm:$0xff] }
  0xb6   :  { %9781 = vmatpush1.bf16.msra.mxu0 %v14844_v24  ;;  %10314 = vmatpush1.bf16.msra.mxu1 %v14846_v25  ;;  %v452_v24 = vld [vmem:[%s23258_s1 + $0xd28] sm:$0xff]  ;;  %v14900_v25 = vcombine.low %v439_v12, %v443_v13  ;;  %v495_v13 = vld [vmem:[%s23258_s1 + $0xe80] sm:$0xff] }
  0xb7   :  { %9782 = vmatprep.subr.bf16.mxu0 %v14853_v26  ;;  %10315 = vmatprep.subr.bf16.mxu1 %v14855_v59  ;;  %v14902_v26 = vcombine.low %v440_v14, %v444_v15  ;;  %v14909_v59 = vcombine.high %v447_v20, %v451_v21  ;;  %v14911_v27 = vcombine.high %v448_v22, %v452_v24  ;;  %v499_v14 = vld [vmem:[%s23258_s1 + $0xea0] sm:$0xff]  ;;  %v496_v15 = vld [vmem:[%s23258_s1 + $0xe88] sm:$0xff] }
  0xba   :  { %9783 = vmatpush1.bf16.msra.mxu0 %v14852_v32  ;;  %10316 = vmatpush1.bf16.msra.mxu1 %v14854_v33  ;;  %v460_v32 = vld [vmem:[%s23258_s1 + $0xd68] sm:$0xff]  ;;  %v14908_v33 = vcombine.low %v447_v20, %v451_v21  ;;  %v503_v21 = vld [vmem:[%s23258_s1 + $0xec0] sm:$0xff] }
  0xbb   :  { %9784 = vmatprep.subr.bf16.mxu0 %v14861_v34  ;;  %10317 = vmatprep.subr.bf16.mxu1 %v14863_v35  ;;  %v14910_v34 = vcombine.low %v448_v22, %v452_v24  ;;  %v14917_v35 = vcombine.high %v455_v29, %v459_v63  ;;  %v14919_v36 = vcombine.high %v456_v30, %v460_v32  ;;  %v507_v22 = vld [vmem:[%s23258_s1 + $0xee0] sm:$0xff]  ;;  %v504_v24 = vld [vmem:[%s23258_s1 + $0xec8] sm:$0xff] }
  0xbe   :  { %9785 = vmatpush1.bf16.msra.mxu0 %v14860_v41  ;;  %10318 = vmatpush1.bf16.msra.mxu1 %v14862_v42  ;;  %v468_v41 = vld [vmem:[%s23258_s1 + $0xda8] sm:$0xff]  ;;  %v14916_v42 = vcombine.low %v455_v29, %v459_v63  ;;  %v511_v63 = vld [vmem:[%s23258_s1 + $0xf00] sm:$0xff] }
  0xbf   :  { %9786 = vmatprep.subr.bf16.mxu0 %v14869_v44  ;;  %10319 = vmatprep.subr.bf16.mxu1 %v14871_v45  ;;  %v14918_v44 = vcombine.low %v456_v30, %v460_v32  ;;  %v14925_v45 = vcombine.high %v463_v37, %v467_v39  ;;  %v14927_v46 = vcombine.high %v464_v40, %v468_v41  ;;  %v515_v30 = vld [vmem:[%s23258_s1 + $0xf20] sm:$0xff]  ;;  %v512_v32 = vld [vmem:[%s23258_s1 + $0xf08] sm:$0xff] }
  0xc2   :  { %9787 = vmatpush1.bf16.msra.mxu0 %v14868_v51  ;;  %10320 = vmatpush1.bf16.msra.mxu1 %v14870_v52  ;;  %v476_v51 = vld [vmem:[%s23258_s1 + $0xde8] sm:$0xff]  ;;  %v14924_v52 = vcombine.low %v463_v37, %v467_v39  ;;  %v519_v39 = vld [vmem:[%s23258_s1 + $0xf40] sm:$0xff] }
  0xc3   :  { %9797 = vmatprep.subr.bf16.mxu0 %v14877_v54  ;;  %10330 = vmatprep.subr.bf16.mxu1 %v14879_v55  ;;  %v14926_v54 = vcombine.low %v464_v40, %v468_v41  ;;  %v14933_v55 = vcombine.high %v471_v47, %v475_v49  ;;  %v14935_v56 = vcombine.high %v472_v50, %v476_v51  ;;  %v523_v40 = vld [vmem:[%s23258_s1 + $0xf60] sm:$0xff]  ;;  %v520_v41 = vld [vmem:[%s23258_s1 + $0xf48] sm:$0xff] }
  0xc5   :  { %9789 = vmatmul.mubr.bf16.vlgmr.msra.gmra.mrb[0].mxu0 %v18071_v58  ;;  %10322 = vmatmul.mubr.bf16.vlgmr.msra.gmra.mrb[0].mxu1 %v18071_v58 }
  0xc6   :  { %9798 = vmatpush1.bf16.msra.mxu0 %v14876_v62  ;;  %10331 = vmatpush1.bf16.msra.mxu1 %v14878_v0  ;;  %v484_v62 = vld [vmem:[%s23258_s1 + $0xe28] sm:$0xff]  ;;  %v14932_v0 = vcombine.low %v471_v47, %v475_v49  ;;  %v527_v49 = vld [vmem:[%s23258_s1 + $0xf80] sm:$0xff] }
  0xc7   :  { %9799 = vmatprep.subr.bf16.mxu0 %v14885_v1  ;;  %10332 = vmatprep.subr.bf16.mxu1 %v14887_v2  ;;  %v14934_v1 = vcombine.low %v472_v50, %v476_v51  ;;  %v14941_v2 = vcombine.high %v479_v57, %v483_v60  ;;  %v14943_v28 = vcombine.high %v480_v61, %v484_v62  ;;  %v531_v50 = vld [vmem:[%s23258_s1 + $0xfa0] sm:$0xff]  ;;  %v528_v51 = vld [vmem:[%s23258_s1 + $0xf88] sm:$0xff] }
  0xc8   :  { %9829 = vmatprep.mubr.bf16.mxu0 %v18087_v4  ;;  %10362 = vmatprep.mubr.bf16.mxu1 %v18087_v4 }
  0xca   :  { %9800 = vmatpush1.bf16.msra.mxu0 %v14884_v7  ;;  %10333 = vmatpush1.bf16.msra.mxu1 %v14886_v8  ;;  %v492_v7 = vld [vmem:[%s23258_s1 + $0xe68] sm:$0xff]  ;;  %v14940_v8 = vcombine.low %v479_v57, %v483_v60  ;;  %v535_v60 = vld [vmem:[%s23258_s1 + $0xfc0] sm:$0xff] }
  0xcb   :  { %9801 = vmatprep.subr.bf16.mxu0 %v14893_v10  ;;  %10334 = vmatprep.subr.bf16.mxu1 %v14895_v11  ;;  %v14942_v10 = vcombine.low %v480_v61, %v484_v62  ;;  %v14949_v11 = vcombine.high %v487_v3, %v491_v5  ;;  %v14951_v12 = vcombine.high %v488_v6, %v492_v7  ;;  %v539_v61 = vld [vmem:[%s23258_s1 + $0xfe0] sm:$0xff]  ;;  %v536_v62 = vld [vmem:[%s23258_s1 + $0xfc8] sm:$0xff] }
  0xce   :  { %9802 = vmatpush1.bf16.msra.mxu0 %v14892_v16  ;;  %10335 = vmatpush1.bf16.msra.mxu1 %v14894_v17  ;;  %v500_v16 = vld [vmem:[%s23258_s1 + $0xea8] sm:$0xff]  ;;  %v14948_v17 = vcombine.low %v487_v3, %v491_v5  ;;  %v14997_v3 = vcombine.high %v535_v60, %v539_v61 }
  0xcf   :  { %9803 = vmatprep.subr.bf16.mxu0 %v14901_v18  ;;  %10336 = vmatprep.subr.bf16.mxu1 %v14903_v19  ;;  %v14950_v18 = vcombine.low %v488_v6, %v492_v7  ;;  %v14957_v19 = vcombine.high %v495_v13, %v499_v14  ;;  %v14959_v20 = vcombine.high %v496_v15, %v500_v16  ;;  %v543_v6 = vld [vmem:[%s23258_s1 + $0x1000] sm:$0xff] }
  0xd0   :  { %v547_v7 = vld [vmem:[%s23258_s1 + $0x1020] sm:$0xff] }
  0xd2   :  { %9804 = vmatpush1.bf16.msra.mxu0 %v14900_v25  ;;  %10337 = vmatpush1.bf16.msra.mxu1 %v14902_v26  ;;  %v508_v25 = vld [vmem:[%s23258_s1 + $0xee8] sm:$0xff]  ;;  %v14956_v26 = vcombine.low %v495_v13, %v499_v14  ;;  %v15005_v14 = vcombine.high %v543_v6, %v547_v7 }
  0xd3   :  { %9805 = vmatprep.subr.bf16.mxu0 %v14909_v59  ;;  %10338 = vmatprep.subr.bf16.mxu1 %v14911_v27  ;;  %v14958_v59 = vcombine.low %v496_v15, %v500_v16  ;;  %v14965_v27 = vcombine.high %v503_v21, %v507_v22  ;;  %v14967_v29 = vcombine.high %v504_v24, %v508_v25  ;;  %v551_v16 = vld [vmem:[%s23258_s1 + $0x1040] sm:$0xff] }
  0xd6   :  { %9806 = vmatpush1.bf16.msra.mxu0 %v14908_v33  ;;  %10339 = vmatpush1.bf16.msra.mxu1 %v14910_v34  ;;  %v516_v33 = vld [vmem:[%s23258_s1 + $0xf28] sm:$0xff]  ;;  %v14964_v34 = vcombine.low %v503_v21, %v507_v22  ;;  %v15004_v22 = vcombine.low %v543_v6, %v547_v7 }
  0xd7   :  { %9807 = vmatprep.subr.bf16.mxu0 %v14917_v35  ;;  %10340 = vmatprep.subr.bf16.mxu1 %v14919_v36  ;;  %v14966_v35 = vcombine.low %v504_v24, %v508_v25  ;;  %v14973_v36 = vcombine.high %v511_v63, %v515_v30  ;;  %v14975_v37 = vcombine.high %v512_v32, %v516_v33  ;;  %v556_v21 = vld [vmem:[%s23258_s1 + $0x1068] sm:$0xff] }
  0xd8   :  { %v592_v6 = vld [vmem:[%s23258_s1 + $0x1188] sm:$0xff] }
  0xd9   :  { %v596_v7 = vld [vmem:[%s23258_s1 + $0x11a8] sm:$0xff] }
  0xda   :  { %9808 = vmatpush1.bf16.msra.mxu0 %v14916_v42  ;;  %10341 = vmatpush1.bf16.msra.mxu1 %v14918_v44  ;;  %v524_v42 = vld [vmem:[%s23258_s1 + $0xf68] sm:$0xff]  ;;  %v14972_v44 = vcombine.low %v511_v63, %v515_v30 }
  0xdb   :  { %9809 = vmatprep.subr.bf16.mxu0 %v14925_v45  ;;  %10342 = vmatprep.subr.bf16.mxu1 %v14927_v46  ;;  %v14974_v45 = vcombine.low %v512_v32, %v516_v33  ;;  %v14981_v46 = vcombine.high %v519_v39, %v523_v40  ;;  %v14983_v47 = vcombine.high %v520_v41, %v524_v42  ;;  %v560_v63 = vld [vmem:[%s23258_s1 + $0x1088] sm:$0xff] }
  0xdc   :  { %v564_v30 = vld [vmem:[%s23258_s1 + $0x10a8] sm:$0xff] }
  0xde   :  { %9810 = vmatpush1.bf16.msra.mxu0 %v14924_v52  ;;  %10343 = vmatpush1.bf16.msra.mxu1 %v14926_v54  ;;  %v532_v52 = vld [vmem:[%s23258_s1 + $0xfa8] sm:$0xff]  ;;  %v14980_v54 = vcombine.low %v519_v39, %v523_v40 }
  0xdf   :  { %9811 = vmatprep.subr.bf16.mxu0 %v14933_v55  ;;  %10344 = vmatprep.subr.bf16.mxu1 %v14935_v56  ;;  %v14982_v55 = vcombine.low %v520_v41, %v524_v42  ;;  %v14989_v56 = vcombine.high %v527_v49, %v531_v50  ;;  %v14991_v57 = vcombine.high %v528_v51, %v532_v52  ;;  %v568_v39 = vld [vmem:[%s23258_s1 + $0x10c8] sm:$0xff] }
  0xe0   :  { %v572_v40 = vld [vmem:[%s23258_s1 + $0x10e8] sm:$0xff]  ;;  %v15022_v42 = vcombine.low %v560_v63, %v564_v30 }
  0xe2   :  { %9812 = vmatpush1.bf16.msra.mxu0 %v14932_v0  ;;  %10345 = vmatpush1.bf16.msra.mxu1 %v14934_v1  ;;  %v540_v0 = vld [vmem:[%s23258_s1 + $0xfe8] sm:$0xff] }
  0xe3   :  { %9813 = vmatprep.subr.bf16.mxu0 %v14941_v2  ;;  %10346 = vmatprep.subr.bf16.mxu1 %v14943_v28  ;;  %v18258_v1 = vld [vmem:[%s23259_s0 + $0x8] sm:$0xff]  ;;  %v14988_v2 = vcombine.low %v527_v49, %v531_v50  ;;  %v14990_v28 = vcombine.low %v528_v51, %v532_v52  ;;  %v14999_v5 = vcombine.high %v536_v62, %v540_v0 }
  0xe4   :  { %v14998_v13 = vcombine.low %v536_v62, %v540_v0  ;;  %v576_v49 = vld [vmem:[%s23258_s1 + $0x1108] sm:$0xff]  ;;  %v15030_v52 = vcombine.low %v568_v39, %v572_v40 }
  0xe5   :  { %v580_v50 = vld [vmem:[%s23258_s1 + $0x1128] sm:$0xff] }
  0xe6   :  { %9814 = vmatpush1.bf16.msra.mxu0 %v14940_v8  ;;  %10347 = vmatpush1.bf16.msra.mxu1 %v14942_v10  ;;  %v18268_v8 = vrot.slane %v18258_v1, %v17505_v53  ;;  %v544_v10 = vld [vmem:[%s23258_s1 + $0x1008] sm:$0xff]  ;;  %v15038_v0 = vcombine.low %v576_v49, %v580_v50 }
  0xe7   :  { %9815 = vmatprep.subr.bf16.mxu0 %v14949_v11  ;;  %10348 = vmatprep.subr.bf16.mxu1 %v14951_v12  ;;  %v548_v11 = vld [vmem:[%s23258_s1 + $0x1028] sm:$0xff]  ;;  %v14996_v12 = vcombine.low %v535_v60, %v539_v61 }
  0xe8   :  { %v15007_v15 = vcombine.high %v544_v10, %v548_v11  ;;  %v15006_v24 = vcombine.low %v544_v10, %v548_v11  ;;  %v584_v60 = vld [vmem:[%s23258_s1 + $0x1148] sm:$0xff] }
  0xe9   :  { %v588_v61 = vld [vmem:[%s23258_s1 + $0x1168] sm:$0xff] }
  0xea   :  { %9816 = vmatpush1.bf16.msra.mxu0 %v14948_v17  ;;  %10349 = vmatpush1.bf16.msra.mxu1 %v14950_v18  ;;  %v555_v17 = vld [vmem:[%s23258_s1 + $0x1060] sm:$0xff]  ;;  %v1709_v18 = vcombine.high %v18268_v8, %v18268_v8  ;;  %v15046_v11 = vcombine.low %v584_v60, %v588_v61 }
  0xeb   :  { %9817 = vmatprep.subr.bf16.mxu0 %v14957_v19  ;;  %10350 = vmatprep.subr.bf16.mxu1 %v14959_v20  ;;  %v18286_v19 = vcombine.high %v18071_v58, %v18071_v58  ;;  %v552_v20 = vld [vmem:[%s23258_s1 + $0x1048] sm:$0xff]  ;;  %v15013_v25 = vcombine.high %v551_v16, %v555_v17  ;;  %v15012_v32 = vcombine.low %v551_v16, %v555_v17 }
  0xec   :  { %v15014_v33 = vcombine.low %v552_v20, %v556_v21  ;;  %v600_v16 = vld [vmem:[%s23258_s1 + $0x11c8] sm:$0xff] }
  0xed   :  { %v604_v17 = vld [vmem:[%s23258_s1 + $0x11e8] sm:$0xff] }
  0xee   :  { %9818 = vmatpush1.bf16.msra.mxu0 %v14956_v26  ;;  %10351 = vmatpush1.bf16.msra.mxu1 %v14958_v59  ;;  %v15015_v26 = vcombine.high %v552_v20, %v556_v21  ;;  %v559_v59 = vld [vmem:[%s23258_s1 + $0x1080] sm:$0xff]  ;;  %v15054_v20 = vcombine.low %v592_v6, %v596_v7 }
  0xef   :  { %9819 = vmatprep.subr.bf16.mxu0 %v14965_v27  ;;  %10352 = vmatprep.subr.bf16.mxu1 %v14967_v29  ;;  %v563_v27 = vld [vmem:[%s23258_s1 + $0x10a0] sm:$0xff]  ;;  %v18301_v29 = vrot.slane %v1709_v18, %v17505_v53 }
  0xf0   :  { %v15020_v41 = vcombine.low %v559_v59, %v563_v27 }
  0xf2   :  { %9820 = vmatpush1.bf16.msra.mxu0 %v14964_v34  ;;  %10353 = vmatpush1.bf16.msra.mxu1 %v14966_v35  ;;  %v15021_v34 = vcombine.high %v559_v59, %v563_v27  ;;  %v15023_v35 = vcombine.high %v560_v63, %v564_v30  ;;  %v612_v59 = vld [vmem:[%s23258_s1 + $0x1228] sm:$0xff]  ;;  %v15062_v63 = vcombine.low %v600_v16, %v604_v17 }
  0xf3   :  { %9821 = vmatprep.subr.bf16.mxu0 %v14973_v36  ;;  %10354 = vmatprep.subr.bf16.mxu1 %v14975_v37  ;;  %v567_v36 = vld [vmem:[%s23258_s1 + $0x10c0] sm:$0xff] }
  0xf4   :  { %v571_v37 = vld [vmem:[%s23258_s1 + $0x10e0] sm:$0xff] }
  0xf5   :  { %v15028_v51 = vcombine.low %v567_v36, %v571_v37 }
  0xf6   :  { %9822 = vmatpush1.bf16.msra.mxu0 %v14972_v44  ;;  %10355 = vmatpush1.bf16.msra.mxu1 %v14974_v45  ;;  %v15029_v44 = vcombine.high %v567_v36, %v571_v37  ;;  %v15031_v45 = vcombine.high %v568_v39, %v572_v40  ;;  %v620_v36 = vld [vmem:[%s23258_s1 + $0x1268] sm:$0xff] }
  0xf7   :  { %9823 = vmatprep.subr.bf16.mxu0 %v14981_v46  ;;  %10356 = vmatprep.subr.bf16.mxu1 %v14983_v47  ;;  %v575_v46 = vld [vmem:[%s23258_s1 + $0x1100] sm:$0xff] }
  0xf8   :  { %v579_v47 = vld [vmem:[%s23258_s1 + $0x1120] sm:$0xff] }
  0xf9   :  { %v15036_v62 = vcombine.low %v575_v46, %v579_v47 }
  0xfa   :  { %9824 = vmatpush1.bf16.msra.mxu0 %v14980_v54  ;;  %10357 = vmatpush1.bf16.msra.mxu1 %v14982_v55  ;;  %v15037_v54 = vcombine.high %v575_v46, %v579_v47  ;;  %v15039_v55 = vcombine.high %v576_v49, %v580_v50  ;;  %v628_v46 = vld [vmem:[%s23258_s1 + $0x12a8] sm:$0xff] }
  0xfb   :  { %9825 = vmatprep.subr.bf16.mxu0 %v14989_v56  ;;  %10358 = vmatprep.subr.bf16.mxu1 %v14991_v57  ;;  %v583_v56 = vld [vmem:[%s23258_s1 + $0x1140] sm:$0xff] }
  0xfc   :  { %v587_v57 = vld [vmem:[%s23258_s1 + $0x1160] sm:$0xff] }
  0xfd   :  { %v15044_v10 = vcombine.low %v583_v56, %v587_v57 }
  0xfe   :  { %9826 = vmatpush1.bf16.msra.mxu0 %v14988_v2  ;;  %10359 = vmatpush1.bf16.msra.mxu1 %v14990_v28  ;;  %v15045_v2 = vcombine.high %v583_v56, %v587_v57  ;;  %v15047_v28 = vcombine.high %v584_v60, %v588_v61  ;;  %v636_v56 = vld [vmem:[%s23258_s1 + $0x12e8] sm:$0xff] }
  0xff   :  { %9827 = vmatprep.subr.bf16.mxu0 %v14997_v3  ;;  %10360 = vmatprep.subr.bf16.mxu1 %v14999_v5  ;;  %v591_v3 = vld [vmem:[%s23258_s1 + $0x1180] sm:$0xff] }
 0x100   :  { %v595_v5 = vld [vmem:[%s23258_s1 + $0x11a0] sm:$0xff] }
 0x101   :  { %v15052_v18 = vcombine.low %v591_v3, %v595_v5 }
 0x102   :  { %9828 = vmatpush1.bf16.msra.mxu0 %v14996_v12  ;;  %10361 = vmatpush1.bf16.msra.mxu1 %v14998_v13  ;;  %v15053_v12 = vcombine.high %v591_v3, %v595_v5  ;;  %v15055_v13 = vcombine.high %v592_v6, %v596_v7  ;;  %v644_v3 = vld [vmem:[%s23258_s1 + $0x1328] sm:$0xff] }
 0x103   :  { %9838 = vmatprep.subr.bf16.mxu0 %v15005_v14  ;;  %10371 = vmatprep.subr.bf16.mxu1 %v15007_v15  ;;  %v599_v14 = vld [vmem:[%s23258_s1 + $0x11c0] sm:$0xff] }
 0x104   :  { %v603_v15 = vld [vmem:[%s23258_s1 + $0x11e0] sm:$0xff] }
 0x105   :  { %9830 = vmatmul.mubr.bf16.vlgmr.msra.gmra.mrb[0].mxu0 %v18286_v19  ;;  %10363 = vmatmul.mubr.bf16.vlgmr.msra.gmra.mrb[0].mxu1 %v18286_v19  ;;  %v15061_v21 = vcombine.high %v599_v14, %v603_v15  ;;  %v15060_v27 = vcombine.low %v599_v14, %v603_v15  ;;  %v652_v14 = vld [vmem:[%s23258_s1 + $0x1368] sm:$0xff] }
 0x106   :  { %9839 = vmatpush1.bf16.msra.mxu0 %v15004_v22  ;;  %10372 = vmatpush1.bf16.msra.mxu1 %v15006_v24  ;;  %v15063_v22 = vcombine.high %v600_v16, %v604_v17  ;;  %v607_v24 = vld [vmem:[%s23258_s1 + $0x1200] sm:$0xff] }
 0x107   :  { %9840 = vmatprep.subr.bf16.mxu0 %v15013_v25  ;;  %10373 = vmatprep.subr.bf16.mxu1 %v15015_v26  ;;  %v611_v25 = vld [vmem:[%s23258_s1 + $0x1220] sm:$0xff]  ;;  %v608_v26 = vld [vmem:[%s23258_s1 + $0x1208] sm:$0xff] }
 0x108   :  { %9870 = vmatprep.mubr.bf16.mxu0 %v18301_v29  ;;  %10403 = vmatprep.mubr.bf16.mxu1 %v18301_v29  ;;  %v15069_v30 = vcombine.high %v607_v24, %v611_v25  ;;  %v15068_v37 = vcombine.low %v607_v24, %v611_v25  ;;  %v15070_v39 = vcombine.low %v608_v26, %v612_v59  ;;  %v660_v24 = vld [vmem:[%s23258_s1 + $0x13a8] sm:$0xff] }
 0x10a   :  { %9841 = vmatpush1.bf16.msra.mxu0 %v15012_v32  ;;  %10374 = vmatpush1.bf16.msra.mxu1 %v15014_v33  ;;  %v15071_v32 = vcombine.high %v608_v26, %v612_v59  ;;  %v615_v33 = vld [vmem:[%s23258_s1 + $0x1240] sm:$0xff] }
 0x10b   :  { %9842 = vmatprep.subr.bf16.mxu0 %v15021_v34  ;;  %10375 = vmatprep.subr.bf16.mxu1 %v15023_v35  ;;  %v619_v34 = vld [vmem:[%s23258_s1 + $0x1260] sm:$0xff]  ;;  %v616_v35 = vld [vmem:[%s23258_s1 + $0x1248] sm:$0xff] }
 0x10c   :  { %v15077_v40 = vcombine.high %v615_v33, %v619_v34  ;;  %v15076_v47 = vcombine.low %v615_v33, %v619_v34  ;;  %v15078_v49 = vcombine.low %v616_v35, %v620_v36  ;;  %v668_v33 = vld [vmem:[%s23258_s1 + $0x13e8] sm:$0xff] }
 0x10e   :  { %9843 = vmatpush1.bf16.msra.mxu0 %v15020_v41  ;;  %10376 = vmatpush1.bf16.msra.mxu1 %v15022_v42  ;;  %v15079_v41 = vcombine.high %v616_v35, %v620_v36  ;;  %v623_v42 = vld [vmem:[%s23258_s1 + $0x1280] sm:$0xff] }
 0x10f   :  { %9844 = vmatprep.subr.bf16.mxu0 %v15029_v44  ;;  %10377 = vmatprep.subr.bf16.mxu1 %v15031_v45  ;;  %v627_v44 = vld [vmem:[%s23258_s1 + $0x12a0] sm:$0xff]  ;;  %v624_v45 = vld [vmem:[%s23258_s1 + $0x1288] sm:$0xff] }
 0x110   :  { %v15085_v50 = vcombine.high %v623_v42, %v627_v44  ;;  %v15084_v57 = vcombine.low %v623_v42, %v627_v44  ;;  %v15086_v60 = vcombine.low %v624_v45, %v628_v46  ;;  %v676_v42 = vld [vmem:[%s23258_s1 + $0x1428] sm:$0xff] }
 0x112   :  { %9845 = vmatpush1.bf16.msra.mxu0 %v15028_v51  ;;  %10378 = vmatpush1.bf16.msra.mxu1 %v15030_v52  ;;  %v15087_v51 = vcombine.high %v624_v45, %v628_v46  ;;  %v631_v52 = vld [vmem:[%s23258_s1 + $0x12c0] sm:$0xff] }
 0x113   :  { %9846 = vmatprep.subr.bf16.mxu0 %v15037_v54  ;;  %10379 = vmatprep.subr.bf16.mxu1 %v15039_v55  ;;  %v635_v54 = vld [vmem:[%s23258_s1 + $0x12e0] sm:$0xff]  ;;  %v632_v55 = vld [vmem:[%s23258_s1 + $0x12c8] sm:$0xff] }
 0x114   :  { %v15093_v61 = vcombine.high %v631_v52, %v635_v54  ;;  %v15092_v5 = vcombine.low %v631_v52, %v635_v54  ;;  %v15094_v6 = vcombine.low %v632_v55, %v636_v56  ;;  %v680_v52 = vld [vmem:[%s23258_s1 + $0x1448] sm:$0xff] }
 0x115   :  { %v684_v54 = vld [vmem:[%s23258_s1 + $0x1468] sm:$0xff] }
 0x116   :  { %9847 = vmatpush1.bf16.msra.mxu0 %v15036_v62  ;;  %10380 = vmatpush1.bf16.msra.mxu1 %v15038_v0  ;;  %v15095_v62 = vcombine.high %v632_v55, %v636_v56  ;;  %v639_v0 = vld [vmem:[%s23258_s1 + $0x1300] sm:$0xff] }
 0x117   :  { %9848 = vmatprep.subr.bf16.mxu0 %v15045_v2  ;;  %10381 = vmatprep.subr.bf16.mxu1 %v15047_v28  ;;  %v643_v2 = vld [vmem:[%s23258_s1 + $0x1320] sm:$0xff]  ;;  %v640_v28 = vld [vmem:[%s23258_s1 + $0x1308] sm:$0xff] }
 0x118   :  { %v15101_v7 = vcombine.high %v639_v0, %v643_v2  ;;  %v15100_v15 = vcombine.low %v639_v0, %v643_v2  ;;  %v15102_v16 = vcombine.low %v640_v28, %v644_v3  ;;  %v688_v0 = vld [vmem:[%s23258_s1 + $0x1488] sm:$0xff] }
 0x119   :  { %v692_v2 = vld [vmem:[%s23258_s1 + $0x14a8] sm:$0xff] }
 0x11a   :  { %9849 = vmatpush1.bf16.msra.mxu0 %v15044_v10  ;;  %10382 = vmatpush1.bf16.msra.mxu1 %v15046_v11  ;;  %v15103_v10 = vcombine.high %v640_v28, %v644_v3  ;;  %v647_v11 = vld [vmem:[%s23258_s1 + $0x1340] sm:$0xff]  ;;  %v15142_v3 = vcombine.low %v680_v52, %v684_v54 }
 0x11b   :  { %9850 = vmatprep.subr.bf16.mxu0 %v15053_v12  ;;  %10383 = vmatprep.subr.bf16.mxu1 %v15055_v13  ;;  %v651_v12 = vld [vmem:[%s23258_s1 + $0x1360] sm:$0xff]  ;;  %v648_v13 = vld [vmem:[%s23258_s1 + $0x1348] sm:$0xff] }
 0x11c   :  { %v15109_v17 = vcombine.high %v647_v11, %v651_v12  ;;  %v15108_v25 = vcombine.low %v647_v11, %v651_v12  ;;  %v15110_v26 = vcombine.low %v648_v13, %v652_v14  ;;  %v696_v11 = vld [vmem:[%s23258_s1 + $0x14c8] sm:$0xff] }
 0x11d   :  { %v700_v12 = vld [vmem:[%s23258_s1 + $0x14e8] sm:$0xff] }
 0x11e   :  { %9851 = vmatpush1.bf16.msra.mxu0 %v15052_v18  ;;  %10384 = vmatpush1.bf16.msra.mxu1 %v15054_v20  ;;  %v15111_v18 = vcombine.high %v648_v13, %v652_v14  ;;  %v655_v20 = vld [vmem:[%s23258_s1 + $0x1380] sm:$0xff]  ;;  %v15150_v14 = vcombine.low %v688_v0, %v692_v2 }
 0x11f   :  { %9852 = vmatprep.subr.bf16.mxu0 %v15061_v21  ;;  %10385 = vmatprep.subr.bf16.mxu1 %v15063_v22  ;;  %v659_v21 = vld [vmem:[%s23258_s1 + $0x13a0] sm:$0xff]  ;;  %v656_v22 = vld [vmem:[%s23258_s1 + $0x1388] sm:$0xff] }
 0x120   :  { %v15117_v59 = vcombine.high %v655_v20, %v659_v21  ;;  %v15116_v34 = vcombine.low %v655_v20, %v659_v21  ;;  %v15118_v35 = vcombine.low %v656_v22, %v660_v24  ;;  %v704_v20 = vld [vmem:[%s23258_s1 + $0x1508] sm:$0xff] }
 0x121   :  { %v708_v21 = vld [vmem:[%s23258_s1 + $0x1528] sm:$0xff] }
 0x122   :  { %9853 = vmatpush1.bf16.msra.mxu0 %v15060_v27  ;;  %10386 = vmatpush1.bf16.msra.mxu1 %v15062_v63  ;;  %v15119_v27 = vcombine.high %v656_v22, %v660_v24  ;;  %v663_v63 = vld [vmem:[%s23258_s1 + $0x13c0] sm:$0xff]  ;;  %v15158_v24 = vcombine.low %v696_v11, %v700_v12 }
 0x123   :  { %9854 = vmatprep.subr.bf16.mxu0 %v15069_v30  ;;  %10387 = vmatprep.subr.bf16.mxu1 %v15071_v32  ;;  %v667_v30 = vld [vmem:[%s23258_s1 + $0x13e0] sm:$0xff]  ;;  %v664_v32 = vld [vmem:[%s23258_s1 + $0x13c8] sm:$0xff] }
 0x124   :  { %v15125_v36 = vcombine.high %v663_v63, %v667_v30  ;;  %v15124_v44 = vcombine.low %v663_v63, %v667_v30  ;;  %v15126_v45 = vcombine.low %v664_v32, %v668_v33  ;;  %v712_v63 = vld [vmem:[%s23258_s1 + $0x1548] sm:$0xff] }
 0x125   :  { %v716_v30 = vld [vmem:[%s23258_s1 + $0x1568] sm:$0xff] }
 0x126   :  { %9855 = vmatpush1.bf16.msra.mxu0 %v15068_v37  ;;  %10388 = vmatpush1.bf16.msra.mxu1 %v15070_v39  ;;  %v15127_v37 = vcombine.high %v664_v32, %v668_v33  ;;  %v671_v39 = vld [vmem:[%s23258_s1 + $0x1400] sm:$0xff]  ;;  %v15166_v33 = vcombine.low %v704_v20, %v708_v21 }
 0x127   :  { %9856 = vmatprep.subr.bf16.mxu0 %v15077_v40  ;;  %10389 = vmatprep.subr.bf16.mxu1 %v15079_v41  ;;  %v675_v40 = vld [vmem:[%s23258_s1 + $0x1420] sm:$0xff]  ;;  %v672_v41 = vld [vmem:[%s23258_s1 + $0x1408] sm:$0xff] }
 0x128   :  { %v15133_v46 = vcombine.high %v671_v39, %v675_v40  ;;  %v15132_v55 = vcombine.low %v671_v39, %v675_v40  ;;  %v15134_v56 = vcombine.low %v672_v41, %v676_v42  ;;  %v720_v39 = vld [vmem:[%s23258_s1 + $0x1588] sm:$0xff] }
 0x129   :  { %v724_v40 = vld [vmem:[%s23258_s1 + $0x15a8] sm:$0xff] }
 0x12a   :  { %9857 = vmatpush1.bf16.msra.mxu0 %v15076_v47  ;;  %10390 = vmatpush1.bf16.msra.mxu1 %v15078_v49  ;;  %v15135_v47 = vcombine.high %v672_v41, %v676_v42  ;;  %v679_v49 = vld [vmem:[%s23258_s1 + $0x1440] sm:$0xff]  ;;  %v15174_v42 = vcombine.low %v712_v63, %v716_v30 }
 0x12b   :  { %9858 = vmatprep.subr.bf16.mxu0 %v15085_v50  ;;  %10391 = vmatprep.subr.bf16.mxu1 %v15087_v51  ;;  %v683_v50 = vld [vmem:[%s23258_s1 + $0x1460] sm:$0xff]  ;;  %v18489_v51 = vrot.slane %v18268_v8, %v17505_v53 }
 0x12c   :  { %v687_v8 = vld [vmem:[%s23258_s1 + $0x1480] sm:$0xff]  ;;  %v15140_v28 = vcombine.low %v679_v49, %v683_v50 }
 0x12e   :  { %9859 = vmatpush1.bf16.msra.mxu0 %v15084_v57  ;;  %10392 = vmatpush1.bf16.msra.mxu1 %v15086_v60  ;;  %v15141_v57 = vcombine.high %v679_v49, %v683_v50  ;;  %v15143_v60 = vcombine.high %v680_v52, %v684_v54  ;;  %v728_v49 = vld [vmem:[%s23258_s1 + $0x15c8] sm:$0xff]  ;;  %v15182_v54 = vcombine.low %v720_v39, %v724_v40 }
 0x12f   :  { %9860 = vmatprep.subr.bf16.mxu0 %v15093_v61  ;;  %10393 = vmatprep.subr.bf16.mxu1 %v15095_v62  ;;  %v691_v61 = vld [vmem:[%s23258_s1 + $0x14a0] sm:$0xff]  ;;  %v18505_v62 = vcombine.high %v18301_v29, %v18301_v29  ;;  %v732_v50 = vld [vmem:[%s23258_s1 + $0x15e8] sm:$0xff] }
 0x130   :  { %v15148_v13 = vcombine.low %v687_v8, %v691_v61 }
 0x132   :  { %9861 = vmatpush1.bf16.msra.mxu0 %v15092_v5  ;;  %10394 = vmatpush1.bf16.msra.mxu1 %v15094_v6  ;;  %v15149_v5 = vcombine.high %v687_v8, %v691_v61  ;;  %v15151_v6 = vcombine.high %v688_v0, %v692_v2  ;;  %v736_v8 = vld [vmem:[%s23258_s1 + $0x1608] sm:$0xff]  ;;  %v15190_v2 = vcombine.low %v728_v49, %v732_v50 }
 0x133   :  { %9862 = vmatprep.subr.bf16.mxu0 %v15101_v7  ;;  %10395 = vmatprep.subr.bf16.mxu1 %v15103_v10  ;;  %v695_v7 = vld [vmem:[%s23258_s1 + $0x14c0] sm:$0xff]  ;;  %v740_v61 = vld [vmem:[%s23258_s1 + $0x1628] sm:$0xff] }
 0x134   :  { %v699_v10 = vld [vmem:[%s23258_s1 + $0x14e0] sm:$0xff] }
 0x135   :  { %v15156_v22 = vcombine.low %v695_v7, %v699_v10 }
 0x136   :  { %9863 = vmatpush1.bf16.msra.mxu0 %v15100_v15  ;;  %10396 = vmatpush1.bf16.msra.mxu1 %v15102_v16  ;;  %v15157_v15 = vcombine.high %v695_v7, %v699_v10  ;;  %v15159_v16 = vcombine.high %v696_v11, %v700_v12  ;;  %v744_v7 = vld [vmem:[%s23258_s1 + $0x1648] sm:$0xff]  ;;  %v15198_v12 = vcombine.low %v736_v8, %v740_v61 }
 0x137   :  { %9864 = vmatprep.subr.bf16.mxu0 %v15109_v17  ;;  %10397 = vmatprep.subr.bf16.mxu1 %v15111_v18  ;;  %v703_v17 = vld [vmem:[%s23258_s1 + $0x1500] sm:$0xff]  ;;  %v748_v10 = vld [vmem:[%s23258_s1 + $0x1668] sm:$0xff] }
 0x138   :  { %v707_v18 = vld [vmem:[%s23258_s1 + $0x1520] sm:$0xff] }
 0x139   :  { %v15164_v32 = vcombine.low %v703_v17, %v707_v18 }
 0x13a   :  { %9865 = vmatpush1.bf16.msra.mxu0 %v15108_v25  ;;  %10398 = vmatpush1.bf16.msra.mxu1 %v15110_v26  ;;  %v15165_v25 = vcombine.high %v703_v17, %v707_v18  ;;  %v15167_v26 = vcombine.high %v704_v20, %v708_v21  ;;  %v752_v17 = vld [vmem:[%s23258_s1 + $0x1688] sm:$0xff]  ;;  %v15206_v21 = vcombine.low %v744_v7, %v748_v10 }
 0x13b   :  { %9866 = vmatprep.subr.bf16.mxu0 %v15117_v59  ;;  %10399 = vmatprep.subr.bf16.mxu1 %v15119_v27  ;;  %v711_v59 = vld [vmem:[%s23258_s1 + $0x1540] sm:$0xff]  ;;  %v756_v18 = vld [vmem:[%s23258_s1 + $0x16a8] sm:$0xff] }
 0x13c   :  { %v715_v27 = vld [vmem:[%s23258_s1 + $0x1560] sm:$0xff] }
 0x13d   :  { %v15172_v41 = vcombine.low %v711_v59, %v715_v27 }
 0x13e   :  { %9867 = vmatpush1.bf16.msra.mxu0 %v15116_v34  ;;  %10400 = vmatpush1.bf16.msra.mxu1 %v15118_v35  ;;  %v15173_v34 = vcombine.high %v711_v59, %v715_v27  ;;  %v15175_v35 = vcombine.high %v712_v63, %v716_v30  ;;  %v760_v59 = vld [vmem:[%s23258_s1 + $0x16c8] sm:$0xff]  ;;  %v15214_v30 = vcombine.low %v752_v17, %v756_v18 }
 0x13f   :  { %9868 = vmatprep.subr.bf16.mxu0 %v15125_v36  ;;  %10401 = vmatprep.subr.bf16.mxu1 %v15127_v37  ;;  %v719_v36 = vld [vmem:[%s23258_s1 + $0x1580] sm:$0xff]  ;;  %v764_v27 = vld [vmem:[%s23258_s1 + $0x16e8] sm:$0xff] }
 0x140   :  { %v723_v37 = vld [vmem:[%s23258_s1 + $0x15a0] sm:$0xff] }
 0x141   :  { %v15180_v52 = vcombine.low %v719_v36, %v723_v37 }
 0x142   :  { %9869 = vmatpush1.bf16.msra.mxu0 %v15124_v44  ;;  %10402 = vmatpush1.bf16.msra.mxu1 %v15126_v45  ;;  %v15181_v44 = vcombine.high %v719_v36, %v723_v37  ;;  %v15183_v45 = vcombine.high %v720_v39, %v724_v40  ;;  %v768_v36 = vld [vmem:[%s23258_s1 + $0x1708] sm:$0xff]  ;;  %v15222_v40 = vcombine.low %v760_v59, %v764_v27 }
 0x143   :  { %9879 = vmatprep.subr.bf16.mxu0 %v15133_v46  ;;  %10412 = vmatprep.subr.bf16.mxu1 %v15135_v47  ;;  %v727_v46 = vld [vmem:[%s23258_s1 + $0x15c0] sm:$0xff]  ;;  %v772_v37 = vld [vmem:[%s23258_s1 + $0x1728] sm:$0xff] }
 0x144   :  { %v731_v47 = vld [vmem:[%s23258_s1 + $0x15e0] sm:$0xff] }
 0x145   :  { %9871 = vmatmul.mubr.bf16.vlgmr.msra.gmra.mrb[0].mxu0 %v18489_v51  ;;  %10404 = vmatmul.mubr.bf16.vlgmr.msra.gmra.mrb[0].mxu1 %v18489_v51  ;;  %v15188_v0 = vcombine.low %v727_v46, %v731_v47 }
 0x146   :  { %9880 = vmatpush1.bf16.msra.mxu0 %v15132_v55  ;;  %10413 = vmatpush1.bf16.msra.mxu1 %v15134_v56  ;;  %v15189_v55 = vcombine.high %v727_v46, %v731_v47  ;;  %v15191_v56 = vcombine.high %v728_v49, %v732_v50  ;;  %v776_v46 = vld [vmem:[%s23258_s1 + $0x1748] sm:$0xff]  ;;  %v15230_v50 = vcombine.low %v768_v36, %v772_v37 }
 0x147   :  { %9881 = vmatprep.subr.bf16.mxu0 %v15141_v57  ;;  %10414 = vmatprep.subr.bf16.mxu1 %v15143_v60  ;;  %v735_v57 = vld [vmem:[%s23258_s1 + $0x1600] sm:$0xff]  ;;  %v780_v47 = vld [vmem:[%s23258_s1 + $0x1768] sm:$0xff] }
 0x148   :  { %9911 = vmatprep.mubr.bf16.mxu0 %v18505_v62  ;;  %10444 = vmatprep.mubr.bf16.mxu1 %v18505_v62  ;;  %v739_v60 = vld [vmem:[%s23258_s1 + $0x1620] sm:$0xff] }
 0x149   :  { %v15196_v11 = vcombine.low %v735_v57, %v739_v60 }
 0x14a   :  { %9882 = vmatpush1.bf16.msra.mxu0 %v15140_v28  ;;  %10415 = vmatpush1.bf16.msra.mxu1 %v15142_v3  ;;  %v15197_v28 = vcombine.high %v735_v57, %v739_v60  ;;  %v15199_v3 = vcombine.high %v736_v8, %v740_v61  ;;  %v784_v57 = vld [vmem:[%s23258_s1 + $0x1788] sm:$0xff]  ;;  %v15238_v61 = vcombine.low %v776_v46, %v780_v47 }
 0x14b   :  { %9883 = vmatprep.subr.bf16.mxu0 %v15149_v5  ;;  %10416 = vmatprep.subr.bf16.mxu1 %v15151_v6  ;;  %v743_v5 = vld [vmem:[%s23258_s1 + $0x1640] sm:$0xff]  ;;  %v788_v60 = vld [vmem:[%s23258_s1 + $0x17a8] sm:$0xff] }
 0x14c   :  { %v747_v6 = vld [vmem:[%s23258_s1 + $0x1660] sm:$0xff] }
 0x14d   :  { %v15204_v20 = vcombine.low %v743_v5, %v747_v6 }
 0x14e   :  { %9884 = vmatpush1.bf16.msra.mxu0 %v15148_v13  ;;  %10417 = vmatpush1.bf16.msra.mxu1 %v15150_v14  ;;  %v15205_v13 = vcombine.high %v743_v5, %v747_v6  ;;  %v15207_v14 = vcombine.high %v744_v7, %v748_v10  ;;  %v1694_v5 = vcombine.high %v18258_v1, %v18258_v1  ;;  %v792_v6 = vld [vmem:[%s23258_s1 + $0x17c8] sm:$0xff]  ;;  %v799_v1 = vld [vmem:[%s23258_s1 + $0x1800] sm:$0xff] }
 0x14f   :  { %9885 = vmatprep.subr.bf16.mxu0 %v15157_v15  ;;  %10418 = vmatprep.subr.bf16.mxu1 %v15159_v16  ;;  %v751_v15 = vld [vmem:[%s23258_s1 + $0x1680] sm:$0xff]  ;;  %v796_v7 = vld [vmem:[%s23258_s1 + $0x17e8] sm:$0xff] }
 0x150   :  { %v755_v16 = vld [vmem:[%s23258_s1 + $0x16a0] sm:$0xff] }
 0x151   :  { %v15212_v63 = vcombine.low %v751_v15, %v755_v16 }
 0x152   :  { %9886 = vmatpush1.bf16.msra.mxu0 %v15156_v22  ;;  %10419 = vmatpush1.bf16.msra.mxu1 %v15158_v24  ;;  %v15213_v22 = vcombine.high %v751_v15, %v755_v16  ;;  %v15215_v24 = vcombine.high %v752_v17, %v756_v18  ;;  %v18682_v15 = vrot.slane %v1694_v5, %v17505_v53  ;;  %v800_v16 = vld [vmem:[%s23258_s1 + $0x1808] sm:$0xff]  ;;  %v839_v5 = vld [vmem:[%s23258_s1 + $0x1940] sm:$0xff] }
 0x153   :  { %9887 = vmatprep.subr.bf16.mxu0 %v15165_v25  ;;  %10420 = vmatprep.subr.bf16.mxu1 %v15167_v26  ;;  %v759_v25 = vld [vmem:[%s23258_s1 + $0x16c0] sm:$0xff]  ;;  %v804_v17 = vld [vmem:[%s23258_s1 + $0x1828] sm:$0xff] }
 0x154   :  { %v763_v26 = vld [vmem:[%s23258_s1 + $0x16e0] sm:$0xff] }
 0x155   :  { %v15220_v39 = vcombine.low %v759_v25, %v763_v26 }
 0x156   :  { %9888 = vmatpush1.bf16.msra.mxu0 %v15164_v32  ;;  %10421 = vmatpush1.bf16.msra.mxu1 %v15166_v33  ;;  %v15221_v32 = vcombine.high %v759_v25, %v763_v26  ;;  %v15223_v33 = vcombine.high %v760_v59, %v764_v27  ;;  %v811_v25 = vld [vmem:[%s23258_s1 + $0x1860] sm:$0xff]  ;;  %v1710_v26 = vcombine.high %v18682_v15, %v18682_v15  ;;  %v808_v27 = vld [vmem:[%s23258_s1 + $0x1848] sm:$0xff] }
 0x157   :  { %9889 = vmatprep.subr.bf16.mxu0 %v15173_v34  ;;  %10422 = vmatprep.subr.bf16.mxu1 %v15175_v35  ;;  %v767_v34 = vld [vmem:[%s23258_s1 + $0x1700] sm:$0xff]  ;;  %v18700_v59 = vcombine.high %v18489_v51, %v18489_v51 }
 0x158   :  { %v771_v35 = vld [vmem:[%s23258_s1 + $0x1720] sm:$0xff] }
 0x159   :  { %v15228_v49 = vcombine.low %v767_v34, %v771_v35 }
 0x15a   :  { %9890 = vmatpush1.bf16.msra.mxu0 %v15172_v41  ;;  %10423 = vmatpush1.bf16.msra.mxu1 %v15174_v42  ;;  %v15229_v41 = vcombine.high %v767_v34, %v771_v35  ;;  %v15231_v42 = vcombine.high %v768_v36, %v772_v37  ;;  %v815_v35 = vld [vmem:[%s23258_s1 + $0x1880] sm:$0xff]  ;;  %v18715_v37 = vrot.slane %v1710_v26, %v17505_v53 }
 0x15b   :  { %9891 = vmatprep.subr.bf16.mxu0 %v15181_v44  ;;  %10424 = vmatprep.subr.bf16.mxu1 %v15183_v45  ;;  %v775_v44 = vld [vmem:[%s23258_s1 + $0x1740] sm:$0xff] }
 0x15c   :  { %v779_v45 = vld [vmem:[%s23258_s1 + $0x1760] sm:$0xff] }
 0x15d   :  { %v15236_v8 = vcombine.low %v775_v44, %v779_v45  ;;  %v819_v36 = vld [vmem:[%s23258_s1 + $0x18a0] sm:$0xff] }
 0x15e   :  { %9892 = vmatpush1.bf16.msra.mxu0 %v15180_v52  ;;  %10425 = vmatpush1.bf16.msra.mxu1 %v15182_v54  ;;  %v15237_v52 = vcombine.high %v775_v44, %v779_v45  ;;  %v15239_v54 = vcombine.high %v776_v46, %v780_v47  ;;  %v15277_v44 = vcombine.high %v815_v35, %v819_v36  ;;  %v823_v46 = vld [vmem:[%s23258_s1 + $0x18c0] sm:$0xff] }
 0x15f   :  { %9893 = vmatprep.subr.bf16.mxu0 %v15189_v55  ;;  %10426 = vmatprep.subr.bf16.mxu1 %v15191_v56  ;;  %v783_v55 = vld [vmem:[%s23258_s1 + $0x1780] sm:$0xff] }
 0x160   :  { %v787_v56 = vld [vmem:[%s23258_s1 + $0x17a0] sm:$0xff] }
 0x161   :  { %v15244_v10 = vcombine.low %v783_v55, %v787_v56  ;;  %v827_v47 = vld [vmem:[%s23258_s1 + $0x18e0] sm:$0xff] }
 0x162   :  { %9894 = vmatpush1.bf16.msra.mxu0 %v15188_v0  ;;  %10427 = vmatpush1.bf16.msra.mxu1 %v15190_v2  ;;  %v15245_v0 = vcombine.high %v783_v55, %v787_v56  ;;  %v15247_v2 = vcombine.high %v784_v57, %v788_v60  ;;  %v15285_v55 = vcombine.high %v823_v46, %v827_v47  ;;  %v859_v26 = vld [vmem:[%s23258_s1 + $0x19e0] sm:$0xff] }
 0x163   :  { %9895 = vmatprep.subr.bf16.mxu0 %v15197_v28  ;;  %10428 = vmatprep.subr.bf16.mxu1 %v15199_v3  ;;  %v791_v28 = vld [vmem:[%s23258_s1 + $0x17c0] sm:$0xff] }
 0x164   :  { %v795_v3 = vld [vmem:[%s23258_s1 + $0x17e0] sm:$0xff] }
 0x165   :  { %v15252_v18 = vcombine.low %v791_v28, %v795_v3 }
 0x166   :  { %9896 = vmatpush1.bf16.msra.mxu0 %v15196_v11  ;;  %10429 = vmatpush1.bf16.msra.mxu1 %v15198_v12  ;;  %v15246_v11 = vcombine.low %v784_v57, %v788_v60  ;;  %v15253_v12 = vcombine.high %v791_v28, %v795_v3  ;;  %v831_v57 = vld [vmem:[%s23258_s1 + $0x1900] sm:$0xff] }
 0x167   :  { %9897 = vmatprep.subr.bf16.mxu0 %v15205_v13  ;;  %10430 = vmatprep.subr.bf16.mxu1 %v15207_v14  ;;  %v15255_v13 = vcombine.high %v792_v6, %v796_v7  ;;  %v803_v14 = vld [vmem:[%s23258_s1 + $0x1820] sm:$0xff] }
 0x168   :  { %v835_v60 = vld [vmem:[%s23258_s1 + $0x1920] sm:$0xff] }
 0x169   :  { %v15293_v28 = vcombine.high %v831_v57, %v835_v60 }
 0x16a   :  { %9898 = vmatpush1.bf16.msra.mxu0 %v15204_v20  ;;  %10431 = vmatpush1.bf16.msra.mxu1 %v15206_v21  ;;  %v15254_v20 = vcombine.low %v792_v6, %v796_v7  ;;  %v15261_v21 = vcombine.high %v799_v1, %v803_v14  ;;  %v843_v6 = vld [vmem:[%s23258_s1 + $0x1960] sm:$0xff]  ;;  %v840_v7 = vld [vmem:[%s23258_s1 + $0x1948] sm:$0xff] }
 0x16b   :  { %9899 = vmatprep.subr.bf16.mxu0 %v15213_v22  ;;  %10432 = vmatprep.subr.bf16.mxu1 %v15215_v24  ;;  %v15263_v22 = vcombine.high %v800_v16, %v804_v17  ;;  %v807_v24 = vld [vmem:[%s23258_s1 + $0x1840] sm:$0xff] }
 0x16e   :  { %9900 = vmatpush1.bf16.msra.mxu0 %v15212_v63  ;;  %10433 = vmatpush1.bf16.msra.mxu1 %v15214_v30  ;;  %v812_v63 = vld [vmem:[%s23258_s1 + $0x1868] sm:$0xff]  ;;  %v15260_v30 = vcombine.low %v799_v1, %v803_v14  ;;  %v847_v14 = vld [vmem:[%s23258_s1 + $0x1980] sm:$0xff] }
 0x16f   :  { %9901 = vmatprep.subr.bf16.mxu0 %v15221_v32  ;;  %10434 = vmatprep.subr.bf16.mxu1 %v15223_v33  ;;  %v15262_v32 = vcombine.low %v800_v16, %v804_v17  ;;  %v15269_v33 = vcombine.high %v807_v24, %v811_v25  ;;  %v15271_v34 = vcombine.high %v808_v27, %v812_v63  ;;  %v851_v16 = vld [vmem:[%s23258_s1 + $0x19a0] sm:$0xff]  ;;  %v848_v17 = vld [vmem:[%s23258_s1 + $0x1988] sm:$0xff] }
 0x172   :  { %9902 = vmatpush1.bf16.msra.mxu0 %v15220_v39  ;;  %10435 = vmatpush1.bf16.msra.mxu1 %v15222_v40  ;;  %v816_v39 = vld [vmem:[%s23258_s1 + $0x1888] sm:$0xff] }
 0x173   :  { %9903 = vmatprep.subr.bf16.mxu0 %v15229_v41  ;;  %10436 = vmatprep.subr.bf16.mxu1 %v15231_v42  ;;  %v820_v40 = vld [vmem:[%s23258_s1 + $0x18a8] sm:$0xff]  ;;  %v15268_v41 = vcombine.low %v807_v24, %v811_v25  ;;  %v15270_v42 = vcombine.low %v808_v27, %v812_v63  ;;  %v855_v25 = vld [vmem:[%s23258_s1 + $0x19c0] sm:$0xff] }
 0x174   :  { %v15279_v45 = vcombine.high %v816_v39, %v820_v40  ;;  %v856_v27 = vld [vmem:[%s23258_s1 + $0x19c8] sm:$0xff] }
 0x175   :  { %v860_v63 = vld [vmem:[%s23258_s1 + $0x19e8] sm:$0xff] }
 0x176   :  { %9904 = vmatpush1.bf16.msra.mxu0 %v15228_v49  ;;  %10437 = vmatpush1.bf16.msra.mxu1 %v15230_v50  ;;  %v824_v49 = vld [vmem:[%s23258_s1 + $0x18c8] sm:$0xff] }
 0x177   :  { %9905 = vmatprep.subr.bf16.mxu0 %v15237_v52  ;;  %10438 = vmatprep.subr.bf16.mxu1 %v15239_v54  ;;  %v828_v50 = vld [vmem:[%s23258_s1 + $0x18e8] sm:$0xff]  ;;  %v15276_v52 = vcombine.low %v815_v35, %v819_v36  ;;  %v15278_v54 = vcombine.low %v816_v39, %v820_v40  ;;  %v863_v35 = vld [vmem:[%s23258_s1 + $0x1a00] sm:$0xff] }
 0x178   :  { %v15287_v56 = vcombine.high %v824_v49, %v828_v50  ;;  %v867_v36 = vld [vmem:[%s23258_s1 + $0x1a20] sm:$0xff]  ;;  %v864_v39 = vld [vmem:[%s23258_s1 + $0x1a08] sm:$0xff] }
 0x179   :  { %v868_v40 = vld [vmem:[%s23258_s1 + $0x1a28] sm:$0xff] }
 0x17a   :  { %9906 = vmatpush1.bf16.msra.mxu0 %v15236_v8  ;;  %10439 = vmatpush1.bf16.msra.mxu1 %v15238_v61  ;;  %v832_v8 = vld [vmem:[%s23258_s1 + $0x1908] sm:$0xff] }
 0x17b   :  { %9907 = vmatprep.subr.bf16.mxu0 %v15245_v0  ;;  %10440 = vmatprep.subr.bf16.mxu1 %v15247_v2  ;;  %v836_v61 = vld [vmem:[%s23258_s1 + $0x1928] sm:$0xff]  ;;  %v15284_v0 = vcombine.low %v823_v46, %v827_v47  ;;  %v15286_v2 = vcombine.low %v824_v49, %v828_v50  ;;  %v871_v46 = vld [vmem:[%s23258_s1 + $0x1a40] sm:$0xff] }
 0x17c   :  { %v15295_v3 = vcombine.high %v832_v8, %v836_v61  ;;  %v875_v47 = vld [vmem:[%s23258_s1 + $0x1a60] sm:$0xff]  ;;  %v872_v49 = vld [vmem:[%s23258_s1 + $0x1a48] sm:$0xff] }
 0x17d   :  { %v876_v50 = vld [vmem:[%s23258_s1 + $0x1a68] sm:$0xff] }
 0x17e   :  { %9908 = vmatpush1.bf16.msra.mxu0 %v15244_v10  ;;  %10441 = vmatpush1.bf16.msra.mxu1 %v15246_v11  ;;  %v844_v10 = vld [vmem:[%s23258_s1 + $0x1968] sm:$0xff]  ;;  %v15292_v11 = vcombine.low %v831_v57, %v835_v60  ;;  %v879_v57 = vld [vmem:[%s23258_s1 + $0x1a80] sm:$0xff] }
 0x17f   :  { %9909 = vmatprep.subr.bf16.mxu0 %v15253_v12  ;;  %10442 = vmatprep.subr.bf16.mxu1 %v15255_v13  ;;  %v15294_v12 = vcombine.low %v832_v8, %v836_v61  ;;  %v15301_v13 = vcombine.high %v839_v5, %v843_v6  ;;  %v15303_v1 = vcombine.high %v840_v7, %v844_v10  ;;  %v883_v60 = vld [vmem:[%s23258_s1 + $0x1aa0] sm:$0xff]  ;;  %v880_v8 = vld [vmem:[%s23258_s1 + $0x1a88] sm:$0xff] }
 0x180   :  { %v884_v61 = vld [vmem:[%s23258_s1 + $0x1aa8] sm:$0xff] }
 0x182   :  { %9910 = vmatpush1.bf16.msra.mxu0 %v15252_v18  ;;  %10443 = vmatpush1.bf16.msra.mxu1 %v15254_v20  ;;  %v852_v18 = vld [vmem:[%s23258_s1 + $0x19a8] sm:$0xff]  ;;  %v15300_v20 = vcombine.low %v839_v5, %v843_v6  ;;  %v887_v5 = vld [vmem:[%s23258_s1 + $0x1ac0] sm:$0xff] }
 0x183   :  { %9920 = vmatprep.subr.bf16.mxu0 %v15261_v21  ;;  %10453 = vmatprep.subr.bf16.mxu1 %v15263_v22  ;;  %v15302_v21 = vcombine.low %v840_v7, %v844_v10  ;;  %v15309_v22 = vcombine.high %v847_v14, %v851_v16  ;;  %v15311_v24 = vcombine.high %v848_v17, %v852_v18  ;;  %v891_v6 = vld [vmem:[%s23258_s1 + $0x1ae0] sm:$0xff]  ;;  %v888_v7 = vld [vmem:[%s23258_s1 + $0x1ac8] sm:$0xff] }
 0x184   :  { %v892_v10 = vld [vmem:[%s23258_s1 + $0x1ae8] sm:$0xff] }
 0x185   :  { %9912 = vmatmul.mubr.bf16.vlgmr.msra.gmra.mrb[0].mxu0 %v18700_v59  ;;  %10445 = vmatmul.mubr.bf16.vlgmr.msra.gmra.mrb[0].mxu1 %v18700_v59 }
 0x186   :  { %9921 = vmatpush1.bf16.msra.mxu0 %v15260_v30  ;;  %10454 = vmatpush1.bf16.msra.mxu1 %v15262_v32  ;;  %v15308_v30 = vcombine.low %v847_v14, %v851_v16  ;;  %v15310_v32 = vcombine.low %v848_v17, %v852_v18  ;;  %v895_v14 = vld [vmem:[%s23258_s1 + $0x1b00] sm:$0xff]  ;;  %v896_v17 = vld [vmem:[%s23258_s1 + $0x1b08] sm:$0xff] }
 0x187   :  { %9922 = vmatprep.subr.bf16.mxu0 %v15269_v33  ;;  %10455 = vmatprep.subr.bf16.mxu1 %v15271_v34  ;;  %v15317_v33 = vcombine.high %v855_v25, %v859_v26  ;;  %v15319_v34 = vcombine.high %v856_v27, %v860_v63  ;;  %v899_v16 = vld [vmem:[%s23258_s1 + $0x1b20] sm:$0xff]  ;;  %v900_v18 = vld [vmem:[%s23258_s1 + $0x1b28] sm:$0xff] }
 0x188   :  { %9952 = vmatprep.mubr.bf16.mxu0 %v18715_v37  ;;  %10485 = vmatprep.mubr.bf16.mxu1 %v18715_v37 }
 0x18a   :  { %9923 = vmatpush1.bf16.msra.mxu0 %v15268_v41  ;;  %10456 = vmatpush1.bf16.msra.mxu1 %v15270_v42  ;;  %v15316_v41 = vcombine.low %v855_v25, %v859_v26  ;;  %v15318_v42 = vcombine.low %v856_v27, %v860_v63  ;;  %v903_v25 = vld [vmem:[%s23258_s1 + $0x1b40] sm:$0xff]  ;;  %v904_v27 = vld [vmem:[%s23258_s1 + $0x1b48] sm:$0xff] }
 0x18b   :  { %9924 = vmatprep.subr.bf16.mxu0 %v15277_v44  ;;  %10457 = vmatprep.subr.bf16.mxu1 %v15279_v45  ;;  %v15325_v44 = vcombine.high %v863_v35, %v867_v36  ;;  %v15327_v45 = vcombine.high %v864_v39, %v868_v40  ;;  %v907_v26 = vld [vmem:[%s23258_s1 + $0x1b60] sm:$0xff]  ;;  %v908_v63 = vld [vmem:[%s23258_s1 + $0x1b68] sm:$0xff] }
 0x18e   :  { %9925 = vmatpush1.bf16.msra.mxu0 %v15276_v52  ;;  %10458 = vmatpush1.bf16.msra.mxu1 %v15278_v54  ;;  %v15324_v52 = vcombine.low %v863_v35, %v867_v36  ;;  %v15326_v54 = vcombine.low %v864_v39, %v868_v40  ;;  %v911_v35 = vld [vmem:[%s23258_s1 + $0x1b80] sm:$0xff]  ;;  %v912_v39 = vld [vmem:[%s23258_s1 + $0x1b88] sm:$0xff] }
 0x18f   :  { %9926 = vmatprep.subr.bf16.mxu0 %v15285_v55  ;;  %10459 = vmatprep.subr.bf16.mxu1 %v15287_v56  ;;  %v15333_v55 = vcombine.high %v871_v46, %v875_v47  ;;  %v15335_v56 = vcombine.high %v872_v49, %v876_v50  ;;  %v915_v36 = vld [vmem:[%s23258_s1 + $0x1ba0] sm:$0xff]  ;;  %v916_v40 = vld [vmem:[%s23258_s1 + $0x1ba8] sm:$0xff] }
 0x192   :  { %9927 = vmatpush1.bf16.msra.mxu0 %v15284_v0  ;;  %10460 = vmatpush1.bf16.msra.mxu1 %v15286_v2  ;;  %v15332_v0 = vcombine.low %v871_v46, %v875_v47  ;;  %v15334_v2 = vcombine.low %v872_v49, %v876_v50  ;;  %v919_v46 = vld [vmem:[%s23258_s1 + $0x1bc0] sm:$0xff]  ;;  %v920_v49 = vld [vmem:[%s23258_s1 + $0x1bc8] sm:$0xff] }
 0x193   :  { %9928 = vmatprep.subr.bf16.mxu0 %v15293_v28  ;;  %10461 = vmatprep.subr.bf16.mxu1 %v15295_v3  ;;  %v15341_v28 = vcombine.high %v879_v57, %v883_v60  ;;  %v15343_v3 = vcombine.high %v880_v8, %v884_v61  ;;  %v923_v47 = vld [vmem:[%s23258_s1 + $0x1be0] sm:$0xff]  ;;  %v924_v50 = vld [vmem:[%s23258_s1 + $0x1be8] sm:$0xff] }
 0x196   :  { %9929 = vmatpush1.bf16.msra.mxu0 %v15292_v11  ;;  %10462 = vmatpush1.bf16.msra.mxu1 %v15294_v12  ;;  %v15340_v11 = vcombine.low %v879_v57, %v883_v60  ;;  %v15342_v12 = vcombine.low %v880_v8, %v884_v61  ;;  %v927_v57 = vld [vmem:[%s23258_s1 + $0x1c00] sm:$0xff]  ;;  %v928_v8 = vld [vmem:[%s23258_s1 + $0x1c08] sm:$0xff] }
 0x197   :  { %9930 = vmatprep.subr.bf16.mxu0 %v15301_v13  ;;  %10463 = vmatprep.subr.bf16.mxu1 %v15303_v1  ;;  %v15349_v13 = vcombine.high %v887_v5, %v891_v6  ;;  %v15351_v1 = vcombine.high %v888_v7, %v892_v10  ;;  %v931_v60 = vld [vmem:[%s23258_s1 + $0x1c20] sm:$0xff]  ;;  %v932_v61 = vld [vmem:[%s23258_s1 + $0x1c28] sm:$0xff] }
 0x19a   :  { %9931 = vmatpush1.bf16.msra.mxu0 %v15300_v20  ;;  %10464 = vmatpush1.bf16.msra.mxu1 %v15302_v21  ;;  %v15348_v20 = vcombine.low %v887_v5, %v891_v6  ;;  %v15350_v21 = vcombine.low %v888_v7, %v892_v10  ;;  %v935_v5 = vld [vmem:[%s23258_s1 + $0x1c40] sm:$0xff]  ;;  %v18903_v7 = vrot.slane %v18682_v15, %v17505_v53  ;;  %v936_v10 = vld [vmem:[%s23258_s1 + $0x1c48] sm:$0xff] }
 0x19b   :  { %9932 = vmatprep.subr.bf16.mxu0 %v15309_v22  ;;  %10465 = vmatprep.subr.bf16.mxu1 %v15311_v24  ;;  %v15357_v22 = vcombine.high %v895_v14, %v899_v16  ;;  %v15359_v24 = vcombine.high %v896_v17, %v900_v18  ;;  %v939_v6 = vld [vmem:[%s23258_s1 + $0x1c60] sm:$0xff] }
 0x19c   :  { %v943_v15 = vld [vmem:[%s23258_s1 + $0x1c80] sm:$0xff] }
 0x19e   :  { %9933 = vmatpush1.bf16.msra.mxu0 %v15308_v30  ;;  %10466 = vmatpush1.bf16.msra.mxu1 %v15310_v32  ;;  %v15356_v30 = vcombine.low %v895_v14, %v899_v16  ;;  %v15358_v32 = vcombine.low %v896_v17, %v900_v18  ;;  %v947_v16 = vld [vmem:[%s23258_s1 + $0x1ca0] sm:$0xff]  ;;  %v18919_v17 = vcombine.high %v18715_v37, %v18715_v37  ;;  %v944_v18 = vld [vmem:[%s23258_s1 + $0x1c88] sm:$0xff] }
 0x19f   :  { %9934 = vmatprep.subr.bf16.mxu0 %v15317_v33  ;;  %10467 = vmatprep.subr.bf16.mxu1 %v15319_v34  ;;  %v15365_v33 = vcombine.high %v903_v25, %v907_v26  ;;  %v15367_v34 = vcombine.high %v904_v27, %v908_v63 }
 0x1a2   :  { %9935 = vmatpush1.bf16.msra.mxu0 %v15316_v41  ;;  %10468 = vmatpush1.bf16.msra.mxu1 %v15318_v42  ;;  %v15364_v41 = vcombine.low %v903_v25, %v907_v26  ;;  %v15366_v42 = vcombine.low %v904_v27, %v908_v63  ;;  %v951_v26 = vld [vmem:[%s23258_s1 + $0x1cc0] sm:$0xff]  ;;  %v952_v63 = vld [vmem:[%s23258_s1 + $0x1cc8] sm:$0xff] }
 0x1a3   :  { %9936 = vmatprep.subr.bf16.mxu0 %v15325_v44  ;;  %10469 = vmatprep.subr.bf16.mxu1 %v15327_v45  ;;  %v15373_v44 = vcombine.high %v911_v35, %v915_v36  ;;  %v15375_v45 = vcombine.high %v912_v39, %v916_v40  ;;  %v955_v27 = vld [vmem:[%s23258_s1 + $0x1ce0] sm:$0xff] }
 0x1a6   :  { %9937 = vmatpush1.bf16.msra.mxu0 %v15324_v52  ;;  %10470 = vmatpush1.bf16.msra.mxu1 %v15326_v54  ;;  %v15372_v52 = vcombine.low %v911_v35, %v915_v36  ;;  %v15374_v54 = vcombine.low %v912_v39, %v916_v40  ;;  %v959_v36 = vld [vmem:[%s23258_s1 + $0x1d00] sm:$0xff]  ;;  %v960_v40 = vld [vmem:[%s23258_s1 + $0x1d08] sm:$0xff] }
 0x1a7   :  { %9938 = vmatprep.subr.bf16.mxu0 %v15333_v55  ;;  %10471 = vmatprep.subr.bf16.mxu1 %v15335_v56  ;;  %v15381_v55 = vcombine.high %v919_v46, %v923_v47  ;;  %v15383_v56 = vcombine.high %v920_v49, %v924_v50  ;;  %v963_v39 = vld [vmem:[%s23258_s1 + $0x1d20] sm:$0xff] }
 0x1aa   :  { %9939 = vmatpush1.bf16.msra.mxu0 %v15332_v0  ;;  %10472 = vmatpush1.bf16.msra.mxu1 %v15334_v2  ;;  %v15380_v0 = vcombine.low %v919_v46, %v923_v47  ;;  %v15382_v2 = vcombine.low %v920_v49, %v924_v50  ;;  %v967_v47 = vld [vmem:[%s23258_s1 + $0x1d40] sm:$0xff]  ;;  %v968_v50 = vld [vmem:[%s23258_s1 + $0x1d48] sm:$0xff] }
 0x1ab   :  { %9940 = vmatprep.subr.bf16.mxu0 %v15341_v28  ;;  %10473 = vmatprep.subr.bf16.mxu1 %v15343_v3  ;;  %v15389_v28 = vcombine.high %v927_v57, %v931_v60  ;;  %v15391_v3 = vcombine.high %v928_v8, %v932_v61  ;;  %v971_v49 = vld [vmem:[%s23258_s1 + $0x1d60] sm:$0xff] }
 0x1ae   :  { %9941 = vmatpush1.bf16.msra.mxu0 %v15340_v11  ;;  %10474 = vmatpush1.bf16.msra.mxu1 %v15342_v12  ;;  %v940_v11 = vld [vmem:[%s23258_s1 + $0x1c68] sm:$0xff]  ;;  %v15388_v12 = vcombine.low %v927_v57, %v931_v60  ;;  %v975_v60 = vld [vmem:[%s23258_s1 + $0x1d80] sm:$0xff] }
 0x1af   :  { %9942 = vmatprep.subr.bf16.mxu0 %v15349_v13  ;;  %10475 = vmatprep.subr.bf16.mxu1 %v15351_v1  ;;  %v15390_v13 = vcombine.low %v928_v8, %v932_v61  ;;  %v15397_v1 = vcombine.high %v935_v5, %v939_v6  ;;  %v15399_v14 = vcombine.high %v936_v10, %v940_v11  ;;  %v979_v8 = vld [vmem:[%s23258_s1 + $0x1da0] sm:$0xff]  ;;  %v976_v61 = vld [vmem:[%s23258_s1 + $0x1d88] sm:$0xff] }
 0x1b2   :  { %9943 = vmatpush1.bf16.msra.mxu0 %v15348_v20  ;;  %10476 = vmatpush1.bf16.msra.mxu1 %v15350_v21  ;;  %v948_v20 = vld [vmem:[%s23258_s1 + $0x1ca8] sm:$0xff]  ;;  %v15396_v21 = vcombine.low %v935_v5, %v939_v6  ;;  %v983_v6 = vld [vmem:[%s23258_s1 + $0x1dc0] sm:$0xff] }
 0x1b3   :  { %9944 = vmatprep.subr.bf16.mxu0 %v15357_v22  ;;  %10477 = vmatprep.subr.bf16.mxu1 %v15359_v24  ;;  %v15398_v22 = vcombine.low %v936_v10, %v940_v11  ;;  %v15405_v24 = vcombine.high %v943_v15, %v947_v16  ;;  %v15407_v25 = vcombine.high %v944_v18, %v948_v20  ;;  %v987_v10 = vld [vmem:[%s23258_s1 + $0x1de0] sm:$0xff]  ;;  %v984_v11 = vld [vmem:[%s23258_s1 + $0x1dc8] sm:$0xff] }
 0x1b6   :  { %9945 = vmatpush1.bf16.msra.mxu0 %v15356_v30  ;;  %10478 = vmatpush1.bf16.msra.mxu1 %v15358_v32  ;;  %v956_v30 = vld [vmem:[%s23258_s1 + $0x1ce8] sm:$0xff]  ;;  %v15404_v32 = vcombine.low %v943_v15, %v947_v16  ;;  %v991_v16 = vld [vmem:[%s23258_s1 + $0x1e00] sm:$0xff] }
 0x1b7   :  { %9946 = vmatprep.subr.bf16.mxu0 %v15365_v33  ;;  %10479 = vmatprep.subr.bf16.mxu1 %v15367_v34  ;;  %v15406_v33 = vcombine.low %v944_v18, %v948_v20  ;;  %v15413_v34 = vcombine.high %v951_v26, %v955_v27  ;;  %v15415_v35 = vcombine.high %v952_v63, %v956_v30  ;;  %v995_v18 = vld [vmem:[%s23258_s1 + $0x1e20] sm:$0xff]  ;;  %v992_v20 = vld [vmem:[%s23258_s1 + $0x1e08] sm:$0xff] }
 0x1ba   :  { %9947 = vmatpush1.bf16.msra.mxu0 %v15364_v41  ;;  %10480 = vmatpush1.bf16.msra.mxu1 %v15366_v42  ;;  %v964_v41 = vld [vmem:[%s23258_s1 + $0x1d28] sm:$0xff]  ;;  %v15412_v42 = vcombine.low %v951_v26, %v955_v27  ;;  %v999_v27 = vld [vmem:[%s23258_s1 + $0x1e40] sm:$0xff] }
 0x1bb   :  { %9948 = vmatprep.subr.bf16.mxu0 %v15373_v44  ;;  %10481 = vmatprep.subr.bf16.mxu1 %v15375_v45  ;;  %v15414_v44 = vcombine.low %v952_v63, %v956_v30  ;;  %v15421_v45 = vcombine.high %v959_v36, %v963_v39  ;;  %v15423_v46 = vcombine.high %v960_v40, %v964_v41  ;;  %v1003_v63 = vld [vmem:[%s23258_s1 + $0x1e60] sm:$0xff]  ;;  %v1000_v30 = vld [vmem:[%s23258_s1 + $0x1e48] sm:$0xff] }
 0x1be   :  { %9949 = vmatpush1.bf16.msra.mxu0 %v15372_v52  ;;  %10482 = vmatpush1.bf16.msra.mxu1 %v15374_v54  ;;  %v972_v52 = vld [vmem:[%s23258_s1 + $0x1d68] sm:$0xff]  ;;  %v15420_v54 = vcombine.low %v959_v36, %v963_v39  ;;  %v1007_v39 = vld [vmem:[%s23258_s1 + $0x1e80] sm:$0xff] }
 0x1bf   :  { %9950 = vmatprep.subr.bf16.mxu0 %v15381_v55  ;;  %10483 = vmatprep.subr.bf16.mxu1 %v15383_v56  ;;  %v15422_v55 = vcombine.low %v960_v40, %v964_v41  ;;  %v15429_v56 = vcombine.high %v967_v47, %v971_v49  ;;  %v15431_v57 = vcombine.high %v968_v50, %v972_v52  ;;  %v1011_v40 = vld [vmem:[%s23258_s1 + $0x1ea0] sm:$0xff]  ;;  %v1008_v41 = vld [vmem:[%s23258_s1 + $0x1e88] sm:$0xff] }
 0x1c2   :  { %9951 = vmatpush1.bf16.msra.mxu0 %v15380_v0  ;;  %10484 = vmatpush1.bf16.msra.mxu1 %v15382_v2  ;;  %v980_v0 = vld [vmem:[%s23258_s1 + $0x1da8] sm:$0xff]  ;;  %v15428_v2 = vcombine.low %v967_v47, %v971_v49  ;;  %v1015_v49 = vld [vmem:[%s23258_s1 + $0x1ec0] sm:$0xff] }
 0x1c3   :  { %9961 = vmatprep.subr.bf16.mxu0 %v15389_v28  ;;  %10494 = vmatprep.subr.bf16.mxu1 %v15391_v3  ;;  %v15430_v28 = vcombine.low %v968_v50, %v972_v52  ;;  %v15437_v3 = vcombine.high %v975_v60, %v979_v8  ;;  %v15439_v5 = vcombine.high %v976_v61, %v980_v0  ;;  %v1019_v50 = vld [vmem:[%s23258_s1 + $0x1ee0] sm:$0xff]  ;;  %v1016_v52 = vld [vmem:[%s23258_s1 + $0x1ec8] sm:$0xff] }
 0x1c5   :  { %9953 = vmatmul.mubr.bf16.vlgmr.msra.gmra.mrb[0].mxu0 %v18903_v7  ;;  %10486 = vmatmul.mubr.bf16.vlgmr.msra.gmra.mrb[0].mxu1 %v18903_v7 }
 0x1c6   :  { %9962 = vmatpush1.bf16.msra.mxu0 %v15388_v12  ;;  %10495 = vmatpush1.bf16.msra.mxu1 %v15390_v13  ;;  %v988_v12 = vld [vmem:[%s23258_s1 + $0x1de8] sm:$0xff]  ;;  %v15436_v13 = vcombine.low %v975_v60, %v979_v8  ;;  %v1023_v8 = vld [vmem:[%s23258_s1 + $0x1f00] sm:$0xff] }
 0x1c7   :  { %9963 = vmatprep.subr.bf16.mxu0 %v15397_v1  ;;  %10496 = vmatprep.subr.bf16.mxu1 %v15399_v14  ;;  %v15438_v1 = vcombine.low %v976_v61, %v980_v0  ;;  %v15445_v14 = vcombine.high %v983_v6, %v987_v10  ;;  %v15447_v15 = vcombine.high %v984_v11, %v988_v12  ;;  %v1027_v61 = vld [vmem:[%s23258_s1 + $0x1f20] sm:$0xff]  ;;  %v1024_v0 = vld [vmem:[%s23258_s1 + $0x1f08] sm:$0xff] }
 0x1c8   :  { %9993 = vmatprep.mubr.bf16.mxu0 %v18919_v17  ;;  %10526 = vmatprep.mubr.bf16.mxu1 %v18919_v17 }
 0x1ca   :  { %9964 = vmatpush1.bf16.msra.mxu0 %v15396_v21  ;;  %10497 = vmatpush1.bf16.msra.mxu1 %v15398_v22  ;;  %v996_v21 = vld [vmem:[%s23258_s1 + $0x1e28] sm:$0xff]  ;;  %v15444_v22 = vcombine.low %v983_v6, %v987_v10  ;;  %v1031_v10 = vld [vmem:[%s23258_s1 + $0x1f40] sm:$0xff] }
 0x1cb   :  { %9965 = vmatprep.subr.bf16.mxu0 %v15405_v24  ;;  %10498 = vmatprep.subr.bf16.mxu1 %v15407_v25  ;;  %v15446_v24 = vcombine.low %v984_v11, %v988_v12  ;;  %v15453_v25 = vcombine.high %v991_v16, %v995_v18  ;;  %v15455_v26 = vcombine.high %v992_v20, %v996_v21  ;;  %v1035_v11 = vld [vmem:[%s23258_s1 + $0x1f60] sm:$0xff]  ;;  %v1032_v12 = vld [vmem:[%s23258_s1 + $0x1f48] sm:$0xff] }
 0x1ce   :  { %9966 = vmatpush1.bf16.msra.mxu0 %v15404_v32  ;;  %10499 = vmatpush1.bf16.msra.mxu1 %v15406_v33  ;;  %v1004_v32 = vld [vmem:[%s23258_s1 + $0x1e68] sm:$0xff]  ;;  %v15452_v33 = vcombine.low %v991_v16, %v995_v18  ;;  %v1039_v18 = vld [vmem:[%s23258_s1 + $0x1f80] sm:$0xff] }
 0x1cf   :  { %9967 = vmatprep.subr.bf16.mxu0 %v15413_v34  ;;  %10500 = vmatprep.subr.bf16.mxu1 %v15415_v35  ;;  %v15454_v34 = vcombine.low %v992_v20, %v996_v21  ;;  %v15461_v35 = vcombine.high %v999_v27, %v1003_v63  ;;  %v15463_v36 = vcombine.high %v1000_v30, %v1004_v32  ;;  %v1043_v20 = vld [vmem:[%s23258_s1 + $0x1fa0] sm:$0xff]  ;;  %v1040_v21 = vld [vmem:[%s23258_s1 + $0x1f88] sm:$0xff] }
 0x1d2   :  { %9968 = vmatpush1.bf16.msra.mxu0 %v15412_v42  ;;  %10501 = vmatpush1.bf16.msra.mxu1 %v15414_v44  ;;  %v1012_v42 = vld [vmem:[%s23258_s1 + $0x1ea8] sm:$0xff]  ;;  %v15460_v44 = vcombine.low %v999_v27, %v1003_v63  ;;  %v1047_v63 = vld [vmem:[%s23258_s1 + $0x1fc0] sm:$0xff] }
 0x1d3   :  { %9969 = vmatprep.subr.bf16.mxu0 %v15421_v45  ;;  %10502 = vmatprep.subr.bf16.mxu1 %v15423_v46  ;;  %v15462_v45 = vcombine.low %v1000_v30, %v1004_v32  ;;  %v15469_v46 = vcombine.high %v1007_v39, %v1011_v40  ;;  %v15471_v47 = vcombine.high %v1008_v41, %v1012_v42  ;;  %v1051_v30 = vld [vmem:[%s23258_s1 + $0x1fe0] sm:$0xff]  ;;  %v1048_v32 = vld [vmem:[%s23258_s1 + $0x1fc8] sm:$0xff] }
 0x1d6   :  { %9970 = vmatpush1.bf16.msra.mxu0 %v15420_v54  ;;  %10503 = vmatpush1.bf16.msra.mxu1 %v15422_v55  ;;  %v1020_v54 = vld [vmem:[%s23258_s1 + $0x1ee8] sm:$0xff]  ;;  %v15468_v55 = vcombine.low %v1007_v39, %v1011_v40  ;;  %v15509_v39 = vcombine.high %v1047_v63, %v1051_v30 }
 0x1d7   :  { %9971 = vmatprep.subr.bf16.mxu0 %v15429_v56  ;;  %10504 = vmatprep.subr.bf16.mxu1 %v15431_v57  ;;  %v15470_v56 = vcombine.low %v1008_v41, %v1012_v42  ;;  %v15477_v57 = vcombine.high %v1015_v49, %v1019_v50  ;;  %v15479_v60 = vcombine.high %v1016_v52, %v1020_v54  ;;  %v1055_v41 = vld [vmem:[%s23258_s1 + $0x2000] sm:$0xff] }
 0x1d8   :  { %v1059_v42 = vld [vmem:[%s23258_s1 + $0x2020] sm:$0xff] }
 0x1da   :  { %9972 = vmatpush1.bf16.msra.mxu0 %v15428_v2  ;;  %10505 = vmatpush1.bf16.msra.mxu1 %v15430_v28  ;;  %v1028_v2 = vld [vmem:[%s23258_s1 + $0x1f28] sm:$0xff]  ;;  %v15476_v28 = vcombine.low %v1015_v49, %v1019_v50  ;;  %v15517_v50 = vcombine.high %v1055_v41, %v1059_v42 }
 0x1db   :  { %9973 = vmatprep.subr.bf16.mxu0 %v15437_v3  ;;  %10506 = vmatprep.subr.bf16.mxu1 %v15439_v5  ;;  %v15478_v3 = vcombine.low %v1016_v52, %v1020_v54  ;;  %v15485_v5 = vcombine.high %v1023_v8, %v1027_v61  ;;  %v15487_v6 = vcombine.high %v1024_v0, %v1028_v2  ;;  %v1063_v54 = vld [vmem:[%s23258_s1 + $0x2040] sm:$0xff] }
 0x1de   :  { %9974 = vmatpush1.bf16.msra.mxu0 %v15436_v13  ;;  %10507 = vmatpush1.bf16.msra.mxu1 %v15438_v1  ;;  %v1036_v13 = vld [vmem:[%s23258_s1 + $0x1f68] sm:$0xff]  ;;  %v15484_v1 = vcombine.low %v1023_v8, %v1027_v61  ;;  %v15516_v61 = vcombine.low %v1055_v41, %v1059_v42 }
 0x1df   :  { %9975 = vmatprep.subr.bf16.mxu0 %v15445_v14  ;;  %10508 = vmatprep.subr.bf16.mxu1 %v15447_v15  ;;  %v15486_v14 = vcombine.low %v1024_v0, %v1028_v2  ;;  %v15493_v15 = vcombine.high %v1031_v10, %v1035_v11  ;;  %v15495_v16 = vcombine.high %v1032_v12, %v1036_v13  ;;  %v1068_v8 = vld [vmem:[%s23258_s1 + $0x2068] sm:$0xff] }
 0x1e0   :  { %v1096_v41 = vld [vmem:[%s23258_s1 + $0x2148] sm:$0xff] }
 0x1e1   :  { %v1100_v42 = vld [vmem:[%s23258_s1 + $0x2168] sm:$0xff] }
 0x1e2   :  { %9976 = vmatpush1.bf16.msra.mxu0 %v15444_v22  ;;  %10509 = vmatpush1.bf16.msra.mxu1 %v15446_v24  ;;  %v1044_v22 = vld [vmem:[%s23258_s1 + $0x1fa8] sm:$0xff]  ;;  %v15492_v24 = vcombine.low %v1031_v10, %v1035_v11 }
 0x1e3   :  { %9977 = vmatprep.subr.bf16.mxu0 %v15453_v25  ;;  %10510 = vmatprep.subr.bf16.mxu1 %v15455_v26  ;;  %v15494_v25 = vcombine.low %v1032_v12, %v1036_v13  ;;  %v15501_v26 = vcombine.high %v1039_v18, %v1043_v20  ;;  %v15503_v27 = vcombine.high %v1040_v21, %v1044_v22  ;;  %v1072_v10 = vld [vmem:[%s23258_s1 + $0x2088] sm:$0xff] }
 0x1e4   :  { %v1076_v11 = vld [vmem:[%s23258_s1 + $0x20a8] sm:$0xff] }
 0x1e6   :  { %9978 = vmatpush1.bf16.msra.mxu0 %v15452_v33  ;;  %10511 = vmatpush1.bf16.msra.mxu1 %v15454_v34  ;;  %v1052_v33 = vld [vmem:[%s23258_s1 + $0x1fe8] sm:$0xff]  ;;  %v19090_v34 = vld [vmem:[%s23259_s0 + $0x10] sm:$0xff] }
 0x1e7   :  { %9979 = vmatprep.subr.bf16.mxu0 %v15461_v35  ;;  %10512 = vmatprep.subr.bf16.mxu1 %v15463_v36  ;;  %v15500_v35 = vcombine.low %v1039_v18, %v1043_v20  ;;  %v15502_v36 = vcombine.low %v1040_v21, %v1044_v22  ;;  %v15511_v40 = vcombine.high %v1048_v32, %v1052_v33  ;;  %v1080_v18 = vld [vmem:[%s23258_s1 + $0x20c8] sm:$0xff] }
 0x1e8   :  { %v15510_v49 = vcombine.low %v1048_v32, %v1052_v33  ;;  %v1084_v20 = vld [vmem:[%s23258_s1 + $0x20e8] sm:$0xff]  ;;  %v15534_v22 = vcombine.low %v1072_v10, %v1076_v11 }
 0x1e9   :  { %v15542_v33 = vcombine.low %v1080_v18, %v1084_v20 }
 0x1ea   :  { %9980 = vmatpush1.bf16.msra.mxu0 %v15460_v44  ;;  %10513 = vmatpush1.bf16.msra.mxu1 %v15462_v45  ;;  %v19100_v44 = vrot.slane %v19090_v34, %v17505_v53  ;;  %v1056_v45 = vld [vmem:[%s23258_s1 + $0x2008] sm:$0xff] }
 0x1eb   :  { %9981 = vmatprep.subr.bf16.mxu0 %v15469_v46  ;;  %10514 = vmatprep.subr.bf16.mxu1 %v15471_v47  ;;  %v1060_v46 = vld [vmem:[%s23258_s1 + $0x2028] sm:$0xff]  ;;  %v15508_v47 = vcombine.low %v1047_v63, %v1051_v30 }
 0x1ec   :  { %v15519_v52 = vcombine.high %v1056_v45, %v1060_v46  ;;  %v15518_v0 = vcombine.low %v1056_v45, %v1060_v46  ;;  %v1088_v63 = vld [vmem:[%s23258_s1 + $0x2108] sm:$0xff] }
 0x1ed   :  { %v1092_v30 = vld [vmem:[%s23258_s1 + $0x2128] sm:$0xff] }
 0x1ee   :  { %9982 = vmatpush1.bf16.msra.mxu0 %v15468_v55  ;;  %10515 = vmatpush1.bf16.msra.mxu1 %v15470_v56  ;;  %v1067_v55 = vld [vmem:[%s23258_s1 + $0x2060] sm:$0xff]  ;;  %v1758_v56 = vcombine.high %v19100_v44, %v19100_v44  ;;  %v15550_v46 = vcombine.low %v1088_v63, %v1092_v30 }
 0x1ef   :  { %9983 = vmatprep.subr.bf16.mxu0 %v15477_v57  ;;  %10516 = vmatprep.subr.bf16.mxu1 %v15479_v60  ;;  %v19118_v57 = vcombine.high %v18903_v7, %v18903_v7  ;;  %v1064_v60 = vld [vmem:[%s23258_s1 + $0x2048] sm:$0xff]  ;;  %v15525_v2 = vcombine.high %v1063_v54, %v1067_v55  ;;  %v15524_v12 = vcombine.low %v1063_v54, %v1067_v55 }
 0x1f0   :  { %v15526_v13 = vcombine.low %v1064_v60, %v1068_v8  ;;  %v1104_v54 = vld [vmem:[%s23258_s1 + $0x2188] sm:$0xff] }
 0x1f1   :  { %v1108_v55 = vld [vmem:[%s23258_s1 + $0x21a8] sm:$0xff] }
 0x1f2   :  { %9984 = vmatpush1.bf16.msra.mxu0 %v15476_v28  ;;  %10517 = vmatpush1.bf16.msra.mxu1 %v15478_v3  ;;  %v15527_v28 = vcombine.high %v1064_v60, %v1068_v8  ;;  %v1071_v3 = vld [vmem:[%s23258_s1 + $0x2080] sm:$0xff]  ;;  %v15558_v60 = vcombine.low %v1096_v41, %v1100_v42 }
 0x1f3   :  { %9985 = vmatprep.subr.bf16.mxu0 %v15485_v5  ;;  %10518 = vmatprep.subr.bf16.mxu1 %v15487_v6  ;;  %v1075_v5 = vld [vmem:[%s23258_s1 + $0x20a0] sm:$0xff]  ;;  %v19133_v6 = vrot.slane %v1758_v56, %v17505_v53 }
 0x1f4   :  { %v15532_v21 = vcombine.low %v1071_v3, %v1075_v5 }
 0x1f6   :  { %9986 = vmatpush1.bf16.msra.mxu0 %v15484_v1  ;;  %10519 = vmatpush1.bf16.msra.mxu1 %v15486_v14  ;;  %v15533_v1 = vcombine.high %v1071_v3, %v1075_v5  ;;  %v15535_v14 = vcombine.high %v1072_v10, %v1076_v11  ;;  %v1116_v3 = vld [vmem:[%s23258_s1 + $0x21e8] sm:$0xff]  ;;  %v15566_v10 = vcombine.low %v1104_v54, %v1108_v55 }
 0x1f7   :  { %9987 = vmatprep.subr.bf16.mxu0 %v15493_v15  ;;  %10520 = vmatprep.subr.bf16.mxu1 %v15495_v16  ;;  %v1079_v15 = vld [vmem:[%s23258_s1 + $0x20c0] sm:$0xff] }
 0x1f8   :  { %v1083_v16 = vld [vmem:[%s23258_s1 + $0x20e0] sm:$0xff] }
 0x1f9   :  { %v15540_v32 = vcombine.low %v1079_v15, %v1083_v16 }
 0x1fa   :  { %9988 = vmatpush1.bf16.msra.mxu0 %v15492_v24  ;;  %10521 = vmatpush1.bf16.msra.mxu1 %v15494_v25  ;;  %v15541_v24 = vcombine.high %v1079_v15, %v1083_v16  ;;  %v15543_v25 = vcombine.high %v1080_v18, %v1084_v20  ;;  %v1124_v15 = vld [vmem:[%s23258_s1 + $0x2228] sm:$0xff] }
 0x1fb   :  { %9989 = vmatprep.subr.bf16.mxu0 %v15501_v26  ;;  %10522 = vmatprep.subr.bf16.mxu1 %v15503_v27  ;;  %v1087_v26 = vld [vmem:[%s23258_s1 + $0x2100] sm:$0xff] }
 0x1fc   :  { %v1091_v27 = vld [vmem:[%s23258_s1 + $0x2120] sm:$0xff] }
 0x1fd   :  { %v15548_v45 = vcombine.low %v1087_v26, %v1091_v27 }
 0x1fe   :  { %9990 = vmatpush1.bf16.msra.mxu0 %v15500_v35  ;;  %10523 = vmatpush1.bf16.msra.mxu1 %v15502_v36  ;;  %v15549_v35 = vcombine.high %v1087_v26, %v1091_v27  ;;  %v15551_v36 = vcombine.high %v1088_v63, %v1092_v30  ;;  %v1132_v26 = vld [vmem:[%s23258_s1 + $0x2268] sm:$0xff] }
 0x1ff   :  { %9991 = vmatprep.subr.bf16.mxu0 %v15509_v39  ;;  %10524 = vmatprep.subr.bf16.mxu1 %v15511_v40  ;;  %v1095_v39 = vld [vmem:[%s23258_s1 + $0x2140] sm:$0xff] }
 0x200   :  { %v1099_v40 = vld [vmem:[%s23258_s1 + $0x2160] sm:$0xff] }
 0x201   :  { %v15556_v56 = vcombine.low %v1095_v39, %v1099_v40 }
 0x202   :  { %9992 = vmatpush1.bf16.msra.mxu0 %v15508_v47  ;;  %10525 = vmatpush1.bf16.msra.mxu1 %v15510_v49  ;;  %v15557_v47 = vcombine.high %v1095_v39, %v1099_v40  ;;  %v15559_v49 = vcombine.high %v1096_v41, %v1100_v42  ;;  %v1140_v39 = vld [vmem:[%s23258_s1 + $0x22a8] sm:$0xff] }
 0x203   :  { %10002 = vmatprep.subr.bf16.mxu0 %v15517_v50  ;;  %10535 = vmatprep.subr.bf16.mxu1 %v15519_v52  ;;  %v1103_v50 = vld [vmem:[%s23258_s1 + $0x2180] sm:$0xff] }
 0x204   :  { %v1107_v52 = vld [vmem:[%s23258_s1 + $0x21a0] sm:$0xff] }
 0x205   :  { %9994 = vmatmul.mubr.bf16.vlgmr.msra.gmra.mrb[0].mxu0 %v19118_v57  ;;  %10527 = vmatmul.mubr.bf16.vlgmr.msra.gmra.mrb[0].mxu1 %v19118_v57  ;;  %v15565_v8 = vcombine.high %v1103_v50, %v1107_v52  ;;  %v15564_v5 = vcombine.low %v1103_v50, %v1107_v52  ;;  %v1148_v50 = vld [vmem:[%s23258_s1 + $0x22e8] sm:$0xff] }
 0x206   :  { %10003 = vmatpush1.bf16.msra.mxu0 %v15516_v61  ;;  %10536 = vmatpush1.bf16.msra.mxu1 %v15518_v0  ;;  %v15567_v61 = vcombine.high %v1104_v54, %v1108_v55  ;;  %v1111_v0 = vld [vmem:[%s23258_s1 + $0x21c0] sm:$0xff] }
 0x207   :  { %10004 = vmatprep.subr.bf16.mxu0 %v15525_v2  ;;  %10537 = vmatprep.subr.bf16.mxu1 %v15527_v28  ;;  %v1115_v2 = vld [vmem:[%s23258_s1 + $0x21e0] sm:$0xff]  ;;  %v1112_v28 = vld [vmem:[%s23258_s1 + $0x21c8] sm:$0xff] }
 0x208   :  { %10034 = vmatprep.mubr.bf16.mxu0 %v19133_v6  ;;  %10567 = vmatprep.mubr.bf16.mxu1 %v19133_v6  ;;  %v15573_v11 = vcombine.high %v1111_v0, %v1115_v2  ;;  %v15572_v16 = vcombine.low %v1111_v0, %v1115_v2  ;;  %v15574_v18 = vcombine.low %v1112_v28, %v1116_v3  ;;  %v1156_v0 = vld [vmem:[%s23258_s1 + $0x2328] sm:$0xff] }
 0x20a   :  { %10005 = vmatpush1.bf16.msra.mxu0 %v15524_v12  ;;  %10538 = vmatpush1.bf16.msra.mxu1 %v15526_v13  ;;  %v15575_v12 = vcombine.high %v1112_v28, %v1116_v3  ;;  %v1119_v13 = vld [vmem:[%s23258_s1 + $0x2200] sm:$0xff] }
 0x20b   :  { %10006 = vmatprep.subr.bf16.mxu0 %v15533_v1  ;;  %10539 = vmatprep.subr.bf16.mxu1 %v15535_v14  ;;  %v1123_v1 = vld [vmem:[%s23258_s1 + $0x2220] sm:$0xff]  ;;  %v1120_v14 = vld [vmem:[%s23258_s1 + $0x2208] sm:$0xff] }
 0x20c   :  { %v15581_v20 = vcombine.high %v1119_v13, %v1123_v1  ;;  %v15580_v27 = vcombine.low %v1119_v13, %v1123_v1  ;;  %v15582_v63 = vcombine.low %v1120_v14, %v1124_v15  ;;  %v1164_v13 = vld [vmem:[%s23258_s1 + $0x2368] sm:$0xff] }
 0x20e   :  { %10007 = vmatpush1.bf16.msra.mxu0 %v15532_v21  ;;  %10540 = vmatpush1.bf16.msra.mxu1 %v15534_v22  ;;  %v15583_v21 = vcombine.high %v1120_v14, %v1124_v15  ;;  %v1127_v22 = vld [vmem:[%s23258_s1 + $0x2240] sm:$0xff] }
 0x20f   :  { %10008 = vmatprep.subr.bf16.mxu0 %v15541_v24  ;;  %10541 = vmatprep.subr.bf16.mxu1 %v15543_v25  ;;  %v1131_v24 = vld [vmem:[%s23258_s1 + $0x2260] sm:$0xff]  ;;  %v1128_v25 = vld [vmem:[%s23258_s1 + $0x2248] sm:$0xff] }
 0x210   :  { %v15589_v30 = vcombine.high %v1127_v22, %v1131_v24  ;;  %v15588_v40 = vcombine.low %v1127_v22, %v1131_v24  ;;  %v15590_v41 = vcombine.low %v1128_v25, %v1132_v26  ;;  %v1172_v22 = vld [vmem:[%s23258_s1 + $0x23a8] sm:$0xff] }
 0x212   :  { %10009 = vmatpush1.bf16.msra.mxu0 %v15540_v32  ;;  %10542 = vmatpush1.bf16.msra.mxu1 %v15542_v33  ;;  %v15591_v32 = vcombine.high %v1128_v25, %v1132_v26  ;;  %v1135_v33 = vld [vmem:[%s23258_s1 + $0x2280] sm:$0xff] }
 0x213   :  { %10010 = vmatprep.subr.bf16.mxu0 %v15549_v35  ;;  %10543 = vmatprep.subr.bf16.mxu1 %v15551_v36  ;;  %v1139_v35 = vld [vmem:[%s23258_s1 + $0x22a0] sm:$0xff]  ;;  %v1136_v36 = vld [vmem:[%s23258_s1 + $0x2288] sm:$0xff] }
 0x214   :  { %v15597_v42 = vcombine.high %v1135_v33, %v1139_v35  ;;  %v15596_v52 = vcombine.low %v1135_v33, %v1139_v35  ;;  %v15598_v54 = vcombine.low %v1136_v36, %v1140_v39  ;;  %v1180_v33 = vld [vmem:[%s23258_s1 + $0x23e8] sm:$0xff] }
 0x216   :  { %10011 = vmatpush1.bf16.msra.mxu0 %v15548_v45  ;;  %10544 = vmatpush1.bf16.msra.mxu1 %v15550_v46  ;;  %v15599_v45 = vcombine.high %v1136_v36, %v1140_v39  ;;  %v1143_v46 = vld [vmem:[%s23258_s1 + $0x22c0] sm:$0xff] }
 0x217   :  { %10012 = vmatprep.subr.bf16.mxu0 %v15557_v47  ;;  %10545 = vmatprep.subr.bf16.mxu1 %v15559_v49  ;;  %v1147_v47 = vld [vmem:[%s23258_s1 + $0x22e0] sm:$0xff]  ;;  %v1144_v49 = vld [vmem:[%s23258_s1 + $0x22c8] sm:$0xff] }
 0x218   :  { %v15605_v55 = vcombine.high %v1143_v46, %v1147_v47  ;;  %v15604_v2 = vcombine.low %v1143_v46, %v1147_v47  ;;  %v15606_v28 = vcombine.low %v1144_v49, %v1148_v50  ;;  %v1188_v46 = vld [vmem:[%s23258_s1 + $0x2428] sm:$0xff] }
 0x21a   :  { %10013 = vmatpush1.bf16.msra.mxu0 %v15556_v56  ;;  %10546 = vmatpush1.bf16.msra.mxu1 %v15558_v60  ;;  %v15607_v56 = vcombine.high %v1144_v49, %v1148_v50  ;;  %v1151_v60 = vld [vmem:[%s23258_s1 + $0x2300] sm:$0xff] }
 0x21b   :  { %10014 = vmatprep.subr.bf16.mxu0 %v15565_v8  ;;  %10547 = vmatprep.subr.bf16.mxu1 %v15567_v61  ;;  %v1155_v8 = vld [vmem:[%s23258_s1 + $0x2320] sm:$0xff]  ;;  %v1152_v61 = vld [vmem:[%s23258_s1 + $0x2308] sm:$0xff] }
 0x21c   :  { %v15613_v3 = vcombine.high %v1151_v60, %v1155_v8  ;;  %v15612_v1 = vcombine.low %v1151_v60, %v1155_v8  ;;  %v15614_v14 = vcombine.low %v1152_v61, %v1156_v0  ;;  %v1192_v60 = vld [vmem:[%s23258_s1 + $0x2448] sm:$0xff] }
 0x21d   :  { %v1196_v8 = vld [vmem:[%s23258_s1 + $0x2468] sm:$0xff] }
 0x21e   :  { %10015 = vmatpush1.bf16.msra.mxu0 %v15564_v5  ;;  %10548 = vmatpush1.bf16.msra.mxu1 %v15566_v10  ;;  %v15615_v5 = vcombine.high %v1152_v61, %v1156_v0  ;;  %v1159_v10 = vld [vmem:[%s23258_s1 + $0x2340] sm:$0xff] }
 0x21f   :  { %10016 = vmatprep.subr.bf16.mxu0 %v15573_v11  ;;  %10549 = vmatprep.subr.bf16.mxu1 %v15575_v12  ;;  %v1163_v11 = vld [vmem:[%s23258_s1 + $0x2360] sm:$0xff]  ;;  %v1160_v12 = vld [vmem:[%s23258_s1 + $0x2348] sm:$0xff] }
 0x220   :  { %v15621_v15 = vcombine.high %v1159_v10, %v1163_v11  ;;  %v15620_v24 = vcombine.low %v1159_v10, %v1163_v11  ;;  %v15622_v25 = vcombine.low %v1160_v12, %v1164_v13  ;;  %v1200_v10 = vld [vmem:[%s23258_s1 + $0x2488] sm:$0xff] }
 0x221   :  { %v1204_v11 = vld [vmem:[%s23258_s1 + $0x24a8] sm:$0xff] }
 0x222   :  { %10017 = vmatpush1.bf16.msra.mxu0 %v15572_v16  ;;  %10550 = vmatpush1.bf16.msra.mxu1 %v15574_v18  ;;  %v15623_v16 = vcombine.high %v1160_v12, %v1164_v13  ;;  %v1167_v18 = vld [vmem:[%s23258_s1 + $0x2380] sm:$0xff]  ;;  %v15654_v13 = vcombine.low %v1192_v60, %v1196_v8 }
 0x223   :  { %10018 = vmatprep.subr.bf16.mxu0 %v15581_v20  ;;  %10551 = vmatprep.subr.bf16.mxu1 %v15583_v21  ;;  %v1171_v20 = vld [vmem:[%s23258_s1 + $0x23a0] sm:$0xff]  ;;  %v1168_v21 = vld [vmem:[%s23258_s1 + $0x2388] sm:$0xff] }
 0x224   :  { %v15629_v26 = vcombine.high %v1167_v18, %v1171_v20  ;;  %v15628_v35 = vcombine.low %v1167_v18, %v1171_v20  ;;  %v15630_v36 = vcombine.low %v1168_v21, %v1172_v22  ;;  %v1208_v18 = vld [vmem:[%s23258_s1 + $0x24c8] sm:$0xff] }
 0x225   :  { %v1212_v20 = vld [vmem:[%s23258_s1 + $0x24e8] sm:$0xff] }
 0x226   :  { %10019 = vmatpush1.bf16.msra.mxu0 %v15580_v27  ;;  %10552 = vmatpush1.bf16.msra.mxu1 %v15582_v63  ;;  %v15631_v27 = vcombine.high %v1168_v21, %v1172_v22  ;;  %v1175_v63 = vld [vmem:[%s23258_s1 + $0x23c0] sm:$0xff]  ;;  %v15662_v22 = vcombine.low %v1200_v10, %v1204_v11 }
 0x227   :  { %10020 = vmatprep.subr.bf16.mxu0 %v15589_v30  ;;  %10553 = vmatprep.subr.bf16.mxu1 %v15591_v32  ;;  %v1179_v30 = vld [vmem:[%s23258_s1 + $0x23e0] sm:$0xff]  ;;  %v1176_v32 = vld [vmem:[%s23258_s1 + $0x23c8] sm:$0xff] }
 0x228   :  { %v15637_v39 = vcombine.high %v1175_v63, %v1179_v30  ;;  %v15636_v47 = vcombine.low %v1175_v63, %v1179_v30  ;;  %v15638_v49 = vcombine.low %v1176_v32, %v1180_v33  ;;  %v1216_v63 = vld [vmem:[%s23258_s1 + $0x2508] sm:$0xff] }
 0x229   :  { %v1220_v30 = vld [vmem:[%s23258_s1 + $0x2528] sm:$0xff] }
 0x22a   :  { %10021 = vmatpush1.bf16.msra.mxu0 %v15588_v40  ;;  %10554 = vmatpush1.bf16.msra.mxu1 %v15590_v41  ;;  %v15639_v40 = vcombine.high %v1176_v32, %v1180_v33  ;;  %v1183_v41 = vld [vmem:[%s23258_s1 + $0x2400] sm:$0xff]  ;;  %v15670_v33 = vcombine.low %v1208_v18, %v1212_v20 }
 0x22b   :  { %10022 = vmatprep.subr.bf16.mxu0 %v15597_v42  ;;  %10555 = vmatprep.subr.bf16.mxu1 %v15599_v45  ;;  %v1187_v42 = vld [vmem:[%s23258_s1 + $0x2420] sm:$0xff]  ;;  %v1184_v45 = vld [vmem:[%s23258_s1 + $0x2408] sm:$0xff] }
 0x22c   :  { %v15645_v50 = vcombine.high %v1183_v41, %v1187_v42  ;;  %v15644_v61 = vcombine.low %v1183_v41, %v1187_v42  ;;  %v15646_v0 = vcombine.low %v1184_v45, %v1188_v46  ;;  %v1224_v41 = vld [vmem:[%s23258_s1 + $0x2548] sm:$0xff] }
 0x22d   :  { %v1228_v42 = vld [vmem:[%s23258_s1 + $0x2568] sm:$0xff] }
 0x22e   :  { %10023 = vmatpush1.bf16.msra.mxu0 %v15596_v52  ;;  %10556 = vmatpush1.bf16.msra.mxu1 %v15598_v54  ;;  %v15647_v52 = vcombine.high %v1184_v45, %v1188_v46  ;;  %v1191_v54 = vld [vmem:[%s23258_s1 + $0x2440] sm:$0xff]  ;;  %v15678_v46 = vcombine.low %v1216_v63, %v1220_v30 }
 0x22f   :  { %10024 = vmatprep.subr.bf16.mxu0 %v15605_v55  ;;  %10557 = vmatprep.subr.bf16.mxu1 %v15607_v56  ;;  %v1195_v55 = vld [vmem:[%s23258_s1 + $0x2460] sm:$0xff]  ;;  %v19321_v56 = vrot.slane %v19100_v44, %v17505_v53 }
 0x230   :  { %v1199_v44 = vld [vmem:[%s23258_s1 + $0x2480] sm:$0xff]  ;;  %v15652_v12 = vcombine.low %v1191_v54, %v1195_v55 }
 0x232   :  { %10025 = vmatpush1.bf16.msra.mxu0 %v15604_v2  ;;  %10558 = vmatpush1.bf16.msra.mxu1 %v15606_v28  ;;  %v15653_v2 = vcombine.high %v1191_v54, %v1195_v55  ;;  %v15655_v28 = vcombine.high %v1192_v60, %v1196_v8  ;;  %v1232_v54 = vld [vmem:[%s23258_s1 + $0x2588] sm:$0xff]  ;;  %v15686_v8 = vcombine.low %v1224_v41, %v1228_v42 }
 0x233   :  { %10026 = vmatprep.subr.bf16.mxu0 %v15613_v3  ;;  %10559 = vmatprep.subr.bf16.mxu1 %v15615_v5  ;;  %v1203_v3 = vld [vmem:[%s23258_s1 + $0x24a0] sm:$0xff]  ;;  %v19337_v5 = vcombine.high %v19133_v6, %v19133_v6  ;;  %v1236_v55 = vld [vmem:[%s23258_s1 + $0x25a8] sm:$0xff] }
 0x234   :  { %v15660_v21 = vcombine.low %v1199_v44, %v1203_v3 }
 0x236   :  { %10027 = vmatpush1.bf16.msra.mxu0 %v15612_v1  ;;  %10560 = vmatpush1.bf16.msra.mxu1 %v15614_v14  ;;  %v15661_v1 = vcombine.high %v1199_v44, %v1203_v3  ;;  %v15663_v14 = vcombine.high %v1200_v10, %v1204_v11  ;;  %v1240_v44 = vld [vmem:[%s23258_s1 + $0x25c8] sm:$0xff]  ;;  %v15694_v11 = vcombine.low %v1232_v54, %v1236_v55 }
 0x237   :  { %10028 = vmatprep.subr.bf16.mxu0 %v15621_v15  ;;  %10561 = vmatprep.subr.bf16.mxu1 %v15623_v16  ;;  %v1207_v15 = vld [vmem:[%s23258_s1 + $0x24c0] sm:$0xff]  ;;  %v1244_v3 = vld [vmem:[%s23258_s1 + $0x25e8] sm:$0xff] }
 0x238   :  { %v1211_v16 = vld [vmem:[%s23258_s1 + $0x24e0] sm:$0xff] }
 0x239   :  { %v15668_v32 = vcombine.low %v1207_v15, %v1211_v16 }
 0x23a   :  { %10029 = vmatpush1.bf16.msra.mxu0 %v15620_v24  ;;  %10562 = vmatpush1.bf16.msra.mxu1 %v15622_v25  ;;  %v15669_v24 = vcombine.high %v1207_v15, %v1211_v16  ;;  %v15671_v25 = vcombine.high %v1208_v18, %v1212_v20  ;;  %v1248_v15 = vld [vmem:[%s23258_s1 + $0x2608] sm:$0xff]  ;;  %v15702_v20 = vcombine.low %v1240_v44, %v1244_v3 }
 0x23b   :  { %10030 = vmatprep.subr.bf16.mxu0 %v15629_v26  ;;  %10563 = vmatprep.subr.bf16.mxu1 %v15631_v27  ;;  %v1215_v26 = vld [vmem:[%s23258_s1 + $0x2500] sm:$0xff]  ;;  %v1252_v16 = vld [vmem:[%s23258_s1 + $0x2628] sm:$0xff] }
 0x23c   :  { %v1219_v27 = vld [vmem:[%s23258_s1 + $0x2520] sm:$0xff] }
 0x23d   :  { %v15676_v45 = vcombine.low %v1215_v26, %v1219_v27 }
 0x23e   :  { %10031 = vmatpush1.bf16.msra.mxu0 %v15628_v35  ;;  %10564 = vmatpush1.bf16.msra.mxu1 %v15630_v36  ;;  %v15677_v35 = vcombine.high %v1215_v26, %v1219_v27  ;;  %v15679_v36 = vcombine.high %v1216_v63, %v1220_v30  ;;  %v1256_v26 = vld [vmem:[%s23258_s1 + $0x2648] sm:$0xff]  ;;  %v15710_v30 = vcombine.low %v1248_v15, %v1252_v16 }
 0x23f   :  { %10032 = vmatprep.subr.bf16.mxu0 %v15637_v39  ;;  %10565 = vmatprep.subr.bf16.mxu1 %v15639_v40  ;;  %v1223_v39 = vld [vmem:[%s23258_s1 + $0x2540] sm:$0xff]  ;;  %v1260_v27 = vld [vmem:[%s23258_s1 + $0x2668] sm:$0xff] }
 0x240   :  { %v1227_v40 = vld [vmem:[%s23258_s1 + $0x2560] sm:$0xff] }
 0x241   :  { %v15684_v60 = vcombine.low %v1223_v39, %v1227_v40 }
 0x242   :  { %10033 = vmatpush1.bf16.msra.mxu0 %v15636_v47  ;;  %10566 = vmatpush1.bf16.msra.mxu1 %v15638_v49  ;;  %v15685_v47 = vcombine.high %v1223_v39, %v1227_v40  ;;  %v15687_v49 = vcombine.high %v1224_v41, %v1228_v42  ;;  %v1264_v39 = vld [vmem:[%s23258_s1 + $0x2688] sm:$0xff]  ;;  %v15718_v42 = vcombine.low %v1256_v26, %v1260_v27 }
 0x243   :  { %10043 = vmatprep.subr.bf16.mxu0 %v15645_v50  ;;  %10576 = vmatprep.subr.bf16.mxu1 %v15647_v52  ;;  %v1231_v50 = vld [vmem:[%s23258_s1 + $0x2580] sm:$0xff]  ;;  %v1268_v40 = vld [vmem:[%s23258_s1 + $0x26a8] sm:$0xff] }
 0x244   :  { %v1235_v52 = vld [vmem:[%s23258_s1 + $0x25a0] sm:$0xff] }
 0x245   :  { %10035 = vmatmul.mubr.bf16.vlgmr.msra.gmra.mrb[0].mxu0 %v19321_v56  ;;  %10568 = vmatmul.mubr.bf16.vlgmr.msra.gmra.mrb[0].mxu1 %v19321_v56  ;;  %v15692_v10 = vcombine.low %v1231_v50, %v1235_v52 }
 0x246   :  { %10044 = vmatpush1.bf16.msra.mxu0 %v15644_v61  ;;  %10577 = vmatpush1.bf16.msra.mxu1 %v15646_v0  ;;  %v15693_v61 = vcombine.high %v1231_v50, %v1235_v52  ;;  %v15695_v0 = vcombine.high %v1232_v54, %v1236_v55  ;;  %v1272_v50 = vld [vmem:[%s23258_s1 + $0x26c8] sm:$0xff]  ;;  %v15726_v55 = vcombine.low %v1264_v39, %v1268_v40 }
 0x247   :  { %10045 = vmatprep.subr.bf16.mxu0 %v15653_v2  ;;  %10578 = vmatprep.subr.bf16.mxu1 %v15655_v28  ;;  %v1239_v2 = vld [vmem:[%s23258_s1 + $0x25c0] sm:$0xff]  ;;  %v1276_v52 = vld [vmem:[%s23258_s1 + $0x26e8] sm:$0xff] }
 0x248   :  { %10075 = vmatprep.mubr.bf16.mxu0 %v19337_v5  ;;  %10608 = vmatprep.mubr.bf16.mxu1 %v19337_v5  ;;  %v1243_v28 = vld [vmem:[%s23258_s1 + $0x25e0] sm:$0xff] }
 0x249   :  { %v15700_v18 = vcombine.low %v1239_v2, %v1243_v28 }
 0x24a   :  { %10046 = vmatpush1.bf16.msra.mxu0 %v15652_v12  ;;  %10579 = vmatpush1.bf16.msra.mxu1 %v15654_v13  ;;  %v15701_v12 = vcombine.high %v1239_v2, %v1243_v28  ;;  %v15703_v13 = vcombine.high %v1240_v44, %v1244_v3  ;;  %v1280_v2 = vld [vmem:[%s23258_s1 + $0x2708] sm:$0xff]  ;;  %v15734_v3 = vcombine.low %v1272_v50, %v1276_v52 }
 0x24b   :  { %10047 = vmatprep.subr.bf16.mxu0 %v15661_v1  ;;  %10580 = vmatprep.subr.bf16.mxu1 %v15663_v14  ;;  %v1247_v1 = vld [vmem:[%s23258_s1 + $0x2600] sm:$0xff]  ;;  %v1284_v28 = vld [vmem:[%s23258_s1 + $0x2728] sm:$0xff] }
 0x24c   :  { %v1251_v14 = vld [vmem:[%s23258_s1 + $0x2620] sm:$0xff] }
 0x24d   :  { %v15708_v63 = vcombine.low %v1247_v1, %v1251_v14 }
 0x24e   :  { %10048 = vmatpush1.bf16.msra.mxu0 %v15660_v21  ;;  %10581 = vmatpush1.bf16.msra.mxu1 %v15662_v22  ;;  %v15709_v21 = vcombine.high %v1247_v1, %v1251_v14  ;;  %v15711_v22 = vcombine.high %v1248_v15, %v1252_v16  ;;  %v1288_v1 = vld [vmem:[%s23258_s1 + $0x2748] sm:$0xff]  ;;  %v15742_v16 = vcombine.low %v1280_v2, %v1284_v28 }
 0x24f   :  { %10049 = vmatprep.subr.bf16.mxu0 %v15669_v24  ;;  %10582 = vmatprep.subr.bf16.mxu1 %v15671_v25  ;;  %v1255_v24 = vld [vmem:[%s23258_s1 + $0x2640] sm:$0xff]  ;;  %v1292_v14 = vld [vmem:[%s23258_s1 + $0x2768] sm:$0xff] }
 0x250   :  { %v1259_v25 = vld [vmem:[%s23258_s1 + $0x2660] sm:$0xff] }
 0x251   :  { %v15716_v41 = vcombine.low %v1255_v24, %v1259_v25 }
 0x252   :  { %10050 = vmatpush1.bf16.msra.mxu0 %v15668_v32  ;;  %10583 = vmatpush1.bf16.msra.mxu1 %v15670_v33  ;;  %v15717_v32 = vcombine.high %v1255_v24, %v1259_v25  ;;  %v15719_v33 = vcombine.high %v1256_v26, %v1260_v27  ;;  %v1296_v24 = vld [vmem:[%s23258_s1 + $0x2788] sm:$0xff]  ;;  %v15750_v27 = vcombine.low %v1288_v1, %v1292_v14 }
 0x253   :  { %10051 = vmatprep.subr.bf16.mxu0 %v15677_v35  ;;  %10584 = vmatprep.subr.bf16.mxu1 %v15679_v36  ;;  %v1263_v35 = vld [vmem:[%s23258_s1 + $0x2680] sm:$0xff]  ;;  %v1300_v25 = vld [vmem:[%s23258_s1 + $0x27a8] sm:$0xff] }
 0x254   :  { %v1267_v36 = vld [vmem:[%s23258_s1 + $0x26a0] sm:$0xff] }
 0x255   :  { %v15724_v54 = vcombine.low %v1263_v35, %v1267_v36 }
 0x256   :  { %10052 = vmatpush1.bf16.msra.mxu0 %v15676_v45  ;;  %10585 = vmatpush1.bf16.msra.mxu1 %v15678_v46  ;;  %v15725_v45 = vcombine.high %v1263_v35, %v1267_v36  ;;  %v15727_v46 = vcombine.high %v1264_v39, %v1268_v40  ;;  %v1743_v35 = vcombine.high %v19090_v34, %v19090_v34  ;;  %v1304_v36 = vld [vmem:[%s23258_s1 + $0x27c8] sm:$0xff]  ;;  %v1311_v34 = vld [vmem:[%s23258_s1 + $0x2800] sm:$0xff] }
 0x257   :  { %10053 = vmatprep.subr.bf16.mxu0 %v15685_v47  ;;  %10586 = vmatprep.subr.bf16.mxu1 %v15687_v49  ;;  %v1271_v47 = vld [vmem:[%s23258_s1 + $0x26c0] sm:$0xff]  ;;  %v1308_v39 = vld [vmem:[%s23258_s1 + $0x27e8] sm:$0xff] }
 0x258   :  { %v1275_v49 = vld [vmem:[%s23258_s1 + $0x26e0] sm:$0xff] }
 0x259   :  { %v15732_v44 = vcombine.low %v1271_v47, %v1275_v49 }
 0x25a   :  { %10054 = vmatpush1.bf16.msra.mxu0 %v15684_v60  ;;  %10587 = vmatpush1.bf16.msra.mxu1 %v15686_v8  ;;  %v15733_v60 = vcombine.high %v1271_v47, %v1275_v49  ;;  %v15735_v8 = vcombine.high %v1272_v50, %v1276_v52  ;;  %v19514_v47 = vrot.slane %v1743_v35, %v17505_v53  ;;  %v1312_v49 = vld [vmem:[%s23258_s1 + $0x2808] sm:$0xff]  ;;  %v1343_v35 = vld [vmem:[%s23258_s1 + $0x2900] sm:$0xff] }
 0x25b   :  { %10055 = vmatprep.subr.bf16.mxu0 %v15693_v61  ;;  %10588 = vmatprep.subr.bf16.mxu1 %v15695_v0  ;;  %v1279_v61 = vld [vmem:[%s23258_s1 + $0x2700] sm:$0xff]  ;;  %v1316_v50 = vld [vmem:[%s23258_s1 + $0x2828] sm:$0xff] }
 0x25c   :  { %v1283_v0 = vld [vmem:[%s23258_s1 + $0x2720] sm:$0xff] }
 0x25d   :  { %v15740_v15 = vcombine.low %v1279_v61, %v1283_v0 }
 0x25e   :  { %10056 = vmatpush1.bf16.msra.mxu0 %v15692_v10  ;;  %10589 = vmatpush1.bf16.msra.mxu1 %v15694_v11  ;;  %v15741_v10 = vcombine.high %v1279_v61, %v1283_v0  ;;  %v15743_v11 = vcombine.high %v1280_v2, %v1284_v28  ;;  %v1323_v61 = vld [vmem:[%s23258_s1 + $0x2860] sm:$0xff]  ;;  %v1759_v0 = vcombine.high %v19514_v47, %v19514_v47  ;;  %v1320_v28 = vld [vmem:[%s23258_s1 + $0x2848] sm:$0xff] }
 0x25f   :  { %10057 = vmatprep.subr.bf16.mxu0 %v15701_v12  ;;  %10590 = vmatprep.subr.bf16.mxu1 %v15703_v13  ;;  %v1287_v12 = vld [vmem:[%s23258_s1 + $0x2740] sm:$0xff]  ;;  %v19532_v2 = vcombine.high %v19321_v56, %v19321_v56 }
 0x260   :  { %v1291_v13 = vld [vmem:[%s23258_s1 + $0x2760] sm:$0xff] }
 0x261   :  { %v15748_v26 = vcombine.low %v1287_v12, %v1291_v13 }
 0x262   :  { %10058 = vmatpush1.bf16.msra.mxu0 %v15700_v18  ;;  %10591 = vmatpush1.bf16.msra.mxu1 %v15702_v20  ;;  %v15749_v18 = vcombine.high %v1287_v12, %v1291_v13  ;;  %v15751_v20 = vcombine.high %v1288_v1, %v1292_v14  ;;  %v1327_v13 = vld [vmem:[%s23258_s1 + $0x2880] sm:$0xff]  ;;  %v19547_v14 = vrot.slane %v1759_v0, %v17505_v53 }
 0x263   :  { %10059 = vmatprep.subr.bf16.mxu0 %v15709_v21  ;;  %10592 = vmatprep.subr.bf16.mxu1 %v15711_v22  ;;  %v1295_v21 = vld [vmem:[%s23258_s1 + $0x2780] sm:$0xff] }
 0x264   :  { %v1299_v22 = vld [vmem:[%s23258_s1 + $0x27a0] sm:$0xff] }
 0x265   :  { %v15756_v40 = vcombine.low %v1295_v21, %v1299_v22  ;;  %v1331_v1 = vld [vmem:[%s23258_s1 + $0x28a0] sm:$0xff] }
 0x266   :  { %10060 = vmatpush1.bf16.msra.mxu0 %v15708_v63  ;;  %10593 = vmatpush1.bf16.msra.mxu1 %v15710_v30  ;;  %v15757_v63 = vcombine.high %v1295_v21, %v1299_v22  ;;  %v15759_v30 = vcombine.high %v1296_v24, %v1300_v25  ;;  %v15789_v21 = vcombine.high %v1327_v13, %v1331_v1  ;;  %v1363_v0 = vld [vmem:[%s23258_s1 + $0x29a0] sm:$0xff] }
 0x267   :  { %10061 = vmatprep.subr.bf16.mxu0 %v15717_v32  ;;  %10594 = vmatprep.subr.bf16.mxu1 %v15719_v33  ;;  %v1303_v32 = vld [vmem:[%s23258_s1 + $0x27c0] sm:$0xff] }
 0x268   :  { %v1307_v33 = vld [vmem:[%s23258_s1 + $0x27e0] sm:$0xff] }
 0x269   :  { %v15764_v52 = vcombine.low %v1303_v32, %v1307_v33 }
 0x26a   :  { %10062 = vmatpush1.bf16.msra.mxu0 %v15716_v41  ;;  %10595 = vmatpush1.bf16.msra.mxu1 %v15718_v42  ;;  %v15758_v41 = vcombine.low %v1296_v24, %v1300_v25  ;;  %v15765_v42 = vcombine.high %v1303_v32, %v1307_v33  ;;  %v1335_v24 = vld [vmem:[%s23258_s1 + $0x28c0] sm:$0xff] }
 0x26b   :  { %10063 = vmatprep.subr.bf16.mxu0 %v15725_v45  ;;  %10596 = vmatprep.subr.bf16.mxu1 %v15727_v46  ;;  %v15767_v45 = vcombine.high %v1304_v36, %v1308_v39  ;;  %v1315_v46 = vld [vmem:[%s23258_s1 + $0x2820] sm:$0xff] }
 0x26c   :  { %v1339_v25 = vld [vmem:[%s23258_s1 + $0x28e0] sm:$0xff] }
 0x26d   :  { %v15797_v32 = vcombine.high %v1335_v24, %v1339_v25 }
 0x26e   :  { %10064 = vmatpush1.bf16.msra.mxu0 %v15724_v54  ;;  %10597 = vmatpush1.bf16.msra.mxu1 %v15726_v55  ;;  %v15766_v54 = vcombine.low %v1304_v36, %v1308_v39  ;;  %v15773_v55 = vcombine.high %v1311_v34, %v1315_v46  ;;  %v1347_v36 = vld [vmem:[%s23258_s1 + $0x2920] sm:$0xff]  ;;  %v1344_v39 = vld [vmem:[%s23258_s1 + $0x2908] sm:$0xff] }
 0x26f   :  { %10065 = vmatprep.subr.bf16.mxu0 %v15733_v60  ;;  %10598 = vmatprep.subr.bf16.mxu1 %v15735_v8  ;;  %v15775_v60 = vcombine.high %v1312_v49, %v1316_v50  ;;  %v1319_v8 = vld [vmem:[%s23258_s1 + $0x2840] sm:$0xff] }
 0x272   :  { %10066 = vmatpush1.bf16.msra.mxu0 %v15732_v44  ;;  %10599 = vmatpush1.bf16.msra.mxu1 %v15734_v3  ;;  %v1324_v44 = vld [vmem:[%s23258_s1 + $0x2868] sm:$0xff]  ;;  %v15772_v3 = vcombine.low %v1311_v34, %v1315_v46  ;;  %v1351_v46 = vld [vmem:[%s23258_s1 + $0x2940] sm:$0xff] }
 0x273   :  { %10067 = vmatprep.subr.bf16.mxu0 %v15741_v10  ;;  %10600 = vmatprep.subr.bf16.mxu1 %v15743_v11  ;;  %v15774_v10 = vcombine.low %v1312_v49, %v1316_v50  ;;  %v15781_v11 = vcombine.high %v1319_v8, %v1323_v61  ;;  %v15783_v12 = vcombine.high %v1320_v28, %v1324_v44  ;;  %v1355_v49 = vld [vmem:[%s23258_s1 + $0x2960] sm:$0xff]  ;;  %v1352_v50 = vld [vmem:[%s23258_s1 + $0x2948] sm:$0xff] }
 0x276   :  { %10068 = vmatpush1.bf16.msra.mxu0 %v15740_v15  ;;  %10601 = vmatpush1.bf16.msra.mxu1 %v15742_v16  ;;  %v1328_v15 = vld [vmem:[%s23258_s1 + $0x2888] sm:$0xff] }
 0x277   :  { %10069 = vmatprep.subr.bf16.mxu0 %v15749_v18  ;;  %10602 = vmatprep.subr.bf16.mxu1 %v15751_v20  ;;  %v1332_v16 = vld [vmem:[%s23258_s1 + $0x28a8] sm:$0xff]  ;;  %v15780_v18 = vcombine.low %v1319_v8, %v1323_v61  ;;  %v15782_v20 = vcombine.low %v1320_v28, %v1324_v44  ;;  %v1359_v61 = vld [vmem:[%s23258_s1 + $0x2980] sm:$0xff] }
 0x278   :  { %v15791_v22 = vcombine.high %v1328_v15, %v1332_v16  ;;  %v1360_v28 = vld [vmem:[%s23258_s1 + $0x2988] sm:$0xff] }
 0x279   :  { %v1364_v44 = vld [vmem:[%s23258_s1 + $0x29a8] sm:$0xff] }
 0x27a   :  { %10070 = vmatpush1.bf16.msra.mxu0 %v15748_v26  ;;  %10603 = vmatpush1.bf16.msra.mxu1 %v15750_v27  ;;  %v1336_v26 = vld [vmem:[%s23258_s1 + $0x28c8] sm:$0xff] }
 0x27b   :  { %10071 = vmatprep.subr.bf16.mxu0 %v15757_v63  ;;  %10604 = vmatprep.subr.bf16.mxu1 %v15759_v30  ;;  %v1340_v27 = vld [vmem:[%s23258_s1 + $0x28e8] sm:$0xff]  ;;  %v15788_v63 = vcombine.low %v1327_v13, %v1331_v1  ;;  %v15790_v30 = vcombine.low %v1328_v15, %v1332_v16  ;;  %v1367_v13 = vld [vmem:[%s23258_s1 + $0x29c0] sm:$0xff] }
 0x27c   :  { %v15799_v33 = vcombine.high %v1336_v26, %v1340_v27  ;;  %v1371_v1 = vld [vmem:[%s23258_s1 + $0x29e0] sm:$0xff]  ;;  %v1368_v15 = vld [vmem:[%s23258_s1 + $0x29c8] sm:$0xff] }
 0x27d   :  { %v1372_v16 = vld [vmem:[%s23258_s1 + $0x29e8] sm:$0xff] }
 0x27e   :  { %10072 = vmatpush1.bf16.msra.mxu0 %v15756_v40  ;;  %10605 = vmatpush1.bf16.msra.mxu1 %v15758_v41  ;;  %v1348_v40 = vld [vmem:[%s23258_s1 + $0x2928] sm:$0xff]  ;;  %v15796_v41 = vcombine.low %v1335_v24, %v1339_v25  ;;  %v1375_v24 = vld [vmem:[%s23258_s1 + $0x2a00] sm:$0xff] }
 0x27f   :  { %10073 = vmatprep.subr.bf16.mxu0 %v15765_v42  ;;  %10606 = vmatprep.subr.bf16.mxu1 %v15767_v45  ;;  %v15798_v42 = vcombine.low %v1336_v26, %v1340_v27  ;;  %v15805_v45 = vcombine.high %v1343_v35, %v1347_v36  ;;  %v15807_v34 = vcombine.high %v1344_v39, %v1348_v40  ;;  %v1379_v25 = vld [vmem:[%s23258_s1 + $0x2a20] sm:$0xff]  ;;  %v1376_v26 = vld [vmem:[%s23258_s1 + $0x2a08] sm:$0xff] }
 0x280   :  { %v1380_v27 = vld [vmem:[%s23258_s1 + $0x2a28] sm:$0xff] }
 0x282   :  { %10074 = vmatpush1.bf16.msra.mxu0 %v15764_v52  ;;  %10607 = vmatpush1.bf16.msra.mxu1 %v15766_v54  ;;  %v1356_v52 = vld [vmem:[%s23258_s1 + $0x2968] sm:$0xff]  ;;  %v15804_v54 = vcombine.low %v1343_v35, %v1347_v36  ;;  %v1383_v35 = vld [vmem:[%s23258_s1 + $0x2a40] sm:$0xff] }
 0x283   :  { %10084 = vmatprep.subr.bf16.mxu0 %v15773_v55  ;;  %10617 = vmatprep.subr.bf16.mxu1 %v15775_v60  ;;  %v15806_v55 = vcombine.low %v1344_v39, %v1348_v40  ;;  %v15813_v60 = vcombine.high %v1351_v46, %v1355_v49  ;;  %v15815_v8 = vcombine.high %v1352_v50, %v1356_v52  ;;  %v1387_v36 = vld [vmem:[%s23258_s1 + $0x2a60] sm:$0xff]  ;;  %v1384_v39 = vld [vmem:[%s23258_s1 + $0x2a48] sm:$0xff] }
 0x284   :  { %v1388_v40 = vld [vmem:[%s23258_s1 + $0x2a68] sm:$0xff] }
 0x285   :  { %10076 = vmatmul.mubr.bf16.vlgmr.msra.gmra.mrb[0].mxu0 %v19532_v2  ;;  %10609 = vmatmul.mubr.bf16.vlgmr.msra.gmra.mrb[0].mxu1 %v19532_v2 }
 0x286   :  { %10085 = vmatpush1.bf16.msra.mxu0 %v15772_v3  ;;  %10618 = vmatpush1.bf16.msra.mxu1 %v15774_v10  ;;  %v15812_v3 = vcombine.low %v1351_v46, %v1355_v49  ;;  %v15814_v10 = vcombine.low %v1352_v50, %v1356_v52  ;;  %v1391_v46 = vld [vmem:[%s23258_s1 + $0x2a80] sm:$0xff]  ;;  %v1392_v50 = vld [vmem:[%s23258_s1 + $0x2a88] sm:$0xff] }
 0x287   :  { %10086 = vmatprep.subr.bf16.mxu0 %v15781_v11  ;;  %10619 = vmatprep.subr.bf16.mxu1 %v15783_v12  ;;  %v15821_v11 = vcombine.high %v1359_v61, %v1363_v0  ;;  %v15823_v12 = vcombine.high %v1360_v28, %v1364_v44  ;;  %v1395_v49 = vld [vmem:[%s23258_s1 + $0x2aa0] sm:$0xff]  ;;  %v1396_v52 = vld [vmem:[%s23258_s1 + $0x2aa8] sm:$0xff] }
 0x288   :  { %10116 = vmatprep.mubr.bf16.mxu0 %v19547_v14  ;;  %10649 = vmatprep.mubr.bf16.mxu1 %v19547_v14 }
 0x28a   :  { %10087 = vmatpush1.bf16.msra.mxu0 %v15780_v18  ;;  %10620 = vmatpush1.bf16.msra.mxu1 %v15782_v20  ;;  %v15820_v18 = vcombine.low %v1359_v61, %v1363_v0  ;;  %v15822_v20 = vcombine.low %v1360_v28, %v1364_v44  ;;  %v1399_v61 = vld [vmem:[%s23258_s1 + $0x2ac0] sm:$0xff]  ;;  %v1400_v28 = vld [vmem:[%s23258_s1 + $0x2ac8] sm:$0xff] }
 0x28b   :  { %10088 = vmatprep.subr.bf16.mxu0 %v15789_v21  ;;  %10621 = vmatprep.subr.bf16.mxu1 %v15791_v22  ;;  %v15829_v21 = vcombine.high %v1367_v13, %v1371_v1  ;;  %v15831_v22 = vcombine.high %v1368_v15, %v1372_v16  ;;  %v1403_v0 = vld [vmem:[%s23258_s1 + $0x2ae0] sm:$0xff]  ;;  %v1404_v44 = vld [vmem:[%s23258_s1 + $0x2ae8] sm:$0xff] }
 0x28e   :  { %10089 = vmatpush1.bf16.msra.mxu0 %v15788_v63  ;;  %10622 = vmatpush1.bf16.msra.mxu1 %v15790_v30  ;;  %v15828_v63 = vcombine.low %v1367_v13, %v1371_v1  ;;  %v15830_v30 = vcombine.low %v1368_v15, %v1372_v16  ;;  %v1407_v13 = vld [vmem:[%s23258_s1 + $0x2b00] sm:$0xff]  ;;  %v1408_v15 = vld [vmem:[%s23258_s1 + $0x2b08] sm:$0xff] }
 0x28f   :  { %10090 = vmatprep.subr.bf16.mxu0 %v15797_v32  ;;  %10623 = vmatprep.subr.bf16.mxu1 %v15799_v33  ;;  %v15837_v32 = vcombine.high %v1375_v24, %v1379_v25  ;;  %v15839_v33 = vcombine.high %v1376_v26, %v1380_v27  ;;  %v1411_v1 = vld [vmem:[%s23258_s1 + $0x2b20] sm:$0xff]  ;;  %v1412_v16 = vld [vmem:[%s23258_s1 + $0x2b28] sm:$0xff] }
 0x292   :  { %10091 = vmatpush1.bf16.msra.mxu0 %v15796_v41  ;;  %10624 = vmatpush1.bf16.msra.mxu1 %v15798_v42  ;;  %v15836_v41 = vcombine.low %v1375_v24, %v1379_v25  ;;  %v15838_v42 = vcombine.low %v1376_v26, %v1380_v27  ;;  %v1415_v24 = vld [vmem:[%s23258_s1 + $0x2b40] sm:$0xff]  ;;  %v1416_v26 = vld [vmem:[%s23258_s1 + $0x2b48] sm:$0xff] }
 0x293   :  { %10092 = vmatprep.subr.bf16.mxu0 %v15805_v45  ;;  %10625 = vmatprep.subr.bf16.mxu1 %v15807_v34  ;;  %v15845_v45 = vcombine.high %v1383_v35, %v1387_v36  ;;  %v15847_v34 = vcombine.high %v1384_v39, %v1388_v40  ;;  %v1419_v25 = vld [vmem:[%s23258_s1 + $0x2b60] sm:$0xff]  ;;  %v1420_v27 = vld [vmem:[%s23258_s1 + $0x2b68] sm:$0xff] }
 0x296   :  { %10093 = vmatpush1.bf16.msra.mxu0 %v15804_v54  ;;  %10626 = vmatpush1.bf16.msra.mxu1 %v15806_v55  ;;  %v15844_v54 = vcombine.low %v1383_v35, %v1387_v36  ;;  %v15846_v55 = vcombine.low %v1384_v39, %v1388_v40  ;;  %v1423_v35 = vld [vmem:[%s23258_s1 + $0x2b80] sm:$0xff]  ;;  %v1424_v39 = vld [vmem:[%s23258_s1 + $0x2b88] sm:$0xff] }
 0x297   :  { %10094 = vmatprep.subr.bf16.mxu0 %v15813_v60  ;;  %10627 = vmatprep.subr.bf16.mxu1 %v15815_v8  ;;  %v15853_v60 = vcombine.high %v1391_v46, %v1395_v49  ;;  %v15855_v8 = vcombine.high %v1392_v50, %v1396_v52  ;;  %v1427_v36 = vld [vmem:[%s23258_s1 + $0x2ba0] sm:$0xff]  ;;  %v1428_v40 = vld [vmem:[%s23258_s1 + $0x2ba8] sm:$0xff] }
 0x29a   :  { %10095 = vmatpush1.bf16.msra.mxu0 %v15812_v3  ;;  %10628 = vmatpush1.bf16.msra.mxu1 %v15814_v10  ;;  %v15852_v3 = vcombine.low %v1391_v46, %v1395_v49  ;;  %v15854_v10 = vcombine.low %v1392_v50, %v1396_v52  ;;  %v1431_v46 = vld [vmem:[%s23258_s1 + $0x2bc0] sm:$0xff]  ;;  %v1432_v50 = vld [vmem:[%s23258_s1 + $0x2bc8] sm:$0xff] }
 0x29b   :  { %10096 = vmatprep.subr.bf16.mxu0 %v15821_v11  ;;  %10629 = vmatprep.subr.bf16.mxu1 %v15823_v12  ;;  %v15861_v11 = vcombine.high %v1399_v61, %v1403_v0  ;;  %v15863_v12 = vcombine.high %v1400_v28, %v1404_v44  ;;  %v1435_v49 = vld [vmem:[%s23258_s1 + $0x2be0] sm:$0xff]  ;;  %v1436_v52 = vld [vmem:[%s23258_s1 + $0x2be8] sm:$0xff] }
 0x29e   :  { %10097 = vmatpush1.bf16.msra.mxu0 %v15820_v18  ;;  %10630 = vmatpush1.bf16.msra.mxu1 %v15822_v20  ;;  %v15860_v18 = vcombine.low %v1399_v61, %v1403_v0  ;;  %v15862_v20 = vcombine.low %v1400_v28, %v1404_v44  ;;  %v1439_v61 = vld [vmem:[%s23258_s1 + $0x2c00] sm:$0xff]  ;;  %v1440_v28 = vld [vmem:[%s23258_s1 + $0x2c08] sm:$0xff] }
 0x29f   :  { %10098 = vmatprep.subr.bf16.mxu0 %v15829_v21  ;;  %10631 = vmatprep.subr.bf16.mxu1 %v15831_v22  ;;  %v15869_v21 = vcombine.high %v1407_v13, %v1411_v1  ;;  %v15871_v22 = vcombine.high %v1408_v15, %v1412_v16  ;;  %v1443_v0 = vld [vmem:[%s23258_s1 + $0x2c20] sm:$0xff]  ;;  %v1444_v44 = vld [vmem:[%s23258_s1 + $0x2c28] sm:$0xff] }
 0x2a2   :  { %10099 = vmatpush1.bf16.msra.mxu0 %v15828_v63  ;;  %10632 = vmatpush1.bf16.msra.mxu1 %v15830_v30  ;;  %v15868_v63 = vcombine.low %v1407_v13, %v1411_v1  ;;  %v15870_v30 = vcombine.low %v1408_v15, %v1412_v16  ;;  %v1447_v13 = vld [vmem:[%s23258_s1 + $0x2c40] sm:$0xff]  ;;  %v19735_v15 = vrot.slane %v19514_v47, %v17505_v53  ;;  %v1448_v16 = vld [vmem:[%s23258_s1 + $0x2c48] sm:$0xff] }
 0x2a3   :  { %10100 = vmatprep.subr.bf16.mxu0 %v15837_v32  ;;  %10633 = vmatprep.subr.bf16.mxu1 %v15839_v33  ;;  %v15877_v32 = vcombine.high %v1415_v24, %v1419_v25  ;;  %v15879_v33 = vcombine.high %v1416_v26, %v1420_v27  ;;  %v1451_v1 = vld [vmem:[%s23258_s1 + $0x2c60] sm:$0xff] }
 0x2a4   :  { %v1455_v47 = vld [vmem:[%s23258_s1 + $0x2c80] sm:$0xff] }
 0x2a6   :  { %10101 = vmatpush1.bf16.msra.mxu0 %v15836_v41  ;;  %10634 = vmatpush1.bf16.msra.mxu1 %v15838_v42  ;;  %v15876_v41 = vcombine.low %v1415_v24, %v1419_v25  ;;  %v15878_v42 = vcombine.low %v1416_v26, %v1420_v27  ;;  %v1459_v25 = vld [vmem:[%s23258_s1 + $0x2ca0] sm:$0xff]  ;;  %v19751_v26 = vcombine.high %v19547_v14, %v19547_v14  ;;  %v1456_v27 = vld [vmem:[%s23258_s1 + $0x2c88] sm:$0xff] }
 0x2a7   :  { %10102 = vmatprep.subr.bf16.mxu0 %v15845_v45  ;;  %10635 = vmatprep.subr.bf16.mxu1 %v15847_v34  ;;  %v15885_v45 = vcombine.high %v1423_v35, %v1427_v36  ;;  %v15887_v34 = vcombine.high %v1424_v39, %v1428_v40 }
 0x2aa   :  { %10103 = vmatpush1.bf16.msra.mxu0 %v15844_v54  ;;  %10636 = vmatpush1.bf16.msra.mxu1 %v15846_v55  ;;  %v15884_v54 = vcombine.low %v1423_v35, %v1427_v36  ;;  %v15886_v55 = vcombine.low %v1424_v39, %v1428_v40  ;;  %v1463_v36 = vld [vmem:[%s23258_s1 + $0x2cc0] sm:$0xff]  ;;  %v1464_v40 = vld [vmem:[%s23258_s1 + $0x2cc8] sm:$0xff] }
 0x2ab   :  { %10104 = vmatprep.subr.bf16.mxu0 %v15853_v60  ;;  %10637 = vmatprep.subr.bf16.mxu1 %v15855_v8  ;;  %v15893_v60 = vcombine.high %v1431_v46, %v1435_v49  ;;  %v15895_v8 = vcombine.high %v1432_v50, %v1436_v52  ;;  %v1467_v39 = vld [vmem:[%s23258_s1 + $0x2ce0] sm:$0xff] }
 0x2ae   :  { %10105 = vmatpush1.bf16.msra.mxu0 %v15852_v3  ;;  %10638 = vmatpush1.bf16.msra.mxu1 %v15854_v10  ;;  %v15892_v3 = vcombine.low %v1431_v46, %v1435_v49  ;;  %v15894_v10 = vcombine.low %v1432_v50, %v1436_v52  ;;  %v1471_v49 = vld [vmem:[%s23258_s1 + $0x2d00] sm:$0xff]  ;;  %v1472_v52 = vld [vmem:[%s23258_s1 + $0x2d08] sm:$0xff] }
 0x2af   :  { %10106 = vmatprep.subr.bf16.mxu0 %v15861_v11  ;;  %10639 = vmatprep.subr.bf16.mxu1 %v15863_v12  ;;  %v15901_v11 = vcombine.high %v1439_v61, %v1443_v0  ;;  %v15903_v12 = vcombine.high %v1440_v28, %v1444_v44  ;;  %v1475_v50 = vld [vmem:[%s23258_s1 + $0x2d20] sm:$0xff] }
 0x2b2   :  { %10107 = vmatpush1.bf16.msra.mxu0 %v15860_v18  ;;  %10640 = vmatpush1.bf16.msra.mxu1 %v15862_v20  ;;  %v1452_v18 = vld [vmem:[%s23258_s1 + $0x2c68] sm:$0xff]  ;;  %v15900_v20 = vcombine.low %v1439_v61, %v1443_v0  ;;  %v1479_v0 = vld [vmem:[%s23258_s1 + $0x2d40] sm:$0xff] }
 0x2b3   :  { %10108 = vmatprep.subr.bf16.mxu0 %v15869_v21  ;;  %10641 = vmatprep.subr.bf16.mxu1 %v15871_v22  ;;  %v15902_v21 = vcombine.low %v1440_v28, %v1444_v44  ;;  %v15909_v22 = vcombine.high %v1447_v13, %v1451_v1  ;;  %v15911_v24 = vcombine.high %v1448_v16, %v1452_v18  ;;  %v1483_v28 = vld [vmem:[%s23258_s1 + $0x2d60] sm:$0xff]  ;;  %v1480_v44 = vld [vmem:[%s23258_s1 + $0x2d48] sm:$0xff] }
 0x2b6   :  { %10109 = vmatpush1.bf16.msra.mxu0 %v15868_v63  ;;  %10642 = vmatpush1.bf16.msra.mxu1 %v15870_v30  ;;  %v1460_v63 = vld [vmem:[%s23258_s1 + $0x2ca8] sm:$0xff]  ;;  %v15908_v30 = vcombine.low %v1447_v13, %v1451_v1  ;;  %v1487_v1 = vld [vmem:[%s23258_s1 + $0x2d80] sm:$0xff] }
 0x2b7   :  { %10110 = vmatprep.subr.bf16.mxu0 %v15877_v32  ;;  %10643 = vmatprep.subr.bf16.mxu1 %v15879_v33  ;;  %v15910_v32 = vcombine.low %v1448_v16, %v1452_v18  ;;  %v15917_v33 = vcombine.high %v1455_v47, %v1459_v25  ;;  %v15919_v35 = vcombine.high %v1456_v27, %v1460_v63  ;;  %v1491_v16 = vld [vmem:[%s23258_s1 + $0x2da0] sm:$0xff]  ;;  %v1488_v18 = vld [vmem:[%s23258_s1 + $0x2d88] sm:$0xff] }
 0x2ba   :  { %10111 = vmatpush1.bf16.msra.mxu0 %v15876_v41  ;;  %10644 = vmatpush1.bf16.msra.mxu1 %v15878_v42  ;;  %v1468_v41 = vld [vmem:[%s23258_s1 + $0x2ce8] sm:$0xff]  ;;  %v15916_v42 = vcombine.low %v1455_v47, %v1459_v25  ;;  %v1495_v25 = vld [vmem:[%s23258_s1 + $0x2dc0] sm:$0xff] }
 0x2bb   :  { %10112 = vmatprep.subr.bf16.mxu0 %v15885_v45  ;;  %10645 = vmatprep.subr.bf16.mxu1 %v15887_v34  ;;  %v15918_v45 = vcombine.low %v1456_v27, %v1460_v63  ;;  %v15925_v34 = vcombine.high %v1463_v36, %v1467_v39  ;;  %v15927_v46 = vcombine.high %v1464_v40, %v1468_v41  ;;  %v1499_v27 = vld [vmem:[%s23258_s1 + $0x2de0] sm:$0xff]  ;;  %v1496_v63 = vld [vmem:[%s23258_s1 + $0x2dc8] sm:$0xff] }
 0x2be   :  { %10113 = vmatpush1.bf16.msra.mxu0 %v15884_v54  ;;  %10646 = vmatpush1.bf16.msra.mxu1 %v15886_v55  ;;  %v1476_v54 = vld [vmem:[%s23258_s1 + $0x2d28] sm:$0xff]  ;;  %v15924_v55 = vcombine.low %v1463_v36, %v1467_v39  ;;  %v1503_v39 = vld [vmem:[%s23258_s1 + $0x2e00] sm:$0xff] }
 0x2bf   :  { %10114 = vmatprep.subr.bf16.mxu0 %v15893_v60  ;;  %10647 = vmatprep.subr.bf16.mxu1 %v15895_v8  ;;  %v15926_v60 = vcombine.low %v1464_v40, %v1468_v41  ;;  %v15933_v8 = vcombine.high %v1471_v49, %v1475_v50  ;;  %v15935_v61 = vcombine.high %v1472_v52, %v1476_v54  ;;  %v1507_v40 = vld [vmem:[%s23258_s1 + $0x2e20] sm:$0xff]  ;;  %v1504_v41 = vld [vmem:[%s23258_s1 + $0x2e08] sm:$0xff] }
 0x2c2   :  { %10115 = vmatpush1.bf16.msra.mxu0 %v15892_v3  ;;  %10648 = vmatpush1.bf16.msra.mxu1 %v15894_v10  ;;  %v1484_v3 = vld [vmem:[%s23258_s1 + $0x2d68] sm:$0xff]  ;;  %v15932_v10 = vcombine.low %v1471_v49, %v1475_v50  ;;  %v1511_v50 = vld [vmem:[%s23258_s1 + $0x2e40] sm:$0xff] }
 0x2c3   :  { %10125 = vmatprep.subr.bf16.mxu0 %v15901_v11  ;;  %10658 = vmatprep.subr.bf16.mxu1 %v15903_v12  ;;  %v15934_v11 = vcombine.low %v1472_v52, %v1476_v54  ;;  %v15941_v12 = vcombine.high %v1479_v0, %v1483_v28  ;;  %v15943_v13 = vcombine.high %v1480_v44, %v1484_v3  ;;  %v1515_v52 = vld [vmem:[%s23258_s1 + $0x2e60] sm:$0xff]  ;;  %v1512_v54 = vld [vmem:[%s23258_s1 + $0x2e48] sm:$0xff] }
 0x2c5   :  { %10117 = vmatmul.mubr.bf16.vlgmr.msra.gmra.mrb[0].mxu0 %v19735_v15  ;;  %10650 = vmatmul.mubr.bf16.vlgmr.msra.gmra.mrb[0].mxu1 %v19735_v15 }
 0x2c6   :  { %10126 = vmatpush1.bf16.msra.mxu0 %v15900_v20  ;;  %10659 = vmatpush1.bf16.msra.mxu1 %v15902_v21  ;;  %v1492_v20 = vld [vmem:[%s23258_s1 + $0x2da8] sm:$0xff]  ;;  %v15940_v21 = vcombine.low %v1479_v0, %v1483_v28  ;;  %v1519_v28 = vld [vmem:[%s23258_s1 + $0x2e80] sm:$0xff] }
 0x2c7   :  { %10127 = vmatprep.subr.bf16.mxu0 %v15909_v22  ;;  %10660 = vmatprep.subr.bf16.mxu1 %v15911_v24  ;;  %v15942_v22 = vcombine.low %v1480_v44, %v1484_v3  ;;  %v15949_v24 = vcombine.high %v1487_v1, %v1491_v16  ;;  %v15951_v47 = vcombine.high %v1488_v18, %v1492_v20  ;;  %v1523_v44 = vld [vmem:[%s23258_s1 + $0x2ea0] sm:$0xff]  ;;  %v1520_v3 = vld [vmem:[%s23258_s1 + $0x2e88] sm:$0xff] }
 0x2c8   :  { %10157 = vmatprep.mubr.bf16.mxu0 %v19751_v26  ;;  %10690 = vmatprep.mubr.bf16.mxu1 %v19751_v26 }
 0x2ca   :  { %10128 = vmatpush1.bf16.msra.mxu0 %v15908_v30  ;;  %10661 = vmatpush1.bf16.msra.mxu1 %v15910_v32  ;;  %v1500_v30 = vld [vmem:[%s23258_s1 + $0x2de8] sm:$0xff]  ;;  %v15948_v32 = vcombine.low %v1487_v1, %v1491_v16  ;;  %v1527_v16 = vld [vmem:[%s23258_s1 + $0x2ec0] sm:$0xff] }
 0x2cb   :  { %10129 = vmatprep.subr.bf16.mxu0 %v15917_v33  ;;  %10662 = vmatprep.subr.bf16.mxu1 %v15919_v35  ;;  %v15950_v33 = vcombine.low %v1488_v18, %v1492_v20  ;;  %v15957_v35 = vcombine.high %v1495_v25, %v1499_v27  ;;  %v15959_v36 = vcombine.high %v1496_v63, %v1500_v30  ;;  %v1531_v18 = vld [vmem:[%s23258_s1 + $0x2ee0] sm:$0xff]  ;;  %v1528_v20 = vld [vmem:[%s23258_s1 + $0x2ec8] sm:$0xff] }
 0x2ce   :  { %10130 = vmatpush1.bf16.msra.mxu0 %v15916_v42  ;;  %10663 = vmatpush1.bf16.msra.mxu1 %v15918_v45  ;;  %v1508_v42 = vld [vmem:[%s23258_s1 + $0x2e28] sm:$0xff]  ;;  %v15956_v45 = vcombine.low %v1495_v25, %v1499_v27  ;;  %v1535_v27 = vld [vmem:[%s23258_s1 + $0x2f00] sm:$0xff] }
 0x2cf   :  { %10131 = vmatprep.subr.bf16.mxu0 %v15925_v34  ;;  %10664 = vmatprep.subr.bf16.mxu1 %v15927_v46  ;;  %v15958_v34 = vcombine.low %v1496_v63, %v1500_v30  ;;  %v15965_v46 = vcombine.high %v1503_v39, %v1507_v40  ;;  %v15967_v49 = vcombine.high %v1504_v41, %v1508_v42  ;;  %v1539_v63 = vld [vmem:[%s23258_s1 + $0x2f20] sm:$0xff]  ;;  %v1536_v30 = vld [vmem:[%s23258_s1 + $0x2f08] sm:$0xff] }
 0x2d2   :  { %10132 = vmatpush1.bf16.msra.mxu0 %v15924_v55  ;;  %10665 = vmatpush1.bf16.msra.mxu1 %v15926_v60  ;;  %v1516_v55 = vld [vmem:[%s23258_s1 + $0x2e68] sm:$0xff]  ;;  %v15964_v60 = vcombine.low %v1503_v39, %v1507_v40  ;;  %v1543_v40 = vld [vmem:[%s23258_s1 + $0x2f40] sm:$0xff] }
 0x2d3   :  { %10133 = vmatprep.subr.bf16.mxu0 %v15933_v8  ;;  %10666 = vmatprep.subr.bf16.mxu1 %v15935_v61  ;;  %v15966_v8 = vcombine.low %v1504_v41, %v1508_v42  ;;  %v15973_v61 = vcombine.high %v1511_v50, %v1515_v52  ;;  %v15975_v0 = vcombine.high %v1512_v54, %v1516_v55  ;;  %v1547_v41 = vld [vmem:[%s23258_s1 + $0x2f60] sm:$0xff]  ;;  %v1544_v42 = vld [vmem:[%s23258_s1 + $0x2f48] sm:$0xff] }
 0x2d6   :  { %10134 = vmatpush1.bf16.msra.mxu0 %v15932_v10  ;;  %10667 = vmatpush1.bf16.msra.mxu1 %v15934_v11  ;;  %v1524_v10 = vld [vmem:[%s23258_s1 + $0x2ea8] sm:$0xff]  ;;  %v15972_v11 = vcombine.low %v1511_v50, %v1515_v52  ;;  %v1551_v52 = vld [vmem:[%s23258_s1 + $0x2f80] sm:$0xff] }
 0x2d7   :  { %10135 = vmatprep.subr.bf16.mxu0 %v15941_v12  ;;  %10668 = vmatprep.subr.bf16.mxu1 %v15943_v13  ;;  %v15974_v12 = vcombine.low %v1512_v54, %v1516_v55  ;;  %v15981_v13 = vcombine.high %v1519_v28, %v1523_v44  ;;  %v15983_v1 = vcombine.high %v1520_v3, %v1524_v10  ;;  %v1555_v54 = vld [vmem:[%s23258_s1 + $0x2fa0] sm:$0xff]  ;;  %v1552_v55 = vld [vmem:[%s23258_s1 + $0x2f88] sm:$0xff] }
 0x2da   :  { %10136 = vmatpush1.bf16.msra.mxu0 %v15940_v21  ;;  %10669 = vmatpush1.bf16.msra.mxu1 %v15942_v22  ;;  %v1532_v21 = vld [vmem:[%s23258_s1 + $0x2ee8] sm:$0xff]  ;;  %v15980_v22 = vcombine.low %v1519_v28, %v1523_v44  ;;  %v1559_v44 = vld [vmem:[%s23258_s1 + $0x2fc0] sm:$0xff] }
 0x2db   :  { %10137 = vmatprep.subr.bf16.mxu0 %v15949_v24  ;;  %10670 = vmatprep.subr.bf16.mxu1 %v15951_v47  ;;  %v15982_v24 = vcombine.low %v1520_v3, %v1524_v10  ;;  %v15989_v47 = vcombine.high %v1527_v16, %v1531_v18  ;;  %v15991_v25 = vcombine.high %v1528_v20, %v1532_v21  ;;  %v1563_v3 = vld [vmem:[%s23258_s1 + $0x2fe0] sm:$0xff]  ;;  %v1560_v10 = vld [vmem:[%s23258_s1 + $0x2fc8] sm:$0xff] }
 0x2de   :  { %10138 = vmatpush1.bf16.msra.mxu0 %v15948_v32  ;;  %10671 = vmatpush1.bf16.msra.mxu1 %v15950_v33  ;;  %v1540_v32 = vld [vmem:[%s23258_s1 + $0x2f28] sm:$0xff]  ;;  %v15988_v33 = vcombine.low %v1527_v16, %v1531_v18  ;;  %v1567_v18 = vld [vmem:[%s23258_s1 + $0x3000] sm:$0xff] }
 0x2df   :  { %10139 = vmatprep.subr.bf16.mxu0 %v15957_v35  ;;  %10672 = vmatprep.subr.bf16.mxu1 %v15959_v36  ;;  %v15990_v35 = vcombine.low %v1528_v20, %v1532_v21  ;;  %v15997_v36 = vcombine.high %v1535_v27, %v1539_v63  ;;  %v15999_v39 = vcombine.high %v1536_v30, %v1540_v32  ;;  %v1571_v20 = vld [vmem:[%s23258_s1 + $0x3020] sm:$0xff]  ;;  %v1568_v21 = vld [vmem:[%s23258_s1 + $0x3008] sm:$0xff] }
 0x2e2   :  { %10140 = vmatpush1.bf16.msra.mxu0 %v15956_v45  ;;  %10673 = vmatpush1.bf16.msra.mxu1 %v15958_v34  ;;  %v1548_v45 = vld [vmem:[%s23258_s1 + $0x2f68] sm:$0xff]  ;;  %v15996_v34 = vcombine.low %v1535_v27, %v1539_v63  ;;  %v1575_v63 = vld [vmem:[%s23258_s1 + $0x3040] sm:$0xff] }
 0x2e3   :  { %10141 = vmatprep.subr.bf16.mxu0 %v15965_v46  ;;  %10674 = vmatprep.subr.bf16.mxu1 %v15967_v49  ;;  %v15998_v46 = vcombine.low %v1536_v30, %v1540_v32  ;;  %v16005_v49 = vcombine.high %v1543_v40, %v1547_v41  ;;  %v16007_v50 = vcombine.high %v1544_v42, %v1548_v45  ;;  %v1579_v30 = vld [vmem:[%s23258_s1 + $0x3060] sm:$0xff] }
 0x2e4   :  { %v19939_v32 = vcombine.high %v19735_v15, %v19735_v15 }
 0x2e6   :  { %10142 = vmatpush1.bf16.msra.mxu0 %v15964_v60  ;;  %10675 = vmatpush1.bf16.msra.mxu1 %v15966_v8  ;;  %v1556_v60 = vld [vmem:[%s23258_s1 + $0x2fa8] sm:$0xff]  ;;  %v16004_v8 = vcombine.low %v1543_v40, %v1547_v41  ;;  %v16037_v40 = vcombine.high %v1575_v63, %v1579_v30 }
 0x2e7   :  { %10143 = vmatprep.subr.bf16.mxu0 %v15973_v61  ;;  %10676 = vmatprep.subr.bf16.mxu1 %v15975_v0  ;;  %v16006_v61 = vcombine.low %v1544_v42, %v1548_v45  ;;  %v16013_v0 = vcombine.high %v1551_v52, %v1555_v54  ;;  %v16015_v28 = vcombine.high %v1552_v55, %v1556_v60  ;;  %v1583_v42 = vld [vmem:[%s23258_s1 + $0x3080] sm:$0xff] }
 0x2e8   :  { %v1587_v45 = vld [vmem:[%s23258_s1 + $0x30a0] sm:$0xff] }
 0x2ea   :  { %10144 = vmatpush1.bf16.msra.mxu0 %v15972_v11  ;;  %10677 = vmatpush1.bf16.msra.mxu1 %v15974_v12  ;;  %v1564_v11 = vld [vmem:[%s23258_s1 + $0x2fe8] sm:$0xff]  ;;  %v16012_v12 = vcombine.low %v1551_v52, %v1555_v54  ;;  %v16045_v52 = vcombine.high %v1583_v42, %v1587_v45 }
 0x2eb   :  { %10145 = vmatprep.subr.bf16.mxu0 %v15981_v13  ;;  %10678 = vmatprep.subr.bf16.mxu1 %v15983_v1  ;;  %v16014_v13 = vcombine.low %v1552_v55, %v1556_v60  ;;  %v16021_v1 = vcombine.high %v1559_v44, %v1563_v3  ;;  %v16023_v16 = vcombine.high %v1560_v10, %v1564_v11  ;;  %v1591_v55 = vld [vmem:[%s23258_s1 + $0x30c0] sm:$0xff] }
 0x2ec   :  { %v1595_v60 = vld [vmem:[%s23258_s1 + $0x30e0] sm:$0xff] }
 0x2ee   :  { %10146 = vmatpush1.bf16.msra.mxu0 %v15980_v22  ;;  %10679 = vmatpush1.bf16.msra.mxu1 %v15982_v24  ;;  %v1572_v22 = vld [vmem:[%s23258_s1 + $0x3028] sm:$0xff]  ;;  %v16020_v24 = vcombine.low %v1559_v44, %v1563_v3  ;;  %v16053_v3 = vcombine.high %v1591_v55, %v1595_v60 }
 0x2ef   :  { %10147 = vmatprep.subr.bf16.mxu0 %v15989_v47  ;;  %10680 = vmatprep.subr.bf16.mxu1 %v15991_v25  ;;  %v16022_v47 = vcombine.low %v1560_v10, %v1564_v11  ;;  %v16029_v25 = vcombine.high %v1567_v18, %v1571_v20  ;;  %v16031_v27 = vcombine.high %v1568_v21, %v1572_v22  ;;  %v33_v11 = vld [vmem:[%s23258_s1 + $0x10] sm:$0xff] }
 0x2f2   :  { %10148 = vmatpush1.bf16.msra.mxu0 %v15988_v33  ;;  %10681 = vmatpush1.bf16.msra.mxu1 %v15990_v35  ;;  %v1576_v33 = vld [vmem:[%s23258_s1 + $0x3048] sm:$0xff] }
 0x2f3   :  { %10149 = vmatprep.subr.bf16.mxu0 %v15997_v36  ;;  %10682 = vmatprep.subr.bf16.mxu1 %v15999_v39  ;;  %v1580_v35 = vld [vmem:[%s23258_s1 + $0x3068] sm:$0xff]  ;;  %v16028_v36 = vcombine.low %v1567_v18, %v1571_v20  ;;  %v16030_v39 = vcombine.low %v1568_v21, %v1572_v22  ;;  %v14491_v18 = vld.sshfl [vmem:[%s23259_s0 + $0x18] sm:$0x1 pattern:$0x75316420] }
 0x2f4   :  { %v16039_v41 = vcombine.high %v1576_v33, %v1580_v35 }
 0x2f6   :  { %10150 = vmatpush1.bf16.msra.mxu0 %v15996_v34  ;;  %10683 = vmatpush1.bf16.msra.mxu1 %v15998_v46  ;;  %v1584_v34 = vld [vmem:[%s23258_s1 + $0x3088] sm:$0xff] }
 0x2f7   :  { %10151 = vmatprep.subr.bf16.mxu0 %v16005_v49  ;;  %10684 = vmatprep.subr.bf16.mxu1 %v16007_v50  ;;  %v1588_v46 = vld [vmem:[%s23258_s1 + $0x30a8] sm:$0xff]  ;;  %v16036_v49 = vcombine.low %v1575_v63, %v1579_v30  ;;  %v16038_v50 = vcombine.low %v1576_v33, %v1580_v35  ;;  %v46_v63 = vld [vmem:[%s23258_s1 + $0x78] sm:$0xff] }
 0x2f8   :  { %v16047_v54 = vcombine.high %v1584_v34, %v1588_v46  ;;  %v16046_v44 = vcombine.low %v1584_v34, %v1588_v46 }
 0x2fa   :  { %10152 = vmatpush1.bf16.msra.mxu0 %v16004_v8  ;;  %10685 = vmatpush1.bf16.msra.mxu1 %v16006_v61  ;;  %v17383_v8 = vmov 0   ;;  %v1592_v61 = vld [vmem:[%s23258_s1 + $0x30c8] sm:$0xff] }
 0x2fb   :  { %10153 = vmatprep.subr.bf16.mxu0 %v16013_v0  ;;  %10686 = vmatprep.subr.bf16.mxu1 %v16015_v28  ;;  %v1596_v0 = vld [vmem:[%s23258_s1 + $0x30e8] sm:$0xff]  ;;  %v16044_v28 = vcombine.low %v1583_v42, %v1587_v45  ;;  %v54_v42 = vld [vmem:[%s23258_s1 + $0xb8] sm:$0xff] }
 0x2fc   :  { %v16055_v10 = vcombine.high %v1592_v61, %v1596_v0  ;;  %v16054_v20 = vcombine.low %v1592_v61, %v1596_v0 }
 0x2fe   :  { %10154 = vmatpush1.bf16.msra.mxu0 %v16012_v12  ;;  %10687 = vmatpush1.bf16.msra.mxu1 %v16014_v13  ;;  %v37_v12 = vld [vmem:[%s23258_s1 + $0x30] sm:$0xff]  ;;  %v34_v13 = vld [vmem:[%s23258_s1 + $0x18] sm:$0xff] }
 0x2ff   :  { %10155 = vmatprep.subr.bf16.mxu0 %v16021_v1  ;;  %10688 = vmatprep.subr.bf16.mxu1 %v16023_v16  ;;  %v38_v1 = vld [vmem:[%s23258_s1 + $0x38] sm:$0xff]  ;;  %v16052_v16 = vcombine.low %v1591_v55, %v1595_v60  ;;  %v14497_v21 = vcombine.high %v33_v11, %v37_v12  ;;  %v14496_v30 = vcombine.low %v33_v11, %v37_v12 }
 0x300   :  { %v14499_v22 = vcombine.high %v34_v13, %v38_v1  ;;  %v14498_v33 = vcombine.low %v34_v13, %v38_v1  ;;  %v62_v55 = vld [vmem:[%s23258_s1 + $0xf8] sm:$0xff] }
 0x302   :  { %10156 = vmatpush1.bf16.msra.mxu0 %v16020_v24  ;;  %10689 = vmatpush1.bf16.msra.mxu1 %v16022_v47  ;;  %v41_v24 = vld [vmem:[%s23258_s1 + $0x50] sm:$0xff] }
 0x303   :  { %10166 = vmatprep.subr.bf16.mxu0 %v16029_v25  ;;  %10699 = vmatprep.subr.bf16.mxu1 %v16031_v27  ;;  %v45_v47 = vld [vmem:[%s23258_s1 + $0x70] sm:$0xff]  ;;  %v19997_v25 = vrot.slane %v14491_v18, %v17505_v53  ;;  %v42_v27 = vld [vmem:[%s23258_s1 + $0x58] sm:$0xff] }
 0x304   :  { %v14505_v35 = vcombine.high %v41_v24, %v45_v47  ;;  %v14504_v45 = vcombine.low %v41_v24, %v45_v47  ;;  %v14506_v34 = vcombine.low %v42_v27, %v46_v63  ;;  %v77_v18 = vld [vmem:[%s23258_s1 + $0x170] sm:$0xff] }
 0x305   :  { %10158 = vmatmul.mubr.bf16.vlgmr.msra.gmra.mrb[0].mxu0 %v19939_v32  ;;  %10691 = vmatmul.mubr.bf16.vlgmr.msra.gmra.mrb[0].mxu1 %v19939_v32 }
 0x306   :  { %10167 = vmatpush1.bf16.msra.mxu0 %v16028_v36  ;;  %10700 = vmatpush1.bf16.msra.mxu1 %v16030_v39  ;;  %v14507_v36 = vcombine.high %v42_v27, %v46_v63  ;;  %v49_v39 = vld [vmem:[%s23258_s1 + $0x90] sm:$0xff] }
 0x307   :  { %10168 = vmatprep.subr.bf16.mxu0 %v16037_v40  ;;  %10701 = vmatprep.subr.bf16.mxu1 %v16039_v41  ;;  %v53_v40 = vld [vmem:[%s23258_s1 + $0xb0] sm:$0xff]  ;;  %v50_v41 = vld [vmem:[%s23258_s1 + $0x98] sm:$0xff] }
 0x308   :  { %10198 = vmatprep.mubr.bf16.mxu0 %v17383_v8  ;;  %10731 = vmatprep.mubr.bf16.mxu1 %v17383_v8  ;;  %v14513_v46 = vcombine.high %v49_v39, %v53_v40  ;;  %v14512_v60 = vcombine.low %v49_v39, %v53_v40  ;;  %v14514_v61 = vcombine.low %v50_v41, %v54_v42  ;;  %v81_v63 = vld [vmem:[%s23258_s1 + $0x190] sm:$0xff] }
 0x30a   :  { %10169 = vmatpush1.bf16.msra.mxu0 %v16036_v49  ;;  %10702 = vmatpush1.bf16.msra.mxu1 %v16038_v50  ;;  %v14515_v49 = vcombine.high %v50_v41, %v54_v42  ;;  %v57_v50 = vld [vmem:[%s23258_s1 + $0xd0] sm:$0xff] }
 0x30b   :  { %10170 = vmatprep.subr.bf16.mxu0 %v16045_v52  ;;  %10703 = vmatprep.subr.bf16.mxu1 %v16047_v54  ;;  %v61_v52 = vld [vmem:[%s23258_s1 + $0xf0] sm:$0xff]  ;;  %v58_v54 = vld [vmem:[%s23258_s1 + $0xd8] sm:$0xff] }
 0x30c   :  { %v14521_v0 = vcombine.high %v57_v50, %v61_v52  ;;  %v14520_v11 = vcombine.low %v57_v50, %v61_v52  ;;  %v14522_v12 = vcombine.low %v58_v54, %v62_v55  ;;  %v89_v42 = vld [vmem:[%s23258_s1 + $0x1d0] sm:$0xff] }
 0x30e   :  { %10171 = vmatpush1.bf16.msra.mxu0 %v16044_v28  ;;  %10704 = vmatpush1.bf16.msra.mxu1 %v16046_v44  ;;  %v14523_v28 = vcombine.high %v58_v54, %v62_v55  ;;  %v65_v44 = vld [vmem:[%s23258_s1 + $0x110] sm:$0xff] }
 0x30f   :  { %10172 = vmatprep.subr.bf16.mxu0 %v16053_v3  ;;  %10705 = vmatprep.subr.bf16.mxu1 %v16055_v10  ;;  %v69_v3 = vld [vmem:[%s23258_s1 + $0x130] sm:$0xff]  ;;  %v70_v10 = vld [vmem:[%s23258_s1 + $0x138] sm:$0xff] }
 0x310   :  { %v14529_v13 = vcombine.high %v65_v44, %v69_v3  ;;  %v97_v55 = vld [vmem:[%s23258_s1 + $0x210] sm:$0xff] }
 0x312   :  { %10173 = vmatpush1.bf16.msra.mxu0 %v16052_v16  ;;  %10706 = vmatpush1.bf16.msra.mxu1 %v16054_v20  ;;  %v73_v16 = vld [vmem:[%s23258_s1 + $0x150] sm:$0xff]  ;;  %v74_v20 = vld [vmem:[%s23258_s1 + $0x158] sm:$0xff] }
 0x313   :  { %10740 = vmatprep.subr.bf16.mxu0 %v14497_v21  ;;  %11273 = vmatprep.subr.bf16.mxu1 %v14499_v22  ;;  %v78_v21 = vld [vmem:[%s23258_s1 + $0x178] sm:$0xff]  ;;  %v14528_v22 = vcombine.low %v65_v44, %v69_v3  ;;  %v14537_v47 = vcombine.high %v73_v16, %v77_v18 }
 0x314   :  { %v14539_v27 = vcombine.high %v74_v20, %v78_v21  ;;  %v14538_v39 = vcombine.low %v74_v20, %v78_v21  ;;  %v113_v21 = vld [vmem:[%s23258_s1 + $0x290] sm:$0xff] }
 0x315   :  { %16060 = vmatmul.mubr.msk.bf16.vlgmr.msra.gmra.mrb[0].mxu0 %vm9670_vm0, %v19997_v25  ;;  %16061 = vmatmul.mubr.msk.bf16.vlgmr.msra.gmra.mrb[0].mxu1 %vm9670_vm0, %v19997_v25 }
 0x316   :  { %10741 = vmatpush1.bf16.msra.mxu0 %v14496_v30  ;;  %11274 = vmatpush1.bf16.msra.mxu1 %v14498_v33  ;;  %v85_v30 = vld [vmem:[%s23258_s1 + $0x1b0] sm:$0xff]  ;;  %v82_v33 = vld [vmem:[%s23258_s1 + $0x198] sm:$0xff] }
 0x317   :  { %10742 = vmatprep.subr.bf16.mxu0 %v14505_v35  ;;  %11275 = vmatprep.subr.bf16.mxu1 %v14507_v36  ;;  %v86_v35 = vld [vmem:[%s23258_s1 + $0x1b8] sm:$0xff]  ;;  %v14536_v36 = vcombine.low %v73_v16, %v77_v18  ;;  %v14545_v40 = vcombine.high %v81_v63, %v85_v30 }
 0x318   :  { %10772 = vmatprep.mubr.bf16.mxu0 %v17543_v9  ;;  %11305 = vmatprep.mubr.bf16.mxu1 %v17543_v9  ;;  %v66_v9 = vld [vmem:[%s23258_s1 + $0x118] sm:$0xff]  ;;  %v14547_v41 = vcombine.high %v82_v33, %v86_v35  ;;  %v14546_v50 = vcombine.low %v82_v33, %v86_v35  ;;  %v121_v35 = vld [vmem:[%s23258_s1 + $0x2d0] sm:$0xff] }
 0x319   :  { %v14531_v1 = vcombine.high %v66_v9, %v70_v10  ;;  %v14530_v24 = vcombine.low %v66_v9, %v70_v10  ;;  %v105_v10 = vld [vmem:[%s23258_s1 + $0x250] sm:$0xff] }
 0x31a   :  { %10743 = vmatpush1.bf16.msra.mxu0 %v14504_v45  ;;  %11276 = vmatpush1.bf16.msra.mxu1 %v14506_v34  ;;  %v93_v45 = vld [vmem:[%s23258_s1 + $0x1f0] sm:$0xff]  ;;  %v90_v34 = vld [vmem:[%s23258_s1 + $0x1d8] sm:$0xff] }
 0x31b   :  { %10744 = vmatprep.subr.bf16.mxu0 %v14513_v46  ;;  %11277 = vmatprep.subr.bf16.mxu1 %v14515_v49  ;;  %v94_v46 = vld [vmem:[%s23258_s1 + $0x1f8] sm:$0xff]  ;;  %v14544_v49 = vcombine.low %v81_v63, %v85_v30  ;;  %v14553_v52 = vcombine.high %v89_v42, %v93_v45 }
 0x31c   :  { %v14555_v54 = vcombine.high %v90_v34, %v94_v46  ;;  %v14554_v44 = vcombine.low %v90_v34, %v94_v46  ;;  %v129_v46 = vld [vmem:[%s23258_s1 + $0x310] sm:$0xff] }
 0x31e   :  { %10745 = vmatpush1.bf16.msra.mxu0 %v14512_v60  ;;  %11278 = vmatpush1.bf16.msra.mxu1 %v14514_v61  ;;  %v101_v60 = vld [vmem:[%s23258_s1 + $0x230] sm:$0xff]  ;;  %v98_v61 = vld [vmem:[%s23258_s1 + $0x218] sm:$0xff] }
 0x31f   :  { %10746 = vmatprep.subr.bf16.mxu0 %v14521_v0  ;;  %11279 = vmatprep.subr.bf16.mxu1 %v14523_v28  ;;  %v102_v0 = vld [vmem:[%s23258_s1 + $0x238] sm:$0xff]  ;;  %v14552_v28 = vcombine.low %v89_v42, %v93_v45  ;;  %v14561_v3 = vcombine.high %v97_v55, %v101_v60 }
 0x320   :  { %v14563_v9 = vcombine.high %v98_v61, %v102_v0  ;;  %v14562_v16 = vcombine.low %v98_v61, %v102_v0  ;;  %v137_v0 = vld [vmem:[%s23258_s1 + $0x350] sm:$0xff] }
 0x322   :  { %10747 = vmatpush1.bf16.msra.mxu0 %v14520_v11  ;;  %11280 = vmatpush1.bf16.msra.mxu1 %v14522_v12  ;;  %v109_v11 = vld [vmem:[%s23258_s1 + $0x270] sm:$0xff]  ;;  %v106_v12 = vld [vmem:[%s23258_s1 + $0x258] sm:$0xff] }
 0x323   :  { %10748 = vmatprep.subr.bf16.mxu0 %v14529_v13  ;;  %11281 = vmatprep.subr.bf16.mxu1 %v14531_v1  ;;  %v110_v13 = vld [vmem:[%s23258_s1 + $0x278] sm:$0xff]  ;;  %v14560_v1 = vcombine.low %v97_v55, %v101_v60  ;;  %v14569_v18 = vcombine.high %v105_v10, %v109_v11 }
 0x324   :  { %v14571_v20 = vcombine.high %v106_v12, %v110_v13  ;;  %v14570_v63 = vcombine.low %v106_v12, %v110_v13  ;;  %v145_v13 = vld [vmem:[%s23258_s1 + $0x390] sm:$0xff] }
 0x326   :  { %10749 = vmatpush1.bf16.msra.mxu0 %v14528_v22  ;;  %11282 = vmatpush1.bf16.msra.mxu1 %v14530_v24  ;;  %v117_v22 = vld [vmem:[%s23258_s1 + $0x2b0] sm:$0xff]  ;;  %v114_v24 = vld [vmem:[%s23258_s1 + $0x298] sm:$0xff] }
 0x327   :  { %10750 = vmatprep.subr.bf16.mxu0 %v14537_v47  ;;  %11283 = vmatprep.subr.bf16.mxu1 %v14539_v27  ;;  %v118_v47 = vld [vmem:[%s23258_s1 + $0x2b8] sm:$0xff]  ;;  %v14568_v27 = vcombine.low %v105_v10, %v109_v11  ;;  %v14577_v30 = vcombine.high %v113_v21, %v117_v22 }
 0x328   :  { %v14579_v33 = vcombine.high %v114_v24, %v118_v47  ;;  %v14578_v42 = vcombine.low %v114_v24, %v118_v47  ;;  %v153_v47 = vld [vmem:[%s23258_s1 + $0x3d0] sm:$0xff] }
 0x32a   :  { %10751 = vmatpush1.bf16.msra.mxu0 %v14536_v36  ;;  %11284 = vmatpush1.bf16.msra.mxu1 %v14538_v39  ;;  %v125_v36 = vld [vmem:[%s23258_s1 + $0x2f0] sm:$0xff]  ;;  %v122_v39 = vld [vmem:[%s23258_s1 + $0x2d8] sm:$0xff] }
 0x32b   :  { %10752 = vmatprep.subr.bf16.mxu0 %v14545_v40  ;;  %11285 = vmatprep.subr.bf16.mxu1 %v14547_v41  ;;  %v126_v40 = vld [vmem:[%s23258_s1 + $0x2f8] sm:$0xff]  ;;  %v14576_v41 = vcombine.low %v113_v21, %v117_v22  ;;  %v14585_v45 = vcombine.high %v121_v35, %v125_v36 }
 0x32c   :  { %v14587_v34 = vcombine.high %v122_v39, %v126_v40  ;;  %v14586_v55 = vcombine.low %v122_v39, %v126_v40  ;;  %v161_v40 = vld [vmem:[%s23258_s1 + $0x410] sm:$0xff] }
 0x32e   :  { %10753 = vmatpush1.bf16.msra.mxu0 %v14544_v49  ;;  %11286 = vmatpush1.bf16.msra.mxu1 %v14546_v50  ;;  %v133_v49 = vld [vmem:[%s23258_s1 + $0x330] sm:$0xff]  ;;  %v130_v50 = vld [vmem:[%s23258_s1 + $0x318] sm:$0xff] }
 0x32f   :  { %10754 = vmatprep.subr.bf16.mxu0 %v14553_v52  ;;  %11287 = vmatprep.subr.bf16.mxu1 %v14555_v54  ;;  %v134_v52 = vld [vmem:[%s23258_s1 + $0x338] sm:$0xff]  ;;  %v14584_v54 = vcombine.low %v121_v35, %v125_v36  ;;  %v14593_v60 = vcombine.high %v129_v46, %v133_v49 }
 0x330   :  { %v14595_v61 = vcombine.high %v130_v50, %v134_v52  ;;  %v14594_v10 = vcombine.low %v130_v50, %v134_v52  ;;  %v169_v52 = vld [vmem:[%s23258_s1 + $0x450] sm:$0xff] }
 0x332   :  { %10755 = vmatpush1.bf16.msra.mxu0 %v14552_v28  ;;  %11288 = vmatpush1.bf16.msra.mxu1 %v14554_v44  ;;  %v141_v28 = vld [vmem:[%s23258_s1 + $0x370] sm:$0xff]  ;;  %v138_v44 = vld [vmem:[%s23258_s1 + $0x358] sm:$0xff] }
 0x333   :  { %10756 = vmatprep.subr.bf16.mxu0 %v14561_v3  ;;  %11289 = vmatprep.subr.bf16.mxu1 %v14563_v9  ;;  %v142_v3 = vld [vmem:[%s23258_s1 + $0x378] sm:$0xff]  ;;  %v14592_v9 = vcombine.low %v129_v46, %v133_v49  ;;  %v14601_v11 = vcombine.high %v137_v0, %v141_v28 }
 0x334   :  { %v14603_v12 = vcombine.high %v138_v44, %v142_v3  ;;  %v14602_v21 = vcombine.low %v138_v44, %v142_v3  ;;  %v177_v3 = vld [vmem:[%s23258_s1 + $0x490] sm:$0xff] }
 0x336   :  { %10757 = vmatpush1.bf16.msra.mxu0 %v14560_v1  ;;  %11290 = vmatpush1.bf16.msra.mxu1 %v14562_v16  ;;  %v149_v1 = vld [vmem:[%s23258_s1 + $0x3b0] sm:$0xff]  ;;  %v146_v16 = vld [vmem:[%s23258_s1 + $0x398] sm:$0xff] }
 0x337   :  { %10758 = vmatprep.subr.bf16.mxu0 %v14569_v18  ;;  %11291 = vmatprep.subr.bf16.mxu1 %v14571_v20  ;;  %v150_v18 = vld [vmem:[%s23258_s1 + $0x3b8] sm:$0xff]  ;;  %v14600_v20 = vcombine.low %v137_v0, %v141_v28  ;;  %v14609_v22 = vcombine.high %v145_v13, %v149_v1 }
 0x338   :  { %v14611_v24 = vcombine.high %v146_v16, %v150_v18  ;;  %v14610_v35 = vcombine.low %v146_v16, %v150_v18  ;;  %v185_v18 = vld [vmem:[%s23258_s1 + $0x4d0] sm:$0xff] }
 0x33a   :  { %10759 = vmatpush1.bf16.msra.mxu0 %v14568_v27  ;;  %11292 = vmatpush1.bf16.msra.mxu1 %v14570_v63  ;;  %v157_v27 = vld [vmem:[%s23258_s1 + $0x3f0] sm:$0xff]  ;;  %v154_v63 = vld [vmem:[%s23258_s1 + $0x3d8] sm:$0xff] }
 0x33b   :  { %10760 = vmatprep.subr.bf16.mxu0 %v14577_v30  ;;  %11293 = vmatprep.subr.bf16.mxu1 %v14579_v33  ;;  %v158_v30 = vld [vmem:[%s23258_s1 + $0x3f8] sm:$0xff]  ;;  %v14608_v33 = vcombine.low %v145_v13, %v149_v1  ;;  %v14617_v36 = vcombine.high %v153_v47, %v157_v27 }
 0x33c   :  { %v14619_v39 = vcombine.high %v154_v63, %v158_v30  ;;  %v14618_v46 = vcombine.low %v154_v63, %v158_v30  ;;  %v193_v63 = vld [vmem:[%s23258_s1 + $0x510] sm:$0xff] }
 0x33d   :  { %v197_v30 = vld [vmem:[%s23258_s1 + $0x530] sm:$0xff] }
 0x33e   :  { %10761 = vmatpush1.bf16.msra.mxu0 %v14576_v41  ;;  %11294 = vmatpush1.bf16.msra.mxu1 %v14578_v42  ;;  %v165_v41 = vld [vmem:[%s23258_s1 + $0x430] sm:$0xff]  ;;  %v162_v42 = vld [vmem:[%s23258_s1 + $0x418] sm:$0xff] }
 0x33f   :  { %10762 = vmatprep.subr.bf16.mxu0 %v14585_v45  ;;  %11295 = vmatprep.subr.bf16.mxu1 %v14587_v34  ;;  %v166_v45 = vld [vmem:[%s23258_s1 + $0x438] sm:$0xff]  ;;  %v14616_v34 = vcombine.low %v153_v47, %v157_v27  ;;  %v14625_v49 = vcombine.high %v161_v40, %v165_v41 }
 0x340   :  { %v14627_v50 = vcombine.high %v162_v42, %v166_v45  ;;  %v14626_v0 = vcombine.low %v162_v42, %v166_v45  ;;  %v205_v42 = vld [vmem:[%s23258_s1 + $0x570] sm:$0xff]  ;;  %v202_v45 = vld [vmem:[%s23258_s1 + $0x558] sm:$0xff] }
 0x342   :  { %10763 = vmatpush1.bf16.msra.mxu0 %v14584_v54  ;;  %11296 = vmatpush1.bf16.msra.mxu1 %v14586_v55  ;;  %v173_v54 = vld [vmem:[%s23258_s1 + $0x470] sm:$0xff]  ;;  %v170_v55 = vld [vmem:[%s23258_s1 + $0x458] sm:$0xff] }
 0x343   :  { %10764 = vmatprep.subr.bf16.mxu0 %v14593_v60  ;;  %11297 = vmatprep.subr.bf16.mxu1 %v14595_v61  ;;  %v174_v60 = vld [vmem:[%s23258_s1 + $0x478] sm:$0xff]  ;;  %v14624_v61 = vcombine.low %v161_v40, %v165_v41  ;;  %v14633_v28 = vcombine.high %v169_v52, %v173_v54  ;;  %v201_v41 = vld [vmem:[%s23258_s1 + $0x550] sm:$0xff] }
 0x344   :  { %v14635_v44 = vcombine.high %v170_v55, %v174_v60  ;;  %v14634_v13 = vcombine.low %v170_v55, %v174_v60  ;;  %v213_v55 = vld [vmem:[%s23258_s1 + $0x5b0] sm:$0xff]  ;;  %v210_v60 = vld [vmem:[%s23258_s1 + $0x598] sm:$0xff] }
 0x346   :  { %10765 = vmatpush1.bf16.msra.mxu0 %v14592_v9  ;;  %11298 = vmatpush1.bf16.msra.mxu1 %v14594_v10  ;;  %v181_v9 = vld [vmem:[%s23258_s1 + $0x4b0] sm:$0xff]  ;;  %v178_v10 = vld [vmem:[%s23258_s1 + $0x498] sm:$0xff] }
 0x347   :  { %10766 = vmatprep.subr.bf16.mxu0 %v14601_v11  ;;  %11299 = vmatprep.subr.bf16.mxu1 %v14603_v12  ;;  %v182_v11 = vld [vmem:[%s23258_s1 + $0x4b8] sm:$0xff]  ;;  %v14632_v12 = vcombine.low %v169_v52, %v173_v54  ;;  %v14641_v1 = vcombine.high %v177_v3, %v181_v9  ;;  %v209_v54 = vld [vmem:[%s23258_s1 + $0x590] sm:$0xff] }
 0x348   :  { %v14643_v16 = vcombine.high %v178_v10, %v182_v11 }
 0x34a   :  { %10767 = vmatpush1.bf16.msra.mxu0 %v14600_v20  ;;  %11300 = vmatpush1.bf16.msra.mxu1 %v14602_v21  ;;  %v189_v20 = vld [vmem:[%s23258_s1 + $0x4f0] sm:$0xff]  ;;  %v190_v21 = vld [vmem:[%s23258_s1 + $0x4f8] sm:$0xff] }
 0x34b   :  { %10768 = vmatprep.subr.bf16.mxu0 %v14609_v22  ;;  %11301 = vmatprep.subr.bf16.mxu1 %v14611_v24  ;;  %v14640_v22 = vcombine.low %v177_v3, %v181_v9  ;;  %v14642_v24 = vcombine.low %v178_v10, %v182_v11  ;;  %v14649_v47 = vcombine.high %v185_v18, %v189_v20  ;;  %v217_v9 = vld [vmem:[%s23258_s1 + $0x5d0] sm:$0xff]  ;;  %v218_v11 = vld [vmem:[%s23258_s1 + $0x5d8] sm:$0xff] }
 0x34c   :  { %v221_v10 = vld [vmem:[%s23258_s1 + $0x5f0] sm:$0xff] }
 0x34e   :  { %10769 = vmatpush1.bf16.msra.mxu0 %v14608_v33  ;;  %11302 = vmatpush1.bf16.msra.mxu1 %v14610_v35  ;;  %v198_v33 = vld [vmem:[%s23258_s1 + $0x538] sm:$0xff]  ;;  %v14648_v35 = vcombine.low %v185_v18, %v189_v20  ;;  %v225_v20 = vld [vmem:[%s23258_s1 + $0x610] sm:$0xff] }
 0x34f   :  { %10770 = vmatprep.subr.bf16.mxu0 %v14617_v36  ;;  %11303 = vmatprep.subr.bf16.mxu1 %v14619_v39  ;;  %v14657_v39 = vcombine.high %v193_v63, %v197_v30 }
 0x352   :  { %10771 = vmatpush1.bf16.msra.mxu0 %v14616_v34  ;;  %11304 = vmatpush1.bf16.msra.mxu1 %v14618_v46  ;;  %v206_v34 = vld [vmem:[%s23258_s1 + $0x578] sm:$0xff]  ;;  %v14656_v46 = vcombine.low %v193_v63, %v197_v30  ;;  %v233_v30 = vld [vmem:[%s23258_s1 + $0x650] sm:$0xff] }
 0x353   :  { %10781 = vmatprep.subr.bf16.mxu0 %v14625_v49  ;;  %11314 = vmatprep.subr.bf16.mxu1 %v14627_v50  ;;  %v14665_v50 = vcombine.high %v201_v41, %v205_v42  ;;  %v14667_v52 = vcombine.high %v202_v45, %v206_v34 }
 0x355   :  { %10773 = vmatmul.mubr.bf16.vlgmr.msra.gmra.mrb[4].mxu0 %v17657_v23  ;;  %11306 = vmatmul.mubr.bf16.vlgmr.msra.gmra.mrb[4].mxu1 %v17657_v23  ;;  %v186_v23 = vld [vmem:[%s23258_s1 + $0x4d8] sm:$0xff] }
 0x356   :  { %10782 = vmatpush1.bf16.msra.mxu0 %v14624_v61  ;;  %11315 = vmatpush1.bf16.msra.mxu1 %v14626_v0  ;;  %v14651_v27 = vcombine.high %v186_v23, %v190_v21  ;;  %v14650_v36 = vcombine.low %v186_v23, %v190_v21  ;;  %v214_v61 = vld [vmem:[%s23258_s1 + $0x5b8] sm:$0xff]  ;;  %v14664_v0 = vcombine.low %v201_v41, %v205_v42  ;;  %v229_v23 = vld [vmem:[%s23258_s1 + $0x630] sm:$0xff] }
 0x357   :  { %10783 = vmatprep.subr.bf16.mxu0 %v14633_v28  ;;  %11316 = vmatprep.subr.bf16.mxu1 %v14635_v44  ;;  %v14666_v28 = vcombine.low %v202_v45, %v206_v34  ;;  %v14673_v44 = vcombine.high %v209_v54, %v213_v55  ;;  %v14675_v3 = vcombine.high %v210_v60, %v214_v61  ;;  %v226_v21 = vld [vmem:[%s23258_s1 + $0x618] sm:$0xff]  ;;  %v241_v42 = vld [vmem:[%s23258_s1 + $0x690] sm:$0xff] }
 0x358   :  { %10813 = vmatprep.mubr.bf16.mxu0 %v17673_v31  ;;  %11346 = vmatprep.mubr.bf16.mxu1 %v17673_v31  ;;  %v194_v31 = vld [vmem:[%s23258_s1 + $0x518] sm:$0xff]  ;;  %v245_v45 = vld [vmem:[%s23258_s1 + $0x6b0] sm:$0xff] }
 0x359   :  { %v14659_v40 = vcombine.high %v194_v31, %v198_v33  ;;  %v14658_v49 = vcombine.low %v194_v31, %v198_v33  ;;  %v237_v31 = vld [vmem:[%s23258_s1 + $0x670] sm:$0xff]  ;;  %v234_v33 = vld [vmem:[%s23258_s1 + $0x658] sm:$0xff] }
 0x35a   :  { %10784 = vmatpush1.bf16.msra.mxu0 %v14632_v12  ;;  %11317 = vmatpush1.bf16.msra.mxu1 %v14634_v13  ;;  %v222_v12 = vld [vmem:[%s23258_s1 + $0x5f8] sm:$0xff]  ;;  %v14672_v13 = vcombine.low %v209_v54, %v213_v55  ;;  %v249_v55 = vld [vmem:[%s23258_s1 + $0x6d0] sm:$0xff] }
 0x35b   :  { %10785 = vmatprep.subr.bf16.mxu0 %v14641_v1  ;;  %11318 = vmatprep.subr.bf16.mxu1 %v14643_v16  ;;  %v14674_v1 = vcombine.low %v210_v60, %v214_v61  ;;  %v14681_v16 = vcombine.high %v217_v9, %v221_v10  ;;  %v14683_v18 = vcombine.high %v218_v11, %v222_v12  ;;  %v242_v34 = vld [vmem:[%s23258_s1 + $0x698] sm:$0xff]  ;;  %v253_v60 = vld [vmem:[%s23258_s1 + $0x6f0] sm:$0xff] }
 0x35c   :  { %v250_v61 = vld [vmem:[%s23258_s1 + $0x6d8] sm:$0xff] }
 0x35e   :  { %10786 = vmatpush1.bf16.msra.mxu0 %v14640_v22  ;;  %11319 = vmatpush1.bf16.msra.mxu1 %v14642_v24  ;;  %v230_v22 = vld [vmem:[%s23258_s1 + $0x638] sm:$0xff]  ;;  %v14680_v24 = vcombine.low %v217_v9, %v221_v10  ;;  %v257_v10 = vld [vmem:[%s23258_s1 + $0x710] sm:$0xff] }
 0x35f   :  { %10787 = vmatprep.subr.bf16.mxu0 %v14649_v47  ;;  %11320 = vmatprep.subr.bf16.mxu1 %v14651_v27  ;;  %v14682_v47 = vcombine.low %v218_v11, %v222_v12  ;;  %v14689_v27 = vcombine.high %v225_v20, %v229_v23  ;;  %v14691_v63 = vcombine.high %v226_v21, %v230_v22  ;;  %v261_v11 = vld [vmem:[%s23258_s1 + $0x730] sm:$0xff]  ;;  %v258_v12 = vld [vmem:[%s23258_s1 + $0x718] sm:$0xff] }
 0x362   :  { %10788 = vmatpush1.bf16.msra.mxu0 %v14648_v35  ;;  %11321 = vmatpush1.bf16.msra.mxu1 %v14650_v36  ;;  %v238_v35 = vld [vmem:[%s23258_s1 + $0x678] sm:$0xff]  ;;  %v14688_v36 = vcombine.low %v225_v20, %v229_v23  ;;  %v265_v23 = vld [vmem:[%s23258_s1 + $0x750] sm:$0xff] }
 0x363   :  { %10789 = vmatprep.subr.bf16.mxu0 %v14657_v39  ;;  %11322 = vmatprep.subr.bf16.mxu1 %v14659_v40  ;;  %v14690_v39 = vcombine.low %v226_v21, %v230_v22  ;;  %v14697_v40 = vcombine.high %v233_v30, %v237_v31  ;;  %v14699_v41 = vcombine.high %v234_v33, %v238_v35  ;;  %v269_v21 = vld [vmem:[%s23258_s1 + $0x770] sm:$0xff]  ;;  %v266_v22 = vld [vmem:[%s23258_s1 + $0x758] sm:$0xff] }
 0x366   :  { %10790 = vmatpush1.bf16.msra.mxu0 %v14656_v46  ;;  %11323 = vmatpush1.bf16.msra.mxu1 %v14658_v49  ;;  %v246_v46 = vld [vmem:[%s23258_s1 + $0x6b8] sm:$0xff]  ;;  %v14696_v49 = vcombine.low %v233_v30, %v237_v31  ;;  %v273_v31 = vld [vmem:[%s23258_s1 + $0x790] sm:$0xff] }
 0x367   :  { %10791 = vmatprep.subr.bf16.mxu0 %v14665_v50  ;;  %11324 = vmatprep.subr.bf16.mxu1 %v14667_v52  ;;  %v14698_v50 = vcombine.low %v234_v33, %v238_v35  ;;  %v14705_v52 = vcombine.high %v241_v42, %v245_v45  ;;  %v14707_v54 = vcombine.high %v242_v34, %v246_v46  ;;  %v277_v33 = vld [vmem:[%s23258_s1 + $0x7b0] sm:$0xff]  ;;  %v274_v35 = vld [vmem:[%s23258_s1 + $0x798] sm:$0xff] }
 0x36a   :  { %10792 = vmatpush1.bf16.msra.mxu0 %v14664_v0  ;;  %11325 = vmatpush1.bf16.msra.mxu1 %v14666_v28  ;;  %v254_v0 = vld [vmem:[%s23258_s1 + $0x6f8] sm:$0xff]  ;;  %v14704_v28 = vcombine.low %v241_v42, %v245_v45  ;;  %v281_v45 = vld [vmem:[%s23258_s1 + $0x7d0] sm:$0xff] }
 0x36b   :  { %10793 = vmatprep.subr.bf16.mxu0 %v14673_v44  ;;  %11326 = vmatprep.subr.bf16.mxu1 %v14675_v3  ;;  %v14706_v44 = vcombine.low %v242_v34, %v246_v46  ;;  %v14713_v3 = vcombine.high %v249_v55, %v253_v60  ;;  %v14715_v9 = vcombine.high %v250_v61, %v254_v0  ;;  %v285_v34 = vld [vmem:[%s23258_s1 + $0x7f0] sm:$0xff]  ;;  %v282_v46 = vld [vmem:[%s23258_s1 + $0x7d8] sm:$0xff] }
 0x36e   :  { %10794 = vmatpush1.bf16.msra.mxu0 %v14672_v13  ;;  %11327 = vmatpush1.bf16.msra.mxu1 %v14674_v1  ;;  %v262_v13 = vld [vmem:[%s23258_s1 + $0x738] sm:$0xff]  ;;  %v14712_v1 = vcombine.low %v249_v55, %v253_v60  ;;  %v289_v60 = vld [vmem:[%s23258_s1 + $0x810] sm:$0xff] }
 0x36f   :  { %10795 = vmatprep.subr.bf16.mxu0 %v14681_v16  ;;  %11328 = vmatprep.subr.bf16.mxu1 %v14683_v18  ;;  %v14714_v16 = vcombine.low %v250_v61, %v254_v0  ;;  %v14721_v18 = vcombine.high %v257_v10, %v261_v11  ;;  %v14723_v20 = vcombine.high %v258_v12, %v262_v13  ;;  %v293_v61 = vld [vmem:[%s23258_s1 + $0x830] sm:$0xff]  ;;  %v290_v0 = vld [vmem:[%s23258_s1 + $0x818] sm:$0xff] }
 0x372   :  { %10796 = vmatpush1.bf16.msra.mxu0 %v14680_v24  ;;  %11329 = vmatpush1.bf16.msra.mxu1 %v14682_v47  ;;  %v270_v24 = vld [vmem:[%s23258_s1 + $0x778] sm:$0xff]  ;;  %v14720_v47 = vcombine.low %v257_v10, %v261_v11  ;;  %v297_v11 = vld [vmem:[%s23258_s1 + $0x850] sm:$0xff] }
 0x373   :  { %10797 = vmatprep.subr.bf16.mxu0 %v14689_v27  ;;  %11330 = vmatprep.subr.bf16.mxu1 %v14691_v63  ;;  %v14722_v27 = vcombine.low %v258_v12, %v262_v13  ;;  %v14729_v63 = vcombine.high %v265_v23, %v269_v21  ;;  %v14731_v30 = vcombine.high %v266_v22, %v270_v24  ;;  %v301_v12 = vld [vmem:[%s23258_s1 + $0x870] sm:$0xff]  ;;  %v298_v13 = vld [vmem:[%s23258_s1 + $0x858] sm:$0xff] }
 0x376   :  { %10798 = vmatpush1.bf16.msra.mxu0 %v14688_v36  ;;  %11331 = vmatpush1.bf16.msra.mxu1 %v14690_v39  ;;  %v278_v36 = vld [vmem:[%s23258_s1 + $0x7b8] sm:$0xff]  ;;  %v14728_v39 = vcombine.low %v265_v23, %v269_v21  ;;  %v305_v21 = vld [vmem:[%s23258_s1 + $0x890] sm:$0xff] }
 0x377   :  { %10799 = vmatprep.subr.bf16.mxu0 %v14697_v40  ;;  %11332 = vmatprep.subr.bf16.mxu1 %v14699_v41  ;;  %v14730_v40 = vcombine.low %v266_v22, %v270_v24  ;;  %v14737_v41 = vcombine.high %v273_v31, %v277_v33  ;;  %v14739_v42 = vcombine.high %v274_v35, %v278_v36  ;;  %v309_v22 = vld [vmem:[%s23258_s1 + $0x8b0] sm:$0xff]  ;;  %v306_v24 = vld [vmem:[%s23258_s1 + $0x898] sm:$0xff] }
 0x37a   :  { %10800 = vmatpush1.bf16.msra.mxu0 %v14696_v49  ;;  %11333 = vmatpush1.bf16.msra.mxu1 %v14698_v50  ;;  %v286_v49 = vld [vmem:[%s23258_s1 + $0x7f8] sm:$0xff]  ;;  %v14736_v50 = vcombine.low %v273_v31, %v277_v33  ;;  %v313_v33 = vld [vmem:[%s23258_s1 + $0x8d0] sm:$0xff] }
 0x37b   :  { %10801 = vmatprep.subr.bf16.mxu0 %v14705_v52  ;;  %11334 = vmatprep.subr.bf16.mxu1 %v14707_v54  ;;  %v14738_v52 = vcombine.low %v274_v35, %v278_v36  ;;  %v14745_v54 = vcombine.high %v281_v45, %v285_v34  ;;  %v14747_v55 = vcombine.high %v282_v46, %v286_v49  ;;  %v317_v35 = vld [vmem:[%s23258_s1 + $0x8f0] sm:$0xff]  ;;  %v318_v36 = vld [vmem:[%s23258_s1 + $0x8f8] sm:$0xff] }
 0x37e   :  { %10802 = vmatpush1.bf16.msra.mxu0 %v14704_v28  ;;  %11335 = vmatpush1.bf16.msra.mxu1 %v14706_v44  ;;  %v294_v28 = vld [vmem:[%s23258_s1 + $0x838] sm:$0xff]  ;;  %v14744_v44 = vcombine.low %v281_v45, %v285_v34  ;;  %v321_v45 = vld [vmem:[%s23258_s1 + $0x910] sm:$0xff] }
 0x37f   :  { %10803 = vmatprep.subr.bf16.mxu0 %v14713_v3  ;;  %11336 = vmatprep.subr.bf16.mxu1 %v14715_v9  ;;  %v14746_v3 = vcombine.low %v282_v46, %v286_v49  ;;  %v14753_v9 = vcombine.high %v289_v60, %v293_v61  ;;  %v14755_v10 = vcombine.high %v290_v0, %v294_v28  ;;  %v325_v34 = vld [vmem:[%s23258_s1 + $0x930] sm:$0xff]  ;;  %v326_v46 = vld [vmem:[%s23258_s1 + $0x938] sm:$0xff] }
 0x380   :  { %v14776_v49 = vcombine.low %v313_v33, %v317_v35 }
 0x382   :  { %10804 = vmatpush1.bf16.msra.mxu0 %v14712_v1  ;;  %11337 = vmatpush1.bf16.msra.mxu1 %v14714_v16  ;;  %v302_v1 = vld [vmem:[%s23258_s1 + $0x878] sm:$0xff]  ;;  %v14752_v16 = vcombine.low %v289_v60, %v293_v61  ;;  %v333_v60 = vld [vmem:[%s23258_s1 + $0x970] sm:$0xff] }
 0x383   :  { %10805 = vmatprep.subr.bf16.mxu0 %v14721_v18  ;;  %11338 = vmatprep.subr.bf16.mxu1 %v14723_v20  ;;  %v14754_v18 = vcombine.low %v290_v0, %v294_v28  ;;  %v14761_v20 = vcombine.high %v297_v11, %v301_v12  ;;  %v14763_v23 = vcombine.high %v298_v13, %v302_v1  ;;  %v330_v61 = vld [vmem:[%s23258_s1 + $0x958] sm:$0xff] }
 0x384   :  { %v334_v0 = vld [vmem:[%s23258_s1 + $0x978] sm:$0xff]  ;;  %v14784_v28 = vcombine.low %v321_v45, %v325_v34 }
 0x386   :  { %10806 = vmatpush1.bf16.msra.mxu0 %v14720_v47  ;;  %11339 = vmatpush1.bf16.msra.mxu1 %v14722_v27  ;;  %v310_v47 = vld [vmem:[%s23258_s1 + $0x8b8] sm:$0xff]  ;;  %v14760_v27 = vcombine.low %v297_v11, %v301_v12  ;;  %v341_v11 = vld [vmem:[%s23258_s1 + $0x9b0] sm:$0xff] }
 0x387   :  { %10807 = vmatprep.subr.bf16.mxu0 %v14729_v63  ;;  %11340 = vmatprep.subr.bf16.mxu1 %v14731_v30  ;;  %v14762_v63 = vcombine.low %v298_v13, %v302_v1  ;;  %v14769_v30 = vcombine.high %v305_v21, %v309_v22  ;;  %v14771_v31 = vcombine.high %v306_v24, %v310_v47  ;;  %v338_v12 = vld [vmem:[%s23258_s1 + $0x998] sm:$0xff] }
 0x388   :  { %v342_v13 = vld [vmem:[%s23258_s1 + $0x9b8] sm:$0xff] }
 0x38a   :  { %10808 = vmatpush1.bf16.msra.mxu0 %v14728_v39  ;;  %11341 = vmatpush1.bf16.msra.mxu1 %v14730_v40  ;;  %v14768_v39 = vcombine.low %v305_v21, %v309_v22  ;;  %v14770_v40 = vcombine.low %v306_v24, %v310_v47  ;;  %v349_v21 = vld [vmem:[%s23258_s1 + $0x9f0] sm:$0xff]  ;;  %v346_v22 = vld [vmem:[%s23258_s1 + $0x9d8] sm:$0xff] }
 0x38b   :  { %10809 = vmatprep.subr.bf16.mxu0 %v14737_v41  ;;  %11342 = vmatprep.subr.bf16.mxu1 %v14739_v42  ;;  %v14777_v41 = vcombine.high %v313_v33, %v317_v35  ;;  %v350_v24 = vld [vmem:[%s23258_s1 + $0x9f8] sm:$0xff]  ;;  %v357_v33 = vld [vmem:[%s23258_s1 + $0xa30] sm:$0xff] }
 0x38c   :  { %v354_v35 = vld [vmem:[%s23258_s1 + $0xa18] sm:$0xff] }
 0x38e   :  { %10810 = vmatpush1.bf16.msra.mxu0 %v14736_v50  ;;  %11343 = vmatpush1.bf16.msra.mxu1 %v14738_v52  ;;  %v14785_v52 = vcombine.high %v321_v45, %v325_v34  ;;  %v365_v45 = vld [vmem:[%s23258_s1 + $0xa70] sm:$0xff]  ;;  %v362_v34 = vld [vmem:[%s23258_s1 + $0xa58] sm:$0xff] }
 0x38f   :  { %10811 = vmatprep.subr.bf16.mxu0 %v14745_v54  ;;  %11344 = vmatprep.subr.bf16.mxu1 %v14747_v55  ;;  %v329_v55 = vld [vmem:[%s23258_s1 + $0x950] sm:$0xff] }
 0x390   :  { %v14792_v1 = vcombine.low %v329_v55, %v333_v60 }
 0x392   :  { %10812 = vmatpush1.bf16.msra.mxu0 %v14744_v44  ;;  %11345 = vmatpush1.bf16.msra.mxu1 %v14746_v3  ;;  %v14793_v3 = vcombine.high %v329_v55, %v333_v60  ;;  %v373_v55 = vld [vmem:[%s23258_s1 + $0xab0] sm:$0xff]  ;;  %v370_v60 = vld [vmem:[%s23258_s1 + $0xa98] sm:$0xff] }
 0x393   :  { %10822 = vmatprep.subr.bf16.mxu0 %v14753_v9  ;;  %11355 = vmatprep.subr.bf16.mxu1 %v14755_v10  ;;  %v14795_v9 = vcombine.high %v330_v61, %v334_v0  ;;  %v337_v10 = vld [vmem:[%s23258_s1 + $0x990] sm:$0xff] }
 0x394   :  { %v14800_v47 = vcombine.low %v337_v10, %v341_v11 }
 0x395   :  { %10814 = vmatmul.mubr.bf16.vlgmr.msra.gmra.mrb[4].mxu0 %v17868_v38  ;;  %11347 = vmatmul.mubr.bf16.vlgmr.msra.gmra.mrb[4].mxu1 %v17868_v38  ;;  %v314_v38 = vld [vmem:[%s23258_s1 + $0x8d8] sm:$0xff] }
 0x396   :  { %10823 = vmatpush1.bf16.msra.mxu0 %v14752_v16  ;;  %11356 = vmatpush1.bf16.msra.mxu1 %v14754_v18  ;;  %v14779_v42 = vcombine.high %v314_v38, %v318_v36  ;;  %v14778_v50 = vcombine.low %v314_v38, %v318_v36  ;;  %v14794_v16 = vcombine.low %v330_v61, %v334_v0  ;;  %v358_v38 = vld [vmem:[%s23258_s1 + $0xa38] sm:$0xff] }
 0x397   :  { %10824 = vmatprep.subr.bf16.mxu0 %v14761_v20  ;;  %11357 = vmatprep.subr.bf16.mxu1 %v14763_v23  ;;  %v14801_v18 = vcombine.high %v337_v10, %v341_v11  ;;  %v14803_v20 = vcombine.high %v338_v12, %v342_v13  ;;  %v345_v23 = vld [vmem:[%s23258_s1 + $0x9d0] sm:$0xff]  ;;  %v374_v61 = vld [vmem:[%s23258_s1 + $0xab8] sm:$0xff] }
 0x398   :  { %10854 = vmatprep.mubr.bf16.mxu0 %v17883_v48  ;;  %11387 = vmatprep.mubr.bf16.mxu1 %v17883_v48  ;;  %v322_v48 = vld [vmem:[%s23258_s1 + $0x918] sm:$0xff]  ;;  %v14808_v36 = vcombine.low %v345_v23, %v349_v21  ;;  %v381_v10 = vld [vmem:[%s23258_s1 + $0xaf0] sm:$0xff] }
 0x399   :  { %v14787_v54 = vcombine.high %v322_v48, %v326_v46  ;;  %v14786_v44 = vcombine.low %v322_v48, %v326_v46  ;;  %v366_v48 = vld [vmem:[%s23258_s1 + $0xa78] sm:$0xff] }
 0x39a   :  { %10825 = vmatpush1.bf16.msra.mxu0 %v14760_v27  ;;  %11358 = vmatpush1.bf16.msra.mxu1 %v14762_v63  ;;  %v14802_v27 = vcombine.low %v338_v12, %v342_v13  ;;  %v14809_v63 = vcombine.high %v345_v23, %v349_v21  ;;  %v378_v11 = vld [vmem:[%s23258_s1 + $0xad8] sm:$0xff]  ;;  %v389_v23 = vld [vmem:[%s23258_s1 + $0xb30] sm:$0xff] }
 0x39b   :  { %10826 = vmatprep.subr.bf16.mxu0 %v14769_v30  ;;  %11359 = vmatprep.subr.bf16.mxu1 %v14771_v31  ;;  %v14811_v30 = vcombine.high %v346_v22, %v350_v24  ;;  %v353_v31 = vld [vmem:[%s23258_s1 + $0xa10] sm:$0xff]  ;;  %v382_v12 = vld [vmem:[%s23258_s1 + $0xaf8] sm:$0xff] }
 0x39c   :  { %v14816_v46 = vcombine.low %v353_v31, %v357_v33  ;;  %v386_v21 = vld [vmem:[%s23258_s1 + $0xb18] sm:$0xff] }
 0x39e   :  { %10827 = vmatpush1.bf16.msra.mxu0 %v14768_v39  ;;  %11360 = vmatpush1.bf16.msra.mxu1 %v14770_v40  ;;  %v14810_v39 = vcombine.low %v346_v22, %v350_v24  ;;  %v14817_v40 = vcombine.high %v353_v31, %v357_v33  ;;  %v390_v22 = vld [vmem:[%s23258_s1 + $0xb38] sm:$0xff]  ;;  %v397_v31 = vld [vmem:[%s23258_s1 + $0xb70] sm:$0xff] }
 0x39f   :  { %10828 = vmatprep.subr.bf16.mxu0 %v14777_v41  ;;  %11361 = vmatprep.subr.bf16.mxu1 %v14779_v42  ;;  %v14819_v41 = vcombine.high %v354_v35, %v358_v38  ;;  %v361_v42 = vld [vmem:[%s23258_s1 + $0xa50] sm:$0xff]  ;;  %v394_v33 = vld [vmem:[%s23258_s1 + $0xb58] sm:$0xff] }
 0x3a0   :  { %v14824_v0 = vcombine.low %v361_v42, %v365_v45 }
 0x3a2   :  { %10829 = vmatpush1.bf16.msra.mxu0 %v14776_v49  ;;  %11362 = vmatpush1.bf16.msra.mxu1 %v14778_v50  ;;  %v14818_v49 = vcombine.low %v354_v35, %v358_v38  ;;  %v14825_v50 = vcombine.high %v361_v42, %v365_v45  ;;  %v398_v35 = vld [vmem:[%s23258_s1 + $0xb78] sm:$0xff]  ;;  %v405_v42 = vld [vmem:[%s23258_s1 + $0xbb0] sm:$0xff] }
 0x3a3   :  { %10830 = vmatprep.subr.bf16.mxu0 %v14785_v52  ;;  %11363 = vmatprep.subr.bf16.mxu1 %v14787_v54  ;;  %v14827_v52 = vcombine.high %v362_v34, %v366_v48  ;;  %v369_v54 = vld [vmem:[%s23258_s1 + $0xa90] sm:$0xff]  ;;  %v402_v45 = vld [vmem:[%s23258_s1 + $0xb98] sm:$0xff] }
 0x3a4   :  { %v14832_v13 = vcombine.low %v369_v54, %v373_v55 }
 0x3a6   :  { %10831 = vmatpush1.bf16.msra.mxu0 %v14784_v28  ;;  %11364 = vmatpush1.bf16.msra.mxu1 %v14786_v44  ;;  %v14826_v28 = vcombine.low %v362_v34, %v366_v48  ;;  %v14833_v44 = vcombine.high %v369_v54, %v373_v55  ;;  %v406_v34 = vld [vmem:[%s23258_s1 + $0xbb8] sm:$0xff]  ;;  %v413_v54 = vld [vmem:[%s23258_s1 + $0xbf0] sm:$0xff] }
 0x3a7   :  { %10832 = vmatprep.subr.bf16.mxu0 %v14793_v3  ;;  %11365 = vmatprep.subr.bf16.mxu1 %v14795_v9  ;;  %v14835_v3 = vcombine.high %v370_v60, %v374_v61  ;;  %v377_v9 = vld [vmem:[%s23258_s1 + $0xad0] sm:$0xff]  ;;  %v410_v55 = vld [vmem:[%s23258_s1 + $0xbd8] sm:$0xff] }
 0x3a8   :  { %v14840_v24 = vcombine.low %v377_v9, %v381_v10 }
 0x3aa   :  { %10833 = vmatpush1.bf16.msra.mxu0 %v14792_v1  ;;  %11366 = vmatpush1.bf16.msra.mxu1 %v14794_v16  ;;  %v14834_v1 = vcombine.low %v370_v60, %v374_v61  ;;  %v14841_v16 = vcombine.high %v377_v9, %v381_v10  ;;  %v414_v60 = vld [vmem:[%s23258_s1 + $0xbf8] sm:$0xff]  ;;  %v421_v9 = vld [vmem:[%s23258_s1 + $0xc30] sm:$0xff] }
 0x3ab   :  { %10834 = vmatprep.subr.bf16.mxu0 %v14801_v18  ;;  %11367 = vmatprep.subr.bf16.mxu1 %v14803_v20  ;;  %v14843_v18 = vcombine.high %v378_v11, %v382_v12  ;;  %v385_v20 = vld [vmem:[%s23258_s1 + $0xb10] sm:$0xff]  ;;  %v418_v10 = vld [vmem:[%s23258_s1 + $0xc18] sm:$0xff] }
 0x3ac   :  { %v14848_v38 = vcombine.low %v385_v20, %v389_v23 }
 0x3ae   :  { %10835 = vmatpush1.bf16.msra.mxu0 %v14800_v47  ;;  %11368 = vmatpush1.bf16.msra.mxu1 %v14802_v27  ;;  %v14842_v47 = vcombine.low %v378_v11, %v382_v12  ;;  %v14849_v27 = vcombine.high %v385_v20, %v389_v23  ;;  %v422_v11 = vld [vmem:[%s23258_s1 + $0xc38] sm:$0xff]  ;;  %v429_v20 = vld [vmem:[%s23258_s1 + $0xc70] sm:$0xff] }
 0x3af   :  { %10836 = vmatprep.subr.bf16.mxu0 %v14809_v63  ;;  %11369 = vmatprep.subr.bf16.mxu1 %v14811_v30  ;;  %v14851_v63 = vcombine.high %v386_v21, %v390_v22  ;;  %v393_v30 = vld [vmem:[%s23258_s1 + $0xb50] sm:$0xff]  ;;  %v426_v23 = vld [vmem:[%s23258_s1 + $0xc58] sm:$0xff] }
 0x3b0   :  { %v14856_v48 = vcombine.low %v393_v30, %v397_v31 }
 0x3b2   :  { %10837 = vmatpush1.bf16.msra.mxu0 %v14808_v36  ;;  %11370 = vmatpush1.bf16.msra.mxu1 %v14810_v39  ;;  %v14850_v36 = vcombine.low %v386_v21, %v390_v22  ;;  %v14857_v39 = vcombine.high %v393_v30, %v397_v31  ;;  %v430_v21 = vld [vmem:[%s23258_s1 + $0xc78] sm:$0xff]  ;;  %v437_v30 = vld [vmem:[%s23258_s1 + $0xcb0] sm:$0xff] }
 0x3b3   :  { %10838 = vmatprep.subr.bf16.mxu0 %v14817_v40  ;;  %11371 = vmatprep.subr.bf16.mxu1 %v14819_v41  ;;  %v14859_v40 = vcombine.high %v394_v33, %v398_v35  ;;  %v401_v41 = vld [vmem:[%s23258_s1 + $0xb90] sm:$0xff]  ;;  %v434_v31 = vld [vmem:[%s23258_s1 + $0xc98] sm:$0xff] }
 0x3b4   :  { %v14864_v61 = vcombine.low %v401_v41, %v405_v42 }
 0x3b6   :  { %10839 = vmatpush1.bf16.msra.mxu0 %v14816_v46  ;;  %11372 = vmatpush1.bf16.msra.mxu1 %v14818_v49  ;;  %v14858_v46 = vcombine.low %v394_v33, %v398_v35  ;;  %v14865_v49 = vcombine.high %v401_v41, %v405_v42  ;;  %v438_v33 = vld [vmem:[%s23258_s1 + $0xcb8] sm:$0xff]  ;;  %v445_v41 = vld [vmem:[%s23258_s1 + $0xcf0] sm:$0xff] }
 0x3b7   :  { %10840 = vmatprep.subr.bf16.mxu0 %v14825_v50  ;;  %11373 = vmatprep.subr.bf16.mxu1 %v14827_v52  ;;  %v14867_v50 = vcombine.high %v402_v45, %v406_v34  ;;  %v409_v52 = vld [vmem:[%s23258_s1 + $0xbd0] sm:$0xff]  ;;  %v446_v42 = vld [vmem:[%s23258_s1 + $0xcf8] sm:$0xff] }
 0x3b8   :  { %v14872_v12 = vcombine.low %v409_v52, %v413_v54 }
 0x3ba   :  { %10841 = vmatpush1.bf16.msra.mxu0 %v14824_v0  ;;  %11374 = vmatpush1.bf16.msra.mxu1 %v14826_v28  ;;  %v14866_v0 = vcombine.low %v402_v45, %v406_v34  ;;  %v14873_v28 = vcombine.high %v409_v52, %v413_v54  ;;  %v14898_v34 = vcombine.low %v434_v31, %v438_v33  ;;  %v454_v52 = vld [vmem:[%s23258_s1 + $0xd38] sm:$0xff] }
 0x3bb   :  { %10842 = vmatprep.subr.bf16.mxu0 %v14833_v44  ;;  %11375 = vmatprep.subr.bf16.mxu1 %v14835_v3  ;;  %v14875_v44 = vcombine.high %v410_v55, %v414_v60  ;;  %v417_v3 = vld [vmem:[%s23258_s1 + $0xc10] sm:$0xff] }
 0x3bc   :  { %v14880_v22 = vcombine.low %v417_v3, %v421_v9 }
 0x3be   :  { %10843 = vmatpush1.bf16.msra.mxu0 %v14832_v13  ;;  %11376 = vmatpush1.bf16.msra.mxu1 %v14834_v1  ;;  %v14874_v13 = vcombine.low %v410_v55, %v414_v60  ;;  %v14881_v1 = vcombine.high %v417_v3, %v421_v9  ;;  %v462_v3 = vld [vmem:[%s23258_s1 + $0xd78] sm:$0xff] }
 0x3bf   :  { %10844 = vmatprep.subr.bf16.mxu0 %v14841_v16  ;;  %11377 = vmatprep.subr.bf16.mxu1 %v14843_v18  ;;  %v14883_v16 = vcombine.high %v418_v10, %v422_v11  ;;  %v425_v18 = vld [vmem:[%s23258_s1 + $0xc50] sm:$0xff] }
 0x3c0   :  { %v14888_v35 = vcombine.low %v425_v18, %v429_v20 }
 0x3c2   :  { %10845 = vmatpush1.bf16.msra.mxu0 %v14840_v24  ;;  %11378 = vmatpush1.bf16.msra.mxu1 %v14842_v47  ;;  %v14882_v24 = vcombine.low %v418_v10, %v422_v11  ;;  %v14889_v47 = vcombine.high %v425_v18, %v429_v20  ;;  %v470_v18 = vld [vmem:[%s23258_s1 + $0xdb8] sm:$0xff] }
 0x3c3   :  { %10846 = vmatprep.subr.bf16.mxu0 %v14849_v27  ;;  %11379 = vmatprep.subr.bf16.mxu1 %v14851_v63  ;;  %v14891_v27 = vcombine.high %v426_v23, %v430_v21  ;;  %v433_v63 = vld [vmem:[%s23258_s1 + $0xc90] sm:$0xff] }
 0x3c4   :  { %v14896_v45 = vcombine.low %v433_v63, %v437_v30 }
 0x3c6   :  { %10847 = vmatpush1.bf16.msra.mxu0 %v14848_v38  ;;  %11380 = vmatpush1.bf16.msra.mxu1 %v14850_v36  ;;  %v14890_v38 = vcombine.low %v426_v23, %v430_v21  ;;  %v14897_v36 = vcombine.high %v433_v63, %v437_v30 }
 0x3c7   :  { %10848 = vmatprep.subr.bf16.mxu0 %v14857_v39  ;;  %11381 = vmatprep.subr.bf16.mxu1 %v14859_v40  ;;  %v14899_v39 = vcombine.high %v434_v31, %v438_v33  ;;  %v441_v40 = vld [vmem:[%s23258_s1 + $0xcd0] sm:$0xff]  ;;  %v474_v31 = vld [vmem:[%s23258_s1 + $0xdd8] sm:$0xff] }
 0x3c8   :  { %v14904_v54 = vcombine.low %v441_v40, %v445_v41  ;;  %v478_v33 = vld [vmem:[%s23258_s1 + $0xdf8] sm:$0xff] }
 0x3ca   :  { %10849 = vmatpush1.bf16.msra.mxu0 %v14856_v48  ;;  %11382 = vmatpush1.bf16.msra.mxu1 %v14858_v46  ;;  %v14905_v48 = vcombine.high %v441_v40, %v445_v41 }
 0x3cb   :  { %10850 = vmatprep.subr.bf16.mxu0 %v14865_v49  ;;  %11383 = vmatprep.subr.bf16.mxu1 %v14867_v50  ;;  %v449_v49 = vld [vmem:[%s23258_s1 + $0xd10] sm:$0xff] }
 0x3cc   :  { %v453_v50 = vld [vmem:[%s23258_s1 + $0xd30] sm:$0xff] }
 0x3cd   :  { %v14913_v60 = vcombine.high %v449_v49, %v453_v50  ;;  %v14912_v9 = vcombine.low %v449_v49, %v453_v50  ;;  %v486_v49 = vld [vmem:[%s23258_s1 + $0xe38] sm:$0xff] }
 0x3ce   :  { %10851 = vmatpush1.bf16.msra.mxu0 %v14864_v61  ;;  %11384 = vmatpush1.bf16.msra.mxu1 %v14866_v0  ;;  %v457_v0 = vld [vmem:[%s23258_s1 + $0xd50] sm:$0xff] }
 0x3cf   :  { %10852 = vmatprep.subr.bf16.mxu0 %v14873_v28  ;;  %11385 = vmatprep.subr.bf16.mxu1 %v14875_v44  ;;  %v461_v28 = vld [vmem:[%s23258_s1 + $0xd70] sm:$0xff]  ;;  %v458_v44 = vld [vmem:[%s23258_s1 + $0xd58] sm:$0xff] }
 0x3d0   :  { %v14921_v11 = vcombine.high %v457_v0, %v461_v28  ;;  %v14920_v20 = vcombine.low %v457_v0, %v461_v28  ;;  %v14922_v23 = vcombine.low %v458_v44, %v462_v3  ;;  %v494_v0 = vld [vmem:[%s23258_s1 + $0xe78] sm:$0xff] }
 0x3d2   :  { %10853 = vmatpush1.bf16.msra.mxu0 %v14872_v12  ;;  %11386 = vmatpush1.bf16.msra.mxu1 %v14874_v13  ;;  %v14923_v12 = vcombine.high %v458_v44, %v462_v3  ;;  %v465_v13 = vld [vmem:[%s23258_s1 + $0xd90] sm:$0xff] }
 0x3d3   :  { %10863 = vmatprep.subr.bf16.mxu0 %v14881_v1  ;;  %11396 = vmatprep.subr.bf16.mxu1 %v14883_v16  ;;  %v469_v1 = vld [vmem:[%s23258_s1 + $0xdb0] sm:$0xff]  ;;  %v466_v16 = vld [vmem:[%s23258_s1 + $0xd98] sm:$0xff] }
 0x3d4   :  { %v14929_v21 = vcombine.high %v465_v13, %v469_v1  ;;  %v14930_v41 = vcombine.low %v466_v16, %v470_v18 }
 0x3d5   :  { %10855 = vmatmul.mubr.bf16.vlgmr.msra.gmra.mrb[4].mxu0 %v18071_v58  ;;  %11388 = vmatmul.mubr.bf16.vlgmr.msra.gmra.mrb[4].mxu1 %v18071_v58  ;;  %v442_v58 = vld [vmem:[%s23258_s1 + $0xcd8] sm:$0xff] }
 0x3d6   :  { %10864 = vmatpush1.bf16.msra.mxu0 %v14880_v22  ;;  %11397 = vmatpush1.bf16.msra.mxu1 %v14882_v24  ;;  %v14907_v46 = vcombine.high %v442_v58, %v446_v42  ;;  %v14906_v55 = vcombine.low %v442_v58, %v446_v42  ;;  %v14931_v24 = vcombine.high %v466_v16, %v470_v18 }
 0x3d7   :  { %10865 = vmatprep.subr.bf16.mxu0 %v14889_v47  ;;  %11398 = vmatprep.subr.bf16.mxu1 %v14891_v27  ;;  %v473_v47 = vld [vmem:[%s23258_s1 + $0xdd0] sm:$0xff] }
 0x3d8   :  { %10895 = vmatprep.mubr.bf16.mxu0 %v18087_v4  ;;  %11428 = vmatprep.mubr.bf16.mxu1 %v18087_v4  ;;  %v450_v4 = vld [vmem:[%s23258_s1 + $0xd18] sm:$0xff]  ;;  %v477_v27 = vld [vmem:[%s23258_s1 + $0xdf0] sm:$0xff] }
 0x3d9   :  { %v14915_v61 = vcombine.high %v450_v4, %v454_v52  ;;  %v14914_v10 = vcombine.low %v450_v4, %v454_v52  ;;  %v14937_v58 = vcombine.high %v473_v47, %v477_v27  ;;  %v14936_v50 = vcombine.low %v473_v47, %v477_v27  ;;  %v510_v47 = vld [vmem:[%s23258_s1 + $0xef8] sm:$0xff] }
 0x3da   :  { %10866 = vmatpush1.bf16.msra.mxu0 %v14888_v35  ;;  %11399 = vmatpush1.bf16.msra.mxu1 %v14890_v38  ;;  %v14938_v4 = vcombine.low %v474_v31, %v478_v33 }
 0x3db   :  { %10867 = vmatprep.subr.bf16.mxu0 %v14897_v36  ;;  %11400 = vmatprep.subr.bf16.mxu1 %v14899_v39  ;;  %v14928_v36 = vcombine.low %v465_v13, %v469_v1  ;;  %v502_v13 = vld [vmem:[%s23258_s1 + $0xeb8] sm:$0xff] }
 0x3de   :  { %10868 = vmatpush1.bf16.msra.mxu0 %v14896_v45  ;;  %11401 = vmatpush1.bf16.msra.mxu1 %v14898_v34  ;;  %v14939_v45 = vcombine.high %v474_v31, %v478_v33  ;;  %v481_v34 = vld [vmem:[%s23258_s1 + $0xe10] sm:$0xff] }
 0x3df   :  { %10869 = vmatprep.subr.bf16.mxu0 %v14905_v48  ;;  %11402 = vmatprep.subr.bf16.mxu1 %v14907_v46  ;;  %v485_v48 = vld [vmem:[%s23258_s1 + $0xe30] sm:$0xff]  ;;  %v482_v46 = vld [vmem:[%s23258_s1 + $0xe18] sm:$0xff] }
 0x3e0   :  { %v14945_v52 = vcombine.high %v481_v34, %v485_v48  ;;  %v14944_v28 = vcombine.low %v481_v34, %v485_v48  ;;  %v14946_v44 = vcombine.low %v482_v46, %v486_v49  ;;  %v521_v48 = vld [vmem:[%s23258_s1 + $0xf50] sm:$0xff] }
 0x3e2   :  { %10870 = vmatpush1.bf16.msra.mxu0 %v14904_v54  ;;  %11403 = vmatpush1.bf16.msra.mxu1 %v14906_v55  ;;  %v14947_v54 = vcombine.high %v482_v46, %v486_v49  ;;  %v489_v55 = vld [vmem:[%s23258_s1 + $0xe50] sm:$0xff]  ;;  %v522_v49 = vld [vmem:[%s23258_s1 + $0xf58] sm:$0xff] }
 0x3e3   :  { %10871 = vmatprep.subr.bf16.mxu0 %v14913_v60  ;;  %11404 = vmatprep.subr.bf16.mxu1 %v14915_v61  ;;  %v493_v60 = vld [vmem:[%s23258_s1 + $0xe70] sm:$0xff]  ;;  %v490_v61 = vld [vmem:[%s23258_s1 + $0xe58] sm:$0xff] }
 0x3e4   :  { %v14953_v3 = vcombine.high %v489_v55, %v493_v60  ;;  %v14952_v1 = vcombine.low %v489_v55, %v493_v60  ;;  %v14954_v16 = vcombine.low %v490_v61, %v494_v0  ;;  %v525_v46 = vld [vmem:[%s23258_s1 + $0xf70] sm:$0xff] }
 0x3e5   :  { %v529_v60 = vld [vmem:[%s23258_s1 + $0xf90] sm:$0xff] }
 0x3e6   :  { %10872 = vmatpush1.bf16.msra.mxu0 %v14912_v9  ;;  %11405 = vmatpush1.bf16.msra.mxu1 %v14914_v10  ;;  %v14955_v9 = vcombine.high %v490_v61, %v494_v0  ;;  %v497_v10 = vld [vmem:[%s23258_s1 + $0xe90] sm:$0xff]  ;;  %v530_v0 = vld [vmem:[%s23258_s1 + $0xf98] sm:$0xff] }
 0x3e7   :  { %10873 = vmatprep.subr.bf16.mxu0 %v14921_v11  ;;  %11406 = vmatprep.subr.bf16.mxu1 %v14923_v12  ;;  %v501_v11 = vld [vmem:[%s23258_s1 + $0xeb0] sm:$0xff]  ;;  %v498_v12 = vld [vmem:[%s23258_s1 + $0xe98] sm:$0xff] }
 0x3e8   :  { %v20659_v22 = vpop.f32.mrb[0].mxu0  ;;  %v20667_v63 = vpop.f32.mrb[0].mxu1  ;;  %v14961_v18 = vcombine.high %v497_v10, %v501_v11  ;;  %v14960_v27 = vcombine.low %v497_v10, %v501_v11  ;;  %v14962_v31 = vcombine.low %v498_v12, %v502_v13  ;;  %v533_v61 = vld [vmem:[%s23258_s1 + $0xfb0] sm:$0xff] }
 0x3e9   :  { %v20669_v30 = vpop.f32.mrb[1].mxu0  ;;  %v20677_v35 = vpop.f32.mrb[1].mxu1  ;;  %v537_v11 = vld [vmem:[%s23258_s1 + $0xfd0] sm:$0xff] }
 0x3ea   :  { %v10204_v38 = vpop.f32.mrb[2].mxu0  ;;  %10874 = vmatpush1.bf16.msra.mxu0 %v14920_v20  ;;  %v10737_v39 = vpop.f32.mrb[2].mxu1  ;;  %11407 = vmatpush1.bf16.msra.mxu1 %v14922_v23  ;;  %v14963_v20 = vcombine.high %v498_v12, %v502_v13  ;;  %v505_v23 = vld [vmem:[%s23258_s1 + $0xed0] sm:$0xff]  ;;  %v538_v13 = vld [vmem:[%s23258_s1 + $0xfd8] sm:$0xff] }
 0x3eb   :  { %v10205_v40 = vpop.f32.mrb[3].mxu0  ;;  %10875 = vmatprep.subr.bf16.mxu0 %v14929_v21  ;;  %v10738_v42 = vpop.f32.mrb[3].mxu1  ;;  %11408 = vmatprep.subr.bf16.mxu1 %v14931_v24  ;;  %v509_v21 = vld [vmem:[%s23258_s1 + $0xef0] sm:$0xff]  ;;  %v506_v24 = vld [vmem:[%s23258_s1 + $0xed8] sm:$0xff] }
 0x3ec   :  { %v14969_v33 = vcombine.high %v505_v23, %v509_v21  ;;  %v14971_v38 = vcombine.high %v506_v24, %v510_v47  ;;  %v517_v39 = vld [vmem:[%s23258_s1 + $0xf30] sm:$0xff]  ;;  %v514_v40 = vld [vmem:[%s23258_s1 + $0xf18] sm:$0xff]  ;;  %v14970_v42 = vcombine.low %v506_v24, %v510_v47 }
 0x3ed   :  { %v541_v12 = vld [vmem:[%s23258_s1 + $0xff0] sm:$0xff]  ;;  %v546_v47 = vld [vmem:[%s23258_s1 + $0x1018] sm:$0xff] }
 0x3ee   :  { %10876 = vmatpush1.bf16.msra.mxu0 %v14928_v36  ;;  %11409 = vmatpush1.bf16.msra.mxu1 %v14930_v41  ;;  %v513_v36 = vld [vmem:[%s23258_s1 + $0xf10] sm:$0xff]  ;;  %v518_v41 = vld [vmem:[%s23258_s1 + $0xf38] sm:$0xff] }
 0x3ef   :  { %10877 = vmatprep.subr.bf16.mxu0 %v14937_v58  ;;  %11410 = vmatprep.subr.bf16.mxu1 %v14939_v45  ;;  %v14968_v58 = vcombine.low %v505_v23, %v509_v21  ;;  %v14977_v45 = vcombine.high %v513_v36, %v517_v39  ;;  %v14979_v34 = vcombine.high %v514_v40, %v518_v41  ;;  %v545_v21 = vld [vmem:[%s23258_s1 + $0x1010] sm:$0xff] }
 0x3f0   :  { %v549_v24 = vld [vmem:[%s23258_s1 + $0x1030] sm:$0xff] }
 0x3f2   :  { %10878 = vmatpush1.bf16.msra.mxu0 %v14936_v50  ;;  %11411 = vmatpush1.bf16.msra.mxu1 %v14938_v4  ;;  %v526_v50 = vld [vmem:[%s23258_s1 + $0xf78] sm:$0xff]  ;;  %v14976_v4 = vcombine.low %v513_v36, %v517_v39  ;;  %v553_v39 = vld [vmem:[%s23258_s1 + $0x1050] sm:$0xff] }
 0x3f3   :  { %10879 = vmatprep.subr.bf16.mxu0 %v14945_v52  ;;  %11412 = vmatprep.subr.bf16.mxu1 %v14947_v54  ;;  %v14978_v52 = vcombine.low %v514_v40, %v518_v41  ;;  %v14985_v54 = vcombine.high %v521_v48, %v525_v46  ;;  %v14987_v55 = vcombine.high %v522_v49, %v526_v50  ;;  %v557_v40 = vld [vmem:[%s23258_s1 + $0x1070] sm:$0xff]  ;;  %v554_v41 = vld [vmem:[%s23258_s1 + $0x1058] sm:$0xff] }
 0x3f6   :  { %10880 = vmatpush1.bf16.msra.mxu0 %v14944_v28  ;;  %11413 = vmatpush1.bf16.msra.mxu1 %v14946_v44  ;;  %v534_v28 = vld [vmem:[%s23258_s1 + $0xfb8] sm:$0xff]  ;;  %v14984_v44 = vcombine.low %v521_v48, %v525_v46  ;;  %v561_v46 = vld [vmem:[%s23258_s1 + $0x1090] sm:$0xff] }
 0x3f7   :  { %10881 = vmatprep.subr.bf16.mxu0 %v14953_v3  ;;  %11414 = vmatprep.subr.bf16.mxu1 %v14955_v9  ;;  %v14986_v3 = vcombine.low %v522_v49, %v526_v50  ;;  %v14993_v9 = vcombine.high %v529_v60, %v533_v61  ;;  %v14995_v10 = vcombine.high %v530_v0, %v534_v28  ;;  %v565_v49 = vld [vmem:[%s23258_s1 + $0x10b0] sm:$0xff]  ;;  %v562_v50 = vld [vmem:[%s23258_s1 + $0x1098] sm:$0xff] }
 0x3fa   :  { %10882 = vmatpush1.bf16.msra.mxu0 %v14952_v1  ;;  %11415 = vmatpush1.bf16.msra.mxu1 %v14954_v16  ;;  %v542_v1 = vld [vmem:[%s23258_s1 + $0xff8] sm:$0xff]  ;;  %v14992_v16 = vcombine.low %v529_v60, %v533_v61  ;;  %v569_v61 = vld [vmem:[%s23258_s1 + $0x10d0] sm:$0xff] }
 0x3fb   :  { %10883 = vmatprep.subr.bf16.mxu0 %v14961_v18  ;;  %11416 = vmatprep.subr.bf16.mxu1 %v14963_v20  ;;  %v14994_v18 = vcombine.low %v530_v0, %v534_v28  ;;  %v15001_v20 = vcombine.high %v537_v11, %v541_v12  ;;  %v15003_v23 = vcombine.high %v538_v13, %v542_v1  ;;  %v573_v0 = vld [vmem:[%s23258_s1 + $0x10f0] sm:$0xff]  ;;  %v574_v28 = vld [vmem:[%s23258_s1 + $0x10f8] sm:$0xff] }
 0x3fe   :  { %10884 = vmatpush1.bf16.msra.mxu0 %v14960_v27  ;;  %11417 = vmatpush1.bf16.msra.mxu1 %v14962_v31  ;;  %v550_v27 = vld [vmem:[%s23258_s1 + $0x1038] sm:$0xff]  ;;  %v15000_v31 = vcombine.low %v537_v11, %v541_v12  ;;  %v577_v11 = vld [vmem:[%s23258_s1 + $0x1110] sm:$0xff] }
 0x3ff   :  { %10885 = vmatprep.subr.bf16.mxu0 %v14969_v33  ;;  %11418 = vmatprep.subr.bf16.mxu1 %v14971_v38  ;;  %v15002_v33 = vcombine.low %v538_v13, %v542_v1  ;;  %v15009_v38 = vcombine.high %v545_v21, %v549_v24  ;;  %v15011_v36 = vcombine.high %v546_v47, %v550_v27  ;;  %v581_v12 = vld [vmem:[%s23258_s1 + $0x1130] sm:$0xff]  ;;  %v582_v13 = vld [vmem:[%s23258_s1 + $0x1138] sm:$0xff] }
 0x400   :  { %v15032_v1 = vcombine.low %v569_v61, %v573_v0 }
 0x402   :  { %10886 = vmatpush1.bf16.msra.mxu0 %v14968_v58  ;;  %11419 = vmatpush1.bf16.msra.mxu1 %v14970_v42  ;;  %v558_v58 = vld [vmem:[%s23258_s1 + $0x1078] sm:$0xff]  ;;  %v15008_v42 = vcombine.low %v545_v21, %v549_v24  ;;  %v589_v21 = vld [vmem:[%s23258_s1 + $0x1170] sm:$0xff] }
 0x403   :  { %10887 = vmatprep.subr.bf16.mxu0 %v14977_v45  ;;  %11420 = vmatprep.subr.bf16.mxu1 %v14979_v34  ;;  %v15010_v45 = vcombine.low %v546_v47, %v550_v27  ;;  %v15017_v34 = vcombine.high %v553_v39, %v557_v40  ;;  %v15019_v48 = vcombine.high %v554_v41, %v558_v58  ;;  %v586_v24 = vld [vmem:[%s23258_s1 + $0x1158] sm:$0xff] }
 0x404   :  { %v590_v47 = vld [vmem:[%s23258_s1 + $0x1178] sm:$0xff]  ;;  %v15040_v27 = vcombine.low %v577_v11, %v581_v12 }
 0x406   :  { %10888 = vmatpush1.bf16.msra.mxu0 %v14976_v4  ;;  %11421 = vmatpush1.bf16.msra.mxu1 %v14978_v52  ;;  %v566_v4 = vld [vmem:[%s23258_s1 + $0x10b8] sm:$0xff]  ;;  %v15016_v52 = vcombine.low %v553_v39, %v557_v40  ;;  %v597_v39 = vld [vmem:[%s23258_s1 + $0x11b0] sm:$0xff] }
 0x407   :  { %10889 = vmatprep.subr.bf16.mxu0 %v14985_v54  ;;  %11422 = vmatprep.subr.bf16.mxu1 %v14987_v55  ;;  %v15018_v54 = vcombine.low %v554_v41, %v558_v58  ;;  %v15025_v55 = vcombine.high %v561_v46, %v565_v49  ;;  %v15027_v60 = vcombine.high %v562_v50, %v566_v4  ;;  %v594_v40 = vld [vmem:[%s23258_s1 + $0x1198] sm:$0xff] }
 0x408   :  { %v598_v41 = vld [vmem:[%s23258_s1 + $0x11b8] sm:$0xff] }
 0x40a   :  { %10890 = vmatpush1.bf16.msra.mxu0 %v14984_v44  ;;  %11423 = vmatpush1.bf16.msra.mxu1 %v14986_v3  ;;  %v15024_v44 = vcombine.low %v561_v46, %v565_v49  ;;  %v15026_v3 = vcombine.low %v562_v50, %v566_v4  ;;  %v605_v46 = vld [vmem:[%s23258_s1 + $0x11f0] sm:$0xff]  ;;  %v602_v49 = vld [vmem:[%s23258_s1 + $0x11d8] sm:$0xff] }
 0x40b   :  { %10891 = vmatprep.subr.bf16.mxu0 %v14993_v9  ;;  %11424 = vmatprep.subr.bf16.mxu1 %v14995_v10  ;;  %v15033_v9 = vcombine.high %v569_v61, %v573_v0  ;;  %v606_v50 = vld [vmem:[%s23258_s1 + $0x11f8] sm:$0xff]  ;;  %v613_v61 = vld [vmem:[%s23258_s1 + $0x1230] sm:$0xff] }
 0x40c   :  { %v610_v0 = vld [vmem:[%s23258_s1 + $0x1218] sm:$0xff] }
 0x40e   :  { %10892 = vmatpush1.bf16.msra.mxu0 %v14992_v16  ;;  %11425 = vmatpush1.bf16.msra.mxu1 %v14994_v18  ;;  %v15041_v18 = vcombine.high %v577_v11, %v581_v12  ;;  %v621_v11 = vld [vmem:[%s23258_s1 + $0x1270] sm:$0xff]  ;;  %v618_v12 = vld [vmem:[%s23258_s1 + $0x1258] sm:$0xff] }
 0x40f   :  { %10893 = vmatprep.subr.bf16.mxu0 %v15001_v20  ;;  %11426 = vmatprep.subr.bf16.mxu1 %v15003_v23  ;;  %v585_v23 = vld [vmem:[%s23258_s1 + $0x1150] sm:$0xff] }
 0x410   :  { %v15048_v58 = vcombine.low %v585_v23, %v589_v21 }
 0x412   :  { %10894 = vmatpush1.bf16.msra.mxu0 %v15000_v31  ;;  %11427 = vmatpush1.bf16.msra.mxu1 %v15002_v33  ;;  %v15049_v33 = vcombine.high %v585_v23, %v589_v21  ;;  %v629_v23 = vld [vmem:[%s23258_s1 + $0x12b0] sm:$0xff]  ;;  %v626_v21 = vld [vmem:[%s23258_s1 + $0x1298] sm:$0xff] }
 0x413   :  { %10904 = vmatprep.subr.bf16.mxu0 %v15009_v38  ;;  %11437 = vmatprep.subr.bf16.mxu1 %v15011_v36  ;;  %v15051_v38 = vcombine.high %v586_v24, %v590_v47  ;;  %v593_v36 = vld [vmem:[%s23258_s1 + $0x1190] sm:$0xff] }
 0x414   :  { %v15056_v4 = vcombine.low %v593_v36, %v597_v39 }
 0x415   :  { %10896 = vmatmul.mubr.bf16.vlgmr.msra.gmra.mrb[4].mxu0 %v18286_v19  ;;  %11429 = vmatmul.mubr.bf16.vlgmr.msra.gmra.mrb[4].mxu1 %v18286_v19  ;;  %v570_v19 = vld [vmem:[%s23258_s1 + $0x10d8] sm:$0xff] }
 0x416   :  { %10905 = vmatpush1.bf16.msra.mxu0 %v15008_v42  ;;  %11438 = vmatpush1.bf16.msra.mxu1 %v15010_v45  ;;  %v15035_v10 = vcombine.high %v570_v19, %v574_v28  ;;  %v15034_v16 = vcombine.low %v570_v19, %v574_v28  ;;  %v15050_v42 = vcombine.low %v586_v24, %v590_v47  ;;  %v614_v19 = vld [vmem:[%s23258_s1 + $0x1238] sm:$0xff] }
 0x417   :  { %10906 = vmatprep.subr.bf16.mxu0 %v15017_v34  ;;  %11439 = vmatprep.subr.bf16.mxu1 %v15019_v48  ;;  %v15057_v45 = vcombine.high %v593_v36, %v597_v39  ;;  %v15059_v34 = vcombine.high %v594_v40, %v598_v41  ;;  %v601_v48 = vld [vmem:[%s23258_s1 + $0x11d0] sm:$0xff]  ;;  %v630_v24 = vld [vmem:[%s23258_s1 + $0x12b8] sm:$0xff] }
 0x418   :  { %10936 = vmatprep.mubr.bf16.mxu0 %v18301_v29  ;;  %11469 = vmatprep.mubr.bf16.mxu1 %v18301_v29  ;;  %v578_v29 = vld [vmem:[%s23258_s1 + $0x1118] sm:$0xff]  ;;  %v15064_v28 = vcombine.low %v601_v48, %v605_v46  ;;  %v637_v36 = vld [vmem:[%s23258_s1 + $0x12f0] sm:$0xff] }
 0x419   :  { %v15043_v20 = vcombine.high %v578_v29, %v582_v13  ;;  %v15042_v31 = vcombine.low %v578_v29, %v582_v13  ;;  %v622_v29 = vld [vmem:[%s23258_s1 + $0x1278] sm:$0xff] }
 0x41a   :  { %10907 = vmatpush1.bf16.msra.mxu0 %v15016_v52  ;;  %11440 = vmatpush1.bf16.msra.mxu1 %v15018_v54  ;;  %v15058_v52 = vcombine.low %v594_v40, %v598_v41  ;;  %v15065_v54 = vcombine.high %v601_v48, %v605_v46  ;;  %v634_v39 = vld [vmem:[%s23258_s1 + $0x12d8] sm:$0xff]  ;;  %v645_v48 = vld [vmem:[%s23258_s1 + $0x1330] sm:$0xff] }
 0x41b   :  { %10908 = vmatprep.subr.bf16.mxu0 %v15025_v55  ;;  %11441 = vmatprep.subr.bf16.mxu1 %v15027_v60  ;;  %v15067_v55 = vcombine.high %v602_v49, %v606_v50  ;;  %v609_v60 = vld [vmem:[%s23258_s1 + $0x1210] sm:$0xff]  ;;  %v638_v40 = vld [vmem:[%s23258_s1 + $0x12f8] sm:$0xff] }
 0x41c   :  { %v15072_v13 = vcombine.low %v609_v60, %v613_v61  ;;  %v642_v46 = vld [vmem:[%s23258_s1 + $0x1318] sm:$0xff] }
 0x41e   :  { %10909 = vmatpush1.bf16.msra.mxu0 %v15024_v44  ;;  %11442 = vmatpush1.bf16.msra.mxu1 %v15026_v3  ;;  %v15066_v44 = vcombine.low %v602_v49, %v606_v50  ;;  %v15073_v3 = vcombine.high %v609_v60, %v613_v61  ;;  %v646_v49 = vld [vmem:[%s23258_s1 + $0x1338] sm:$0xff]  ;;  %v653_v60 = vld [vmem:[%s23258_s1 + $0x1370] sm:$0xff] }
 0x41f   :  { %10910 = vmatprep.subr.bf16.mxu0 %v15033_v9  ;;  %11443 = vmatprep.subr.bf16.mxu1 %v15035_v10  ;;  %v15075_v9 = vcombine.high %v610_v0, %v614_v19  ;;  %v617_v10 = vld [vmem:[%s23258_s1 + $0x1250] sm:$0xff]  ;;  %v650_v61 = vld [vmem:[%s23258_s1 + $0x1358] sm:$0xff] }
 0x420   :  { %v15080_v47 = vcombine.low %v617_v10, %v621_v11 }
 0x422   :  { %10911 = vmatpush1.bf16.msra.mxu0 %v15032_v1  ;;  %11444 = vmatpush1.bf16.msra.mxu1 %v15034_v16  ;;  %v15074_v1 = vcombine.low %v610_v0, %v614_v19  ;;  %v15081_v16 = vcombine.high %v617_v10, %v621_v11  ;;  %v654_v0 = vld [vmem:[%s23258_s1 + $0x1378] sm:$0xff]  ;;  %v661_v10 = vld [vmem:[%s23258_s1 + $0x13b0] sm:$0xff] }
 0x423   :  { %10912 = vmatprep.subr.bf16.mxu0 %v15041_v18  ;;  %11445 = vmatprep.subr.bf16.mxu1 %v15043_v20  ;;  %v15083_v18 = vcombine.high %v618_v12, %v622_v29  ;;  %v625_v20 = vld [vmem:[%s23258_s1 + $0x1290] sm:$0xff]  ;;  %v658_v11 = vld [vmem:[%s23258_s1 + $0x1398] sm:$0xff] }
 0x424   :  { %v15088_v41 = vcombine.low %v625_v20, %v629_v23 }
 0x426   :  { %10913 = vmatpush1.bf16.msra.mxu0 %v15040_v27  ;;  %11446 = vmatpush1.bf16.msra.mxu1 %v15042_v31  ;;  %v15082_v27 = vcombine.low %v618_v12, %v622_v29  ;;  %v15089_v31 = vcombine.high %v625_v20, %v629_v23  ;;  %v662_v12 = vld [vmem:[%s23258_s1 + $0x13b8] sm:$0xff]  ;;  %v669_v20 = vld [vmem:[%s23258_s1 + $0x13f0] sm:$0xff] }
 0x427   :  { %10914 = vmatprep.subr.bf16.mxu0 %v15049_v33  ;;  %11447 = vmatprep.subr.bf16.mxu1 %v15051_v38  ;;  %v15091_v33 = vcombine.high %v626_v21, %v630_v24  ;;  %v633_v38 = vld [vmem:[%s23258_s1 + $0x12d0] sm:$0xff]  ;;  %v666_v23 = vld [vmem:[%s23258_s1 + $0x13d8] sm:$0xff] }
 0x428   :  { %v15096_v50 = vcombine.low %v633_v38, %v637_v36 }
 0x42a   :  { %10915 = vmatpush1.bf16.msra.mxu0 %v15048_v58  ;;  %11448 = vmatpush1.bf16.msra.mxu1 %v15050_v42  ;;  %v15090_v58 = vcombine.low %v626_v21, %v630_v24  ;;  %v15097_v42 = vcombine.high %v633_v38, %v637_v36  ;;  %v670_v21 = vld [vmem:[%s23258_s1 + $0x13f8] sm:$0xff]  ;;  %v677_v38 = vld [vmem:[%s23258_s1 + $0x1430] sm:$0xff] }
 0x42b   :  { %10916 = vmatprep.subr.bf16.mxu0 %v15057_v45  ;;  %11449 = vmatprep.subr.bf16.mxu1 %v15059_v34  ;;  %v15099_v45 = vcombine.high %v634_v39, %v638_v40  ;;  %v641_v34 = vld [vmem:[%s23258_s1 + $0x1310] sm:$0xff]  ;;  %v674_v36 = vld [vmem:[%s23258_s1 + $0x1418] sm:$0xff] }
 0x42c   :  { %v15104_v19 = vcombine.low %v641_v34, %v645_v48 }
 0x42e   :  { %10917 = vmatpush1.bf16.msra.mxu0 %v15056_v4  ;;  %11450 = vmatpush1.bf16.msra.mxu1 %v15058_v52  ;;  %v15098_v4 = vcombine.low %v634_v39, %v638_v40  ;;  %v15105_v52 = vcombine.high %v641_v34, %v645_v48  ;;  %v678_v39 = vld [vmem:[%s23258_s1 + $0x1438] sm:$0xff]  ;;  %v685_v34 = vld [vmem:[%s23258_s1 + $0x1470] sm:$0xff] }
 0x42f   :  { %10918 = vmatprep.subr.bf16.mxu0 %v15065_v54  ;;  %11451 = vmatprep.subr.bf16.mxu1 %v15067_v55  ;;  %v15107_v54 = vcombine.high %v642_v46, %v646_v49  ;;  %v649_v55 = vld [vmem:[%s23258_s1 + $0x1350] sm:$0xff]  ;;  %v682_v48 = vld [vmem:[%s23258_s1 + $0x1458] sm:$0xff] }
 0x430   :  { %v15112_v29 = vcombine.low %v649_v55, %v653_v60 }
 0x432   :  { %10919 = vmatpush1.bf16.msra.mxu0 %v15064_v28  ;;  %11452 = vmatpush1.bf16.msra.mxu1 %v15066_v44  ;;  %v15106_v28 = vcombine.low %v642_v46, %v646_v49  ;;  %v15113_v44 = vcombine.high %v649_v55, %v653_v60  ;;  %v686_v46 = vld [vmem:[%s23258_s1 + $0x1478] sm:$0xff]  ;;  %v693_v55 = vld [vmem:[%s23258_s1 + $0x14b0] sm:$0xff] }
 0x433   :  { %10920 = vmatprep.subr.bf16.mxu0 %v15073_v3  ;;  %11453 = vmatprep.subr.bf16.mxu1 %v15075_v9  ;;  %v15115_v3 = vcombine.high %v650_v61, %v654_v0  ;;  %v657_v9 = vld [vmem:[%s23258_s1 + $0x1390] sm:$0xff]  ;;  %v690_v60 = vld [vmem:[%s23258_s1 + $0x1498] sm:$0xff] }
 0x434   :  { %v15120_v24 = vcombine.low %v657_v9, %v661_v10 }
 0x436   :  { %10921 = vmatpush1.bf16.msra.mxu0 %v15072_v13  ;;  %11454 = vmatpush1.bf16.msra.mxu1 %v15074_v1  ;;  %v15114_v13 = vcombine.low %v650_v61, %v654_v0  ;;  %v15121_v1 = vcombine.high %v657_v9, %v661_v10  ;;  %v694_v61 = vld [vmem:[%s23258_s1 + $0x14b8] sm:$0xff]  ;;  %v701_v9 = vld [vmem:[%s23258_s1 + $0x14f0] sm:$0xff] }
 0x437   :  { %10922 = vmatprep.subr.bf16.mxu0 %v15081_v16  ;;  %11455 = vmatprep.subr.bf16.mxu1 %v15083_v18  ;;  %v15123_v16 = vcombine.high %v658_v11, %v662_v12  ;;  %v665_v18 = vld [vmem:[%s23258_s1 + $0x13d0] sm:$0xff]  ;;  %v702_v10 = vld [vmem:[%s23258_s1 + $0x14f8] sm:$0xff] }
 0x438   :  { %v15128_v40 = vcombine.low %v665_v18, %v669_v20 }
 0x43a   :  { %10923 = vmatpush1.bf16.msra.mxu0 %v15080_v47  ;;  %11456 = vmatpush1.bf16.msra.mxu1 %v15082_v27  ;;  %v15122_v47 = vcombine.low %v658_v11, %v662_v12  ;;  %v15129_v27 = vcombine.high %v665_v18, %v669_v20  ;;  %v15154_v12 = vcombine.low %v690_v60, %v694_v61  ;;  %v710_v18 = vld [vmem:[%s23258_s1 + $0x1538] sm:$0xff] }
 0x43b   :  { %10924 = vmatprep.subr.bf16.mxu0 %v15089_v31  ;;  %11457 = vmatprep.subr.bf16.mxu1 %v15091_v33  ;;  %v15131_v31 = vcombine.high %v666_v23, %v670_v21  ;;  %v673_v33 = vld [vmem:[%s23258_s1 + $0x1410] sm:$0xff] }
 0x43c   :  { %v15136_v49 = vcombine.low %v673_v33, %v677_v38 }
 0x43e   :  { %10925 = vmatpush1.bf16.msra.mxu0 %v15088_v41  ;;  %11458 = vmatpush1.bf16.msra.mxu1 %v15090_v58  ;;  %v15130_v41 = vcombine.low %v666_v23, %v670_v21  ;;  %v15137_v58 = vcombine.high %v673_v33, %v677_v38  ;;  %v718_v33 = vld [vmem:[%s23258_s1 + $0x1578] sm:$0xff] }
 0x43f   :  { %10926 = vmatprep.subr.bf16.mxu0 %v15097_v42  ;;  %11459 = vmatprep.subr.bf16.mxu1 %v15099_v45  ;;  %v15139_v42 = vcombine.high %v674_v36, %v678_v39  ;;  %v681_v45 = vld [vmem:[%s23258_s1 + $0x1450] sm:$0xff] }
 0x440   :  { %v15144_v0 = vcombine.low %v681_v45, %v685_v34 }
 0x442   :  { %10927 = vmatpush1.bf16.msra.mxu0 %v15096_v50  ;;  %11460 = vmatpush1.bf16.msra.mxu1 %v15098_v4  ;;  %v15138_v50 = vcombine.low %v674_v36, %v678_v39  ;;  %v15145_v4 = vcombine.high %v681_v45, %v685_v34  ;;  %v726_v45 = vld [vmem:[%s23258_s1 + $0x15b8] sm:$0xff] }
 0x443   :  { %10928 = vmatprep.subr.bf16.mxu0 %v15105_v52  ;;  %11461 = vmatprep.subr.bf16.mxu1 %v15107_v54  ;;  %v15147_v52 = vcombine.high %v682_v48, %v686_v46  ;;  %v689_v54 = vld [vmem:[%s23258_s1 + $0x1490] sm:$0xff] }
 0x444   :  { %v15152_v11 = vcombine.low %v689_v54, %v693_v55 }
 0x446   :  { %10929 = vmatpush1.bf16.msra.mxu0 %v15104_v19  ;;  %11462 = vmatpush1.bf16.msra.mxu1 %v15106_v28  ;;  %v15146_v19 = vcombine.low %v682_v48, %v686_v46  ;;  %v15153_v28 = vcombine.high %v689_v54, %v693_v55  ;;  %v734_v54 = vld [vmem:[%s23258_s1 + $0x15f8] sm:$0xff] }
 0x447   :  { %10930 = vmatprep.subr.bf16.mxu0 %v15113_v44  ;;  %11463 = vmatprep.subr.bf16.mxu1 %v15115_v3  ;;  %v15155_v44 = vcombine.high %v690_v60, %v694_v61  ;;  %v697_v3 = vld [vmem:[%s23258_s1 + $0x14d0] sm:$0xff] }
 0x448   :  { %v15160_v20 = vcombine.low %v697_v3, %v701_v9 }
 0x44a   :  { %10931 = vmatpush1.bf16.msra.mxu0 %v15112_v29  ;;  %11464 = vmatpush1.bf16.msra.mxu1 %v15114_v13  ;;  %v15161_v29 = vcombine.high %v697_v3, %v701_v9  ;;  %v742_v3 = vld [vmem:[%s23258_s1 + $0x1638] sm:$0xff] }
 0x44b   :  { %10932 = vmatprep.subr.bf16.mxu0 %v15121_v1  ;;  %11465 = vmatprep.subr.bf16.mxu1 %v15123_v16  ;;  %v705_v1 = vld [vmem:[%s23258_s1 + $0x1510] sm:$0xff] }
 0x44c   :  { %v709_v16 = vld [vmem:[%s23258_s1 + $0x1530] sm:$0xff] }
 0x44d   :  { %v15169_v21 = vcombine.high %v705_v1, %v709_v16  ;;  %v15168_v38 = vcombine.low %v705_v1, %v709_v16  ;;  %v750_v1 = vld [vmem:[%s23258_s1 + $0x1678] sm:$0xff] }
 0x44e   :  { %10933 = vmatpush1.bf16.msra.mxu0 %v15120_v24  ;;  %11466 = vmatpush1.bf16.msra.mxu1 %v15122_v47  ;;  %v713_v47 = vld [vmem:[%s23258_s1 + $0x1550] sm:$0xff] }
 0x44f   :  { %10934 = vmatprep.subr.bf16.mxu0 %v15129_v27  ;;  %11467 = vmatprep.subr.bf16.mxu1 %v15131_v31  ;;  %v717_v27 = vld [vmem:[%s23258_s1 + $0x1570] sm:$0xff]  ;;  %v714_v31 = vld [vmem:[%s23258_s1 + $0x1558] sm:$0xff] }
 0x450   :  { %v15177_v39 = vcombine.high %v713_v47, %v717_v27  ;;  %v15176_v34 = vcombine.low %v713_v47, %v717_v27  ;;  %v15178_v48 = vcombine.low %v714_v31, %v718_v33  ;;  %v758_v47 = vld [vmem:[%s23258_s1 + $0x16b8] sm:$0xff] }
 0x452   :  { %10935 = vmatpush1.bf16.msra.mxu0 %v15128_v40  ;;  %11468 = vmatpush1.bf16.msra.mxu1 %v15130_v41  ;;  %v15179_v40 = vcombine.high %v714_v31, %v718_v33  ;;  %v721_v41 = vld [vmem:[%s23258_s1 + $0x1590] sm:$0xff] }
 0x453   :  { %10945 = vmatprep.subr.bf16.mxu0 %v15137_v58  ;;  %11478 = vmatprep.subr.bf16.mxu1 %v15139_v42  ;;  %v725_v58 = vld [vmem:[%s23258_s1 + $0x15b0] sm:$0xff]  ;;  %v722_v42 = vld [vmem:[%s23258_s1 + $0x1598] sm:$0xff] }
 0x454   :  { %v15185_v46 = vcombine.high %v721_v41, %v725_v58  ;;  %v15184_v55 = vcombine.low %v721_v41, %v725_v58  ;;  %v15186_v60 = vcombine.low %v722_v42, %v726_v45  ;;  %v766_v41 = vld [vmem:[%s23258_s1 + $0x16f8] sm:$0xff] }
 0x455   :  { %10937 = vmatmul.mubr.bf16.vlgmr.msra.gmra.mrb[4].mxu0 %v18489_v51  ;;  %11470 = vmatmul.mubr.bf16.vlgmr.msra.gmra.mrb[4].mxu1 %v18489_v51  ;;  %v698_v51 = vld [vmem:[%s23258_s1 + $0x14d8] sm:$0xff] }
 0x456   :  { %10946 = vmatpush1.bf16.msra.mxu0 %v15136_v49  ;;  %11479 = vmatpush1.bf16.msra.mxu1 %v15138_v50  ;;  %v15163_v13 = vcombine.high %v698_v51, %v702_v10  ;;  %v15162_v23 = vcombine.low %v698_v51, %v702_v10  ;;  %v15187_v49 = vcombine.high %v722_v42, %v726_v45  ;;  %v729_v50 = vld [vmem:[%s23258_s1 + $0x15d0] sm:$0xff] }
 0x457   :  { %10947 = vmatprep.subr.bf16.mxu0 %v15145_v4  ;;  %11480 = vmatprep.subr.bf16.mxu1 %v15147_v52  ;;  %v733_v4 = vld [vmem:[%s23258_s1 + $0x15f0] sm:$0xff]  ;;  %v730_v52 = vld [vmem:[%s23258_s1 + $0x15d8] sm:$0xff] }
 0x458   :  { %10977 = vmatprep.mubr.bf16.mxu0 %v18505_v62  ;;  %11510 = vmatprep.mubr.bf16.mxu1 %v18505_v62  ;;  %v706_v62 = vld [vmem:[%s23258_s1 + $0x1518] sm:$0xff]  ;;  %v15193_v61 = vcombine.high %v729_v50, %v733_v4  ;;  %v15192_v9 = vcombine.low %v729_v50, %v733_v4  ;;  %v15194_v51 = vcombine.low %v730_v52, %v734_v54 }
 0x459   :  { %v15171_v24 = vcombine.high %v706_v62, %v710_v18  ;;  %v15170_v36 = vcombine.low %v706_v62, %v710_v18  ;;  %v774_v50 = vld [vmem:[%s23258_s1 + $0x1738] sm:$0xff] }
 0x45a   :  { %10948 = vmatpush1.bf16.msra.mxu0 %v15144_v0  ;;  %11481 = vmatpush1.bf16.msra.mxu1 %v15146_v19  ;;  %v15195_v0 = vcombine.high %v730_v52, %v734_v54  ;;  %v737_v19 = vld [vmem:[%s23258_s1 + $0x1610] sm:$0xff] }
 0x45b   :  { %10949 = vmatprep.subr.bf16.mxu0 %v15153_v28  ;;  %11482 = vmatprep.subr.bf16.mxu1 %v15155_v44  ;;  %v741_v28 = vld [vmem:[%s23258_s1 + $0x1630] sm:$0xff]  ;;  %v738_v44 = vld [vmem:[%s23258_s1 + $0x1618] sm:$0xff] }
 0x45c   :  { %v15201_v10 = vcombine.high %v737_v19, %v741_v28  ;;  %v15200_v16 = vcombine.low %v737_v19, %v741_v28  ;;  %v15202_v62 = vcombine.low %v738_v44, %v742_v3  ;;  %v782_v19 = vld [vmem:[%s23258_s1 + $0x1778] sm:$0xff] }
 0x45e   :  { %10950 = vmatpush1.bf16.msra.mxu0 %v15152_v11  ;;  %11483 = vmatpush1.bf16.msra.mxu1 %v15154_v12  ;;  %v15203_v11 = vcombine.high %v738_v44, %v742_v3  ;;  %v745_v12 = vld [vmem:[%s23258_s1 + $0x1650] sm:$0xff] }
 0x45f   :  { %10951 = vmatprep.subr.bf16.mxu0 %v15161_v29  ;;  %11484 = vmatprep.subr.bf16.mxu1 %v15163_v13  ;;  %v749_v29 = vld [vmem:[%s23258_s1 + $0x1670] sm:$0xff]  ;;  %v746_v13 = vld [vmem:[%s23258_s1 + $0x1658] sm:$0xff] }
 0x460   :  { %v15209_v18 = vcombine.high %v745_v12, %v749_v29  ;;  %v15208_v27 = vcombine.low %v745_v12, %v749_v29  ;;  %v15210_v31 = vcombine.low %v746_v13, %v750_v1  ;;  %v790_v12 = vld [vmem:[%s23258_s1 + $0x17b8] sm:$0xff] }
 0x462   :  { %10952 = vmatpush1.bf16.msra.mxu0 %v15160_v20  ;;  %11485 = vmatpush1.bf16.msra.mxu1 %v15162_v23  ;;  %v15211_v20 = vcombine.high %v746_v13, %v750_v1  ;;  %v753_v23 = vld [vmem:[%s23258_s1 + $0x1690] sm:$0xff] }
 0x463   :  { %10953 = vmatprep.subr.bf16.mxu0 %v15169_v21  ;;  %11486 = vmatprep.subr.bf16.mxu1 %v15171_v24  ;;  %v757_v21 = vld [vmem:[%s23258_s1 + $0x16b0] sm:$0xff]  ;;  %v754_v24 = vld [vmem:[%s23258_s1 + $0x1698] sm:$0xff] }
 0x464   :  { %v15217_v33 = vcombine.high %v753_v23, %v757_v21  ;;  %v15216_v58 = vcombine.low %v753_v23, %v757_v21  ;;  %v15218_v42 = vcombine.low %v754_v24, %v758_v47  ;;  %v798_v23 = vld [vmem:[%s23258_s1 + $0x17f8] sm:$0xff] }
 0x466   :  { %10954 = vmatpush1.bf16.msra.mxu0 %v15168_v38  ;;  %11487 = vmatpush1.bf16.msra.mxu1 %v15170_v36  ;;  %v15219_v38 = vcombine.high %v754_v24, %v758_v47  ;;  %v761_v36 = vld [vmem:[%s23258_s1 + $0x16d0] sm:$0xff] }
 0x467   :  { %10955 = vmatprep.subr.bf16.mxu0 %v15177_v39  ;;  %11488 = vmatprep.subr.bf16.mxu1 %v15179_v40  ;;  %v765_v39 = vld [vmem:[%s23258_s1 + $0x16f0] sm:$0xff]  ;;  %v762_v40 = vld [vmem:[%s23258_s1 + $0x16d8] sm:$0xff] }
 0x468   :  { %v15225_v45 = vcombine.high %v761_v36, %v765_v39  ;;  %v15224_v4 = vcombine.low %v761_v36, %v765_v39  ;;  %v15226_v52 = vcombine.low %v762_v40, %v766_v41  ;;  %v806_v36 = vld [vmem:[%s23258_s1 + $0x1838] sm:$0xff] }
 0x46a   :  { %10956 = vmatpush1.bf16.msra.mxu0 %v15176_v34  ;;  %11489 = vmatpush1.bf16.msra.mxu1 %v15178_v48  ;;  %v15227_v34 = vcombine.high %v762_v40, %v766_v41  ;;  %v769_v48 = vld [vmem:[%s23258_s1 + $0x1710] sm:$0xff] }
 0x46b   :  { %10957 = vmatprep.subr.bf16.mxu0 %v15185_v46  ;;  %11490 = vmatprep.subr.bf16.mxu1 %v15187_v49  ;;  %v773_v46 = vld [vmem:[%s23258_s1 + $0x1730] sm:$0xff]  ;;  %v770_v49 = vld [vmem:[%s23258_s1 + $0x1718] sm:$0xff] }
 0x46c   :  { %v15233_v54 = vcombine.high %v769_v48, %v773_v46  ;;  %v15232_v28 = vcombine.low %v769_v48, %v773_v46  ;;  %v15234_v44 = vcombine.low %v770_v49, %v774_v50  ;;  %v814_v48 = vld [vmem:[%s23258_s1 + $0x1878] sm:$0xff] }
 0x46e   :  { %10958 = vmatpush1.bf16.msra.mxu0 %v15184_v55  ;;  %11491 = vmatpush1.bf16.msra.mxu1 %v15186_v60  ;;  %v15235_v55 = vcombine.high %v770_v49, %v774_v50  ;;  %v777_v60 = vld [vmem:[%s23258_s1 + $0x1750] sm:$0xff] }
 0x46f   :  { %10959 = vmatprep.subr.bf16.mxu0 %v15193_v61  ;;  %11492 = vmatprep.subr.bf16.mxu1 %v15195_v0  ;;  %v781_v61 = vld [vmem:[%s23258_s1 + $0x1770] sm:$0xff]  ;;  %v778_v0 = vld [vmem:[%s23258_s1 + $0x1758] sm:$0xff] }
 0x470   :  { %v15241_v3 = vcombine.high %v777_v60, %v781_v61  ;;  %v15240_v29 = vcombine.low %v777_v60, %v781_v61  ;;  %v15242_v13 = vcombine.low %v778_v0, %v782_v19  ;;  %v822_v60 = vld [vmem:[%s23258_s1 + $0x18b8] sm:$0xff] }
 0x472   :  { %10960 = vmatpush1.bf16.msra.mxu0 %v15192_v9  ;;  %11493 = vmatpush1.bf16.msra.mxu1 %v15194_v51  ;;  %v15243_v9 = vcombine.high %v778_v0, %v782_v19  ;;  %v785_v51 = vld [vmem:[%s23258_s1 + $0x1790] sm:$0xff] }
 0x473   :  { %10961 = vmatprep.subr.bf16.mxu0 %v15201_v10  ;;  %11494 = vmatprep.subr.bf16.mxu1 %v15203_v11  ;;  %v789_v10 = vld [vmem:[%s23258_s1 + $0x17b0] sm:$0xff]  ;;  %v786_v11 = vld [vmem:[%s23258_s1 + $0x1798] sm:$0xff] }
 0x474   :  { %v15249_v1 = vcombine.high %v785_v51, %v789_v10  ;;  %v15248_v21 = vcombine.low %v785_v51, %v789_v10  ;;  %v15250_v24 = vcombine.low %v786_v11, %v790_v12 }
 0x476   :  { %10962 = vmatpush1.bf16.msra.mxu0 %v15200_v16  ;;  %11495 = vmatpush1.bf16.msra.mxu1 %v15202_v62  ;;  %v15251_v16 = vcombine.high %v786_v11, %v790_v12  ;;  %v793_v62 = vld [vmem:[%s23258_s1 + $0x17d0] sm:$0xff] }
 0x477   :  { %10963 = vmatprep.subr.bf16.mxu0 %v15209_v18  ;;  %11496 = vmatprep.subr.bf16.mxu1 %v15211_v20  ;;  %v797_v18 = vld [vmem:[%s23258_s1 + $0x17f0] sm:$0xff]  ;;  %v794_v20 = vld [vmem:[%s23258_s1 + $0x17d8] sm:$0xff] }
 0x478   :  { %v15257_v47 = vcombine.high %v793_v62, %v797_v18  ;;  %v15256_v39 = vcombine.low %v793_v62, %v797_v18  ;;  %v15258_v40 = vcombine.low %v794_v20, %v798_v23 }
 0x47a   :  { %10964 = vmatpush1.bf16.msra.mxu0 %v15208_v27  ;;  %11497 = vmatpush1.bf16.msra.mxu1 %v15210_v31  ;;  %v15259_v27 = vcombine.high %v794_v20, %v798_v23  ;;  %v801_v31 = vld [vmem:[%s23258_s1 + $0x1810] sm:$0xff] }
 0x47b   :  { %10965 = vmatprep.subr.bf16.mxu0 %v15217_v33  ;;  %11498 = vmatprep.subr.bf16.mxu1 %v15219_v38  ;;  %v805_v33 = vld [vmem:[%s23258_s1 + $0x1830] sm:$0xff]  ;;  %v802_v38 = vld [vmem:[%s23258_s1 + $0x1818] sm:$0xff] }
 0x47c   :  { %v15265_v41 = vcombine.high %v801_v31, %v805_v33  ;;  %v15264_v46 = vcombine.low %v801_v31, %v805_v33  ;;  %v15266_v49 = vcombine.low %v802_v38, %v806_v36  ;;  %v841_v23 = vld [vmem:[%s23258_s1 + $0x1950] sm:$0xff] }
 0x47e   :  { %10966 = vmatpush1.bf16.msra.mxu0 %v15216_v58  ;;  %11499 = vmatpush1.bf16.msra.mxu1 %v15218_v42  ;;  %v15267_v58 = vcombine.high %v802_v38, %v806_v36  ;;  %v809_v42 = vld [vmem:[%s23258_s1 + $0x1850] sm:$0xff] }
 0x47f   :  { %10967 = vmatprep.subr.bf16.mxu0 %v15225_v45  ;;  %11500 = vmatprep.subr.bf16.mxu1 %v15227_v34  ;;  %v813_v45 = vld [vmem:[%s23258_s1 + $0x1870] sm:$0xff]  ;;  %v810_v34 = vld [vmem:[%s23258_s1 + $0x1858] sm:$0xff] }
 0x480   :  { %v15273_v50 = vcombine.high %v809_v42, %v813_v45  ;;  %v15272_v61 = vcombine.low %v809_v42, %v813_v45  ;;  %v15274_v0 = vcombine.low %v810_v34, %v814_v48  ;;  %v849_v36 = vld [vmem:[%s23258_s1 + $0x1990] sm:$0xff] }
 0x482   :  { %10968 = vmatpush1.bf16.msra.mxu0 %v15224_v4  ;;  %11501 = vmatpush1.bf16.msra.mxu1 %v15226_v52  ;;  %v15275_v4 = vcombine.high %v810_v34, %v814_v48  ;;  %v817_v52 = vld [vmem:[%s23258_s1 + $0x1890] sm:$0xff] }
 0x483   :  { %10969 = vmatprep.subr.bf16.mxu0 %v15233_v54  ;;  %11502 = vmatprep.subr.bf16.mxu1 %v15235_v55  ;;  %v821_v54 = vld [vmem:[%s23258_s1 + $0x18b0] sm:$0xff]  ;;  %v818_v55 = vld [vmem:[%s23258_s1 + $0x1898] sm:$0xff] }
 0x484   :  { %v15281_v19 = vcombine.high %v817_v52, %v821_v54  ;;  %v15280_v51 = vcombine.low %v817_v52, %v821_v54  ;;  %v15282_v10 = vcombine.low %v818_v55, %v822_v60  ;;  %v857_v48 = vld [vmem:[%s23258_s1 + $0x19d0] sm:$0xff] }
 0x486   :  { %10970 = vmatpush1.bf16.msra.mxu0 %v15232_v28  ;;  %11503 = vmatpush1.bf16.msra.mxu1 %v15234_v44  ;;  %v15283_v28 = vcombine.high %v818_v55, %v822_v60  ;;  %v825_v44 = vld [vmem:[%s23258_s1 + $0x18d0] sm:$0xff] }
 0x487   :  { %10971 = vmatprep.subr.bf16.mxu0 %v15241_v3  ;;  %11504 = vmatprep.subr.bf16.mxu1 %v15243_v9  ;;  %v829_v3 = vld [vmem:[%s23258_s1 + $0x18f0] sm:$0xff]  ;;  %v830_v9 = vld [vmem:[%s23258_s1 + $0x18f8] sm:$0xff] }
 0x488   :  { %v15289_v11 = vcombine.high %v825_v44, %v829_v3  ;;  %v865_v60 = vld [vmem:[%s23258_s1 + $0x1a10] sm:$0xff] }
 0x48a   :  { %10972 = vmatpush1.bf16.msra.mxu0 %v15240_v29  ;;  %11505 = vmatpush1.bf16.msra.mxu1 %v15242_v13  ;;  %v833_v29 = vld [vmem:[%s23258_s1 + $0x1910] sm:$0xff] }
 0x48b   :  { %10973 = vmatprep.subr.bf16.mxu0 %v15249_v1  ;;  %11506 = vmatprep.subr.bf16.mxu1 %v15251_v16  ;;  %v837_v13 = vld [vmem:[%s23258_s1 + $0x1930] sm:$0xff]  ;;  %v838_v1 = vld [vmem:[%s23258_s1 + $0x1938] sm:$0xff]  ;;  %v15288_v16 = vcombine.low %v825_v44, %v829_v3 }
 0x48c   :  { %v15297_v18 = vcombine.high %v833_v29, %v837_v13 }
 0x48e   :  { %10974 = vmatpush1.bf16.msra.mxu0 %v15248_v21  ;;  %11507 = vmatpush1.bf16.msra.mxu1 %v15250_v24  ;;  %v845_v21 = vld [vmem:[%s23258_s1 + $0x1970] sm:$0xff]  ;;  %v842_v24 = vld [vmem:[%s23258_s1 + $0x1958] sm:$0xff] }
 0x48f   :  { %10975 = vmatprep.subr.bf16.mxu0 %v15257_v47  ;;  %11508 = vmatprep.subr.bf16.mxu1 %v15259_v27  ;;  %v846_v47 = vld [vmem:[%s23258_s1 + $0x1978] sm:$0xff]  ;;  %v15296_v27 = vcombine.low %v833_v29, %v837_v13  ;;  %v15305_v33 = vcombine.high %v841_v23, %v845_v21 }
 0x490   :  { %v15307_v38 = vcombine.high %v842_v24, %v846_v47  ;;  %v15306_v42 = vcombine.low %v842_v24, %v846_v47  ;;  %v889_v47 = vld [vmem:[%s23258_s1 + $0x1ad0] sm:$0xff] }
 0x492   :  { %10976 = vmatpush1.bf16.msra.mxu0 %v15256_v39  ;;  %11509 = vmatpush1.bf16.msra.mxu1 %v15258_v40  ;;  %v853_v39 = vld [vmem:[%s23258_s1 + $0x19b0] sm:$0xff]  ;;  %v850_v40 = vld [vmem:[%s23258_s1 + $0x1998] sm:$0xff] }
 0x493   :  { %10986 = vmatprep.subr.bf16.mxu0 %v15265_v41  ;;  %11519 = vmatprep.subr.bf16.mxu1 %v15267_v58  ;;  %v854_v41 = vld [vmem:[%s23258_s1 + $0x19b8] sm:$0xff]  ;;  %v15304_v58 = vcombine.low %v841_v23, %v845_v21  ;;  %v15313_v45 = vcombine.high %v849_v36, %v853_v39 }
 0x494   :  { %v15315_v34 = vcombine.high %v850_v40, %v854_v41  ;;  %v15314_v52 = vcombine.low %v850_v40, %v854_v41  ;;  %v897_v41 = vld [vmem:[%s23258_s1 + $0x1b10] sm:$0xff] }
 0x495   :  { %10978 = vmatmul.mubr.bf16.vlgmr.msra.gmra.mrb[4].mxu0 %v18700_v59  ;;  %11511 = vmatmul.mubr.bf16.vlgmr.msra.gmra.mrb[4].mxu1 %v18700_v59  ;;  %v826_v59 = vld [vmem:[%s23258_s1 + $0x18d8] sm:$0xff] }
 0x496   :  { %10987 = vmatpush1.bf16.msra.mxu0 %v15264_v46  ;;  %11520 = vmatpush1.bf16.msra.mxu1 %v15266_v49  ;;  %v15291_v12 = vcombine.high %v826_v59, %v830_v9  ;;  %v15290_v62 = vcombine.low %v826_v59, %v830_v9  ;;  %v861_v46 = vld [vmem:[%s23258_s1 + $0x19f0] sm:$0xff]  ;;  %v858_v49 = vld [vmem:[%s23258_s1 + $0x19d8] sm:$0xff] }
 0x497   :  { %10988 = vmatprep.subr.bf16.mxu0 %v15273_v50  ;;  %11521 = vmatprep.subr.bf16.mxu1 %v15275_v4  ;;  %v862_v50 = vld [vmem:[%s23258_s1 + $0x19f8] sm:$0xff]  ;;  %v15312_v4 = vcombine.low %v849_v36, %v853_v39  ;;  %v15321_v54 = vcombine.high %v857_v48, %v861_v46  ;;  %v873_v9 = vld [vmem:[%s23258_s1 + $0x1a50] sm:$0xff] }
 0x498   :  { %11018 = vmatprep.mubr.bf16.mxu0 %v18715_v37  ;;  %11551 = vmatprep.mubr.bf16.mxu1 %v18715_v37  ;;  %v834_v37 = vld [vmem:[%s23258_s1 + $0x1918] sm:$0xff]  ;;  %v15323_v55 = vcombine.high %v858_v49, %v862_v50  ;;  %v15322_v44 = vcombine.low %v858_v49, %v862_v50  ;;  %v905_v50 = vld [vmem:[%s23258_s1 + $0x1b50] sm:$0xff] }
 0x499   :  { %v15299_v20 = vcombine.high %v834_v37, %v838_v1  ;;  %v15298_v31 = vcombine.low %v834_v37, %v838_v1  ;;  %v881_v1 = vld [vmem:[%s23258_s1 + $0x1a90] sm:$0xff] }
 0x49a   :  { %10989 = vmatpush1.bf16.msra.mxu0 %v15272_v61  ;;  %11522 = vmatpush1.bf16.msra.mxu1 %v15274_v0  ;;  %v869_v61 = vld [vmem:[%s23258_s1 + $0x1a30] sm:$0xff]  ;;  %v866_v0 = vld [vmem:[%s23258_s1 + $0x1a18] sm:$0xff] }
 0x49b   :  { %10990 = vmatprep.subr.bf16.mxu0 %v15281_v19  ;;  %11523 = vmatprep.subr.bf16.mxu1 %v15283_v28  ;;  %v870_v19 = vld [vmem:[%s23258_s1 + $0x1a38] sm:$0xff]  ;;  %v15320_v28 = vcombine.low %v857_v48, %v861_v46  ;;  %v15329_v3 = vcombine.high %v865_v60, %v869_v61 }
 0x49c   :  { %v15331_v59 = vcombine.high %v866_v0, %v870_v19  ;;  %v15330_v29 = vcombine.low %v866_v0, %v870_v19  ;;  %v913_v19 = vld [vmem:[%s23258_s1 + $0x1b90] sm:$0xff] }
 0x49e   :  { %10991 = vmatpush1.bf16.msra.mxu0 %v15280_v51  ;;  %11524 = vmatpush1.bf16.msra.mxu1 %v15282_v10  ;;  %v877_v51 = vld [vmem:[%s23258_s1 + $0x1a70] sm:$0xff]  ;;  %v874_v10 = vld [vmem:[%s23258_s1 + $0x1a58] sm:$0xff] }
 0x49f   :  { %10992 = vmatprep.subr.bf16.mxu0 %v15289_v11  ;;  %11525 = vmatprep.subr.bf16.mxu1 %v15291_v12  ;;  %v878_v11 = vld [vmem:[%s23258_s1 + $0x1a78] sm:$0xff]  ;;  %v15328_v12 = vcombine.low %v865_v60, %v869_v61  ;;  %v15337_v13 = vcombine.high %v873_v9, %v877_v51 }
 0x4a0   :  { %v15339_v37 = vcombine.high %v874_v10, %v878_v11  ;;  %v15338_v23 = vcombine.low %v874_v10, %v878_v11  ;;  %v921_v11 = vld [vmem:[%s23258_s1 + $0x1bd0] sm:$0xff] }
 0x4a2   :  { %10993 = vmatpush1.bf16.msra.mxu0 %v15288_v16  ;;  %11526 = vmatpush1.bf16.msra.mxu1 %v15290_v62  ;;  %v885_v16 = vld [vmem:[%s23258_s1 + $0x1ab0] sm:$0xff]  ;;  %v882_v62 = vld [vmem:[%s23258_s1 + $0x1a98] sm:$0xff] }
 0x4a3   :  { %10994 = vmatprep.subr.bf16.mxu0 %v15297_v18  ;;  %11527 = vmatprep.subr.bf16.mxu1 %v15299_v20  ;;  %v886_v18 = vld [vmem:[%s23258_s1 + $0x1ab8] sm:$0xff]  ;;  %v15336_v20 = vcombine.low %v873_v9, %v877_v51  ;;  %v15345_v21 = vcombine.high %v881_v1, %v885_v16 }
 0x4a4   :  { %v15347_v24 = vcombine.high %v882_v62, %v886_v18  ;;  %v15346_v36 = vcombine.low %v882_v62, %v886_v18  ;;  %v929_v18 = vld [vmem:[%s23258_s1 + $0x1c10] sm:$0xff] }
 0x4a6   :  { %10995 = vmatpush1.bf16.msra.mxu0 %v15296_v27  ;;  %11528 = vmatpush1.bf16.msra.mxu1 %v15298_v31  ;;  %v893_v27 = vld [vmem:[%s23258_s1 + $0x1af0] sm:$0xff]  ;;  %v890_v31 = vld [vmem:[%s23258_s1 + $0x1ad8] sm:$0xff] }
 0x4a7   :  { %10996 = vmatprep.subr.bf16.mxu0 %v15305_v33  ;;  %11529 = vmatprep.subr.bf16.mxu1 %v15307_v38  ;;  %v894_v33 = vld [vmem:[%s23258_s1 + $0x1af8] sm:$0xff]  ;;  %v15344_v38 = vcombine.low %v881_v1, %v885_v16  ;;  %v15353_v39 = vcombine.high %v889_v47, %v893_v27 }
 0x4a8   :  { %v15355_v40 = vcombine.high %v890_v31, %v894_v33  ;;  %v15354_v48 = vcombine.low %v890_v31, %v894_v33  ;;  %v937_v33 = vld [vmem:[%s23258_s1 + $0x1c50] sm:$0xff] }
 0x4aa   :  { %10997 = vmatpush1.bf16.msra.mxu0 %v15304_v58  ;;  %11530 = vmatpush1.bf16.msra.mxu1 %v15306_v42  ;;  %v901_v58 = vld [vmem:[%s23258_s1 + $0x1b30] sm:$0xff]  ;;  %v898_v42 = vld [vmem:[%s23258_s1 + $0x1b18] sm:$0xff] }
 0x4ab   :  { %10998 = vmatprep.subr.bf16.mxu0 %v15313_v45  ;;  %11531 = vmatprep.subr.bf16.mxu1 %v15315_v34  ;;  %v902_v45 = vld [vmem:[%s23258_s1 + $0x1b38] sm:$0xff]  ;;  %v15352_v34 = vcombine.low %v889_v47, %v893_v27  ;;  %v15361_v46 = vcombine.high %v897_v41, %v901_v58 }
 0x4ac   :  { %v15363_v49 = vcombine.high %v898_v42, %v902_v45  ;;  %v15362_v60 = vcombine.low %v898_v42, %v902_v45  ;;  %v945_v45 = vld [vmem:[%s23258_s1 + $0x1c90] sm:$0xff] }
 0x4ae   :  { %10999 = vmatpush1.bf16.msra.mxu0 %v15312_v4  ;;  %11532 = vmatpush1.bf16.msra.mxu1 %v15314_v52  ;;  %v909_v4 = vld [vmem:[%s23258_s1 + $0x1b70] sm:$0xff]  ;;  %v906_v52 = vld [vmem:[%s23258_s1 + $0x1b58] sm:$0xff] }
 0x4af   :  { %11000 = vmatprep.subr.bf16.mxu0 %v15321_v54  ;;  %11533 = vmatprep.subr.bf16.mxu1 %v15323_v55  ;;  %v910_v54 = vld [vmem:[%s23258_s1 + $0x1b78] sm:$0xff]  ;;  %v15360_v55 = vcombine.low %v897_v41, %v901_v58  ;;  %v15369_v61 = vcombine.high %v905_v50, %v909_v4 }
 0x4b0   :  { %v15371_v0 = vcombine.high %v906_v52, %v910_v54  ;;  %v15370_v9 = vcombine.low %v906_v52, %v910_v54  ;;  %v953_v54 = vld [vmem:[%s23258_s1 + $0x1cd0] sm:$0xff] }
 0x4b2   :  { %11001 = vmatpush1.bf16.msra.mxu0 %v15320_v28  ;;  %11534 = vmatpush1.bf16.msra.mxu1 %v15322_v44  ;;  %v917_v28 = vld [vmem:[%s23258_s1 + $0x1bb0] sm:$0xff]  ;;  %v914_v44 = vld [vmem:[%s23258_s1 + $0x1b98] sm:$0xff] }
 0x4b3   :  { %11002 = vmatprep.subr.bf16.mxu0 %v15329_v3  ;;  %11535 = vmatprep.subr.bf16.mxu1 %v15331_v59  ;;  %v918_v3 = vld [vmem:[%s23258_s1 + $0x1bb8] sm:$0xff]  ;;  %v15368_v59 = vcombine.low %v905_v50, %v909_v4  ;;  %v15377_v51 = vcombine.high %v913_v19, %v917_v28 }
 0x4b4   :  { %v15379_v10 = vcombine.high %v914_v44, %v918_v3  ;;  %v15378_v1 = vcombine.low %v914_v44, %v918_v3  ;;  %v961_v44 = vld [vmem:[%s23258_s1 + $0x1d10] sm:$0xff] }
 0x4b5   :  { %v965_v3 = vld [vmem:[%s23258_s1 + $0x1d30] sm:$0xff] }
 0x4b6   :  { %11003 = vmatpush1.bf16.msra.mxu0 %v15328_v12  ;;  %11536 = vmatpush1.bf16.msra.mxu1 %v15330_v29  ;;  %v925_v12 = vld [vmem:[%s23258_s1 + $0x1bf0] sm:$0xff]  ;;  %v922_v29 = vld [vmem:[%s23258_s1 + $0x1bd8] sm:$0xff] }
 0x4b7   :  { %11004 = vmatprep.subr.bf16.mxu0 %v15337_v13  ;;  %11537 = vmatprep.subr.bf16.mxu1 %v15339_v37  ;;  %v926_v13 = vld [vmem:[%s23258_s1 + $0x1bf8] sm:$0xff]  ;;  %v15376_v37 = vcombine.low %v913_v19, %v917_v28  ;;  %v15385_v16 = vcombine.high %v921_v11, %v925_v12 }
 0x4b8   :  { %v15387_v62 = vcombine.high %v922_v29, %v926_v13  ;;  %v15386_v47 = vcombine.low %v922_v29, %v926_v13  ;;  %v973_v29 = vld [vmem:[%s23258_s1 + $0x1d70] sm:$0xff]  ;;  %v970_v13 = vld [vmem:[%s23258_s1 + $0x1d58] sm:$0xff] }
 0x4ba   :  { %11005 = vmatpush1.bf16.msra.mxu0 %v15336_v20  ;;  %11538 = vmatpush1.bf16.msra.mxu1 %v15338_v23  ;;  %v933_v20 = vld [vmem:[%s23258_s1 + $0x1c30] sm:$0xff]  ;;  %v930_v23 = vld [vmem:[%s23258_s1 + $0x1c18] sm:$0xff] }
 0x4bb   :  { %11006 = vmatprep.subr.bf16.mxu0 %v15345_v21  ;;  %11539 = vmatprep.subr.bf16.mxu1 %v15347_v24  ;;  %v934_v21 = vld [vmem:[%s23258_s1 + $0x1c38] sm:$0xff]  ;;  %v15384_v24 = vcombine.low %v921_v11, %v925_v12  ;;  %v15393_v27 = vcombine.high %v929_v18, %v933_v20  ;;  %v969_v12 = vld [vmem:[%s23258_s1 + $0x1d50] sm:$0xff] }
 0x4bc   :  { %v15395_v31 = vcombine.high %v930_v23, %v934_v21  ;;  %v15394_v41 = vcombine.low %v930_v23, %v934_v21  ;;  %v981_v23 = vld [vmem:[%s23258_s1 + $0x1db0] sm:$0xff]  ;;  %v978_v21 = vld [vmem:[%s23258_s1 + $0x1d98] sm:$0xff] }
 0x4be   :  { %11007 = vmatpush1.bf16.msra.mxu0 %v15344_v38  ;;  %11540 = vmatpush1.bf16.msra.mxu1 %v15346_v36  ;;  %v941_v38 = vld [vmem:[%s23258_s1 + $0x1c70] sm:$0xff]  ;;  %v938_v36 = vld [vmem:[%s23258_s1 + $0x1c58] sm:$0xff] }
 0x4bf   :  { %11008 = vmatprep.subr.bf16.mxu0 %v15353_v39  ;;  %11541 = vmatprep.subr.bf16.mxu1 %v15355_v40  ;;  %v942_v39 = vld [vmem:[%s23258_s1 + $0x1c78] sm:$0xff]  ;;  %v15392_v40 = vcombine.low %v929_v18, %v933_v20  ;;  %v15401_v58 = vcombine.high %v937_v33, %v941_v38  ;;  %v977_v20 = vld [vmem:[%s23258_s1 + $0x1d90] sm:$0xff] }
 0x4c0   :  { %v15403_v42 = vcombine.high %v938_v36, %v942_v39  ;;  %v15402_v50 = vcombine.low %v938_v36, %v942_v39  ;;  %v989_v36 = vld [vmem:[%s23258_s1 + $0x1df0] sm:$0xff]  ;;  %v986_v39 = vld [vmem:[%s23258_s1 + $0x1dd8] sm:$0xff] }
 0x4c2   :  { %11009 = vmatpush1.bf16.msra.mxu0 %v15352_v34  ;;  %11542 = vmatpush1.bf16.msra.mxu1 %v15354_v48  ;;  %v949_v34 = vld [vmem:[%s23258_s1 + $0x1cb0] sm:$0xff]  ;;  %v946_v48 = vld [vmem:[%s23258_s1 + $0x1c98] sm:$0xff] }
 0x4c3   :  { %11010 = vmatprep.subr.bf16.mxu0 %v15361_v46  ;;  %11543 = vmatprep.subr.bf16.mxu1 %v15363_v49  ;;  %v950_v46 = vld [vmem:[%s23258_s1 + $0x1cb8] sm:$0xff]  ;;  %v15400_v49 = vcombine.low %v937_v33, %v941_v38  ;;  %v15409_v4 = vcombine.high %v945_v45, %v949_v34  ;;  %v985_v38 = vld [vmem:[%s23258_s1 + $0x1dd0] sm:$0xff] }
 0x4c4   :  { %v15411_v52 = vcombine.high %v946_v48, %v950_v46 }
 0x4c6   :  { %11011 = vmatpush1.bf16.msra.mxu0 %v15360_v55  ;;  %11544 = vmatpush1.bf16.msra.mxu1 %v15362_v60  ;;  %v957_v55 = vld [vmem:[%s23258_s1 + $0x1cf0] sm:$0xff]  ;;  %v958_v60 = vld [vmem:[%s23258_s1 + $0x1cf8] sm:$0xff] }
 0x4c7   :  { %11012 = vmatprep.subr.bf16.mxu0 %v15369_v61  ;;  %11545 = vmatprep.subr.bf16.mxu1 %v15371_v0  ;;  %v15408_v61 = vcombine.low %v945_v45, %v949_v34  ;;  %v15410_v0 = vcombine.low %v946_v48, %v950_v46  ;;  %v15417_v19 = vcombine.high %v953_v54, %v957_v55  ;;  %v993_v34 = vld [vmem:[%s23258_s1 + $0x1e10] sm:$0xff]  ;;  %v994_v46 = vld [vmem:[%s23258_s1 + $0x1e18] sm:$0xff] }
 0x4c8   :  { %v997_v48 = vld [vmem:[%s23258_s1 + $0x1e30] sm:$0xff] }
 0x4ca   :  { %11013 = vmatpush1.bf16.msra.mxu0 %v15368_v59  ;;  %11546 = vmatpush1.bf16.msra.mxu1 %v15370_v9  ;;  %v966_v59 = vld [vmem:[%s23258_s1 + $0x1d38] sm:$0xff]  ;;  %v15416_v9 = vcombine.low %v953_v54, %v957_v55  ;;  %v1001_v55 = vld [vmem:[%s23258_s1 + $0x1e50] sm:$0xff] }
 0x4cb   :  { %11014 = vmatprep.subr.bf16.mxu0 %v15377_v51  ;;  %11547 = vmatprep.subr.bf16.mxu1 %v15379_v10  ;;  %v15425_v10 = vcombine.high %v961_v44, %v965_v3 }
 0x4ce   :  { %11015 = vmatpush1.bf16.msra.mxu0 %v15376_v37  ;;  %11548 = vmatpush1.bf16.msra.mxu1 %v15378_v1  ;;  %v974_v37 = vld [vmem:[%s23258_s1 + $0x1d78] sm:$0xff]  ;;  %v15424_v1 = vcombine.low %v961_v44, %v965_v3  ;;  %v1009_v3 = vld [vmem:[%s23258_s1 + $0x1e90] sm:$0xff] }
 0x4cf   :  { %11016 = vmatprep.subr.bf16.mxu0 %v15385_v16  ;;  %11549 = vmatprep.subr.bf16.mxu1 %v15387_v62  ;;  %v15433_v62 = vcombine.high %v969_v12, %v973_v29  ;;  %v15435_v18 = vcombine.high %v970_v13, %v974_v37 }
 0x4d2   :  { %11017 = vmatpush1.bf16.msra.mxu0 %v15384_v24  ;;  %11550 = vmatpush1.bf16.msra.mxu1 %v15386_v47  ;;  %v982_v24 = vld [vmem:[%s23258_s1 + $0x1db8] sm:$0xff]  ;;  %v15432_v47 = vcombine.low %v969_v12, %v973_v29  ;;  %v1017_v29 = vld [vmem:[%s23258_s1 + $0x1ed0] sm:$0xff] }
 0x4d3   :  { %11027 = vmatprep.subr.bf16.mxu0 %v15393_v27  ;;  %11560 = vmatprep.subr.bf16.mxu1 %v15395_v31  ;;  %v15434_v27 = vcombine.low %v970_v13, %v974_v37  ;;  %v15441_v31 = vcombine.high %v977_v20, %v981_v23  ;;  %v15443_v33 = vcombine.high %v978_v21, %v982_v24  ;;  %v1021_v13 = vld [vmem:[%s23258_s1 + $0x1ef0] sm:$0xff]  ;;  %v1018_v37 = vld [vmem:[%s23258_s1 + $0x1ed8] sm:$0xff] }
 0x4d5   :  { %11019 = vmatmul.mubr.bf16.vlgmr.msra.gmra.mrb[4].mxu0 %v18903_v7  ;;  %11552 = vmatmul.mubr.bf16.vlgmr.msra.gmra.mrb[4].mxu1 %v18903_v7  ;;  %v954_v7 = vld [vmem:[%s23258_s1 + $0x1cd8] sm:$0xff] }
 0x4d6   :  { %11028 = vmatpush1.bf16.msra.mxu0 %v15392_v40  ;;  %11561 = vmatpush1.bf16.msra.mxu1 %v15394_v41  ;;  %v15419_v28 = vcombine.high %v954_v7, %v958_v60  ;;  %v15418_v51 = vcombine.low %v954_v7, %v958_v60  ;;  %v990_v40 = vld [vmem:[%s23258_s1 + $0x1df8] sm:$0xff]  ;;  %v15440_v41 = vcombine.low %v977_v20, %v981_v23  ;;  %v1005_v7 = vld [vmem:[%s23258_s1 + $0x1e70] sm:$0xff] }
 0x4d7   :  { %11029 = vmatprep.subr.bf16.mxu0 %v15401_v58  ;;  %11562 = vmatprep.subr.bf16.mxu1 %v15403_v42  ;;  %v15442_v58 = vcombine.low %v978_v21, %v982_v24  ;;  %v15449_v42 = vcombine.high %v985_v38, %v989_v36  ;;  %v15451_v45 = vcombine.high %v986_v39, %v990_v40  ;;  %v1002_v60 = vld [vmem:[%s23258_s1 + $0x1e58] sm:$0xff]  ;;  %v1025_v23 = vld [vmem:[%s23258_s1 + $0x1f10] sm:$0xff] }
 0x4d8   :  { %11059 = vmatprep.mubr.bf16.mxu0 %v18919_v17  ;;  %11592 = vmatprep.mubr.bf16.mxu1 %v18919_v17  ;;  %v962_v17 = vld [vmem:[%s23258_s1 + $0x1d18] sm:$0xff]  ;;  %v1029_v21 = vld [vmem:[%s23258_s1 + $0x1f30] sm:$0xff] }
 0x4d9   :  { %v15427_v11 = vcombine.high %v962_v17, %v966_v59  ;;  %v15426_v16 = vcombine.low %v962_v17, %v966_v59  ;;  %v1013_v17 = vld [vmem:[%s23258_s1 + $0x1eb0] sm:$0xff]  ;;  %v1010_v59 = vld [vmem:[%s23258_s1 + $0x1e98] sm:$0xff] }
 0x4da   :  { %11030 = vmatpush1.bf16.msra.mxu0 %v15400_v49  ;;  %11563 = vmatpush1.bf16.msra.mxu1 %v15402_v50  ;;  %v998_v49 = vld [vmem:[%s23258_s1 + $0x1e38] sm:$0xff]  ;;  %v15448_v50 = vcombine.low %v985_v38, %v989_v36  ;;  %v1033_v36 = vld [vmem:[%s23258_s1 + $0x1f50] sm:$0xff] }
 0x4db   :  { %11031 = vmatprep.subr.bf16.mxu0 %v15409_v4  ;;  %11564 = vmatprep.subr.bf16.mxu1 %v15411_v52  ;;  %v15450_v4 = vcombine.low %v986_v39, %v990_v40  ;;  %v15457_v52 = vcombine.high %v993_v34, %v997_v48  ;;  %v15459_v54 = vcombine.high %v994_v46, %v998_v49  ;;  %v1026_v24 = vld [vmem:[%s23258_s1 + $0x1f18] sm:$0xff]  ;;  %v1037_v39 = vld [vmem:[%s23258_s1 + $0x1f70] sm:$0xff] }
 0x4dc   :  { %v1034_v40 = vld [vmem:[%s23258_s1 + $0x1f58] sm:$0xff] }
 0x4de   :  { %11032 = vmatpush1.bf16.msra.mxu0 %v15408_v61  ;;  %11565 = vmatpush1.bf16.msra.mxu1 %v15410_v0  ;;  %v1006_v61 = vld [vmem:[%s23258_s1 + $0x1e78] sm:$0xff]  ;;  %v15456_v0 = vcombine.low %v993_v34, %v997_v48  ;;  %v1041_v48 = vld [vmem:[%s23258_s1 + $0x1f90] sm:$0xff] }
 0x4df   :  { %11033 = vmatprep.subr.bf16.mxu0 %v15417_v19  ;;  %11566 = vmatprep.subr.bf16.mxu1 %v15419_v28  ;;  %v15458_v19 = vcombine.low %v994_v46, %v998_v49  ;;  %v15465_v28 = vcombine.high %v1001_v55, %v1005_v7  ;;  %v15467_v44 = vcombine.high %v1002_v60, %v1006_v61  ;;  %v1045_v46 = vld [vmem:[%s23258_s1 + $0x1fb0] sm:$0xff]  ;;  %v1042_v49 = vld [vmem:[%s23258_s1 + $0x1f98] sm:$0xff] }
 0x4e2   :  { %11034 = vmatpush1.bf16.msra.mxu0 %v15416_v9  ;;  %11567 = vmatpush1.bf16.msra.mxu1 %v15418_v51  ;;  %v1014_v9 = vld [vmem:[%s23258_s1 + $0x1eb8] sm:$0xff]  ;;  %v15464_v51 = vcombine.low %v1001_v55, %v1005_v7  ;;  %v1049_v7 = vld [vmem:[%s23258_s1 + $0x1fd0] sm:$0xff] }
 0x4e3   :  { %11035 = vmatprep.subr.bf16.mxu0 %v15425_v10  ;;  %11568 = vmatprep.subr.bf16.mxu1 %v15427_v11  ;;  %v15466_v10 = vcombine.low %v1002_v60, %v1006_v61  ;;  %v15473_v11 = vcombine.high %v1009_v3, %v1013_v17  ;;  %v15475_v12 = vcombine.high %v1010_v59, %v1014_v9  ;;  %v1053_v60 = vld [vmem:[%s23258_s1 + $0x1ff0] sm:$0xff]  ;;  %v1050_v61 = vld [vmem:[%s23258_s1 + $0x1fd8] sm:$0xff] }
 0x4e6   :  { %11036 = vmatpush1.bf16.msra.mxu0 %v15424_v1  ;;  %11569 = vmatpush1.bf16.msra.mxu1 %v15426_v16  ;;  %v1022_v1 = vld [vmem:[%s23258_s1 + $0x1ef8] sm:$0xff]  ;;  %v15472_v16 = vcombine.low %v1009_v3, %v1013_v17  ;;  %v1057_v17 = vld [vmem:[%s23258_s1 + $0x2010] sm:$0xff] }
 0x4e7   :  { %11037 = vmatprep.subr.bf16.mxu0 %v15433_v62  ;;  %11570 = vmatprep.subr.bf16.mxu1 %v15435_v18  ;;  %v15474_v62 = vcombine.low %v1010_v59, %v1014_v9  ;;  %v15481_v18 = vcombine.high %v1017_v29, %v1021_v13  ;;  %v15483_v20 = vcombine.high %v1018_v37, %v1022_v1  ;;  %v1061_v59 = vld [vmem:[%s23258_s1 + $0x2030] sm:$0xff]  ;;  %v1058_v9 = vld [vmem:[%s23258_s1 + $0x2018] sm:$0xff] }
 0x4ea   :  { %11038 = vmatpush1.bf16.msra.mxu0 %v15432_v47  ;;  %11571 = vmatpush1.bf16.msra.mxu1 %v15434_v27  ;;  %v1030_v47 = vld [vmem:[%s23258_s1 + $0x1f38] sm:$0xff]  ;;  %v15480_v27 = vcombine.low %v1017_v29, %v1021_v13  ;;  %v1065_v13 = vld [vmem:[%s23258_s1 + $0x2050] sm:$0xff] }
 0x4eb   :  { %11039 = vmatprep.subr.bf16.mxu0 %v15441_v31  ;;  %11572 = vmatprep.subr.bf16.mxu1 %v15443_v33  ;;  %v15482_v31 = vcombine.low %v1018_v37, %v1022_v1  ;;  %v15489_v33 = vcombine.high %v1025_v23, %v1029_v21  ;;  %v15491_v38 = vcombine.high %v1026_v24, %v1030_v47  ;;  %v1069_v37 = vld [vmem:[%s23258_s1 + $0x2070] sm:$0xff]  ;;  %v1066_v1 = vld [vmem:[%s23258_s1 + $0x2058] sm:$0xff] }
 0x4ee   :  { %11040 = vmatpush1.bf16.msra.mxu0 %v15440_v41  ;;  %11573 = vmatpush1.bf16.msra.mxu1 %v15442_v58  ;;  %v1038_v41 = vld [vmem:[%s23258_s1 + $0x1f78] sm:$0xff]  ;;  %v15488_v58 = vcombine.low %v1025_v23, %v1029_v21  ;;  %v1073_v21 = vld [vmem:[%s23258_s1 + $0x2090] sm:$0xff] }
 0x4ef   :  { %11041 = vmatprep.subr.bf16.mxu0 %v15449_v42  ;;  %11574 = vmatprep.subr.bf16.mxu1 %v15451_v45  ;;  %v15490_v42 = vcombine.low %v1026_v24, %v1030_v47  ;;  %v15497_v45 = vcombine.high %v1033_v36, %v1037_v39  ;;  %v15499_v34 = vcombine.high %v1034_v40, %v1038_v41  ;;  %v1077_v24 = vld [vmem:[%s23258_s1 + $0x20b0] sm:$0xff]  ;;  %v1074_v47 = vld [vmem:[%s23258_s1 + $0x2098] sm:$0xff] }
 0x4f2   :  { %11042 = vmatpush1.bf16.msra.mxu0 %v15448_v50  ;;  %11575 = vmatpush1.bf16.msra.mxu1 %v15450_v4  ;;  %v1046_v50 = vld [vmem:[%s23258_s1 + $0x1fb8] sm:$0xff]  ;;  %v15496_v4 = vcombine.low %v1033_v36, %v1037_v39  ;;  %v1081_v39 = vld [vmem:[%s23258_s1 + $0x20d0] sm:$0xff] }
 0x4f3   :  { %11043 = vmatprep.subr.bf16.mxu0 %v15457_v52  ;;  %11576 = vmatprep.subr.bf16.mxu1 %v15459_v54  ;;  %v15498_v52 = vcombine.low %v1034_v40, %v1038_v41  ;;  %v15505_v54 = vcombine.high %v1041_v48, %v1045_v46  ;;  %v15507_v55 = vcombine.high %v1042_v49, %v1046_v50  ;;  %v1085_v40 = vld [vmem:[%s23258_s1 + $0x20f0] sm:$0xff]  ;;  %v1086_v41 = vld [vmem:[%s23258_s1 + $0x20f8] sm:$0xff] }
 0x4f6   :  { %11044 = vmatpush1.bf16.msra.mxu0 %v15456_v0  ;;  %11577 = vmatpush1.bf16.msra.mxu1 %v15458_v19  ;;  %v1054_v0 = vld [vmem:[%s23258_s1 + $0x1ff8] sm:$0xff]  ;;  %v15504_v19 = vcombine.low %v1041_v48, %v1045_v46  ;;  %v1089_v48 = vld [vmem:[%s23258_s1 + $0x2110] sm:$0xff] }
 0x4f7   :  { %11045 = vmatprep.subr.bf16.mxu0 %v15465_v28  ;;  %11578 = vmatprep.subr.bf16.mxu1 %v15467_v44  ;;  %v15506_v28 = vcombine.low %v1042_v49, %v1046_v50  ;;  %v15513_v44 = vcombine.high %v1049_v7, %v1053_v60  ;;  %v15515_v3 = vcombine.high %v1050_v61, %v1054_v0  ;;  %v1093_v46 = vld [vmem:[%s23258_s1 + $0x2130] sm:$0xff]  ;;  %v1094_v49 = vld [vmem:[%s23258_s1 + $0x2138] sm:$0xff] }
 0x4f8   :  { %v15544_v50 = vcombine.low %v1081_v39, %v1085_v40 }
 0x4fa   :  { %11046 = vmatpush1.bf16.msra.mxu0 %v15464_v51  ;;  %11579 = vmatpush1.bf16.msra.mxu1 %v15466_v10  ;;  %v1062_v51 = vld [vmem:[%s23258_s1 + $0x2038] sm:$0xff]  ;;  %v15512_v10 = vcombine.low %v1049_v7, %v1053_v60  ;;  %v1101_v7 = vld [vmem:[%s23258_s1 + $0x2170] sm:$0xff] }
 0x4fb   :  { %11047 = vmatprep.subr.bf16.mxu0 %v15473_v11  ;;  %11580 = vmatprep.subr.bf16.mxu1 %v15475_v12  ;;  %v15514_v11 = vcombine.low %v1050_v61, %v1054_v0  ;;  %v15521_v12 = vcombine.high %v1057_v17, %v1061_v59  ;;  %v15523_v29 = vcombine.high %v1058_v9, %v1062_v51  ;;  %v1098_v60 = vld [vmem:[%s23258_s1 + $0x2158] sm:$0xff] }
 0x4fc   :  { %v1102_v61 = vld [vmem:[%s23258_s1 + $0x2178] sm:$0xff]  ;;  %v15552_v0 = vcombine.low %v1089_v48, %v1093_v46 }
 0x4fe   :  { %11048 = vmatpush1.bf16.msra.mxu0 %v15472_v16  ;;  %11581 = vmatpush1.bf16.msra.mxu1 %v15474_v62  ;;  %v1070_v16 = vld [vmem:[%s23258_s1 + $0x2078] sm:$0xff]  ;;  %v15520_v62 = vcombine.low %v1057_v17, %v1061_v59  ;;  %v1109_v17 = vld [vmem:[%s23258_s1 + $0x21b0] sm:$0xff] }
 0x4ff   :  { %11049 = vmatprep.subr.bf16.mxu0 %v15481_v18  ;;  %11582 = vmatprep.subr.bf16.mxu1 %v15483_v20  ;;  %v15522_v18 = vcombine.low %v1058_v9, %v1062_v51  ;;  %v15529_v20 = vcombine.high %v1065_v13, %v1069_v37  ;;  %v15531_v23 = vcombine.high %v1066_v1, %v1070_v16  ;;  %v1106_v59 = vld [vmem:[%s23258_s1 + $0x2198] sm:$0xff] }
 0x500   :  { %v1110_v9 = vld [vmem:[%s23258_s1 + $0x21b8] sm:$0xff] }
 0x502   :  { %11050 = vmatpush1.bf16.msra.mxu0 %v15480_v27  ;;  %11583 = vmatpush1.bf16.msra.mxu1 %v15482_v31  ;;  %v1078_v27 = vld [vmem:[%s23258_s1 + $0x20b8] sm:$0xff]  ;;  %v15528_v31 = vcombine.low %v1065_v13, %v1069_v37  ;;  %v1117_v13 = vld [vmem:[%s23258_s1 + $0x21f0] sm:$0xff] }
 0x503   :  { %11051 = vmatprep.subr.bf16.mxu0 %v15489_v33  ;;  %11584 = vmatprep.subr.bf16.mxu1 %v15491_v38  ;;  %v15530_v33 = vcombine.low %v1066_v1, %v1070_v16  ;;  %v15537_v38 = vcombine.high %v1073_v21, %v1077_v24  ;;  %v15539_v36 = vcombine.high %v1074_v47, %v1078_v27  ;;  %v1114_v37 = vld [vmem:[%s23258_s1 + $0x21d8] sm:$0xff] }
 0x504   :  { %v1118_v1 = vld [vmem:[%s23258_s1 + $0x21f8] sm:$0xff] }
 0x506   :  { %11052 = vmatpush1.bf16.msra.mxu0 %v15488_v58  ;;  %11585 = vmatpush1.bf16.msra.mxu1 %v15490_v42  ;;  %v15536_v58 = vcombine.low %v1073_v21, %v1077_v24  ;;  %v15538_v42 = vcombine.low %v1074_v47, %v1078_v27  ;;  %v1125_v21 = vld [vmem:[%s23258_s1 + $0x2230] sm:$0xff]  ;;  %v1122_v24 = vld [vmem:[%s23258_s1 + $0x2218] sm:$0xff] }
 0x507   :  { %11053 = vmatprep.subr.bf16.mxu0 %v15497_v45  ;;  %11586 = vmatprep.subr.bf16.mxu1 %v15499_v34  ;;  %v15545_v45 = vcombine.high %v1081_v39, %v1085_v40  ;;  %v1126_v47 = vld [vmem:[%s23258_s1 + $0x2238] sm:$0xff]  ;;  %v1133_v39 = vld [vmem:[%s23258_s1 + $0x2270] sm:$0xff] }
 0x508   :  { %v1130_v40 = vld [vmem:[%s23258_s1 + $0x2258] sm:$0xff] }
 0x50a   :  { %11054 = vmatpush1.bf16.msra.mxu0 %v15496_v4  ;;  %11587 = vmatpush1.bf16.msra.mxu1 %v15498_v52  ;;  %v15553_v52 = vcombine.high %v1089_v48, %v1093_v46  ;;  %v1141_v48 = vld [vmem:[%s23258_s1 + $0x22b0] sm:$0xff]  ;;  %v1138_v46 = vld [vmem:[%s23258_s1 + $0x2298] sm:$0xff] }
 0x50b   :  { %11055 = vmatprep.subr.bf16.mxu0 %v15505_v54  ;;  %11588 = vmatprep.subr.bf16.mxu1 %v15507_v55  ;;  %v1097_v55 = vld [vmem:[%s23258_s1 + $0x2150] sm:$0xff] }
 0x50c   :  { %v15560_v51 = vcombine.low %v1097_v55, %v1101_v7 }
 0x50e   :  { %11056 = vmatpush1.bf16.msra.mxu0 %v15504_v19  ;;  %11589 = vmatpush1.bf16.msra.mxu1 %v15506_v28  ;;  %v15561_v28 = vcombine.high %v1097_v55, %v1101_v7  ;;  %v1149_v55 = vld [vmem:[%s23258_s1 + $0x22f0] sm:$0xff]  ;;  %v1146_v7 = vld [vmem:[%s23258_s1 + $0x22d8] sm:$0xff] }
 0x50f   :  { %11057 = vmatprep.subr.bf16.mxu0 %v15513_v44  ;;  %11590 = vmatprep.subr.bf16.mxu1 %v15515_v3  ;;  %v15563_v44 = vcombine.high %v1098_v60, %v1102_v61  ;;  %v1105_v3 = vld [vmem:[%s23258_s1 + $0x2190] sm:$0xff] }
 0x510   :  { %v15568_v16 = vcombine.low %v1105_v3, %v1109_v17 }
 0x512   :  { %11058 = vmatpush1.bf16.msra.mxu0 %v15512_v10  ;;  %11591 = vmatpush1.bf16.msra.mxu1 %v15514_v11  ;;  %v15562_v10 = vcombine.low %v1098_v60, %v1102_v61  ;;  %v15569_v11 = vcombine.high %v1105_v3, %v1109_v17  ;;  %v1150_v60 = vld [vmem:[%s23258_s1 + $0x22f8] sm:$0xff]  ;;  %v1157_v3 = vld [vmem:[%s23258_s1 + $0x2330] sm:$0xff] }
 0x513   :  { %11068 = vmatprep.subr.bf16.mxu0 %v15521_v12  ;;  %11601 = vmatprep.subr.bf16.mxu1 %v15523_v29  ;;  %v15571_v12 = vcombine.high %v1106_v59, %v1110_v9  ;;  %v1113_v29 = vld [vmem:[%s23258_s1 + $0x21d0] sm:$0xff]  ;;  %v1154_v17 = vld [vmem:[%s23258_s1 + $0x2318] sm:$0xff] }
 0x514   :  { %v15576_v27 = vcombine.low %v1113_v29, %v1117_v13 }
 0x515   :  { %11060 = vmatmul.mubr.bf16.vlgmr.msra.gmra.mrb[4].mxu0 %v19118_v57  ;;  %11593 = vmatmul.mubr.bf16.vlgmr.msra.gmra.mrb[4].mxu1 %v19118_v57  ;;  %v1082_v57 = vld [vmem:[%s23258_s1 + $0x20d8] sm:$0xff] }
 0x516   :  { %11069 = vmatpush1.bf16.msra.mxu0 %v15520_v62  ;;  %11602 = vmatpush1.bf16.msra.mxu1 %v15522_v18  ;;  %v15547_v34 = vcombine.high %v1082_v57, %v1086_v41  ;;  %v15546_v4 = vcombine.low %v1082_v57, %v1086_v41  ;;  %v15570_v62 = vcombine.low %v1106_v59, %v1110_v9  ;;  %v1134_v57 = vld [vmem:[%s23258_s1 + $0x2278] sm:$0xff] }
 0x517   :  { %11070 = vmatprep.subr.bf16.mxu0 %v15529_v20  ;;  %11603 = vmatprep.subr.bf16.mxu1 %v15531_v23  ;;  %v15577_v18 = vcombine.high %v1113_v29, %v1117_v13  ;;  %v15579_v20 = vcombine.high %v1114_v37, %v1118_v1  ;;  %v1121_v23 = vld [vmem:[%s23258_s1 + $0x2210] sm:$0xff]  ;;  %v1158_v59 = vld [vmem:[%s23258_s1 + $0x2338] sm:$0xff] }
 0x518   :  { %11100 = vmatprep.mubr.bf16.mxu0 %v19133_v6  ;;  %11633 = vmatprep.mubr.bf16.mxu1 %v19133_v6  ;;  %v1090_v6 = vld [vmem:[%s23258_s1 + $0x2118] sm:$0xff]  ;;  %v15584_v41 = vcombine.low %v1121_v23, %v1125_v21  ;;  %v1165_v29 = vld [vmem:[%s23258_s1 + $0x2370] sm:$0xff] }
 0x519   :  { %v15555_v54 = vcombine.high %v1090_v6, %v1094_v49  ;;  %v15554_v19 = vcombine.low %v1090_v6, %v1094_v49  ;;  %v1142_v6 = vld [vmem:[%s23258_s1 + $0x22b8] sm:$0xff] }
 0x51a   :  { %11071 = vmatpush1.bf16.msra.mxu0 %v15528_v31  ;;  %11604 = vmatpush1.bf16.msra.mxu1 %v15530_v33  ;;  %v15578_v31 = vcombine.low %v1114_v37, %v1118_v1  ;;  %v15585_v33 = vcombine.high %v1121_v23, %v1125_v21  ;;  %v1162_v13 = vld [vmem:[%s23258_s1 + $0x2358] sm:$0xff]  ;;  %v1173_v23 = vld [vmem:[%s23258_s1 + $0x23b0] sm:$0xff] }
 0x51b   :  { %11072 = vmatprep.subr.bf16.mxu0 %v15537_v38  ;;  %11605 = vmatprep.subr.bf16.mxu1 %v15539_v36  ;;  %v15587_v38 = vcombine.high %v1122_v24, %v1126_v47  ;;  %v1129_v36 = vld [vmem:[%s23258_s1 + $0x2250] sm:$0xff]  ;;  %v1166_v37 = vld [vmem:[%s23258_s1 + $0x2378] sm:$0xff] }
 0x51c   :  { %v15592_v49 = vcombine.low %v1129_v36, %v1133_v39  ;;  %v1170_v21 = vld [vmem:[%s23258_s1 + $0x2398] sm:$0xff] }
 0x51e   :  { %11073 = vmatpush1.bf16.msra.mxu0 %v15536_v58  ;;  %11606 = vmatpush1.bf16.msra.mxu1 %v15538_v42  ;;  %v15586_v58 = vcombine.low %v1122_v24, %v1126_v47  ;;  %v15593_v42 = vcombine.high %v1129_v36, %v1133_v39  ;;  %v1174_v24 = vld [vmem:[%s23258_s1 + $0x23b8] sm:$0xff]  ;;  %v1181_v36 = vld [vmem:[%s23258_s1 + $0x23f0] sm:$0xff] }
 0x51f   :  { %11074 = vmatprep.subr.bf16.mxu0 %v15545_v45  ;;  %11607 = vmatprep.subr.bf16.mxu1 %v15547_v34  ;;  %v15595_v45 = vcombine.high %v1130_v40, %v1134_v57  ;;  %v1137_v34 = vld [vmem:[%s23258_s1 + $0x2290] sm:$0xff]  ;;  %v1178_v39 = vld [vmem:[%s23258_s1 + $0x23d8] sm:$0xff] }
 0x520   :  { %v15600_v61 = vcombine.low %v1137_v34, %v1141_v48 }
 0x522   :  { %11075 = vmatpush1.bf16.msra.mxu0 %v15544_v50  ;;  %11608 = vmatpush1.bf16.msra.mxu1 %v15546_v4  ;;  %v15594_v50 = vcombine.low %v1130_v40, %v1134_v57  ;;  %v15601_v4 = vcombine.high %v1137_v34, %v1141_v48  ;;  %v1182_v40 = vld [vmem:[%s23258_s1 + $0x23f8] sm:$0xff]  ;;  %v1189_v34 = vld [vmem:[%s23258_s1 + $0x2430] sm:$0xff] }
 0x523   :  { %11076 = vmatprep.subr.bf16.mxu0 %v15553_v52  ;;  %11609 = vmatprep.subr.bf16.mxu1 %v15555_v54  ;;  %v15603_v52 = vcombine.high %v1138_v46, %v1142_v6  ;;  %v1145_v54 = vld [vmem:[%s23258_s1 + $0x22d0] sm:$0xff]  ;;  %v1186_v48 = vld [vmem:[%s23258_s1 + $0x2418] sm:$0xff] }
 0x524   :  { %v15608_v9 = vcombine.low %v1145_v54, %v1149_v55 }
 0x526   :  { %11077 = vmatpush1.bf16.msra.mxu0 %v15552_v0  ;;  %11610 = vmatpush1.bf16.msra.mxu1 %v15554_v19  ;;  %v15602_v0 = vcombine.low %v1138_v46, %v1142_v6  ;;  %v15609_v19 = vcombine.high %v1145_v54, %v1149_v55  ;;  %v1190_v46 = vld [vmem:[%s23258_s1 + $0x2438] sm:$0xff]  ;;  %v1197_v54 = vld [vmem:[%s23258_s1 + $0x2470] sm:$0xff] }
 0x527   :  { %11078 = vmatprep.subr.bf16.mxu0 %v15561_v28  ;;  %11611 = vmatprep.subr.bf16.mxu1 %v15563_v44  ;;  %v15611_v28 = vcombine.high %v1146_v7, %v1150_v60  ;;  %v1153_v44 = vld [vmem:[%s23258_s1 + $0x2310] sm:$0xff]  ;;  %v1194_v55 = vld [vmem:[%s23258_s1 + $0x2458] sm:$0xff] }
 0x528   :  { %v15616_v1 = vcombine.low %v1153_v44, %v1157_v3 }
 0x52a   :  { %11079 = vmatpush1.bf16.msra.mxu0 %v15560_v51  ;;  %11612 = vmatpush1.bf16.msra.mxu1 %v15562_v10  ;;  %v15610_v51 = vcombine.low %v1146_v7, %v1150_v60  ;;  %v15617_v10 = vcombine.high %v1153_v44, %v1157_v3  ;;  %v1198_v7 = vld [vmem:[%s23258_s1 + $0x2478] sm:$0xff]  ;;  %v1205_v44 = vld [vmem:[%s23258_s1 + $0x24b0] sm:$0xff] }
 0x52b   :  { %11080 = vmatprep.subr.bf16.mxu0 %v15569_v11  ;;  %11613 = vmatprep.subr.bf16.mxu1 %v15571_v12  ;;  %v15619_v11 = vcombine.high %v1154_v17, %v1158_v59  ;;  %v1161_v12 = vld [vmem:[%s23258_s1 + $0x2350] sm:$0xff]  ;;  %v1202_v3 = vld [vmem:[%s23258_s1 + $0x2498] sm:$0xff] }
 0x52c   :  { %v15624_v47 = vcombine.low %v1161_v12, %v1165_v29 }
 0x52e   :  { %11081 = vmatpush1.bf16.msra.mxu0 %v15568_v16  ;;  %11614 = vmatpush1.bf16.msra.mxu1 %v15570_v62  ;;  %v15618_v16 = vcombine.low %v1154_v17, %v1158_v59  ;;  %v15625_v62 = vcombine.high %v1161_v12, %v1165_v29  ;;  %v1206_v17 = vld [vmem:[%s23258_s1 + $0x24b8] sm:$0xff]  ;;  %v1213_v12 = vld [vmem:[%s23258_s1 + $0x24f0] sm:$0xff] }
 0x52f   :  { %11082 = vmatprep.subr.bf16.mxu0 %v15577_v18  ;;  %11615 = vmatprep.subr.bf16.mxu1 %v15579_v20  ;;  %v15627_v18 = vcombine.high %v1162_v13, %v1166_v37  ;;  %v1169_v20 = vld [vmem:[%s23258_s1 + $0x2390] sm:$0xff]  ;;  %v1214_v29 = vld [vmem:[%s23258_s1 + $0x24f8] sm:$0xff] }
 0x530   :  { %v15632_v57 = vcombine.low %v1169_v20, %v1173_v23 }
 0x532   :  { %11083 = vmatpush1.bf16.msra.mxu0 %v15576_v27  ;;  %11616 = vmatpush1.bf16.msra.mxu1 %v15578_v31  ;;  %v15626_v27 = vcombine.low %v1162_v13, %v1166_v37  ;;  %v15633_v31 = vcombine.high %v1169_v20, %v1173_v23  ;;  %v15666_v37 = vcombine.low %v1202_v3, %v1206_v17  ;;  %v1222_v20 = vld [vmem:[%s23258_s1 + $0x2538] sm:$0xff] }
 0x533   :  { %11084 = vmatprep.subr.bf16.mxu0 %v15585_v33  ;;  %11617 = vmatprep.subr.bf16.mxu1 %v15587_v38  ;;  %v15635_v33 = vcombine.high %v1170_v21, %v1174_v24  ;;  %v1177_v38 = vld [vmem:[%s23258_s1 + $0x23d0] sm:$0xff] }
 0x534   :  { %v15640_v6 = vcombine.low %v1177_v38, %v1181_v36 }
 0x536   :  { %11085 = vmatpush1.bf16.msra.mxu0 %v15584_v41  ;;  %11618 = vmatpush1.bf16.msra.mxu1 %v15586_v58  ;;  %v15634_v41 = vcombine.low %v1170_v21, %v1174_v24  ;;  %v15641_v58 = vcombine.high %v1177_v38, %v1181_v36  ;;  %v1230_v38 = vld [vmem:[%s23258_s1 + $0x2578] sm:$0xff] }
 0x537   :  { %11086 = vmatprep.subr.bf16.mxu0 %v15593_v42  ;;  %11619 = vmatprep.subr.bf16.mxu1 %v15595_v45  ;;  %v15643_v42 = vcombine.high %v1178_v39, %v1182_v40  ;;  %v1185_v45 = vld [vmem:[%s23258_s1 + $0x2410] sm:$0xff] }
 0x538   :  { %v15648_v60 = vcombine.low %v1185_v45, %v1189_v34 }
 0x53a   :  { %11087 = vmatpush1.bf16.msra.mxu0 %v15592_v49  ;;  %11620 = vmatpush1.bf16.msra.mxu1 %v15594_v50  ;;  %v15642_v49 = vcombine.low %v1178_v39, %v1182_v40  ;;  %v15649_v50 = vcombine.high %v1185_v45, %v1189_v34  ;;  %v1238_v45 = vld [vmem:[%s23258_s1 + $0x25b8] sm:$0xff] }
 0x53b   :  { %11088 = vmatprep.subr.bf16.mxu0 %v15601_v4  ;;  %11621 = vmatprep.subr.bf16.mxu1 %v15603_v52  ;;  %v15651_v4 = vcombine.high %v1186_v48, %v1190_v46  ;;  %v1193_v52 = vld [vmem:[%s23258_s1 + $0x2450] sm:$0xff] }
 0x53c   :  { %v15656_v59 = vcombine.low %v1193_v52, %v1197_v54 }
 0x53e   :  { %11089 = vmatpush1.bf16.msra.mxu0 %v15600_v61  ;;  %11622 = vmatpush1.bf16.msra.mxu1 %v15602_v0  ;;  %v15650_v61 = vcombine.low %v1186_v48, %v1190_v46  ;;  %v15657_v0 = vcombine.high %v1193_v52, %v1197_v54  ;;  %v1246_v52 = vld [vmem:[%s23258_s1 + $0x25f8] sm:$0xff] }
 0x53f   :  { %11090 = vmatprep.subr.bf16.mxu0 %v15609_v19  ;;  %11623 = vmatprep.subr.bf16.mxu1 %v15611_v28  ;;  %v15659_v19 = vcombine.high %v1194_v55, %v1198_v7  ;;  %v1201_v28 = vld [vmem:[%s23258_s1 + $0x2490] sm:$0xff] }
 0x540   :  { %v15664_v13 = vcombine.low %v1201_v28, %v1205_v44 }
 0x542   :  { %11091 = vmatpush1.bf16.msra.mxu0 %v15608_v9  ;;  %11624 = vmatpush1.bf16.msra.mxu1 %v15610_v51  ;;  %v15658_v9 = vcombine.low %v1194_v55, %v1198_v7  ;;  %v15665_v51 = vcombine.high %v1201_v28, %v1205_v44  ;;  %v1254_v28 = vld [vmem:[%s23258_s1 + $0x2638] sm:$0xff] }
 0x543   :  { %11092 = vmatprep.subr.bf16.mxu0 %v15617_v10  ;;  %11625 = vmatprep.subr.bf16.mxu1 %v15619_v11  ;;  %v15667_v10 = vcombine.high %v1202_v3, %v1206_v17  ;;  %v1209_v11 = vld [vmem:[%s23258_s1 + $0x24d0] sm:$0xff] }
 0x544   :  { %v15672_v23 = vcombine.low %v1209_v11, %v1213_v12 }
 0x546   :  { %11093 = vmatpush1.bf16.msra.mxu0 %v15616_v1  ;;  %11626 = vmatpush1.bf16.msra.mxu1 %v15618_v16  ;;  %v15673_v1 = vcombine.high %v1209_v11, %v1213_v12  ;;  %v1262_v11 = vld [vmem:[%s23258_s1 + $0x2678] sm:$0xff] }
 0x547   :  { %11094 = vmatprep.subr.bf16.mxu0 %v15625_v62  ;;  %11627 = vmatprep.subr.bf16.mxu1 %v15627_v18  ;;  %v1217_v62 = vld [vmem:[%s23258_s1 + $0x2510] sm:$0xff] }
 0x548   :  { %v1221_v18 = vld [vmem:[%s23258_s1 + $0x2530] sm:$0xff] }
 0x549   :  { %v15681_v24 = vcombine.high %v1217_v62, %v1221_v18  ;;  %v15680_v36 = vcombine.low %v1217_v62, %v1221_v18  ;;  %v1270_v62 = vld [vmem:[%s23258_s1 + $0x26b8] sm:$0xff] }
 0x54a   :  { %11095 = vmatpush1.bf16.msra.mxu0 %v15624_v47  ;;  %11628 = vmatpush1.bf16.msra.mxu1 %v15626_v27  ;;  %v1225_v27 = vld [vmem:[%s23258_s1 + $0x2550] sm:$0xff] }
 0x54b   :  { %11096 = vmatprep.subr.bf16.mxu0 %v15633_v31  ;;  %11629 = vmatprep.subr.bf16.mxu1 %v15635_v33  ;;  %v1229_v31 = vld [vmem:[%s23258_s1 + $0x2570] sm:$0xff]  ;;  %v1226_v33 = vld [vmem:[%s23258_s1 + $0x2558] sm:$0xff] }
 0x54c   :  { %v15689_v40 = vcombine.high %v1225_v27, %v1229_v31  ;;  %v15688_v34 = vcombine.low %v1225_v27, %v1229_v31  ;;  %v15690_v48 = vcombine.low %v1226_v33, %v1230_v38  ;;  %v1278_v27 = vld [vmem:[%s23258_s1 + $0x26f8] sm:$0xff] }
 0x54e   :  { %11097 = vmatpush1.bf16.msra.mxu0 %v15632_v57  ;;  %11630 = vmatpush1.bf16.msra.mxu1 %v15634_v41  ;;  %v15691_v57 = vcombine.high %v1226_v33, %v1230_v38  ;;  %v1233_v41 = vld [vmem:[%s23258_s1 + $0x2590] sm:$0xff] }
 0x54f   :  { %11098 = vmatprep.subr.bf16.mxu0 %v15641_v58  ;;  %11631 = vmatprep.subr.bf16.mxu1 %v15643_v42  ;;  %v1237_v58 = vld [vmem:[%s23258_s1 + $0x25b0] sm:$0xff]  ;;  %v1234_v42 = vld [vmem:[%s23258_s1 + $0x2598] sm:$0xff] }
 0x550   :  { %v15697_v46 = vcombine.high %v1233_v41, %v1237_v58  ;;  %v15696_v54 = vcombine.low %v1233_v41, %v1237_v58  ;;  %v15698_v55 = vcombine.low %v1234_v42, %v1238_v45  ;;  %v1286_v41 = vld [vmem:[%s23258_s1 + $0x2738] sm:$0xff] }
 0x552   :  { %11099 = vmatpush1.bf16.msra.mxu0 %v15640_v6  ;;  %11632 = vmatpush1.bf16.msra.mxu1 %v15642_v49  ;;  %v15699_v6 = vcombine.high %v1234_v42, %v1238_v45  ;;  %v1241_v49 = vld [vmem:[%s23258_s1 + $0x25d0] sm:$0xff] }
 0x553   :  { %11109 = vmatprep.subr.bf16.mxu0 %v15649_v50  ;;  %11642 = vmatprep.subr.bf16.mxu1 %v15651_v4  ;;  %v1245_v50 = vld [vmem:[%s23258_s1 + $0x25f0] sm:$0xff]  ;;  %v1242_v4 = vld [vmem:[%s23258_s1 + $0x25d8] sm:$0xff] }
 0x554   :  { %v15705_v7 = vcombine.high %v1241_v49, %v1245_v50  ;;  %v15704_v44 = vcombine.low %v1241_v49, %v1245_v50  ;;  %v15706_v3 = vcombine.low %v1242_v4, %v1246_v52  ;;  %v1294_v49 = vld [vmem:[%s23258_s1 + $0x2778] sm:$0xff] }
 0x555   :  { %11101 = vmatmul.mubr.bf16.vlgmr.msra.gmra.mrb[4].mxu0 %v19321_v56  ;;  %11634 = vmatmul.mubr.bf16.vlgmr.msra.gmra.mrb[4].mxu1 %v19321_v56  ;;  %v1210_v56 = vld [vmem:[%s23258_s1 + $0x24d8] sm:$0xff] }
 0x556   :  { %11110 = vmatpush1.bf16.msra.mxu0 %v15648_v60  ;;  %11643 = vmatpush1.bf16.msra.mxu1 %v15650_v61  ;;  %v15675_v16 = vcombine.high %v1210_v56, %v1214_v29  ;;  %v15674_v21 = vcombine.low %v1210_v56, %v1214_v29  ;;  %v15707_v60 = vcombine.high %v1242_v4, %v1246_v52  ;;  %v1249_v61 = vld [vmem:[%s23258_s1 + $0x2610] sm:$0xff] }
 0x557   :  { %11111 = vmatprep.subr.bf16.mxu0 %v15657_v0  ;;  %11644 = vmatprep.subr.bf16.mxu1 %v15659_v19  ;;  %v1253_v0 = vld [vmem:[%s23258_s1 + $0x2630] sm:$0xff]  ;;  %v1250_v19 = vld [vmem:[%s23258_s1 + $0x2618] sm:$0xff] }
 0x558   :  { %11141 = vmatprep.mubr.bf16.mxu0 %v19337_v5  ;;  %11674 = vmatprep.mubr.bf16.mxu1 %v19337_v5  ;;  %v1218_v5 = vld [vmem:[%s23258_s1 + $0x2518] sm:$0xff]  ;;  %v15713_v17 = vcombine.high %v1249_v61, %v1253_v0  ;;  %v15712_v12 = vcombine.low %v1249_v61, %v1253_v0  ;;  %v15714_v56 = vcombine.low %v1250_v19, %v1254_v28 }
 0x559   :  { %v15683_v47 = vcombine.high %v1218_v5, %v1222_v20  ;;  %v15682_v39 = vcombine.low %v1218_v5, %v1222_v20  ;;  %v1302_v61 = vld [vmem:[%s23258_s1 + $0x27b8] sm:$0xff] }
 0x55a   :  { %11112 = vmatpush1.bf16.msra.mxu0 %v15656_v59  ;;  %11645 = vmatpush1.bf16.msra.mxu1 %v15658_v9  ;;  %v15715_v59 = vcombine.high %v1250_v19, %v1254_v28  ;;  %v1257_v9 = vld [vmem:[%s23258_s1 + $0x2650] sm:$0xff] }
 0x55b   :  { %11113 = vmatprep.subr.bf16.mxu0 %v15665_v51  ;;  %11646 = vmatprep.subr.bf16.mxu1 %v15667_v10  ;;  %v1261_v51 = vld [vmem:[%s23258_s1 + $0x2670] sm:$0xff]  ;;  %v1258_v10 = vld [vmem:[%s23258_s1 + $0x2658] sm:$0xff] }
 0x55c   :  { %v15721_v29 = vcombine.high %v1257_v9, %v1261_v51  ;;  %v15720_v18 = vcombine.low %v1257_v9, %v1261_v51  ;;  %v15722_v5 = vcombine.low %v1258_v10, %v1262_v11  ;;  %v1310_v9 = vld [vmem:[%s23258_s1 + $0x27f8] sm:$0xff] }
 0x55e   :  { %11114 = vmatpush1.bf16.msra.mxu0 %v15664_v13  ;;  %11647 = vmatpush1.bf16.msra.mxu1 %v15666_v37  ;;  %v15723_v13 = vcombine.high %v1258_v10, %v1262_v11  ;;  %v1265_v37 = vld [vmem:[%s23258_s1 + $0x2690] sm:$0xff] }
 0x55f   :  { %11115 = vmatprep.subr.bf16.mxu0 %v15673_v1  ;;  %11648 = vmatprep.subr.bf16.mxu1 %v15675_v16  ;;  %v1269_v1 = vld [vmem:[%s23258_s1 + $0x26b0] sm:$0xff]  ;;  %v1266_v16 = vld [vmem:[%s23258_s1 + $0x2698] sm:$0xff] }
 0x560   :  { %v15729_v20 = vcombine.high %v1265_v37, %v1269_v1  ;;  %v15728_v31 = vcombine.low %v1265_v37, %v1269_v1  ;;  %v15730_v33 = vcombine.low %v1266_v16, %v1270_v62  ;;  %v1318_v37 = vld [vmem:[%s23258_s1 + $0x2838] sm:$0xff] }
 0x562   :  { %11116 = vmatpush1.bf16.msra.mxu0 %v15672_v23  ;;  %11649 = vmatpush1.bf16.msra.mxu1 %v15674_v21  ;;  %v15731_v23 = vcombine.high %v1266_v16, %v1270_v62  ;;  %v1273_v21 = vld [vmem:[%s23258_s1 + $0x26d0] sm:$0xff] }
 0x563   :  { %11117 = vmatprep.subr.bf16.mxu0 %v15681_v24  ;;  %11650 = vmatprep.subr.bf16.mxu1 %v15683_v47  ;;  %v1277_v24 = vld [vmem:[%s23258_s1 + $0x26f0] sm:$0xff]  ;;  %v1274_v47 = vld [vmem:[%s23258_s1 + $0x26d8] sm:$0xff] }
 0x564   :  { %v15737_v38 = vcombine.high %v1273_v21, %v1277_v24  ;;  %v15736_v58 = vcombine.low %v1273_v21, %v1277_v24  ;;  %v15738_v42 = vcombine.low %v1274_v47, %v1278_v27  ;;  %v1326_v21 = vld [vmem:[%s23258_s1 + $0x2878] sm:$0xff] }
 0x566   :  { %11118 = vmatpush1.bf16.msra.mxu0 %v15680_v36  ;;  %11651 = vmatpush1.bf16.msra.mxu1 %v15682_v39  ;;  %v15739_v36 = vcombine.high %v1274_v47, %v1278_v27  ;;  %v1281_v39 = vld [vmem:[%s23258_s1 + $0x2710] sm:$0xff] }
 0x567   :  { %11119 = vmatprep.subr.bf16.mxu0 %v15689_v40  ;;  %11652 = vmatprep.subr.bf16.mxu1 %v15691_v57  ;;  %v1285_v40 = vld [vmem:[%s23258_s1 + $0x2730] sm:$0xff]  ;;  %v1282_v57 = vld [vmem:[%s23258_s1 + $0x2718] sm:$0xff] }
 0x568   :  { %v15745_v45 = vcombine.high %v1281_v39, %v1285_v40  ;;  %v15744_v50 = vcombine.low %v1281_v39, %v1285_v40  ;;  %v15746_v4 = vcombine.low %v1282_v57, %v1286_v41  ;;  %v1334_v39 = vld [vmem:[%s23258_s1 + $0x28b8] sm:$0xff] }
 0x56a   :  { %11120 = vmatpush1.bf16.msra.mxu0 %v15688_v34  ;;  %11653 = vmatpush1.bf16.msra.mxu1 %v15690_v48  ;;  %v15747_v34 = vcombine.high %v1282_v57, %v1286_v41  ;;  %v1289_v48 = vld [vmem:[%s23258_s1 + $0x2750] sm:$0xff] }
 0x56b   :  { %11121 = vmatprep.subr.bf16.mxu0 %v15697_v46  ;;  %11654 = vmatprep.subr.bf16.mxu1 %v15699_v6  ;;  %v1293_v46 = vld [vmem:[%s23258_s1 + $0x2770] sm:$0xff]  ;;  %v1290_v6 = vld [vmem:[%s23258_s1 + $0x2758] sm:$0xff] }
 0x56c   :  { %v15753_v52 = vcombine.high %v1289_v48, %v1293_v46  ;;  %v15752_v0 = vcombine.low %v1289_v48, %v1293_v46  ;;  %v15754_v19 = vcombine.low %v1290_v6, %v1294_v49 }
 0x56e   :  { %11122 = vmatpush1.bf16.msra.mxu0 %v15696_v54  ;;  %11655 = vmatpush1.bf16.msra.mxu1 %v15698_v55  ;;  %v15755_v54 = vcombine.high %v1290_v6, %v1294_v49  ;;  %v1297_v55 = vld [vmem:[%s23258_s1 + $0x2790] sm:$0xff] }
 0x56f   :  { %11123 = vmatprep.subr.bf16.mxu0 %v15705_v7  ;;  %11656 = vmatprep.subr.bf16.mxu1 %v15707_v60  ;;  %v1301_v7 = vld [vmem:[%s23258_s1 + $0x27b0] sm:$0xff]  ;;  %v1298_v60 = vld [vmem:[%s23258_s1 + $0x2798] sm:$0xff] }
 0x570   :  { %v15761_v28 = vcombine.high %v1297_v55, %v1301_v7  ;;  %v15760_v51 = vcombine.low %v1297_v55, %v1301_v7  ;;  %v15762_v10 = vcombine.low %v1298_v60, %v1302_v61 }
 0x572   :  { %11124 = vmatpush1.bf16.msra.mxu0 %v15704_v44  ;;  %11657 = vmatpush1.bf16.msra.mxu1 %v15706_v3  ;;  %v15763_v44 = vcombine.high %v1298_v60, %v1302_v61  ;;  %v1305_v3 = vld [vmem:[%s23258_s1 + $0x27d0] sm:$0xff] }
 0x573   :  { %11125 = vmatprep.subr.bf16.mxu0 %v15713_v17  ;;  %11658 = vmatprep.subr.bf16.mxu1 %v15715_v59  ;;  %v1309_v17 = vld [vmem:[%s23258_s1 + $0x27f0] sm:$0xff]  ;;  %v1306_v59 = vld [vmem:[%s23258_s1 + $0x27d8] sm:$0xff] }
 0x574   :  { %v15769_v11 = vcombine.high %v1305_v3, %v1309_v17  ;;  %v15768_v1 = vcombine.low %v1305_v3, %v1309_v17  ;;  %v15770_v16 = vcombine.low %v1306_v59, %v1310_v9  ;;  %v1353_v61 = vld [vmem:[%s23258_s1 + $0x2950] sm:$0xff] }
 0x576   :  { %11126 = vmatpush1.bf16.msra.mxu0 %v15712_v12  ;;  %11659 = vmatpush1.bf16.msra.mxu1 %v15714_v56  ;;  %v15771_v12 = vcombine.high %v1306_v59, %v1310_v9  ;;  %v1313_v56 = vld [vmem:[%s23258_s1 + $0x2810] sm:$0xff] }
 0x577   :  { %11127 = vmatprep.subr.bf16.mxu0 %v15721_v29  ;;  %11660 = vmatprep.subr.bf16.mxu1 %v15723_v13  ;;  %v1317_v29 = vld [vmem:[%s23258_s1 + $0x2830] sm:$0xff]  ;;  %v1314_v13 = vld [vmem:[%s23258_s1 + $0x2818] sm:$0xff] }
 0x578   :  { %v15777_v62 = vcombine.high %v1313_v56, %v1317_v29  ;;  %v15776_v24 = vcombine.low %v1313_v56, %v1317_v29  ;;  %v15778_v47 = vcombine.low %v1314_v13, %v1318_v37  ;;  %v1361_v59 = vld [vmem:[%s23258_s1 + $0x2990] sm:$0xff] }
 0x579   :  { %v1365_v9 = vld [vmem:[%s23258_s1 + $0x29b0] sm:$0xff] }
 0x57a   :  { %11128 = vmatpush1.bf16.msra.mxu0 %v15720_v18  ;;  %11661 = vmatpush1.bf16.msra.mxu1 %v15722_v5  ;;  %v15779_v18 = vcombine.high %v1314_v13, %v1318_v37  ;;  %v1321_v5 = vld [vmem:[%s23258_s1 + $0x2850] sm:$0xff]  ;;  %v15825_v13 = vcombine.high %v1361_v59, %v1365_v9 }
 0x57b   :  { %11129 = vmatprep.subr.bf16.mxu0 %v15729_v20  ;;  %11662 = vmatprep.subr.bf16.mxu1 %v15731_v23  ;;  %v1325_v20 = vld [vmem:[%s23258_s1 + $0x2870] sm:$0xff]  ;;  %v1322_v23 = vld [vmem:[%s23258_s1 + $0x2858] sm:$0xff] }
 0x57c   :  { %v15785_v27 = vcombine.high %v1321_v5, %v1325_v20  ;;  %v15784_v40 = vcombine.low %v1321_v5, %v1325_v20  ;;  %v15786_v57 = vcombine.low %v1322_v23, %v1326_v21  ;;  %v1369_v56 = vld [vmem:[%s23258_s1 + $0x29d0] sm:$0xff] }
 0x57d   :  { %v1373_v37 = vld [vmem:[%s23258_s1 + $0x29f0] sm:$0xff] }
 0x57e   :  { %11130 = vmatpush1.bf16.msra.mxu0 %v15728_v31  ;;  %11663 = vmatpush1.bf16.msra.mxu1 %v15730_v33  ;;  %v15787_v31 = vcombine.high %v1322_v23, %v1326_v21  ;;  %v1329_v33 = vld [vmem:[%s23258_s1 + $0x2890] sm:$0xff]  ;;  %v15833_v23 = vcombine.high %v1369_v56, %v1373_v37 }
 0x57f   :  { %11131 = vmatprep.subr.bf16.mxu0 %v15737_v38  ;;  %11664 = vmatprep.subr.bf16.mxu1 %v15739_v36  ;;  %v1333_v38 = vld [vmem:[%s23258_s1 + $0x28b0] sm:$0xff]  ;;  %v1330_v36 = vld [vmem:[%s23258_s1 + $0x2898] sm:$0xff] }
 0x580   :  { %v15793_v41 = vcombine.high %v1329_v33, %v1333_v38  ;;  %v15792_v48 = vcombine.low %v1329_v33, %v1333_v38  ;;  %v15794_v46 = vcombine.low %v1330_v36, %v1334_v39  ;;  %v1377_v5 = vld [vmem:[%s23258_s1 + $0x2a10] sm:$0xff] }
 0x581   :  { %v1381_v21 = vld [vmem:[%s23258_s1 + $0x2a30] sm:$0xff] }
 0x582   :  { %11132 = vmatpush1.bf16.msra.mxu0 %v15736_v58  ;;  %11665 = vmatpush1.bf16.msra.mxu1 %v15738_v42  ;;  %v15795_v58 = vcombine.high %v1330_v36, %v1334_v39  ;;  %v1337_v42 = vld [vmem:[%s23258_s1 + $0x28d0] sm:$0xff]  ;;  %v15841_v36 = vcombine.high %v1377_v5, %v1381_v21 }
 0x583   :  { %11133 = vmatprep.subr.bf16.mxu0 %v15745_v45  ;;  %11666 = vmatprep.subr.bf16.mxu1 %v15747_v34  ;;  %v1341_v45 = vld [vmem:[%s23258_s1 + $0x28f0] sm:$0xff]  ;;  %v1342_v34 = vld [vmem:[%s23258_s1 + $0x28f8] sm:$0xff] }
 0x584   :  { %v15801_v6 = vcombine.high %v1337_v42, %v1341_v45  ;;  %v1385_v33 = vld [vmem:[%s23258_s1 + $0x2a50] sm:$0xff] }
 0x585   :  { %v1389_v39 = vld [vmem:[%s23258_s1 + $0x2a70] sm:$0xff] }
 0x586   :  { %11134 = vmatpush1.bf16.msra.mxu0 %v15744_v50  ;;  %11667 = vmatpush1.bf16.msra.mxu1 %v15746_v4  ;;  %v1345_v50 = vld [vmem:[%s23258_s1 + $0x2910] sm:$0xff] }
 0x587   :  { %11135 = vmatprep.subr.bf16.mxu0 %v15753_v52  ;;  %11668 = vmatprep.subr.bf16.mxu1 %v15755_v54  ;;  %v1349_v4 = vld [vmem:[%s23258_s1 + $0x2930] sm:$0xff]  ;;  %v1350_v52 = vld [vmem:[%s23258_s1 + $0x2938] sm:$0xff]  ;;  %v15800_v54 = vcombine.low %v1337_v42, %v1341_v45 }
 0x588   :  { %v15809_v7 = vcombine.high %v1345_v50, %v1349_v4  ;;  %v1393_v42 = vld [vmem:[%s23258_s1 + $0x2a90] sm:$0xff] }
 0x58a   :  { %11136 = vmatpush1.bf16.msra.mxu0 %v15752_v0  ;;  %11669 = vmatpush1.bf16.msra.mxu1 %v15754_v19  ;;  %v1357_v0 = vld [vmem:[%s23258_s1 + $0x2970] sm:$0xff]  ;;  %v1354_v19 = vld [vmem:[%s23258_s1 + $0x2958] sm:$0xff] }
 0x58b   :  { %11137 = vmatprep.subr.bf16.mxu0 %v15761_v28  ;;  %11670 = vmatprep.subr.bf16.mxu1 %v15763_v44  ;;  %v1358_v28 = vld [vmem:[%s23258_s1 + $0x2978] sm:$0xff]  ;;  %v15808_v44 = vcombine.low %v1345_v50, %v1349_v4  ;;  %v15817_v17 = vcombine.high %v1353_v61, %v1357_v0  ;;  %v1401_v50 = vld [vmem:[%s23258_s1 + $0x2ad0] sm:$0xff] }
 0x58c   :  { %v15818_v29 = vcombine.low %v1354_v19, %v1358_v28 }
 0x58e   :  { %11138 = vmatpush1.bf16.msra.mxu0 %v15760_v51  ;;  %11671 = vmatpush1.bf16.msra.mxu1 %v15762_v10  ;;  %v15819_v51 = vcombine.high %v1354_v19, %v1358_v28  ;;  %v1362_v10 = vld [vmem:[%s23258_s1 + $0x2998] sm:$0xff]  ;;  %v1413_v28 = vld [vmem:[%s23258_s1 + $0x2b30] sm:$0xff] }
 0x58f   :  { %11139 = vmatprep.subr.bf16.mxu0 %v15769_v11  ;;  %11672 = vmatprep.subr.bf16.mxu1 %v15771_v12  ;;  %v1366_v11 = vld [vmem:[%s23258_s1 + $0x29b8] sm:$0xff]  ;;  %v15816_v12 = vcombine.low %v1353_v61, %v1357_v0  ;;  %v1409_v61 = vld [vmem:[%s23258_s1 + $0x2b10] sm:$0xff] }
 0x590   :  { %v15826_v20 = vcombine.low %v1362_v10, %v1366_v11 }
 0x592   :  { %11140 = vmatpush1.bf16.msra.mxu0 %v15768_v1  ;;  %11673 = vmatpush1.bf16.msra.mxu1 %v15770_v16  ;;  %v15827_v1 = vcombine.high %v1362_v10, %v1366_v11  ;;  %v1370_v16 = vld [vmem:[%s23258_s1 + $0x29d8] sm:$0xff]  ;;  %v15873_v10 = vcombine.high %v1409_v61, %v1413_v28  ;;  %v1421_v11 = vld [vmem:[%s23258_s1 + $0x2b70] sm:$0xff] }
 0x593   :  { %11150 = vmatprep.subr.bf16.mxu0 %v15777_v62  ;;  %11683 = vmatprep.subr.bf16.mxu1 %v15779_v18  ;;  %v1374_v62 = vld [vmem:[%s23258_s1 + $0x29f8] sm:$0xff]  ;;  %v15824_v18 = vcombine.low %v1361_v59, %v1365_v9  ;;  %v1417_v9 = vld [vmem:[%s23258_s1 + $0x2b50] sm:$0xff] }
 0x594   :  { %v15834_v38 = vcombine.low %v1370_v16, %v1374_v62 }
 0x595   :  { %11142 = vmatmul.mubr.bf16.vlgmr.msra.gmra.mrb[4].mxu0 %v19532_v2  ;;  %11675 = vmatmul.mubr.bf16.vlgmr.msra.gmra.mrb[4].mxu1 %v19532_v2  ;;  %v1338_v2 = vld [vmem:[%s23258_s1 + $0x28d8] sm:$0xff] }
 0x596   :  { %11151 = vmatpush1.bf16.msra.mxu0 %v15776_v24  ;;  %11684 = vmatpush1.bf16.msra.mxu1 %v15778_v47  ;;  %v15803_v49 = vcombine.high %v1338_v2, %v1342_v34  ;;  %v15802_v55 = vcombine.low %v1338_v2, %v1342_v34  ;;  %v15835_v24 = vcombine.high %v1370_v16, %v1374_v62  ;;  %v1378_v47 = vld [vmem:[%s23258_s1 + $0x2a18] sm:$0xff]  ;;  %v1397_v34 = vld [vmem:[%s23258_s1 + $0x2ab0] sm:$0xff] }
 0x597   :  { %11152 = vmatprep.subr.bf16.mxu0 %v15785_v27  ;;  %11685 = vmatprep.subr.bf16.mxu1 %v15787_v31  ;;  %v1382_v27 = vld [vmem:[%s23258_s1 + $0x2a38] sm:$0xff]  ;;  %v15832_v31 = vcombine.low %v1369_v56, %v1373_v37  ;;  %v15849_v2 = vcombine.high %v1385_v33, %v1389_v39  ;;  %v1425_v62 = vld [vmem:[%s23258_s1 + $0x2b90] sm:$0xff] }
 0x598   :  { %11182 = vmatprep.mubr.bf16.mxu0 %v19547_v14  ;;  %11715 = vmatprep.mubr.bf16.mxu1 %v19547_v14  ;;  %v1346_v14 = vld [vmem:[%s23258_s1 + $0x2918] sm:$0xff]  ;;  %v15842_v45 = vcombine.low %v1378_v47, %v1382_v27 }
 0x599   :  { %v15811_v60 = vcombine.high %v1346_v14, %v1350_v52  ;;  %v15810_v3 = vcombine.low %v1346_v14, %v1350_v52  ;;  %v15857_v14 = vcombine.high %v1393_v42, %v1397_v34  ;;  %v1405_v52 = vld [vmem:[%s23258_s1 + $0x2af0] sm:$0xff]  ;;  %v1418_v56 = vld [vmem:[%s23258_s1 + $0x2b58] sm:$0xff] }
 0x59a   :  { %11153 = vmatpush1.bf16.msra.mxu0 %v15784_v40  ;;  %11686 = vmatpush1.bf16.msra.mxu1 %v15786_v57  ;;  %v15843_v40 = vcombine.high %v1378_v47, %v1382_v27  ;;  %v1386_v57 = vld [vmem:[%s23258_s1 + $0x2a58] sm:$0xff]  ;;  %v15865_v19 = vcombine.high %v1401_v50, %v1405_v52  ;;  %v15864_v59 = vcombine.low %v1401_v50, %v1405_v52  ;;  %v1437_v27 = vld [vmem:[%s23258_s1 + $0x2bf0] sm:$0xff] }
 0x59b   :  { %11154 = vmatprep.subr.bf16.mxu0 %v15793_v41  ;;  %11687 = vmatprep.subr.bf16.mxu1 %v15795_v58  ;;  %v1390_v41 = vld [vmem:[%s23258_s1 + $0x2a78] sm:$0xff]  ;;  %v15840_v58 = vcombine.low %v1377_v5, %v1381_v21  ;;  %v1433_v21 = vld [vmem:[%s23258_s1 + $0x2bd0] sm:$0xff] }
 0x59c   :  { %v15850_v4 = vcombine.low %v1386_v57, %v1390_v41  ;;  %v1426_v5 = vld [vmem:[%s23258_s1 + $0x2b98] sm:$0xff]  ;;  %v1453_v50 = vld [vmem:[%s23258_s1 + $0x2c70] sm:$0xff] }
 0x59d   :  { %v1450_v52 = vld [vmem:[%s23258_s1 + $0x2c58] sm:$0xff] }
 0x59e   :  { %11155 = vmatpush1.bf16.msra.mxu0 %v15792_v48  ;;  %11688 = vmatpush1.bf16.msra.mxu1 %v15794_v46  ;;  %v15851_v48 = vcombine.high %v1386_v57, %v1390_v41  ;;  %v1394_v46 = vld [vmem:[%s23258_s1 + $0x2a98] sm:$0xff]  ;;  %v15897_v57 = vcombine.high %v1433_v21, %v1437_v27  ;;  %v1445_v41 = vld [vmem:[%s23258_s1 + $0x2c30] sm:$0xff] }
 0x59f   :  { %11156 = vmatprep.subr.bf16.mxu0 %v15801_v6  ;;  %11689 = vmatprep.subr.bf16.mxu1 %v15803_v49  ;;  %v1398_v6 = vld [vmem:[%s23258_s1 + $0x2ab8] sm:$0xff]  ;;  %v15848_v49 = vcombine.low %v1385_v33, %v1389_v39  ;;  %v1441_v39 = vld [vmem:[%s23258_s1 + $0x2c10] sm:$0xff] }
 0x5a0   :  { %v15858_v0 = vcombine.low %v1394_v46, %v1398_v6  ;;  %v1434_v33 = vld [vmem:[%s23258_s1 + $0x2bd8] sm:$0xff] }
 0x5a2   :  { %11157 = vmatpush1.bf16.msra.mxu0 %v15800_v54  ;;  %11690 = vmatpush1.bf16.msra.mxu1 %v15802_v55  ;;  %v15859_v54 = vcombine.high %v1394_v46, %v1398_v6  ;;  %v1402_v55 = vld [vmem:[%s23258_s1 + $0x2ad8] sm:$0xff]  ;;  %v1603_v46 = vsub.s32 0, %v17490_v43 }
 0x5a3   :  { %11158 = vmatprep.subr.bf16.mxu0 %v15809_v7  ;;  %11691 = vmatprep.subr.bf16.mxu1 %v15811_v60  ;;  %v1406_v7 = vld [vmem:[%s23258_s1 + $0x2af8] sm:$0xff]  ;;  %v15856_v60 = vcombine.low %v1393_v42, %v1397_v34  ;;  %v15896_v34 = vcombine.low %v1433_v21, %v1437_v27  ;;  %v1477_v21 = vld [vmem:[%s23258_s1 + $0x2d30] sm:$0xff] }
 0x5a4   :  { %v1442_v42 = vld [vmem:[%s23258_s1 + $0x2c18] sm:$0xff] }
 0x5a5   :  { %v1478_v27 = vld [vmem:[%s23258_s1 + $0x2d38] sm:$0xff] }
 0x5a6   :  { %11159 = vmatpush1.bf16.msra.mxu0 %v15808_v44  ;;  %11692 = vmatpush1.bf16.msra.mxu1 %v15810_v3  ;;  %v15867_v44 = vcombine.high %v1402_v55, %v1406_v7  ;;  %v1410_v3 = vld [vmem:[%s23258_s1 + $0x2b18] sm:$0xff] }
 0x5a7   :  { %11160 = vmatprep.subr.bf16.mxu0 %v15817_v17  ;;  %11693 = vmatprep.subr.bf16.mxu1 %v15819_v51  ;;  %v1414_v17 = vld [vmem:[%s23258_s1 + $0x2b38] sm:$0xff]  ;;  %v15866_v51 = vcombine.low %v1402_v55, %v1406_v7  ;;  %v1615_v7 = vsub.s32 3, %v17490_v43 }
 0x5a8   :  { %v15874_v37 = vcombine.low %v1410_v3, %v1414_v17  ;;  %v1454_v55 = vld [vmem:[%s23258_s1 + $0x2c78] sm:$0xff] }
 0x5aa   :  { %11161 = vmatpush1.bf16.msra.mxu0 %v15816_v12  ;;  %11694 = vmatpush1.bf16.msra.mxu1 %v15818_v29  ;;  %v15875_v12 = vcombine.high %v1410_v3, %v1414_v17  ;;  %v1422_v29 = vld [vmem:[%s23258_s1 + $0x2b78] sm:$0xff]  ;;  %v15915_v17 = vcombine.high %v1450_v52, %v1454_v55 }
 0x5ab   :  { %11162 = vmatprep.subr.bf16.mxu0 %v15825_v13  ;;  %11695 = vmatprep.subr.bf16.mxu1 %v15827_v1  ;;  %v15872_v13 = vcombine.low %v1409_v61, %v1413_v28  ;;  %v15881_v1 = vcombine.high %v1417_v9, %v1421_v11  ;;  %v15883_v16 = vcombine.high %v1418_v56, %v1422_v29  ;;  %v1457_v61 = vld [vmem:[%s23258_s1 + $0x2c90] sm:$0xff] }
 0x5ae   :  { %11163 = vmatpush1.bf16.msra.mxu0 %v15824_v18  ;;  %11696 = vmatpush1.bf16.msra.mxu1 %v15826_v20  ;;  %v1429_v18 = vld [vmem:[%s23258_s1 + $0x2bb0] sm:$0xff]  ;;  %v1430_v20 = vld [vmem:[%s23258_s1 + $0x2bb8] sm:$0xff] }
 0x5af   :  { %11164 = vmatprep.subr.bf16.mxu0 %v15833_v23  ;;  %11697 = vmatprep.subr.bf16.mxu1 %v15835_v24  ;;  %v15880_v23 = vcombine.low %v1417_v9, %v1421_v11  ;;  %v15882_v24 = vcombine.low %v1418_v56, %v1422_v29  ;;  %v15889_v47 = vcombine.high %v1425_v62, %v1429_v18 }
 0x5b0   :  { %v15914_v29 = vcombine.low %v1450_v52, %v1454_v55  ;;  %v1498_v55 = vld [vmem:[%s23258_s1 + $0x2dd8] sm:$0xff] }
 0x5b2   :  { %11165 = vmatpush1.bf16.msra.mxu0 %v15832_v31  ;;  %11698 = vmatpush1.bf16.msra.mxu1 %v15834_v38  ;;  %v15891_v31 = vcombine.high %v1426_v5, %v1430_v20  ;;  %v1438_v38 = vld [vmem:[%s23258_s1 + $0x2bf8] sm:$0xff] }
 0x5b3   :  { %11166 = vmatprep.subr.bf16.mxu0 %v15841_v36  ;;  %11699 = vmatprep.subr.bf16.mxu1 %v15843_v40  ;;  %v15888_v36 = vcombine.low %v1425_v62, %v1429_v18  ;;  %v15890_v40 = vcombine.low %v1426_v5, %v1430_v20  ;;  %v15898_v6 = vcombine.low %v1434_v33, %v1438_v38  ;;  %v1470_v62 = vld [vmem:[%s23258_s1 + $0x2cf8] sm:$0xff]  ;;  %v1473_v5 = vld [vmem:[%s23258_s1 + $0x2d10] sm:$0xff] }
 0x5b6   :  { %11167 = vmatpush1.bf16.msra.mxu0 %v15840_v58  ;;  %11700 = vmatpush1.bf16.msra.mxu1 %v15842_v45  ;;  %v15899_v58 = vcombine.high %v1434_v33, %v1438_v38  ;;  %v1446_v45 = vld [vmem:[%s23258_s1 + $0x2c38] sm:$0xff]  ;;  %v1481_v38 = vld [vmem:[%s23258_s1 + $0x2d50] sm:$0xff] }
 0x5b7   :  { %11168 = vmatprep.subr.bf16.mxu0 %v15849_v2  ;;  %11701 = vmatprep.subr.bf16.mxu1 %v15851_v48  ;;  %v1599_v2 = vld [vmem:[%s23262_s2] sm:$0xff]  ;;  %v1449_v48 = vld [vmem:[%s23258_s1 + $0x2c50] sm:$0xff] }
 0x5b8   :  { %v15913_v28 = vcombine.high %v1449_v48, %v1453_v50  ;;  %v15912_v11 = vcombine.low %v1449_v48, %v1453_v50 }
 0x5ba   :  { %11169 = vmatpush1.bf16.msra.mxu0 %v15848_v49  ;;  %11702 = vmatpush1.bf16.msra.mxu1 %v15850_v4  ;;  %v15905_v49 = vcombine.high %v1441_v39, %v1445_v41  ;;  %v1611_v4 = vsub.s32 2, %v17490_v43 }
 0x5bb   :  { %11170 = vmatprep.subr.bf16.mxu0 %v15857_v14  ;;  %11703 = vmatprep.subr.bf16.mxu1 %v15859_v54  ;;  %v15907_v14 = vcombine.high %v1442_v42, %v1446_v45  ;;  %v1607_v54 = vsub.s32 1, %v17490_v43 }
 0x5bc   :  { %v1612_v3 = vrot.slane %v1599_v2, %v1611_v4  ;;  %v1497_v4 = vld [vmem:[%s23258_s1 + $0x2dd0] sm:$0xff] }
 0x5bd   :  { %v1608_v9 = vrot.slane %v1599_v2, %v1607_v54 }
 0x5be   :  { %11171 = vmatpush1.bf16.msra.mxu0 %v15856_v60  ;;  %11704 = vmatpush1.bf16.msra.mxu1 %v15858_v0  ;;  %v15904_v60 = vcombine.low %v1441_v39, %v1445_v41  ;;  %v1604_v0 = vrot.slane %v1599_v2, %v1603_v46  ;;  %v1486_v41 = vld [vmem:[%s23258_s1 + $0x2d78] sm:$0xff] }
 0x5bf   :  { %11172 = vmatprep.subr.bf16.mxu0 %v15865_v19  ;;  %11705 = vmatprep.subr.bf16.mxu1 %v15867_v44  ;;  %v15906_v19 = vcombine.low %v1442_v42, %v1446_v45  ;;  %v1461_v44 = vld [vmem:[%s23258_s1 + $0x2cb0] sm:$0xff]  ;;  %v15936_v42 = vcombine.low %v1473_v5, %v1477_v21  ;;  %v1490_v46 = vld [vmem:[%s23258_s1 + $0x2d98] sm:$0xff] }
 0x5c0   :  { %v22196_v56 = vadd.f32 %v20659_v22, %v1604_v0  ;;  %v22209_v22 = vadd.f32 %v20669_v30, %v1608_v9  ;;  %v15920_v18 = vcombine.low %v1457_v61, %v1461_v44  ;;  %v1489_v45 = vld [vmem:[%s23258_s1 + $0x2d90] sm:$0xff] }
 0x5c1   :  { %v1505_v0 = vld [vmem:[%s23258_s1 + $0x2e10] sm:$0xff] }
 0x5c2   :  { %11173 = vmatpush1.bf16.msra.mxu0 %v15864_v59  ;;  %11706 = vmatpush1.bf16.msra.mxu1 %v15866_v51  ;;  %v1458_v59 = vld [vmem:[%s23258_s1 + $0x2c98] sm:$0xff]  ;;  %v11806_v20 = vmax.f32 %v22196_v56, 0.0  ;;  %v17173_v56 = vld [vmem:[%s23261_s5 + $0x50] sm:$0xff]  }
 0x5c3   :  { %11174 = vmatprep.subr.bf16.mxu0 %v15873_v10  ;;  %11707 = vmatprep.subr.bf16.mxu1 %v15875_v12  ;;  %v1462_v51 = vld [vmem:[%s23258_s1 + $0x2cb8] sm:$0xff]  ;;  %v1616_v10 = vrot.slane %v1599_v2, %v1615_v7  ;;  %v1465_v12 = vld [vmem:[%s23258_s1 + $0x2cd0] sm:$0xff] }
 0x5c4   :  { %v15922_v30 = vcombine.low %v1458_v59, %v1462_v51  ;;  %v1493_v2 = vld [vmem:[%s23258_s1 + $0x2db0] sm:$0xff]  ;;  %v1502_v7 = vld [vmem:[%s23258_s1 + $0x2df8] sm:$0xff] }
 0x5c5   :  { %v15953_v54 = vcombine.high %v1489_v45, %v1493_v2 }
 0x5c6   :  { %11175 = vmatpush1.bf16.msra.mxu0 %v15872_v13  ;;  %11708 = vmatpush1.bf16.msra.mxu1 %v15874_v37  ;;  %v15921_v13 = vcombine.high %v1457_v61, %v1461_v44  ;;  %v1469_v37 = vld [vmem:[%s23258_s1 + $0x2cf0] sm:$0xff]  ;;  %v15952_v61 = vcombine.low %v1489_v45, %v1493_v2  ;;  %v1538_v2 = vld [vmem:[%s23258_s1 + $0x2f18] sm:$0xff] }
 0x5c7   :  { %11176 = vmatprep.subr.bf16.mxu0 %v15881_v1  ;;  %11709 = vmatprep.subr.bf16.mxu1 %v15883_v16  ;;  %v22202_v1 = vadd.f32 %v20667_v63, %v1612_v3  ;;  %v1466_v16 = vld [vmem:[%s23258_s1 + $0x2cd8] sm:$0xff]  ;;  %v22216_v63 = vadd.f32 %v20677_v35, %v1616_v10  ;;  %v15928_v33 = vcombine.low %v1465_v12, %v1469_v37  ;;  %v1517_v10 = vld [vmem:[%s23258_s1 + $0x2e70] sm:$0xff] }
 0x5c8   :  { %v15931_v35 = vcombine.high %v1466_v16, %v1470_v62  ;;  %v15930_v39 = vcombine.low %v1466_v16, %v1470_v62  ;;  %v1506_v3 = vld [vmem:[%s23258_s1 + $0x2e18] sm:$0xff]  ;;  %v1521_v16 = vld [vmem:[%s23258_s1 + $0x2e90] sm:$0xff] }
 0x5c9   :  { %v1525_v62 = vld [vmem:[%s23258_s1 + $0x2eb0] sm:$0xff] }
 0x5ca   :  { %11177 = vmatpush1.bf16.msra.mxu0 %v15880_v23  ;;  %11710 = vmatpush1.bf16.msra.mxu1 %v15882_v24  ;;  %v15929_v23 = vcombine.high %v1465_v12, %v1469_v37  ;;  %v1474_v24 = vld [vmem:[%s23258_s1 + $0x2d18] sm:$0xff] }
 0x5cb   :  { %11178 = vmatprep.subr.bf16.mxu0 %v15889_v47  ;;  %11711 = vmatprep.subr.bf16.mxu1 %v15891_v31  ;;  %v11807_v47 = vmax.f32 %v22209_v22, 0.0  ;;  %v11809_v31 = vmax.f32 %v22216_v63, 0.0  ;;  %v17142_v22 = vld [vmem:[%s23260_s3 + $0xd0] sm:$0xff]  }
 0x5cc   :  { %v17144_v63 = vld [vmem:[%s23260_s3 + $0x90] sm:$0xff]  }
 0x5ce   :  { %11179 = vmatpush1.bf16.msra.mxu0 %v15888_v36  ;;  %11712 = vmatpush1.bf16.msra.mxu1 %v15890_v40  ;;  %v1485_v36 = vld [vmem:[%s23258_s1 + $0x2d70] sm:$0xff]  ;;  %v15937_v40 = vcombine.high %v1473_v5, %v1477_v21 }
 0x5cf   :  { %11180 = vmatprep.subr.bf16.mxu0 %v15897_v57  ;;  %11713 = vmatprep.subr.bf16.mxu1 %v15899_v58  ;;  %v1482_v57 = vld [vmem:[%s23258_s1 + $0x2d58] sm:$0xff]  ;;  %v15939_v58 = vcombine.high %v1474_v24, %v1478_v27  ;;  %v15945_v48 = vcombine.high %v1481_v38, %v1485_v36  ;;  %v15944_v50 = vcombine.low %v1481_v38, %v1485_v36 }
 0x5d0   :  { %v15946_v52 = vcombine.low %v1482_v57, %v1486_v41  ;;  %v15985_v38 = vcombine.high %v1521_v16, %v1525_v62  ;;  %v1530_v36 = vld [vmem:[%s23258_s1 + $0x2ed8] sm:$0xff] }
 0x5d2   :  { %11181 = vmatpush1.bf16.msra.mxu0 %v15896_v34  ;;  %11714 = vmatpush1.bf16.msra.mxu1 %v15898_v6  ;;  %v15938_v34 = vcombine.low %v1474_v24, %v1478_v27  ;;  %v1494_v6 = vld [vmem:[%s23258_s1 + $0x2db8] sm:$0xff]  ;;  %v1529_v24 = vld [vmem:[%s23258_s1 + $0x2ed0] sm:$0xff] }
 0x5d3   :  { %11191 = vmatprep.subr.bf16.mxu0 %v15905_v49  ;;  %11724 = vmatprep.subr.bf16.mxu1 %v15907_v14  ;;  %v15947_v49 = vcombine.high %v1482_v57, %v1486_v41  ;;  %v1501_v14 = vld [vmem:[%s23258_s1 + $0x2df0] sm:$0xff]  ;;  %v15984_v57 = vcombine.low %v1521_v16, %v1525_v62  ;;  %v1570_v62 = vld [vmem:[%s23258_s1 + $0x3018] sm:$0xff] }
 0x5d4   :  { %v15961_v44 = vcombine.high %v1497_v4, %v1501_v14  ;;  %v15960_v9 = vcombine.low %v1497_v4, %v1501_v14  ;;  %v1533_v27 = vld [vmem:[%s23258_s1 + $0x2ef0] sm:$0xff]  ;;  %v1546_v14 = vld [vmem:[%s23258_s1 + $0x2f58] sm:$0xff] }
 0x5d5   :  { %11183 = vmatmul.mubr.bf16.vlgmr.msra.gmra.mrb[4].mxu0 %v19735_v15  ;;  %11716 = vmatmul.mubr.bf16.vlgmr.msra.gmra.mrb[4].mxu1 %v19735_v15  ;;  %v15923_v15 = vcombine.high %v1458_v59, %v1462_v51  ;;  %v15963_v59 = vcombine.high %v1498_v55, %v1502_v7  ;;  %v1513_v51 = vld [vmem:[%s23258_s1 + $0x2e50] sm:$0xff]  ;;  %v15993_v45 = vcombine.high %v1529_v24, %v1533_v27 }
 0x5d6   :  { %11192 = vmatpush1.bf16.msra.mxu0 %v15904_v60  ;;  %11725 = vmatpush1.bf16.msra.mxu1 %v15906_v19  ;;  %v15955_v60 = vcombine.high %v1490_v46, %v1494_v6  ;;  %v1509_v19 = vld [vmem:[%s23258_s1 + $0x2e30] sm:$0xff]  ;;  %v15977_v5 = vcombine.high %v1513_v51, %v1517_v10 }
 0x5d7   :  { %11193 = vmatprep.subr.bf16.mxu0 %v15913_v28  ;;  %11726 = vmatprep.subr.bf16.mxu1 %v15915_v17  ;;  %v15954_v28 = vcombine.low %v1490_v46, %v1494_v6  ;;  %v1510_v17 = vld [vmem:[%s23258_s1 + $0x2e38] sm:$0xff]  ;;  %v15969_v12 = vcombine.high %v1505_v0, %v1509_v19  ;;  %v1537_v41 = vld [vmem:[%s23258_s1 + $0x2f10] sm:$0xff]  ;;  %v15992_v46 = vcombine.low %v1529_v24, %v1533_v27 }
 0x5d8   :  { %11223 = vmatprep.mubr.bf16.mxu0 %v19751_v26  ;;  %11756 = vmatprep.mubr.bf16.mxu1 %v19751_v26  ;;  %v11808_v26 = vmax.f32 %v22202_v1, 0.0  ;;  %v15971_v37 = vcombine.high %v1506_v3, %v1510_v17  ;;  %v1545_v6 = vld [vmem:[%s23258_s1 + $0x2f50] sm:$0xff]  ;;  %v1578_v27 = vld [vmem:[%s23258_s1 + $0x3058] sm:$0xff] }
 0x5d9   :  { %v17174_v1 = vld [vmem:[%s23261_s5 + $0xd0] sm:$0xff]  }
 0x5da   :  { %11194 = vmatpush1.bf16.msra.mxu0 %v15912_v11  ;;  %11727 = vmatpush1.bf16.msra.mxu1 %v15914_v29  ;;  %v15962_v11 = vcombine.low %v1498_v55, %v1502_v7  ;;  %v1514_v29 = vld [vmem:[%s23258_s1 + $0x2e58] sm:$0xff]  ;;  %v1553_v7 = vld [vmem:[%s23258_s1 + $0x2f90] sm:$0xff] }
 0x5db   :  { %11195 = vmatprep.subr.bf16.mxu0 %v15921_v13  ;;  %11728 = vmatprep.subr.bf16.mxu1 %v15923_v15  ;;  %v1518_v13 = vld [vmem:[%s23258_s1 + $0x2e78] sm:$0xff]  ;;  %v15968_v15 = vcombine.low %v1505_v0, %v1509_v19 }
 0x5dc   :  { %v15979_v21 = vcombine.high %v1514_v29, %v1518_v13  ;;  %v1554_v19 = vld [vmem:[%s23258_s1 + $0x2f98] sm:$0xff] }
 0x5de   :  { %11196 = vmatpush1.bf16.msra.mxu0 %v15920_v18  ;;  %11729 = vmatpush1.bf16.msra.mxu1 %v15922_v30  ;;  %v15970_v18 = vcombine.low %v1506_v3, %v1510_v17  ;;  %v1522_v30 = vld [vmem:[%s23258_s1 + $0x2e98] sm:$0xff]  ;;  %v1561_v17 = vld [vmem:[%s23258_s1 + $0x2fd0] sm:$0xff] }
 0x5df   :  { %11197 = vmatprep.subr.bf16.mxu0 %v15929_v23  ;;  %11730 = vmatprep.subr.bf16.mxu1 %v15931_v35  ;;  %v1526_v23 = vld [vmem:[%s23258_s1 + $0x2eb8] sm:$0xff]  ;;  %v15976_v35 = vcombine.low %v1513_v51, %v1517_v10 }
 0x5e0   :  { %v1562_v10 = vld [vmem:[%s23258_s1 + $0x2fd8] sm:$0xff] }
 0x5e2   :  { %11198 = vmatpush1.bf16.msra.mxu0 %v15928_v33  ;;  %11731 = vmatpush1.bf16.msra.mxu1 %v15930_v39  ;;  %v15978_v33 = vcombine.low %v1514_v29, %v1518_v13  ;;  %v1534_v39 = vld [vmem:[%s23258_s1 + $0x2ef8] sm:$0xff]  ;;  %v1569_v13 = vld [vmem:[%s23258_s1 + $0x3010] sm:$0xff] }
 0x5e3   :  { %11199 = vmatprep.subr.bf16.mxu0 %v15937_v40  ;;  %11732 = vmatprep.subr.bf16.mxu1 %v15939_v58  ;;  %v15987_v40 = vcombine.high %v1522_v30, %v1526_v23  ;;  %v1541_v58 = vld [vmem:[%s23258_s1 + $0x2f30] sm:$0xff] }
 0x5e4   :  { %v16001_v4 = vcombine.high %v1537_v41, %v1541_v58  ;;  %v16000_v55 = vcombine.low %v1537_v41, %v1541_v58  ;;  %v1586_v58 = vld [vmem:[%s23258_s1 + $0x3098] sm:$0xff] }
 0x5e6   :  { %11200 = vmatpush1.bf16.msra.mxu0 %v15936_v42  ;;  %11733 = vmatpush1.bf16.msra.mxu1 %v15938_v34  ;;  %v15986_v42 = vcombine.low %v1522_v30, %v1526_v23  ;;  %v1542_v34 = vld [vmem:[%s23258_s1 + $0x2f38] sm:$0xff]  ;;  %v1577_v23 = vld [vmem:[%s23258_s1 + $0x3050] sm:$0xff] }
 0x5e7   :  { %11201 = vmatprep.subr.bf16.mxu0 %v15945_v48  ;;  %11734 = vmatprep.subr.bf16.mxu1 %v15947_v49  ;;  %v15995_v48 = vcombine.high %v1530_v36, %v1534_v39  ;;  %v1549_v49 = vld [vmem:[%s23258_s1 + $0x2f70] sm:$0xff] }
 0x5e8   :  { %v16009_v0 = vcombine.high %v1545_v6, %v1549_v49  ;;  %v16008_v3 = vcombine.low %v1545_v6, %v1549_v49  ;;  %v1594_v49 = vld [vmem:[%s23258_s1 + $0x30d8] sm:$0xff] }
 0x5ea   :  { %11202 = vmatpush1.bf16.msra.mxu0 %v15944_v50  ;;  %11735 = vmatpush1.bf16.msra.mxu1 %v15946_v52  ;;  %v15994_v50 = vcombine.low %v1530_v36, %v1534_v39  ;;  %v1550_v52 = vld [vmem:[%s23258_s1 + $0x2f78] sm:$0xff]  ;;  %v1585_v39 = vld [vmem:[%s23258_s1 + $0x3090] sm:$0xff] }
 0x5eb   :  { %11203 = vmatprep.subr.bf16.mxu0 %v15953_v54  ;;  %11736 = vmatprep.subr.bf16.mxu1 %v15955_v60  ;;  %v16003_v54 = vcombine.high %v1538_v2, %v1542_v34  ;;  %v1557_v60 = vld [vmem:[%s23258_s1 + $0x2fb0] sm:$0xff] }
 0x5ec   :  { %v16017_v51 = vcombine.high %v1553_v7, %v1557_v60  ;;  %v16016_v29 = vcombine.low %v1553_v7, %v1557_v60  ;;  %v17134_v60 = vld [vmem:[%s23260_s3 + $0xc0] sm:$0xff]  }
 0x5ee   :  { %11204 = vmatpush1.bf16.msra.mxu0 %v15952_v61  ;;  %11737 = vmatpush1.bf16.msra.mxu1 %v15954_v28  ;;  %v16002_v61 = vcombine.low %v1538_v2, %v1542_v34  ;;  %v1558_v28 = vld [vmem:[%s23258_s1 + $0x2fb8] sm:$0xff]  ;;  %v1593_v34 = vld [vmem:[%s23258_s1 + $0x30d0] sm:$0xff] }
 0x5ef   :  { %11205 = vmatprep.subr.bf16.mxu0 %v15961_v44  ;;  %11738 = vmatprep.subr.bf16.mxu1 %v15963_v59  ;;  %v16011_v44 = vcombine.high %v1546_v14, %v1550_v52  ;;  %v1565_v59 = vld [vmem:[%s23258_s1 + $0x2ff0] sm:$0xff] }
 0x5f0   :  { %v16025_v16 = vcombine.high %v1561_v17, %v1565_v59  ;;  %v16024_v30 = vcombine.low %v1561_v17, %v1565_v59  ;;  %v17140_v17 = vld [vmem:[%s23260_s3 + $0x88] sm:$0xff]   ;;  %v17141_v59 = vld [vmem:[%s23260_s3 + $0x50] sm:$0xff]  }
 0x5f2   :  { %11206 = vmatpush1.bf16.msra.mxu0 %v15960_v9  ;;  %11739 = vmatpush1.bf16.msra.mxu1 %v15962_v11  ;;  %v16010_v9 = vcombine.low %v1546_v14, %v1550_v52  ;;  %v1566_v11 = vld [vmem:[%s23258_s1 + $0x2ff8] sm:$0xff] }
 0x5f3   :  { %11207 = vmatprep.subr.bf16.mxu0 %v15969_v12  ;;  %11740 = vmatprep.subr.bf16.mxu1 %v15971_v37  ;;  %v16019_v12 = vcombine.high %v1554_v19, %v1558_v28  ;;  %v1573_v37 = vld [vmem:[%s23258_s1 + $0x3030] sm:$0xff] }
 0x5f4   :  { %v16033_v24 = vcombine.high %v1569_v13, %v1573_v37  ;;  %v16032_v36 = vcombine.low %v1569_v13, %v1573_v37  ;;  %v17152_v13 = vld [vmem:[%s23260_s3 + $0xa0] sm:$0xff]   ;;  %v17153_v37 = vld [vmem:[%s23260_s3 + $0x68] sm:$0xff]  }
 0x5f6   :  { %11208 = vmatpush1.bf16.msra.mxu0 %v15968_v15  ;;  %11741 = vmatpush1.bf16.msra.mxu1 %v15970_v18  ;;  %v16018_v15 = vcombine.low %v1554_v19, %v1558_v28  ;;  %v1574_v18 = vld [vmem:[%s23258_s1 + $0x3038] sm:$0xff]  ;;  %v17137_v19 = vld [vmem:[%s23260_s3 + $0x48] sm:$0xff]  }
 0x5f7   :  { %11209 = vmatprep.subr.bf16.mxu0 %v15977_v5  ;;  %11742 = vmatprep.subr.bf16.mxu1 %v15979_v21  ;;  %v16027_v5 = vcombine.high %v1562_v10, %v1566_v11  ;;  %v1581_v21 = vld [vmem:[%s23258_s1 + $0x3070] sm:$0xff]  ;;  %v17138_v28 = vld [vmem:[%s23260_s3 + $0xc8] sm:$0xff]  }
 0x5f8   :  { %v16041_v41 = vcombine.high %v1577_v23, %v1581_v21  ;;  %v16040_v2 = vcombine.low %v1577_v23, %v1581_v21  ;;  %v17160_v23 = vld [vmem:[%s23260_s3 + $0xb0] sm:$0xff]   ;;  %v17161_v21 = vld [vmem:[%s23260_s3 + $0x78] sm:$0xff]  }
 0x5fa   :  { %11210 = vmatpush1.bf16.msra.mxu0 %v15976_v35  ;;  %11743 = vmatpush1.bf16.msra.mxu1 %v15978_v33  ;;  %v16026_v35 = vcombine.low %v1562_v10, %v1566_v11  ;;  %v1582_v33 = vld [vmem:[%s23258_s1 + $0x3078] sm:$0xff]  ;;  %v17149_v11 = vld [vmem:[%s23260_s3 + $0x60] sm:$0xff]  }
 0x5fb   :  { %11211 = vmatprep.subr.bf16.mxu0 %v15985_v38  ;;  %11744 = vmatprep.subr.bf16.mxu1 %v15987_v40  ;;  %v16035_v38 = vcombine.high %v1570_v62, %v1574_v18  ;;  %v1589_v40 = vld [vmem:[%s23258_s1 + $0x30b0] sm:$0xff]  ;;  %v17148_v10 = vld [vmem:[%s23260_s3 + $0x98] sm:$0xff]  }
 0x5fc   :  { %v16049_v6 = vcombine.high %v1585_v39, %v1589_v40 }
 0x5fe   :  { %11212 = vmatpush1.bf16.msra.mxu0 %v15984_v57  ;;  %11745 = vmatpush1.bf16.msra.mxu1 %v15986_v42  ;;  %v16034_v57 = vcombine.low %v1570_v62, %v1574_v18  ;;  %v1590_v42 = vld [vmem:[%s23258_s1 + $0x30b8] sm:$0xff]  ;;  %v17156_v62 = vld [vmem:[%s23260_s3 + $0xa8] sm:$0xff]   ;;  %v17157_v18 = vld [vmem:[%s23260_s3 + $0x70] sm:$0xff]  }
 0x5ff   :  { %11213 = vmatprep.subr.bf16.mxu0 %v15993_v45  ;;  %11746 = vmatprep.subr.bf16.mxu1 %v15995_v48  ;;  %v16043_v45 = vcombine.high %v1578_v27, %v1582_v33  ;;  %v1597_v48 = vld [vmem:[%s23258_s1 + $0x30f0] sm:$0xff]  ;;  %v16050_v14 = vcombine.low %v1586_v58, %v1590_v42 }
 0x600   :  { %v16057_v52 = vcombine.high %v1593_v34, %v1597_v48  ;;  %v16056_v7 = vcombine.low %v1593_v34, %v1597_v48  ;;  %v17178_v34 = vld [vmem:[%s23261_s5 + $0xd8] sm:$0xff]  }
 0x601   :  { %v17179_v48 = vld [vmem:[%s23261_s5 + $0x18] sm:$0xff]  }
 0x602   :  { %11214 = vmatpush1.bf16.msra.mxu0 %v15992_v46  ;;  %11747 = vmatpush1.bf16.msra.mxu1 %v15994_v50  ;;  %v16042_v46 = vcombine.low %v1578_v27, %v1582_v33  ;;  %v16051_v50 = vcombine.high %v1586_v58, %v1590_v42  ;;  %v17164_v27 = vld [vmem:[%s23260_s3 + $0xb8] sm:$0xff]   ;;  %v17165_v33 = vld [vmem:[%s23261_s5 + $0x40] sm:$0xff]   ;;  %v11816_v58 = vpack.c.bf16 %v11808_v26, %v11808_v26  ;;  %v17171_v42 = vld [vmem:[%s23261_s5 + $0x8] sm:$0xff]  }
 0x603   :  { %11215 = vmatprep.subr.bf16.mxu0 %v16001_v4  ;;  %11748 = vmatprep.subr.bf16.mxu1 %v16003_v54  ;;  %v16048_v4 = vcombine.low %v1585_v39, %v1589_v40  ;;  %v17168_v39 = vld [vmem:[%s23261_s5 + $0x80] sm:$0xff]   ;;  %v17169_v40 = vld [vmem:[%s23261_s5 + $0x48] sm:$0xff]   ;;  %v17176_v26 = vld [vmem:[%s23261_s5 + $0x90] sm:$0xff]  }
 0x606   :  { %11216 = vmatpush1.bf16.msra.mxu0 %v16000_v55  ;;  %11749 = vmatpush1.bf16.msra.mxu1 %v16002_v61  ;;  %v17133_v55 = vld [vmem:[%s23260_s3 + $0x40] sm:$0xff]  }
 0x607   :  { %11217 = vmatprep.subr.bf16.mxu0 %v16009_v0  ;;  %11750 = vmatprep.subr.bf16.mxu1 %v16011_v44  ;;  %v17135_v61 = vld [vmem:[%s23260_s3] sm:$0xff]   ;;  %v17139_v44 = vld [vmem:[%s23260_s3 + $0x8] sm:$0xff]  }
 0x608   :  { %v17136_v0 = vld [vmem:[%s23260_s3 + $0x80] sm:$0xff]  }
 0x60a   :  { %11218 = vmatpush1.bf16.msra.mxu0 %v16008_v3  ;;  %11751 = vmatpush1.bf16.msra.mxu1 %v16010_v9  ;;  %v11815_v3 = vpack.c.bf16 %v11807_v47, %v11807_v47  ;;  %v11817_v9 = vpack.c.bf16 %v11809_v31, %v11809_v31  ;;  %v17143_v47 = vld [vmem:[%s23260_s3 + $0x10] sm:$0xff]   ;;  %v17146_v31 = vld [vmem:[%s23260_s3 + $0xd8] sm:$0xff]  }
 0x60b   :  { %11219 = vmatprep.subr.bf16.mxu0 %v16017_v51  ;;  %11752 = vmatprep.subr.bf16.mxu1 %v16019_v12  ;;  %v17147_v51 = vld [vmem:[%s23260_s3 + $0x18] sm:$0xff]   ;;  %v17150_v12 = vld [vmem:[%s23260_s3 + $0xe0] sm:$0xff]  }
 0x60e   :  { %11220 = vmatpush1.bf16.msra.mxu0 %v16016_v29  ;;  %11753 = vmatpush1.bf16.msra.mxu1 %v16018_v15  ;;  %v17151_v29 = vld [vmem:[%s23260_s3 + $0x20] sm:$0xff]   ;;  %v17154_v15 = vld [vmem:[%s23260_s3 + $0xe8] sm:$0xff]  }
 0x60f   :  { %11221 = vmatprep.subr.bf16.mxu0 %v16025_v16  ;;  %11754 = vmatprep.subr.bf16.mxu1 %v16027_v5  ;;  %v17155_v16 = vld [vmem:[%s23260_s3 + $0x28] sm:$0xff]   ;;  %v17158_v5 = vld [vmem:[%s23260_s3 + $0xf0] sm:$0xff]  }
 0x612   :  { %11222 = vmatpush1.bf16.msra.mxu0 %v16024_v30  ;;  %11755 = vmatpush1.bf16.msra.mxu1 %v16026_v35  ;;  %v17159_v30 = vld [vmem:[%s23260_s3 + $0x30] sm:$0xff]   ;;  %v17162_v35 = vld [vmem:[%s23260_s3 + $0xf8] sm:$0xff]  }
 0x613   :  { %11232 = vmatprep.subr.bf16.mxu0 %v16033_v24  ;;  %11765 = vmatprep.subr.bf16.mxu1 %v16035_v38  ;;  %v17163_v24 = vld [vmem:[%s23260_s3 + $0x38] sm:$0xff]   ;;  %v17166_v38 = vld [vmem:[%s23261_s5 + $0xc0] sm:$0xff]  }
 0x615   :  { %11224 = vmatmul.mubr.bf16.vlgmr.msra.gmra.mrb[4].mxu0 %v19939_v32  ;;  %11757 = vmatmul.mubr.bf16.vlgmr.msra.gmra.mrb[4].mxu1 %v19939_v32  ;;  %v1598_v32 = vld [vmem:[%s23258_s1 + $0x30f8] sm:$0xff] }
 0x616   :  { %11233 = vmatpush1.bf16.msra.mxu0 %v16032_v36  ;;  %11766 = vmatpush1.bf16.msra.mxu1 %v16034_v57  ;;  %v16059_v54 = vcombine.high %v1594_v49, %v1598_v32  ;;  %v17167_v36 = vld [vmem:[%s23261_s5] sm:$0xff]   ;;  %v17170_v57 = vld [vmem:[%s23261_s5 + $0xc8] sm:$0xff]  }
 0x617   :  { %11234 = vmatprep.subr.bf16.mxu0 %v16041_v41  ;;  %11767 = vmatprep.subr.bf16.mxu1 %v16043_v45  ;;  %v11814_v41 = vpack.c.bf16 %v11806_v20, %v11806_v20  ;;  %v17172_v45 = vld [vmem:[%s23261_s5 + $0x88] sm:$0xff]   ;;  %v17175_v20 = vld [vmem:[%s23261_s5 + $0x10] sm:$0xff]  }
 0x618   :  { %11264 = vmatprep.mubr.bf16.mxu0 %v17383_v8  ;;  %11797 = vmatprep.mubr.bf16.mxu1 %v17383_v8  ;;  %v16058_v8 = vcombine.low %v1594_v49, %v1598_v32  ;;  %v17182_v49 = vld [vmem:[%s23261_s5 + $0xe0] sm:$0xff]  }
 0x619   :  { %v17183_v32 = vld [vmem:[%s23261_s5 + $0x20] sm:$0xff]  }
 0x61a   :  { %11235 = vmatpush1.bf16.msra.mxu0 %v16040_v2  ;;  %11768 = vmatpush1.bf16.msra.mxu1 %v16042_v46  ;;  %v17177_v2 = vld [vmem:[%s23261_s5 + $0x58] sm:$0xff]  }
 0x61b   :  { %11236 = vmatprep.subr.bf16.mxu0 %v16049_v6  ;;  %11769 = vmatprep.subr.bf16.mxu1 %v16051_v50  ;;  %v17180_v46 = vld [vmem:[%s23261_s5 + $0x98] sm:$0xff]   ;;  %v17181_v6 = vld [vmem:[%s23261_s5 + $0x60] sm:$0xff]  }
 0x61c   :  { %v17184_v50 = vld [vmem:[%s23261_s5 + $0xa0] sm:$0xff]  }
 0x61e   :  { %11237 = vmatpush1.bf16.msra.mxu0 %v16048_v4  ;;  %11770 = vmatpush1.bf16.msra.mxu1 %v16050_v14  ;;  %v17185_v4 = vld [vmem:[%s23261_s5 + $0x68] sm:$0xff]  }
 0x61f   :  { %11238 = vmatprep.subr.bf16.mxu0 %v16057_v52  ;;  %11771 = vmatprep.subr.bf16.mxu1 %v16059_v54  ;;  %v17186_v14 = vld [vmem:[%s23261_s5 + $0xe8] sm:$0xff]  }
 0x620   :  { %v17187_v52 = vld [vmem:[%s23261_s5 + $0x28] sm:$0xff]  }
 0x621   :  { %v17188_v54 = vld [vmem:[%s23261_s5 + $0xa8] sm:$0xff]  }
 0x622   :  { %11239 = vmatpush1.bf16.msra.mxu0 %v16056_v7  ;;  %11772 = vmatpush1.bf16.msra.mxu1 %v16058_v8  ;;  %v17190_v7 = vld [vmem:[%s23261_s5 + $0xf0] sm:$0xff]  }
 0x623   :  { %16620 = vmatprep.subr.bf16.mxu0 %v17133_v55  ;;  %16642 = vmatprep.subr.bf16.mxu1 %v17134_v60  ;;  %v17189_v55 = vld [vmem:[%s23261_s5 + $0x70] sm:$0xff]  }
 0x624   :  { %v17191_v60 = vld [vmem:[%s23261_s5 + $0x30] sm:$0xff]  }
 0x625   :  { %16062 = vmatmul.mubr.msk.bf16.vlgmr.msra.gmra.mrb[4].mxu0 %vm9670_vm0, %v19997_v25  ;;  %16063 = vmatmul.mubr.msk.bf16.vlgmr.msra.gmra.mrb[4].mxu1 %vm9670_vm0, %v19997_v25  ;;  %v17145_v25 = vld [vmem:[%s23260_s3 + $0x58] sm:$0xff]   ;;  %v17192_v8 = vld [vmem:[%s23261_s5 + $0xb0] sm:$0xff]  }
 0x626   :  { %16621 = vmatpush3.bf16.msra.mxu0 %v17135_v61  ;;  %12117 = vmatprep.mubr.bf16.mxu0 %v11815_v3  ;;  %v17193_v61 = vld [vmem:[%s23261_s5 + $0x78] sm:$0xff]   ;;  %v17198_v3 = vld [vmem:[%s23261_s5 + $0x1c0] sm:$0xff]  }
 0x627   :  { %16643 = vmatpush3.bf16.msra.mxu1 %v17136_v0  ;;  %12157 = vmatprep.mubr.bf16.mxu1 %v11817_v9  ;;  %v17194_v0 = vld [vmem:[%s23261_s5 + $0xf8] sm:$0xff]   ;;  %v1623_v9 = vsub.s32 5, %v17490_v43 }
 0x628   :  { %16622 = vmatprep.subr.bf16.mxu0 %v17137_v19  ;;  %16644 = vmatprep.subr.bf16.mxu1 %v17138_v28  ;;  %v17195_v19 = vld [vmem:[%s23261_s5 + $0x38] sm:$0xff]  }
 0x629   :  { %v17196_v28 = vld [vmem:[%s23261_s5 + $0xb8] sm:$0xff]  }
 0x62a   :  { %16623 = vmatpush3.bf16.msra.mxu0 %v17139_v44  ;;  %v17197_v44 = vld [vmem:[%s23261_s5 + $0x140] sm:$0xff]  }
 0x62b   :  { %16645 = vmatpush3.bf16.msra.mxu1 %v17140_v17  ;;  %16624 = vmatprep.subr.bf16.mxu0 %v17141_v59  ;;  %v1619_v17 = vsub.s32 4, %v17490_v43  ;;  %v1627_v59 = vsub.s32 6, %v17490_v43 }
 0x62c   :  { %16646 = vmatprep.subr.bf16.mxu1 %v17142_v22  ;;  %v1631_v22 = vsub.s32 7, %v17490_v43 }
 0x62e   :  { %16625 = vmatpush3.bf16.msra.mxu0 %v17143_v47  ;;  %v17381_v47 = vld [vmem:[%s23262_s2] sm:$0xff] }
 0x62f   :  { %16647 = vmatpush3.bf16.msra.mxu1 %v17144_v63  ;;  %16626 = vmatprep.subr.bf16.mxu0 %v17145_v25  ;;  %v1620_v63 = vrot.slane %v17381_v47, %v1619_v17  ;;  %v1628_v25 = vrot.slane %v17381_v47, %v1627_v59  ;;  %v17227_v59 = vld [vmem:[%s23261_s5 + $0x138] sm:$0xff]  }
 0x630   :  { %16648 = vmatprep.subr.bf16.mxu1 %v17146_v31  ;;  %v1624_v31 = vrot.slane %v17381_v47, %v1623_v9 }
 0x632   :  { %16627 = vmatpush3.bf16.msra.mxu0 %v17147_v51  ;;  %v1632_v51 = vrot.slane %v17381_v47, %v1631_v22 }
 0x633   :  { %16649 = vmatpush3.bf16.msra.mxu1 %v17148_v10  ;;  %16628 = vmatprep.subr.bf16.mxu0 %v17149_v11 }
 0x634   :  { %16650 = vmatprep.subr.bf16.mxu1 %v17150_v12 }
 0x636   :  { %16629 = vmatpush3.bf16.msra.mxu0 %v17151_v29 }
 0x637   :  { %16651 = vmatpush3.bf16.msra.mxu1 %v17152_v13  ;;  %16630 = vmatprep.subr.bf16.mxu0 %v17153_v37 }
 0x638   :  { %16652 = vmatprep.subr.bf16.mxu1 %v17154_v15 }
 0x63a   :  { %16631 = vmatpush3.bf16.msra.mxu0 %v17155_v16 }
 0x63b   :  { %16653 = vmatpush3.bf16.msra.mxu1 %v17156_v62  ;;  %16632 = vmatprep.subr.bf16.mxu0 %v17157_v18 }
 0x63c   :  { %16654 = vmatprep.subr.bf16.mxu1 %v17158_v5 }
 0x63e   :  { %16633 = vmatpush3.bf16.msra.mxu0 %v17159_v30 }
 0x63f   :  { %16655 = vmatpush3.bf16.msra.mxu1 %v17160_v23  ;;  %16634 = vmatprep.subr.bf16.mxu0 %v17161_v21 }
 0x640   :  { %16656 = vmatprep.subr.bf16.mxu1 %v17162_v35 }
 0x642   :  { %16635 = vmatpush3.bf16.msra.mxu0 %v17163_v24 }
 0x643   :  { %16657 = vmatpush3.bf16.msra.mxu1 %v17164_v27  ;;  %16664 = vmatprep.subr.bf16.mxu0 %v17165_v33  ;;  %v17199_v27 = vld [vmem:[%s23261_s5 + $0x100] sm:$0xff]  }
 0x644   :  { %16686 = vmatprep.subr.bf16.mxu1 %v17166_v38 }
 0x645   :  { %12118 = vmatmul.mubr.bf16.vlgmr.msra.gmra.mrb[8].mxu0 %v11814_v41  ;;  %v17203_v41 = vld [vmem:[%s23261_s5 + $0x108] sm:$0xff]  }
 0x646   :  { %12158 = vmatmul.mubr.bf16.vlgmr.msra.gmra.mrb[8].mxu1 %v11816_v58  ;;  %16665 = vmatpush3.bf16.msra.mxu0 %v17167_v36  ;;  %v17200_v36 = vld [vmem:[%s23261_s5 + $0x180] sm:$0xff]   ;;  %v17204_v58 = vld [vmem:[%s23261_s5 + $0x188] sm:$0xff]  }
 0x647   :  { %16687 = vmatpush3.bf16.msra.mxu1 %v17168_v39  ;;  %16666 = vmatprep.subr.bf16.mxu0 %v17169_v40  ;;  %v17201_v40 = vld [vmem:[%s23261_s5 + $0x148] sm:$0xff]  }
 0x648   :  { %16688 = vmatprep.subr.bf16.mxu1 %v17170_v57  ;;  %v17202_v57 = vld [vmem:[%s23261_s5 + $0x1c8] sm:$0xff]  }
 0x64a   :  { %16667 = vmatpush3.bf16.msra.mxu0 %v17171_v42  ;;  %v17205_v42 = vld [vmem:[%s23261_s5 + $0x150] sm:$0xff]  }
 0x64b   :  { %16689 = vmatpush3.bf16.msra.mxu1 %v17172_v45  ;;  %16668 = vmatprep.subr.bf16.mxu0 %v17173_v56  ;;  %v17206_v45 = vld [vmem:[%s23261_s5 + $0x1d0] sm:$0xff]  }
 0x64c   :  { %16690 = vmatprep.subr.bf16.mxu1 %v17174_v1  ;;  %v17207_v56 = vld [vmem:[%s23261_s5 + $0x110] sm:$0xff]  }
 0x64d   :  { %v17208_v1 = vld [vmem:[%s23261_s5 + $0x190] sm:$0xff]  }
 0x64e   :  { %16669 = vmatpush3.bf16.msra.mxu0 %v17175_v20  ;;  %v17209_v20 = vld [vmem:[%s23261_s5 + $0x158] sm:$0xff]  }
 0x64f   :  { %16691 = vmatpush3.bf16.msra.mxu1 %v17176_v26  ;;  %16670 = vmatprep.subr.bf16.mxu0 %v17177_v2  ;;  %v17210_v26 = vld [vmem:[%s23261_s5 + $0x1d8] sm:$0xff]  }
 0x650   :  { %16692 = vmatprep.subr.bf16.mxu1 %v17178_v34  ;;  %v17211_v2 = vld [vmem:[%s23261_s5 + $0x118] sm:$0xff]  }
 0x651   :  { %v17212_v34 = vld [vmem:[%s23261_s5 + $0x198] sm:$0xff]  }
 0x652   :  { %16671 = vmatpush3.bf16.msra.mxu0 %v17179_v48  ;;  %v17213_v48 = vld [vmem:[%s23261_s5 + $0x160] sm:$0xff]  }
 0x653   :  { %16693 = vmatpush3.bf16.msra.mxu1 %v17180_v46  ;;  %16672 = vmatprep.subr.bf16.mxu0 %v17181_v6  ;;  %v17214_v46 = vld [vmem:[%s23261_s5 + $0x1e0] sm:$0xff]  }
 0x654   :  { %16694 = vmatprep.subr.bf16.mxu1 %v17182_v49  ;;  %v17215_v6 = vld [vmem:[%s23261_s5 + $0x120] sm:$0xff]  }
 0x655   :  { %v17216_v49 = vld [vmem:[%s23261_s5 + $0x1a0] sm:$0xff]  }
 0x656   :  { %16673 = vmatpush3.bf16.msra.mxu0 %v17183_v32  ;;  %v17217_v32 = vld [vmem:[%s23261_s5 + $0x168] sm:$0xff]  }
 0x657   :  { %16695 = vmatpush3.bf16.msra.mxu1 %v17184_v50  ;;  %16674 = vmatprep.subr.bf16.mxu0 %v17185_v4  ;;  %v17218_v50 = vld [vmem:[%s23261_s5 + $0x1e8] sm:$0xff]  }
 0x658   :  { %16696 = vmatprep.subr.bf16.mxu1 %v17186_v14  ;;  %v17219_v4 = vld [vmem:[%s23261_s5 + $0x128] sm:$0xff]  }
 0x659   :  { %v17220_v14 = vld [vmem:[%s23261_s5 + $0x1a8] sm:$0xff]  }
 0x65a   :  { %16675 = vmatpush3.bf16.msra.mxu0 %v17187_v52  ;;  %v17221_v52 = vld [vmem:[%s23261_s5 + $0x170] sm:$0xff]  }
 0x65b   :  { %16697 = vmatpush3.bf16.msra.mxu1 %v17188_v54  ;;  %16676 = vmatprep.subr.bf16.mxu0 %v17189_v55  ;;  %v17222_v54 = vld [vmem:[%s23261_s5 + $0x1f0] sm:$0xff]  }
 0x65c   :  { %16698 = vmatprep.subr.bf16.mxu1 %v17190_v7  ;;  %v17223_v55 = vld [vmem:[%s23261_s5 + $0x130] sm:$0xff]  }
 0x65d   :  { %v17224_v7 = vld [vmem:[%s23261_s5 + $0x1b0] sm:$0xff]  }
 0x65e   :  { %16677 = vmatpush3.bf16.msra.mxu0 %v17191_v60  ;;  %v17225_v60 = vld [vmem:[%s23261_s5 + $0x178] sm:$0xff]  }
 0x65f   :  { %16699 = vmatpush3.bf16.msra.mxu1 %v17192_v8  ;;  %16678 = vmatprep.subr.bf16.mxu0 %v17193_v61  ;;  %v17226_v61 = vld [vmem:[%s23261_s5 + $0x1f8] sm:$0xff]  }
 0x660   :  { %16700 = vmatprep.subr.bf16.mxu1 %v17194_v0 }
 0x662   :  { %16679 = vmatpush3.bf16.msra.mxu0 %v17195_v19  ;;  %v16064_v19 = vld [vmem:[%s23263_s4] ss:$0 sm:$0xff] }
 0x663   :  { %16701 = vmatpush3.bf16.msra.mxu1 %v17196_v28  ;;  %16708 = vmatprep.subr.bf16.mxu0 %v17197_v44 }
 0x664   :  { %16730 = vmatprep.subr.bf16.mxu1 %v17198_v3 }
 0x6f8   :  { %v11266_v10 = vpop.f32.mrb[4].mxu0  ;;  %v11799_v12 = vpop.f32.mrb[4].mxu1 }
 0x6f9   :  { %v16932_v11 = vadd.f32 %v11266_v10, %v1620_v63  ;;  %v11268_v29 = vpop.f32.mrb[5].mxu0  ;;  %v16934_v13 = vadd.f32 %v11799_v12, %v1628_v25  ;;  %v11801_v15 = vpop.f32.mrb[5].mxu1  ;;  %v17228_v63 = vld [vmem:[%s23261_s5 + $0x1b8] sm:$0xff]   ;;  %v17229_v25 = vld [vmem:[%s23261_s5 + $0x240] sm:$0xff]  }
 0x6fa   :  { %v16933_v37 = vadd.f32 %v11268_v29, %v1624_v31  ;;  %v11270_v16 = vpop.f32.mrb[6].mxu0  ;;  %v16935_v18 = vadd.f32 %v11801_v15, %v1632_v51  ;;  %v11803_v5 = vpop.f32.mrb[6].mxu1  ;;  %v17230_v10 = vld [vmem:[%s23261_s5 + $0x2c0] sm:$0xff]   ;;  %v17235_v15 = vld [vmem:[%s23261_s5 + $0x208] sm:$0xff]  }
 0x6fb   :  { %v11810_v62 = vmax.f32 %v16932_v11, 0.0  ;;  %v11271_v43 = vpop.f32.mrb[7].mxu0  ;;  %v11812_v30 = vmax.f32 %v16934_v13, 0.0  ;;  %v11804_v21 = vpop.f32.mrb[7].mxu1  ;;  %v17231_v12 = vld [vmem:[%s23261_s5 + $0x200] sm:$0xff]   ;;  %v17233_v13 = vld [vmem:[%s23261_s5 + $0x248] sm:$0xff]  }
 0x6fc   :  { %v11811_v23 = vmax.f32 %v16933_v37, 0.0  ;;  %v11813_v35 = vmax.f32 %v16935_v18, 0.0  ;;  %v17232_v29 = vld [vmem:[%s23261_s5 + $0x280] sm:$0xff]   ;;  %v17234_v37 = vld [vmem:[%s23261_s5 + $0x2c8] sm:$0xff]   ;;  %v17238_v18 = vld [vmem:[%s23261_s5 + $0x2d0] sm:$0xff]  }
 0x6fd   :  { %v22644_v33 = vpack.c.bf16 %v11810_v62, %v11810_v62  ;;  %v22651_v39 = vpack.c.bf16 %v11812_v30, %v11812_v30  ;;  %v17236_v16 = vld [vmem:[%s23261_s5 + $0x288] sm:$0xff]   ;;  %v17237_v62 = vld [vmem:[%s23261_s5 + $0x250] sm:$0xff]   ;;  %v17241_v30 = vld [vmem:[%s23261_s5 + $0x258] sm:$0xff]  }
 0x6fe   :  { %v22639_v24 = vpack.c.bf16 %v11811_v23, %v11811_v23  ;;  %v22646_v38 = vpack.c.bf16 %v11813_v35, %v11813_v35  ;;  %v17239_v5 = vld [vmem:[%s23261_s5 + $0x210] sm:$0xff]   ;;  %v17242_v23 = vld [vmem:[%s23261_s5 + $0x2d8] sm:$0xff]  }
 0x6ff   :  { %v17240_v43 = vld [vmem:[%s23261_s5 + $0x290] sm:$0xff]   ;;  %v17243_v21 = vld [vmem:[%s23261_s5 + $0x218] sm:$0xff]  }
 0x700   :  { %12460 = vmatprep.mubr.bf16.mxu0 %v22639_v24  ;;  %12500 = vmatprep.mubr.bf16.mxu1 %v22646_v38  ;;  %v17244_v35 = vld [vmem:[%s23261_s5 + $0x298] sm:$0xff]  }
 0x701   :  { %12461 = vmatmul.mubr.bf16.vlgmr.msra.gmra.mrb[12].mxu0 %v22644_v33  ;;  %12501 = vmatmul.mubr.bf16.vlgmr.msra.gmra.mrb[12].mxu1 %v22651_v39 }
 0x702   :  { %16709 = vmatpush3.bf16.msra.mxu0 %v17199_v27  ;;  %16731 = vmatpush3.bf16.msra.mxu1 %v17200_v36  ;;  %v17245_v27 = vld [vmem:[%s23261_s5 + $0x260] sm:$0xff]  }
 0x703   :  { %12805 = vmatprep.mubr.bf16.mxu0 %v22639_v24  ;;  %12845 = vmatprep.mubr.bf16.mxu1 %v22646_v38  ;;  %v17246_v36 = vld [vmem:[%s23261_s5 + $0x2e0] sm:$0xff]  }
 0x704   :  { %16710 = vmatprep.subr.bf16.mxu0 %v17201_v40  ;;  %16732 = vmatprep.subr.bf16.mxu1 %v17202_v57  ;;  %v17247_v40 = vld [vmem:[%s23261_s5 + $0x220] sm:$0xff]  }
 0x705   :  { %v17248_v57 = vld [vmem:[%s23261_s5 + $0x2a0] sm:$0xff]  }
 0x706   :  { %16711 = vmatpush3.bf16.msra.mxu0 %v17203_v41  ;;  %16733 = vmatpush3.bf16.msra.mxu1 %v17204_v58  ;;  %v17249_v41 = vld [vmem:[%s23261_s5 + $0x268] sm:$0xff]  }
 0x707   :  { %16712 = vmatprep.subr.bf16.mxu0 %v17205_v42  ;;  %16734 = vmatprep.subr.bf16.mxu1 %v17206_v45  ;;  %v17250_v58 = vld [vmem:[%s23261_s5 + $0x2e8] sm:$0xff]  }
 0x708   :  { %v17251_v42 = vld [vmem:[%s23261_s5 + $0x228] sm:$0xff]  }
 0x709   :  { %v17252_v45 = vld [vmem:[%s23261_s5 + $0x2a8] sm:$0xff]  }
 0x70a   :  { %16713 = vmatpush3.bf16.msra.mxu0 %v17207_v56  ;;  %16735 = vmatpush3.bf16.msra.mxu1 %v17208_v1  ;;  %v17253_v56 = vld [vmem:[%s23261_s5 + $0x270] sm:$0xff]  }
 0x70b   :  { %16714 = vmatprep.subr.bf16.mxu0 %v17209_v20  ;;  %16736 = vmatprep.subr.bf16.mxu1 %v17210_v26  ;;  %v17254_v1 = vld [vmem:[%s23261_s5 + $0x2f0] sm:$0xff]  }
 0x70c   :  { %v17255_v20 = vld [vmem:[%s23261_s5 + $0x230] sm:$0xff]  }
 0x70d   :  { %v17256_v26 = vld [vmem:[%s23261_s5 + $0x2b0] sm:$0xff]  }
 0x70e   :  { %16715 = vmatpush3.bf16.msra.mxu0 %v17211_v2  ;;  %16737 = vmatpush3.bf16.msra.mxu1 %v17212_v34  ;;  %v17257_v2 = vld [vmem:[%s23261_s5 + $0x278] sm:$0xff]  }
 0x70f   :  { %16716 = vmatprep.subr.bf16.mxu0 %v17213_v48  ;;  %16738 = vmatprep.subr.bf16.mxu1 %v17214_v46  ;;  %v17258_v34 = vld [vmem:[%s23261_s5 + $0x2f8] sm:$0xff]  }
 0x710   :  { %v17259_v48 = vld [vmem:[%s23261_s5 + $0x238] sm:$0xff]  }
 0x711   :  { %v17260_v46 = vld [vmem:[%s23261_s5 + $0x2b8] sm:$0xff]  }
 0x712   :  { %16717 = vmatpush3.bf16.msra.mxu0 %v17215_v6  ;;  %16739 = vmatpush3.bf16.msra.mxu1 %v17216_v49  ;;  %v17261_v6 = vld [vmem:[%s23261_s5 + $0x340] sm:$0xff]  }
 0x713   :  { %16718 = vmatprep.subr.bf16.mxu0 %v17217_v32  ;;  %16740 = vmatprep.subr.bf16.mxu1 %v17218_v50  ;;  %v17262_v49 = vld [vmem:[%s23261_s5 + $0x3c0] sm:$0xff]  }
 0x714   :  { %v17263_v32 = vld [vmem:[%s23261_s5 + $0x300] sm:$0xff]  }
 0x715   :  { %v17264_v50 = vld [vmem:[%s23261_s5 + $0x380] sm:$0xff]  }
 0x716   :  { %16719 = vmatpush3.bf16.msra.mxu0 %v17219_v4  ;;  %16741 = vmatpush3.bf16.msra.mxu1 %v17220_v14  ;;  %v17265_v4 = vld [vmem:[%s23261_s5 + $0x348] sm:$0xff]  }
 0x717   :  { %16720 = vmatprep.subr.bf16.mxu0 %v17221_v52  ;;  %16742 = vmatprep.subr.bf16.mxu1 %v17222_v54  ;;  %v17266_v14 = vld [vmem:[%s23261_s5 + $0x3c8] sm:$0xff]  }
 0x718   :  { %v16636_v8 = vpop.f32.mrb[8].mxu0  ;;  %v17267_v52 = vld [vmem:[%s23261_s5 + $0x308] sm:$0xff]  }
 0x719   :  { %v16658_v0 = vpop.f32.mrb[8].mxu1  ;;  %v16637_v28 = vpop.f32.mrb[9].mxu0  ;;  %v17268_v54 = vld [vmem:[%s23261_s5 + $0x388] sm:$0xff]  }
 0x71a   :  { %v16638_v44 = vadd.f32 %v16637_v28, %v16636_v8  ;;  %v16659_v3 = vpop.f32.mrb[9].mxu1  ;;  %16721 = vmatpush3.bf16.msra.mxu0 %v17223_v55  ;;  %v16639_v17 = vpop.f32.mrb[10].mxu0  ;;  %16743 = vmatpush3.bf16.msra.mxu1 %v17224_v7  ;;  %v17269_v55 = vld [vmem:[%s23261_s5 + $0x350] sm:$0xff]   ;;  %v17276_v28 = vld [vmem:[%s23261_s5 + $0x398] sm:$0xff]  }
 0x71b   :  { %v16660_v9 = vadd.f32 %v16659_v3, %v16658_v0  ;;  %v16661_v22 = vpop.f32.mrb[10].mxu1  ;;  %v16640_v47 = vpop.f32.mrb[11].mxu0  ;;  %16722 = vmatprep.subr.bf16.mxu0 %v17225_v60  ;;  %16744 = vmatprep.subr.bf16.mxu1 %v17226_v61  ;;  %v17270_v7 = vld [vmem:[%s23261_s5 + $0x3d0] sm:$0xff]   ;;  %v17273_v61 = vld [vmem:[%s23261_s5 + $0x358] sm:$0xff]   ;;  %v17278_v3 = vld [vmem:[%s23261_s5 + $0x3e0] sm:$0xff]  }
 0x71c   :  { %v12120_v31 = vadd.f32 %v16638_v44, %v16064_v19  ;;  %v16662_v51 = vpop.f32.mrb[11].mxu1  ;;  %v17271_v60 = vld [vmem:[%s23261_s5 + $0x310] sm:$0xff]   ;;  %v17274_v0 = vld [vmem:[%s23261_s5 + $0x3d8] sm:$0xff]   ;;  %v17277_v44 = vld [vmem:[%s23261_s5 + $0x360] sm:$0xff]  }
 0x71d   :  { %v17272_v8 = vld [vmem:[%s23261_s5 + $0x390] sm:$0xff]   ;;  %v17275_v19 = vld [vmem:[%s23261_s5 + $0x318] sm:$0xff]   ;;  %v17279_v17 = vld [vmem:[%s23261_s5 + $0x320] sm:$0xff]  }
 0x71e   :  { %v22752_v11 = vadd.f32 %v16660_v9, %v12120_v31  ;;  %16723 = vmatpush3.bf16.msra.mxu0 %v17227_v59  ;;  %16745 = vmatpush3.bf16.msra.mxu1 %v17228_v63  ;;  %v17280_v59 = vld [vmem:[%s23261_s5 + $0x3a0] sm:$0xff]   ;;  %v17281_v9 = vld [vmem:[%s23261_s5 + $0x368] sm:$0xff]   ;;  %v17286_v31 = vld [vmem:[%s23261_s5 + $0x3f0] sm:$0xff]  }
 0x71f   :  { %16752 = vmatprep.subr.bf16.mxu0 %v17229_v25  ;;  %16774 = vmatprep.subr.bf16.mxu1 %v17230_v10  ;;  %v17282_v22 = vld [vmem:[%s23261_s5 + $0x3e8] sm:$0xff]   ;;  %v17285_v25 = vld [vmem:[%s23261_s5 + $0x370] sm:$0xff]  }
 0x720   :  { %v17283_v47 = vld [vmem:[%s23261_s5 + $0x328] sm:$0xff]   ;;  %v17287_v51 = vld [vmem:[%s23261_s5 + $0x330] sm:$0xff]  }
 0x721   :  { %12806 = vmatmul.mubr.bf16.vlgmr.msra.gmra.mrb[16].mxu0 %v22644_v33  ;;  %12846 = vmatmul.mubr.bf16.vlgmr.msra.gmra.mrb[16].mxu1 %v22651_v39  ;;  %v17284_v63 = vld [vmem:[%s23261_s5 + $0x3a8] sm:$0xff]   ;;  %v17288_v10 = vld [vmem:[%s23261_s5 + $0x3b0] sm:$0xff]  }
 0x722   :  { %16753 = vmatpush3.bf16.msra.mxu0 %v17231_v12  ;;  %13150 = vmatprep.mubr.bf16.mxu0 %v22639_v24  ;;  %v17289_v12 = vld [vmem:[%s23261_s5 + $0x378] sm:$0xff]  }
 0x723   :  { %16775 = vmatpush3.bf16.msra.mxu1 %v17232_v29  ;;  %13190 = vmatprep.mubr.bf16.mxu1 %v22646_v38  ;;  %v17290_v29 = vld [vmem:[%s23261_s5 + $0x3f8] sm:$0xff]  }
 0x724   :  { %16754 = vmatprep.subr.bf16.mxu0 %v17233_v13  ;;  %16776 = vmatprep.subr.bf16.mxu1 %v17234_v37  ;;  %v17291_v13 = vld [vmem:[%s23261_s5 + $0x338] sm:$0xff]  }
 0x725   :  { %v17292_v37 = vld [vmem:[%s23261_s5 + $0x3b8] sm:$0xff]  }
 0x726   :  { %16755 = vmatpush3.bf16.msra.mxu0 %v17235_v15  ;;  %v17293_v15 = vld [vmem:[%s23261_s5 + $0x440] sm:$0xff]  }
 0x727   :  { %16777 = vmatpush3.bf16.msra.mxu1 %v17236_v16  ;;  %16756 = vmatprep.subr.bf16.mxu0 %v17237_v62  ;;  %v17294_v16 = vld [vmem:[%s23261_s5 + $0x4c0] sm:$0xff]  }
 0x728   :  { %16778 = vmatprep.subr.bf16.mxu1 %v17238_v18  ;;  %v17295_v62 = vld [vmem:[%s23261_s5 + $0x400] sm:$0xff]  }
 0x729   :  { %v17296_v18 = vld [vmem:[%s23261_s5 + $0x480] sm:$0xff]  }
 0x72a   :  { %16757 = vmatpush3.bf16.msra.mxu0 %v17239_v5  ;;  %v17297_v5 = vld [vmem:[%s23261_s5 + $0x448] sm:$0xff]  }
 0x72b   :  { %16779 = vmatpush3.bf16.msra.mxu1 %v17240_v43  ;;  %16758 = vmatprep.subr.bf16.mxu0 %v17241_v30  ;;  %v17298_v43 = vld [vmem:[%s23261_s5 + $0x4c8] sm:$0xff]  }
 0x72c   :  { %16780 = vmatprep.subr.bf16.mxu1 %v17242_v23  ;;  %v17299_v30 = vld [vmem:[%s23261_s5 + $0x408] sm:$0xff]  }
 0x72d   :  { %v17300_v23 = vld [vmem:[%s23261_s5 + $0x488] sm:$0xff]  }
 0x72e   :  { %16759 = vmatpush3.bf16.msra.mxu0 %v17243_v21  ;;  %v17301_v21 = vld [vmem:[%s23261_s5 + $0x450] sm:$0xff]  }
 0x72f   :  { %16781 = vmatpush3.bf16.msra.mxu1 %v17244_v35  ;;  %16760 = vmatprep.subr.bf16.mxu0 %v17245_v27  ;;  %v17302_v35 = vld [vmem:[%s23261_s5 + $0x4d0] sm:$0xff]  }
 0x730   :  { %16782 = vmatprep.subr.bf16.mxu1 %v17246_v36  ;;  %v17303_v27 = vld [vmem:[%s23261_s5 + $0x410] sm:$0xff]  }
 0x731   :  { %v17304_v36 = vld [vmem:[%s23261_s5 + $0x490] sm:$0xff]  }
 0x732   :  { %16761 = vmatpush3.bf16.msra.mxu0 %v17247_v40  ;;  %v17305_v40 = vld [vmem:[%s23261_s5 + $0x458] sm:$0xff]  }
 0x733   :  { %16783 = vmatpush3.bf16.msra.mxu1 %v17248_v57  ;;  %16762 = vmatprep.subr.bf16.mxu0 %v17249_v41  ;;  %v17306_v57 = vld [vmem:[%s23261_s5 + $0x4d8] sm:$0xff]  }
 0x734   :  { %16784 = vmatprep.subr.bf16.mxu1 %v17250_v58  ;;  %v17307_v41 = vld [vmem:[%s23261_s5 + $0x418] sm:$0xff]  }
 0x735   :  { %v17308_v58 = vld [vmem:[%s23261_s5 + $0x498] sm:$0xff]  }
 0x736   :  { %16763 = vmatpush3.bf16.msra.mxu0 %v17251_v42  ;;  %v17309_v42 = vld [vmem:[%s23261_s5 + $0x460] sm:$0xff]  }
 0x737   :  { %16785 = vmatpush3.bf16.msra.mxu1 %v17252_v45  ;;  %16764 = vmatprep.subr.bf16.mxu0 %v17253_v56  ;;  %v17310_v45 = vld [vmem:[%s23261_s5 + $0x4e0] sm:$0xff]  }
 0x738   :  { %16786 = vmatprep.subr.bf16.mxu1 %v17254_v1  ;;  %v17311_v56 = vld [vmem:[%s23261_s5 + $0x420] sm:$0xff]  }
 0x739   :  { %v17312_v1 = vld [vmem:[%s23261_s5 + $0x4a0] sm:$0xff]  }
 0x73a   :  { %16765 = vmatpush3.bf16.msra.mxu0 %v17255_v20  ;;  %v17313_v20 = vld [vmem:[%s23261_s5 + $0x468] sm:$0xff]  }
 0x73b   :  { %16787 = vmatpush3.bf16.msra.mxu1 %v17256_v26  ;;  %16766 = vmatprep.subr.bf16.mxu0 %v17257_v2  ;;  %v17314_v26 = vld [vmem:[%s23261_s5 + $0x4e8] sm:$0xff]  }
 0x73c   :  { %16788 = vmatprep.subr.bf16.mxu1 %v17258_v34  ;;  %v17315_v2 = vld [vmem:[%s23261_s5 + $0x428] sm:$0xff]  }
 0x73d   :  { %v17316_v34 = vld [vmem:[%s23261_s5 + $0x4a8] sm:$0xff]  }
 0x73e   :  { %16767 = vmatpush3.bf16.msra.mxu0 %v17259_v48  ;;  %v17317_v48 = vld [vmem:[%s23261_s5 + $0x470] sm:$0xff]  }
 0x73f   :  { %16789 = vmatpush3.bf16.msra.mxu1 %v17260_v46  ;;  %16796 = vmatprep.subr.bf16.mxu0 %v17261_v6  ;;  %v17318_v46 = vld [vmem:[%s23261_s5 + $0x4f0] sm:$0xff]  }
 0x740   :  { %16818 = vmatprep.subr.bf16.mxu1 %v17262_v49  ;;  %v17319_v6 = vld [vmem:[%s23261_s5 + $0x430] sm:$0xff]  }
 0x741   :  { %13151 = vmatmul.mubr.bf16.vlgmr.msra.gmra.mrb[20].mxu0 %v22644_v33  ;;  %v17320_v49 = vld [vmem:[%s23261_s5 + $0x4b0] sm:$0xff]  }
 0x742   :  { %13191 = vmatmul.mubr.bf16.vlgmr.msra.gmra.mrb[20].mxu1 %v22651_v39  ;;  %16797 = vmatpush3.bf16.msra.mxu0 %v17263_v32  ;;  %v17321_v32 = vld [vmem:[%s23261_s5 + $0x478] sm:$0xff]  }
 0x743   :  { %13495 = vmatprep.mubr.bf16.mxu0 %v22639_v24  ;;  %16819 = vmatpush3.bf16.msra.mxu1 %v17264_v50  ;;  %v17322_v50 = vld [vmem:[%s23261_s5 + $0x4f8] sm:$0xff]  }
 0x744   :  { %13535 = vmatprep.mubr.bf16.mxu1 %v22646_v38  ;;  %16798 = vmatprep.subr.bf16.mxu0 %v17265_v4  ;;  %v17323_v4 = vld [vmem:[%s23261_s5 + $0x438] sm:$0xff]  }
 0x745   :  { %16820 = vmatprep.subr.bf16.mxu1 %v17266_v14  ;;  %v17324_v14 = vld [vmem:[%s23261_s5 + $0x4b8] sm:$0xff]  }
 0x746   :  { %16799 = vmatpush3.bf16.msra.mxu0 %v17267_v52  ;;  %v17325_v52 = vld [vmem:[%s23261_s5 + $0x540] sm:$0xff]  }
 0x747   :  { %16821 = vmatpush3.bf16.msra.mxu1 %v17268_v54  ;;  %16800 = vmatprep.subr.bf16.mxu0 %v17269_v55  ;;  %v17326_v54 = vld [vmem:[%s23261_s5 + $0x5c0] sm:$0xff]  }
 0x748   :  { %16822 = vmatprep.subr.bf16.mxu1 %v17270_v7  ;;  %v17327_v55 = vld [vmem:[%s23261_s5 + $0x500] sm:$0xff]  }
 0x749   :  { %v17328_v7 = vld [vmem:[%s23261_s5 + $0x580] sm:$0xff]  }
 0x74a   :  { %16801 = vmatpush3.bf16.msra.mxu0 %v17271_v60  ;;  %v17329_v60 = vld [vmem:[%s23261_s5 + $0x548] sm:$0xff]  }
 0x74b   :  { %16823 = vmatpush3.bf16.msra.mxu1 %v17272_v8  ;;  %16802 = vmatprep.subr.bf16.mxu0 %v17273_v61  ;;  %v17330_v8 = vld [vmem:[%s23261_s5 + $0x5c8] sm:$0xff]  }
 0x74c   :  { %16824 = vmatprep.subr.bf16.mxu1 %v17274_v0  ;;  %v17331_v61 = vld [vmem:[%s23261_s5 + $0x508] sm:$0xff]  }
 0x74d   :  { %v17332_v0 = vld [vmem:[%s23261_s5 + $0x588] sm:$0xff]  }
 0x74e   :  { %16803 = vmatpush3.bf16.msra.mxu0 %v17275_v19  ;;  %v17333_v19 = vld [vmem:[%s23261_s5 + $0x550] sm:$0xff]  }
 0x74f   :  { %16825 = vmatpush3.bf16.msra.mxu1 %v17276_v28  ;;  %16804 = vmatprep.subr.bf16.mxu0 %v17277_v44  ;;  %v17334_v28 = vld [vmem:[%s23261_s5 + $0x5d0] sm:$0xff]  }
 0x750   :  { %16826 = vmatprep.subr.bf16.mxu1 %v17278_v3  ;;  %v17336_v44 = vld [vmem:[%s23261_s5 + $0x590] sm:$0xff]   ;;  %v17338_v3 = vld [vmem:[%s23261_s5 + $0x5d8] sm:$0xff]  }
 0x752   :  { %16805 = vmatpush3.bf16.msra.mxu0 %v17279_v17  ;;  %v17339_v17 = vld [vmem:[%s23261_s5 + $0x518] sm:$0xff]  }
 0x753   :  { %16827 = vmatpush3.bf16.msra.mxu1 %v17280_v59  ;;  %16806 = vmatprep.subr.bf16.mxu0 %v17281_v9  ;;  %v17340_v59 = vld [vmem:[%s23261_s5 + $0x598] sm:$0xff]   ;;  %v17341_v9 = vld [vmem:[%s23261_s5 + $0x560] sm:$0xff]  }
 0x754   :  { %16828 = vmatprep.subr.bf16.mxu1 %v17282_v22  ;;  %v17342_v22 = vld [vmem:[%s23261_s5 + $0x5e0] sm:$0xff]  }
 0x756   :  { %16807 = vmatpush3.bf16.msra.mxu0 %v17283_v47  ;;  %v17343_v47 = vld [vmem:[%s23261_s5 + $0x520] sm:$0xff]  }
 0x757   :  { %16829 = vmatpush3.bf16.msra.mxu1 %v17284_v63  ;;  %16808 = vmatprep.subr.bf16.mxu0 %v17285_v25  ;;  %v17344_v63 = vld [vmem:[%s23261_s5 + $0x5a0] sm:$0xff]   ;;  %v17345_v25 = vld [vmem:[%s23261_s5 + $0x568] sm:$0xff]  }
 0x758   :  { %16830 = vmatprep.subr.bf16.mxu1 %v17286_v31  ;;  %v17346_v31 = vld [vmem:[%s23261_s5 + $0x5e8] sm:$0xff]  }
 0x75a   :  { %16809 = vmatpush3.bf16.msra.mxu0 %v17287_v51  ;;  %v17347_v51 = vld [vmem:[%s23261_s5 + $0x528] sm:$0xff]  }
 0x75b   :  { %16831 = vmatpush3.bf16.msra.mxu1 %v17288_v10  ;;  %16810 = vmatprep.subr.bf16.mxu0 %v17289_v12  ;;  %v17348_v10 = vld [vmem:[%s23261_s5 + $0x5a8] sm:$0xff]   ;;  %v17349_v12 = vld [vmem:[%s23261_s5 + $0x570] sm:$0xff]  }
 0x75c   :  { %16832 = vmatprep.subr.bf16.mxu1 %v17290_v29  ;;  %v17350_v29 = vld [vmem:[%s23261_s5 + $0x5f0] sm:$0xff]  }
 0x75e   :  { %16811 = vmatpush3.bf16.msra.mxu0 %v17291_v13  ;;  %v17351_v13 = vld [vmem:[%s23261_s5 + $0x530] sm:$0xff]  }
 0x75f   :  { %16833 = vmatpush3.bf16.msra.mxu1 %v17292_v37  ;;  %16840 = vmatprep.subr.bf16.mxu0 %v17293_v15  ;;  %v17352_v37 = vld [vmem:[%s23261_s5 + $0x5b0] sm:$0xff]   ;;  %v17353_v15 = vld [vmem:[%s23261_s5 + $0x578] sm:$0xff]  }
 0x760   :  { %16862 = vmatprep.subr.bf16.mxu1 %v17294_v16  ;;  %v17354_v16 = vld [vmem:[%s23261_s5 + $0x5f8] sm:$0xff]  }
 0x761   :  { %13496 = vmatmul.mubr.bf16.vlgmr.msra.gmra.mrb[24].mxu0 %v22644_v33 }
 0x762   :  { %13536 = vmatmul.mubr.bf16.vlgmr.msra.gmra.mrb[24].mxu1 %v22651_v39  ;;  %16841 = vmatpush3.bf16.msra.mxu0 %v17295_v62  ;;  %v17355_v62 = vld [vmem:[%s23261_s5 + $0x538] sm:$0xff]  }
 0x763   :  { %13840 = vmatprep.mubr.bf16.mxu0 %v22639_v24  ;;  %16863 = vmatpush3.bf16.msra.mxu1 %v17296_v18  ;;  %v17356_v18 = vld [vmem:[%s23261_s5 + $0x5b8] sm:$0xff]  }
 0x764   :  { %13880 = vmatprep.mubr.bf16.mxu1 %v22646_v38  ;;  %16842 = vmatprep.subr.bf16.mxu0 %v17297_v5 }
 0x765   :  { %16864 = vmatprep.subr.bf16.mxu1 %v17298_v43 }
 0x766   :  { %16843 = vmatpush3.bf16.msra.mxu0 %v17299_v30  ;;  %v16097_v30 = vld [vmem:[%s23264_s6] ss:$0 sm:$0xff] }
 0x767   :  { %16865 = vmatpush3.bf16.msra.mxu1 %v17300_v23  ;;  %16844 = vmatprep.subr.bf16.mxu0 %v17301_v21 }
 0x768   :  { %16866 = vmatprep.subr.bf16.mxu1 %v17302_v35 }
 0x76a   :  { %16845 = vmatpush3.bf16.msra.mxu0 %v17303_v27 }
 0x76b   :  { %16867 = vmatpush3.bf16.msra.mxu1 %v17304_v36  ;;  %16846 = vmatprep.subr.bf16.mxu0 %v17305_v40 }
 0x76c   :  { %16868 = vmatprep.subr.bf16.mxu1 %v17306_v57 }
 0x76e   :  { %16847 = vmatpush3.bf16.msra.mxu0 %v17307_v41 }
 0x76f   :  { %16869 = vmatpush3.bf16.msra.mxu1 %v17308_v58  ;;  %16848 = vmatprep.subr.bf16.mxu0 %v17309_v42 }
 0x770   :  { %16870 = vmatprep.subr.bf16.mxu1 %v17310_v45 }
 0x772   :  { %16849 = vmatpush3.bf16.msra.mxu0 %v17311_v56  ;;  %v16195_v56 = vld [vmem:[%s23264_s6 + $0x1] ss:$0 sm:$0xff] }
 0x773   :  { %16871 = vmatpush3.bf16.msra.mxu1 %v17312_v1  ;;  %16850 = vmatprep.subr.bf16.mxu0 %v17313_v20 }
 0x774   :  { %16872 = vmatprep.subr.bf16.mxu1 %v17314_v26 }
 0x776   :  { %16851 = vmatpush3.bf16.msra.mxu0 %v17315_v2 }
 0x777   :  { %16873 = vmatpush3.bf16.msra.mxu1 %v17316_v34  ;;  %16852 = vmatprep.subr.bf16.mxu0 %v17317_v48 }
 0x778   :  { %16874 = vmatprep.subr.bf16.mxu1 %v17318_v46 }
 0x77a   :  { %16853 = vmatpush3.bf16.msra.mxu0 %v17319_v6 }
 0x77b   :  { %16875 = vmatpush3.bf16.msra.mxu1 %v17320_v49  ;;  %16854 = vmatprep.subr.bf16.mxu0 %v17321_v32 }
 0x77c   :  { %16876 = vmatprep.subr.bf16.mxu1 %v17322_v50 }
 0x77e   :  { %16855 = vmatpush3.bf16.msra.mxu0 %v17323_v4 }
 0x77f   :  { %16877 = vmatpush3.bf16.msra.mxu1 %v17324_v14  ;;  %16884 = vmatprep.subr.bf16.mxu0 %v17325_v52 }
 0x780   :  { %16906 = vmatprep.subr.bf16.mxu1 %v17326_v54  ;;  %v16293_v54 = vld [vmem:[%s23264_s6 + $0x2] ss:$0 sm:$0xff] }
 0x781   :  { %13841 = vmatmul.mubr.bf16.vlgmr.msra.gmra.mrb[28].mxu0 %v22644_v33 }
 0x782   :  { %13881 = vmatmul.mubr.bf16.vlgmr.msra.gmra.mrb[28].mxu1 %v22651_v39  ;;  %16885 = vmatpush3.bf16.msra.mxu0 %v17327_v55 }
 0x783   :  { %14185 = vmatprep.mubr.bf16.mxu0 %v22639_v24  ;;  %16907 = vmatpush3.bf16.msra.mxu1 %v17328_v7  ;;  %v17335_v24 = vld [vmem:[%s23261_s5 + $0x510] sm:$0xff]  }
 0x784   :  { %14225 = vmatprep.mubr.bf16.mxu1 %v22646_v38  ;;  %16886 = vmatprep.subr.bf16.mxu0 %v17329_v60  ;;  %v17337_v38 = vld [vmem:[%s23261_s5 + $0x558] sm:$0xff]  }
 0x785   :  { %16908 = vmatprep.subr.bf16.mxu1 %v17330_v8 }
 0x786   :  { %16887 = vmatpush3.bf16.msra.mxu0 %v17331_v61 }
 0x787   :  { %16909 = vmatpush3.bf16.msra.mxu1 %v17332_v0  ;;  %16888 = vmatprep.subr.bf16.mxu0 %v17333_v19 }
 0x788   :  { %16910 = vmatprep.subr.bf16.mxu1 %v17334_v28 }
 0x78a   :  { %16889 = vmatpush3.bf16.msra.mxu0 %v17335_v24 }
 0x78b   :  { %16911 = vmatpush3.bf16.msra.mxu1 %v17336_v44  ;;  %16890 = vmatprep.subr.bf16.mxu0 %v17337_v38 }
 0x78c   :  { %16912 = vmatprep.subr.bf16.mxu1 %v17338_v3 }
 0x78e   :  { %16891 = vmatpush3.bf16.msra.mxu0 %v17339_v17 }
 0x78f   :  { %16913 = vmatpush3.bf16.msra.mxu1 %v17340_v59  ;;  %16892 = vmatprep.subr.bf16.mxu0 %v17341_v9  ;;  %v16391_v9 = vld [vmem:[%s23264_s6 + $0x3] ss:$0 sm:$0xff] }
 0x790   :  { %16914 = vmatprep.subr.bf16.mxu1 %v17342_v22 }
 0x792   :  { %16893 = vmatpush3.bf16.msra.mxu0 %v17343_v47 }
 0x793   :  { %16915 = vmatpush3.bf16.msra.mxu1 %v17344_v63  ;;  %16894 = vmatprep.subr.bf16.mxu0 %v17345_v25 }
 0x794   :  { %16916 = vmatprep.subr.bf16.mxu1 %v17346_v31 }
 0x796   :  { %16895 = vmatpush3.bf16.msra.mxu0 %v17347_v51 }
 0x797   :  { %16917 = vmatpush3.bf16.msra.mxu1 %v17348_v10  ;;  %16896 = vmatprep.subr.bf16.mxu0 %v17349_v12 }
 0x798   :  { %16918 = vmatprep.subr.bf16.mxu1 %v17350_v29 }
 0x79a   :  { %16897 = vmatpush3.bf16.msra.mxu0 %v17351_v13 }
 0x79b   :  { %16919 = vmatpush3.bf16.msra.mxu1 %v17352_v37  ;;  %16898 = vmatprep.subr.bf16.mxu0 %v17353_v15 }
 0x79c   :  { %16920 = vmatprep.subr.bf16.mxu1 %v17354_v16 }
 0x79e   :  { %16899 = vmatpush3.bf16.msra.mxu0 %v17355_v62 }
 0x79f   :  { %16921 = vmatpush3.bf16.msra.mxu1 %v17356_v18  ;;  %v16489_v18 = vld [vmem:[%s23264_s6 + $0x4] ss:$0 sm:$0xff] }
 0x7a1   :  { %14186 = vmatmul.mubr.bf16.vlgmr.msra.gmra.mrb[32].mxu0 %v22644_v33 }
 0x7a2   :  { %14226 = vmatmul.mubr.bf16.vlgmr.msra.gmra.mrb[32].mxu1 %v22651_v39 }
 0x7d4   :  { %v16680_v5 = vpop.f32.mrb[12].mxu0  ;;  %v16702_v43 = vpop.f32.mrb[12].mxu1 }
 0x7d5   :  { %v16681_v23 = vpop.f32.mrb[13].mxu0  ;;  %v16703_v35 = vpop.f32.mrb[13].mxu1 }
 0x7d6   :  { %v16682_v21 = vadd.f32 %v16681_v23, %v16680_v5  ;;  %v16683_v27 = vpop.f32.mrb[14].mxu0  ;;  %v16704_v36 = vadd.f32 %v16703_v35, %v16702_v43  ;;  %v16705_v40 = vpop.f32.mrb[14].mxu1 }
 0x7d7   :  { %v16684_v57 = vpop.f32.mrb[15].mxu0  ;;  %v16706_v58 = vpop.f32.mrb[15].mxu1 }
 0x7d8   :  { %v12463_v41 = vadd.f32 %v16682_v21, %v16097_v30 }
 0x7da   :  { %v12503_v42 = vadd.f32 %v16704_v36, %v12463_v41 }
 0x7dc   :  { %v23154_v33 = vadd.f32 %v12503_v42, %v22752_v11 }
 0x7f4   :  { %v16724_v39 = vpop.f32.mrb[16].mxu0  ;;  %v16746_v45 = vpop.f32.mrb[16].mxu1 }
 0x7f5   :  { %v16725_v1 = vpop.f32.mrb[17].mxu0  ;;  %v16747_v26 = vpop.f32.mrb[17].mxu1 }
 0x7f6   :  { %v16726_v20 = vadd.f32 %v16725_v1, %v16724_v39  ;;  %v16727_v2 = vpop.f32.mrb[18].mxu0  ;;  %v16748_v34 = vadd.f32 %v16747_v26, %v16746_v45  ;;  %v16749_v48 = vpop.f32.mrb[18].mxu1  ;;  %v16587_v45 = vld [vmem:[%s23264_s6 + $0x5] ss:$0 sm:$0xff] }
 0x7f7   :  { %v16728_v46 = vpop.f32.mrb[19].mxu0  ;;  %v16750_v49 = vpop.f32.mrb[19].mxu1 }
 0x7f8   :  { %v12808_v6 = vadd.f32 %v16726_v20, %v16195_v56 }
 0x7fa   :  { %v12848_v32 = vadd.f32 %v16748_v34, %v12808_v6 }
 0x7fc   :  { %v14233_v50 = vadd.f32 %v12848_v32, %v12503_v42  ;;  %v23160_v4 = vadd.f32 %v12848_v32, %v22752_v11 }
 0x814   :  { %v16768_v14 = vpop.f32.mrb[20].mxu0 }
 0x815   :  { %v16790_v52 = vpop.f32.mrb[20].mxu1  ;;  %v16769_v55 = vpop.f32.mrb[21].mxu0 }
 0x816   :  { %v16770_v7 = vadd.f32 %v16769_v55, %v16768_v14  ;;  %v16791_v60 = vpop.f32.mrb[21].mxu1  ;;  %v16771_v8 = vpop.f32.mrb[22].mxu0 }
 0x817   :  { %v16792_v61 = vadd.f32 %v16791_v60, %v16790_v52  ;;  %v16793_v0 = vpop.f32.mrb[22].mxu1  ;;  %v16772_v19 = vpop.f32.mrb[23].mxu0 }
 0x818   :  { %v13153_v28 = vadd.f32 %v16770_v7, %v16293_v54  ;;  %v16794_v24 = vpop.f32.mrb[23].mxu1 }
 0x81a   :  { %v13193_v44 = vadd.f32 %v16792_v61, %v13153_v28 }
 0x81c   :  { %v14234_v38 = vadd.f32 %v14233_v50, %v13193_v44  ;;  %v14323_v3 = vadd.f32 %v13193_v44, %v22752_v11 }
 0x834   :  { %v16812_v17 = vpop.f32.mrb[24].mxu0 }
 0x835   :  { %v16834_v59 = vpop.f32.mrb[24].mxu1  ;;  %v16813_v22 = vpop.f32.mrb[25].mxu0 }
 0x836   :  { %v16814_v47 = vadd.f32 %v16813_v22, %v16812_v17  ;;  %v16835_v63 = vpop.f32.mrb[25].mxu1  ;;  %v16815_v25 = vpop.f32.mrb[26].mxu0 }
 0x837   :  { %v16836_v31 = vadd.f32 %v16835_v63, %v16834_v59  ;;  %v16837_v51 = vpop.f32.mrb[26].mxu1  ;;  %v16816_v10 = vpop.f32.mrb[27].mxu0 }
 0x838   :  { %v13498_v12 = vadd.f32 %v16814_v47, %v16391_v9  ;;  %v16838_v29 = vpop.f32.mrb[27].mxu1 }
 0x83a   :  { %v13538_v13 = vadd.f32 %v16836_v31, %v13498_v12 }
 0x83c   :  { %v14235_v37 = vadd.f32 %v14234_v38, %v13538_v13  ;;  %v14364_v15 = vadd.f32 %v13538_v13, %v22752_v11 }
 0x854   :  { %v16856_v16 = vpop.f32.mrb[28].mxu0 }
 0x855   :  { %v16878_v62 = vpop.f32.mrb[28].mxu1  ;;  %v16857_v5 = vpop.f32.mrb[29].mxu0 }
 0x856   :  { %v16858_v43 = vadd.f32 %v16857_v5, %v16856_v16  ;;  %v16879_v30 = vpop.f32.mrb[29].mxu1  ;;  %v16859_v23 = vpop.f32.mrb[30].mxu0 }
 0x857   :  { %v16880_v21 = vadd.f32 %v16879_v30, %v16878_v62  ;;  %v16881_v35 = vpop.f32.mrb[30].mxu1  ;;  %v16860_v27 = vpop.f32.mrb[31].mxu0 }
 0x858   :  { %v13843_v36 = vadd.f32 %v16858_v43, %v16489_v18  ;;  %v16882_v40 = vpop.f32.mrb[31].mxu1 }
 0x85a   :  { %v13883_v57 = vadd.f32 %v16880_v21, %v13843_v36 }
 0x85c   :  { %v14236_v41 = vadd.f32 %v14235_v37, %v13883_v57  ;;  %v14405_v58 = vadd.f32 %v13883_v57, %v22752_v11 }
 0x874   :  { %v16900_v42 = vpop.f32.mrb[32].mxu0 }
 0x875   :  { %v16922_v39 = vpop.f32.mrb[32].mxu1  ;;  %v16901_v56 = vpop.f32.mrb[33].mxu0 }
 0x876   :  { %v16902_v1 = vadd.f32 %v16901_v56, %v16900_v42  ;;  %v16923_v20 = vpop.f32.mrb[33].mxu1  ;;  %v16903_v26 = vpop.f32.mrb[34].mxu0 }
 0x877   :  { %v16924_v2 = vadd.f32 %v16923_v20, %v16922_v39  ;;  %v16925_v34 = vpop.f32.mrb[34].mxu1  ;;  %v16904_v48 = vpop.f32.mrb[35].mxu0 }
 0x878   :  { %v14188_v46 = vadd.f32 %v16902_v1, %v16587_v45  ;;  %v16926_v6 = vpop.f32.mrb[35].mxu1 }
 0x87a   :  { %v14228_v49 = vadd.f32 %v16924_v2, %v14188_v46 }
 0x87c   :  { %v14237_v32 = vadd.f32 %v14236_v41, %v14228_v49  ;;  %v14446_v50 = vadd.f32 %v14228_v49, %v22752_v11 }
 0x87e   :  { %v14238_v14 = vmul.f32 0.16666667, %v14237_v32 }
 0x880   :  { %v14324_v52 = vsub.f32 %v14323_v3, %v14238_v14  ;;  %v14240_v54 = vsub.f32 %v23154_v33, %v14238_v14  ;;  %v14365_v55 = vsub.f32 %v14364_v15, %v14238_v14  ;;  %v14283_v7 = vsub.f32 %v23160_v4, %v14238_v14 }
 0x881   :  { %v14447_v60 = vsub.f32 %v14446_v50, %v14238_v14  ;;  %v14406_v8 = vsub.f32 %v14405_v58, %v14238_v14 }
 0x882   :  { %v14325_v61 = vsel %vm14241_vm1, %v14324_v52, -inf  ;;  %v14242_v0 = vsel %vm14241_vm1, %v14240_v54, -inf  ;;  %v14366_v19 = vsel %vm14241_vm1, %v14365_v55, -inf  ;;  %v14284_v11 = vsel %vm14241_vm1, %v14283_v7, -inf }
 0x883   :  { %14326 = vmax.xlane.f32.xlu1 %v14325_v61  ;;  %14243 = vmax.xlane.f32.xlu0 %v14242_v0  ;;  %v14448_v28 = vsel %vm14241_vm1, %v14447_v60, -inf  ;;  %v14407_v33 = vsel %vm14241_vm1, %v14406_v8, -inf }
 0x887   :  { %14367 = vmax.xlane.f32.xlu1 %v14366_v19  ;;  %14285 = vmax.xlane.f32.xlu0 %v14284_v11 }
 0x88b   :  { %14449 = vmax.xlane.f32.xlu1 %v14448_v28  ;;  %14408 = vmax.xlane.f32.xlu0 %v14407_v33 }
 0x910   :  { %v14327_v4 = vpop.xlane.xlu1 %14326  ;;  %v14244_v24 = vpop.xlane.xlu0 %14243 }
 0x911   :  { %v14328_v44 = vsub.f32 %v14324_v52, %v14327_v4  ;;  %v14245_v38 = vsub.f32 %v14240_v54, %v14244_v24 }
 0x913   :  { %v14246_v3 = vmul.f32 1.442695, %v14245_v38  ;;  %v14329_v17 = vmul.f32 1.442695, %v14328_v44 }
 0x914   :  { %v14368_v59 = vpop.xlane.xlu1 %14367  ;;  %v14286_v9 = vpop.xlane.xlu0 %14285 }
 0x915   :  { %v14369_v22 = vsub.f32 %v14365_v55, %v14368_v59  ;;  %v14287_v47 = vsub.f32 %v14283_v7, %v14286_v9  ;;  %17357 = vpow2.f32 %v14246_v3 }
 0x916   :  { %17359 = vpow2.f32 %v14329_v17 }
 0x917   :  { %v14288_v63 = vmul.f32 1.442695, %v14287_v47  ;;  %v14370_v25 = vmul.f32 1.442695, %v14369_v22 }
 0x918   :  { %v14450_v31 = vpop.xlane.xlu1 %14449  ;;  %v14409_v51 = vpop.xlane.xlu0 %14408 }
 0x919   :  { %v14451_v10 = vsub.f32 %v14447_v60, %v14450_v31  ;;  %v14410_v12 = vsub.f32 %v14406_v8, %v14409_v51  ;;  %17361 = vpow2.f32 %v14288_v63 }
 0x91a   :  { %17363 = vpow2.f32 %v14370_v25 }
 0x91b   :  { %v14411_v29 = vmul.f32 1.442695, %v14410_v12  ;;  %v14452_v13 = vmul.f32 1.442695, %v14451_v10 }
 0x91d   :  { %17365 = vpow2.f32 %v14411_v29 }
 0x91e   :  { %17367 = vpow2.f32 %v14452_v13 }
 0x91f   :  { %v17358_v37 = vpop.eup %17357 }
 0x920   :  { %v14248_v15 = vsel %vm14241_vm1, %v17358_v37, 0.0  ;;  %v17360_v16 = vpop.eup %17359 }
 0x921   :  { %14249 = vadd.xlane.f32.xlu0 %v14248_v15  ;;  %v14331_v18 = vsel %vm14241_vm1, %v17360_v16, 0.0 }
 0x923   :  { %v17362_v62 = vpop.eup %17361 }
 0x924   :  { %v14290_v5 = vsel %vm14241_vm1, %v17362_v62, 0.0  ;;  %v17364_v43 = vpop.eup %17363 }
 0x925   :  { %14332 = vadd.xlane.f32.xlu0 %v14331_v18  ;;  %14291 = vadd.xlane.f32.xlu1 %v14290_v5  ;;  %v14372_v23 = vsel %vm14241_vm1, %v17364_v43, 0.0 }
 0x927   :  { %v17366_v30 = vpop.eup %17365 }
 0x928   :  { %v14413_v21 = vsel %vm14241_vm1, %v17366_v30, 0.0  ;;  %v17368_v35 = vpop.eup %17367 }
 0x929   :  { %14373 = vadd.xlane.f32.xlu1 %v14372_v23  ;;  %14414 = vadd.xlane.f32.xlu0 %v14413_v21  ;;  %v14454_v27 = vsel %vm14241_vm1, %v17368_v35, 0.0 }
 0x92d   :  { %14455 = vadd.xlane.f32.xlu1 %v14454_v27 }
 0x9ae   :  { %v14250_v36 = vpop.xlane.xlu0 %14249 }
 0x9af   :  { %17369 = vrcp.f32 %v14250_v36 }
 0x9b2   :  { %v14292_v40 = vpop.xlane.xlu1 %14291  ;;  %v14333_v57 = vpop.xlane.xlu0 %14332 }
 0x9b3   :  { %17371 = vrcp.f32 %v14292_v40 }
 0x9b4   :  { %17373 = vrcp.f32 %v14333_v57 }
 0x9b6   :  { %v14374_v41 = vpop.xlane.xlu1 %14373  ;;  %v14415_v58 = vpop.xlane.xlu0 %14414 }
 0x9b7   :  { %17375 = vrcp.f32 %v14374_v41 }
 0x9b8   :  { %17377 = vrcp.f32 %v14415_v58 }
 0x9b9   :  { %v17370_v42 = vpop.eup %17369 }
 0x9ba   :  { %v14252_v39 = vmul.f32 %v17370_v42, %v17358_v37  ;;  %v14456_v45 = vpop.xlane.xlu1 %14455 }
 0x9bb   :  { %17379 = vrcp.f32 %v14456_v45 }
 0x9bc   :  { %v14253_v56 = vmax.f32 %v14252_v39, 0.001 }
 0x9bd   :  { %v17372_v1 = vpop.eup %17371 }
 0x9be   :  { %v17374_v20 = vpop.eup %17373  ;;  %v14261_v26 = vrot.slane %v14253_v56, %v17505_v53  ;;  %v14294_v2 = vmul.f32 %v17372_v1, %v17362_v62 }
 0x9bf   :  { %v14335_v34 = vmul.f32 %v17374_v20, %v17360_v16 }
 0x9c0   :  { %v14262_v48 = vcombine.high %v14261_v26, %v14261_v26  ;;  %v14269_v46 = vrot.slane %v14261_v26, %v17505_v53  ;;  %v14295_v6 = vmax.f32 %v14294_v2, 0.001 }
 0x9c1   :  { %v17376_v49 = vpop.eup %17375  ;;  %v14336_v32 = vmax.f32 %v14335_v34, 0.001 }
 0x9c2   :  { %v17378_v50 = vpop.eup %17377  ;;  %v14276_v14 = vrot.slane %v14262_v48, %v17505_v53  ;;  %14280 = vst.msk [vmem:[%s23265_s7] sm:$0x1] %vm14279_vm2, %v14269_v46  ;;  %v14303_v52 = vrot.slane %v14295_v6, %v17505_v53  ;;  %v14376_v54 = vmul.f32 %v17376_v49, %v17364_v43 }
 0x9c3   :  { %v14344_v55 = vrot.slane %v14336_v32, %v17505_v53  ;;  %v14417_v7 = vmul.f32 %v17378_v50, %v17366_v30 }
 0x9c4   :  { %14281 = vst.msk [vmem:[%s23265_s7 + $0x8] sm:$0x1] %vm14279_vm2, %v14276_v14  ;;  %v14304_v60 = vcombine.high %v14303_v52, %v14303_v52  ;;  %v14311_v8 = vrot.slane %v14303_v52, %v17505_v53  ;;  %v14377_v61 = vmax.f32 %v14376_v54, 0.001 }
 0x9c5   :  { %v17380_v0 = vpop.eup %17379  ;;  %v14345_v19 = vcombine.high %v14344_v55, %v14344_v55  ;;  %v14352_v11 = vrot.slane %v14344_v55, %v17505_v53  ;;  %v14418_v28 = vmax.f32 %v14417_v7, 0.001 }
 0x9c6   :  { %v14318_v33 = vrot.slane %v14304_v60, %v17505_v53  ;;  %14321 = vst.msk [vmem:[%s23265_s7 + $0x1] sm:$0x1] %vm14279_vm2, %v14311_v8  ;;  %v14385_v4 = vrot.slane %v14377_v61, %v17505_v53  ;;  %v14458_v24 = vmul.f32 %v17380_v0, %v17368_v35 }
 0x9c7   :  { %v14359_v44 = vrot.slane %v14345_v19, %v17505_v53  ;;  %14362 = vst.msk [vmem:[%s23265_s7 + $0x2] sm:$0x1] %vm14279_vm2, %v14352_v11  ;;  %v14426_v38 = vrot.slane %v14418_v28, %v17505_v53 }
 0x9c8   :  { %14322 = vst.msk [vmem:[%s23265_s7 + $0x9] sm:$0x1] %vm14279_vm2, %v14318_v33  ;;  %v14386_v3 = vcombine.high %v14385_v4, %v14385_v4  ;;  %v14393_v17 = vrot.slane %v14385_v4, %v17505_v53  ;;  %v14459_v59 = vmax.f32 %v14458_v24, 0.001 }
 0x9c9   :  { %14363 = vst.msk [vmem:[%s23265_s7 + $0xa] sm:$0x1] %vm14279_vm2, %v14359_v44  ;;  %v14427_v9 = vcombine.high %v14426_v38, %v14426_v38  ;;  %v14434_v22 = vrot.slane %v14426_v38, %v17505_v53 }
 0x9ca   :  { %v14400_v47 = vrot.slane %v14386_v3, %v17505_v53  ;;  %14403 = vst.msk [vmem:[%s23265_s7 + $0x3] sm:$0x1] %vm14279_vm2, %v14393_v17  ;;  %v14467_v63 = vrot.slane %v14459_v59, %v17505_v53 }
 0x9cb   :  { %v14441_v25 = vrot.slane %v14427_v9, %v17505_v53  ;;  %14444 = vst.msk [vmem:[%s23265_s7 + $0x4] sm:$0x1] %vm14279_vm2, %v14434_v22 }
 0x9cc   :  { %14404 = vst.msk [vmem:[%s23265_s7 + $0xb] sm:$0x1] %vm14279_vm2, %v14400_v47  ;;  %v14468_v31 = vcombine.high %v14467_v63, %v14467_v63  ;;  %v14475_v51 = vrot.slane %v14467_v63, %v17505_v53 }
 0x9cd   :  { %14445 = vst.msk [vmem:[%s23265_s7 + $0xc] sm:$0x1] %vm14279_vm2, %v14441_v25 }
 0x9ce   :  { %v14482_v10 = vrot.slane %v14468_v31, %v17505_v53  ;;  %14485 = vst.msk [vmem:[%s23265_s7 + $0x5] sm:$0x1] %vm14279_vm2, %v14475_v51 }
 0x9d0   :  { %14486 = vst.msk [vmem:[%s23265_s7 + $0xd] sm:$0x1] %vm14279_vm2, %v14482_v10 }

</bundles_post_ra>
